<compile_context>
chip_gen: v7x
topology: tpu7x:2x2x1
jax: 0.10.0
libtpu: 0.0.40
codegen_flags: <defaults>
</compile_context>

<pallas_src>
import functools

import jax
import jax.numpy as jnp
from jax import lax
from jax.experimental import pallas as pl
from jax.experimental.pallas import tpu as pltpu

EPS = 1e-5              # BatchNorm2d default eps
N_LAYERS = 13           # 6 encoder convs + 7 decoder convs
PARAMS_PER_LAYER = 12   # w00..w22, bias, gamma, beta


def _fused_kernel(x_ref, p_ref, o_ref, *, img_w):
    """Entire CNNEncoderDecoder forward in one kernel.

    x_ref : (Np, H, Wp) f32 VMEM -- `pack = Wp // img_w` images packed along W
    p_ref : (13*12,)    f32 SMEM -- per layer [w00..w22, bias, gamma, beta]
    o_ref : (Np, H, Wp) f32 VMEM
    """
    Np, H, Wp = x_ref.shape
    pack = Wp // img_w
    inv_cnt = 1.0 / float(Np * H * Wp)           # == 1 / (N * S * S)

    row = lax.broadcasted_iota(jnp.int32, (Np, H, Wp), 1)       # sublane index
    col = lax.broadcasted_iota(jnp.int32, (Np, H, Wp), 2)       # lane index
    # column within the image (packing only used when img_w is a power of two)
    col_img = (col & (img_w - 1)) if pack > 1 else col

    def _roll(v, shift, axis):
        shift %= v.shape[axis]
        return v if shift == 0 else pltpu.roll(v, shift, axis)

    def conv_bn_relu(x, layer, B):
        """Conv2d(1,1,3,pad=1) at dilation B + BatchNorm2d (batch stats) + ReLU.

        Conv bias is omitted: it cancels exactly under the BatchNorm.
        Wrapped (rolled-around / cross-image) values only ever land on masked
        positions, so jnp.where with the border masks restores zero padding.
        """
        base = layer * PARAMS_PER_LAYER
        # 3 sublane (H) shifted taps, zero-masked at the image borders
        xh = (
            jnp.where(row >= B, _roll(x, B, axis=1), 0.0),       # tap x[h - B]
            x,                                                   # tap x[h]
            jnp.where(row < H - B, _roll(x, -B, axis=1), 0.0),   # tap x[h + B]
        )
        acc = None
        for ky in range(3):
            xi = xh[ky]
            for kx in range(3):
                if kx == 1:
                    tap = xi
                elif kx == 0:    # tap x[.., c - B]
                    tap = jnp.where(col_img >= B, _roll(xi, B, axis=2), 0.0)
                else:            # tap x[.., c + B]
                    tap = jnp.where(col_img < img_w - B, _roll(xi, -B, axis=2), 0.0)
                term = p_ref[base + ky * 3 + kx] * tap
                acc = term if acc is None else acc + term

        # two-pass batch statistics (numerically stable), folded gamma*rsqrt scale
        mean = jnp.sum(acc) * inv_cnt
        d = acc - mean
        var = jnp.sum(d * d) * inv_cnt
        scale = p_ref[base + 10] * lax.rsqrt(var + EPS)          # gamma / sqrt(var+eps)
        return jnp.maximum(d * scale + p_ref[base + 11], 0.0)    # + beta, ReLU

    def maxpool2(y, B):
        """MaxPool2d(2,2) on the block-replicated layout (block B -> block 2B)."""
        first_w = (col_img & (2 * B - 1)) < B   # lane in first half of its 2B block
        first_h = (row & (2 * B - 1)) < B       # row  in first half of its 2B block
        # max over the W pair (the selected neighbour never crosses an image seam)
        t = jnp.maximum(y, jnp.where(first_w, _roll(y, -B, axis=2),
                                     _roll(y, B, axis=2)))
        # max over the H pair
        return jnp.maximum(t, jnp.where(first_h, _roll(t, -B, axis=1),
                                        _roll(t, B, axis=1)))

    x = x_ref[...]
    layer, B = 0, 1

    # ---- encoder: 5 x [conv-bn-relu, maxpool 2x2], then conv-bn-relu ----------
    for _ in range(5):
        x = maxpool2(conv_bn_relu(x, layer, B), B)
        layer += 1
        B *= 2
    x = conv_bn_relu(x, layer, B); layer += 1

    # (save branch of the PyTorch module is disabled: save == 0)

    # ---- decoder: 5 x [conv-bn-relu, upsample2x (free: halve B)], 2 x conv ----
    for _ in range(5):
        x = conv_bn_relu(x, layer, B); layer += 1
        B //= 2                      # nearest Upsample(2x) is a no-op here
    x = conv_bn_relu(x, layer, B); layer += 1
    x = conv_bn_relu(x, layer, B); layer += 1

    # ---- final global-max normalisation: x / x.max() (same hazard as module if
    #      the last ReLU output is all zeros) ----------------------------------
    o_ref[...] = x * (1.0 / jnp.max(x))


def _flatten_params(params):
    """13 layers x [w(3,3) row-major, bias, gamma, beta] -> (156,) f32."""
    chunks = []
    for w, b, g, bt in params:
        chunks.append(jnp.reshape(jnp.asarray(w, jnp.float32), (9,)))
        chunks.append(jnp.reshape(jnp.asarray(b, jnp.float32), (1,)))
        chunks.append(jnp.reshape(jnp.asarray(g, jnp.float32), (1,)))
        chunks.append(jnp.reshape(jnp.asarray(bt, jnp.float32), (1,)))
    return jnp.concatenate(chunks)


def forward(x_nchw, params):
    """Full CNNEncoderDecoder.forward. x_nchw: (N, 1, S, S) -> (N, 1, S, S)."""
    assert len(params) == N_LAYERS
    x = x_nchw[:, 0, :, :].astype(jnp.float32)   # squeeze the single channel
    N, S, W = x.shape
    assert S == W and S % 32 == 0, "spatial size must be square and a multiple of 32"

    # Lane-dense packing: place `pack` images side by side along W so the last
    # (lane) dim is >= 128 whenever S is a small power of two.
    pack = 1
    if S < 128 and (S & (S - 1)) == 0:
        pack = 128 // S
        while pack > 1 and N % pack != 0:
            pack //= 2
    Np, Wp = N // pack, pack * S
    xp = x.reshape(Np, pack, S, S).transpose(0, 2, 1, 3).reshape(Np, S, Wp)

    flat = _flatten_params(params)
    vmem_limit = int(min(64 << 20, max(32 << 20, 16 * xp.size * 4)))

    out = pl.pallas_call(
        functools.partial(_fused_kernel, img_w=S),
        out_shape=jax.ShapeDtypeStruct((Np, S, Wp), jnp.float32),
        in_specs=[
            pl.BlockSpec(memory_space=pltpu.MemorySpace.VMEM),   # activations
            pl.BlockSpec(memory_space=pltpu.MemorySpace.SMEM),   # all layer params
        ],
        out_specs=pl.BlockSpec(memory_space=pltpu.MemorySpace.VMEM),
        input_output_aliases={0: 0},                             # x dead after first read
        compiler_params=pltpu.CompilerParams(vmem_limit_bytes=vmem_limit),
    )(xp, flat)

    out = out.reshape(Np, S, pack, S).transpose(0, 2, 1, 3).reshape(N, S, S)
    return out[:, None, :, :]   # back to NCHW


# ----------------------------- pure-JAX reference -----------------------------
def _conv_bn_relu_ref(x, w, b, gamma, beta):
    N, H, W = x.shape
    xp = jnp.pad(x, ((0, 0), (1, 1), (1, 1)))
    acc = jnp.zeros_like(x)
    for ky in range(3):
        for kx in range(3):
            acc = acc + w[ky, kx] * xp[:, ky:ky + H, kx:kx + W]
    acc = acc + b
    mean = jnp.mean(acc)
    var = jnp.mean((acc - mean) ** 2)
    y = (acc - mean) / jnp.sqrt(var + EPS) * gamma + beta
    return jnp.maximum(y, 0.0)


def _upsample2x(x):
    return jnp.repeat(jnp.repeat(x, 2, axis=1), 2, axis=2)


def forward_ref(x_nchw, params):
    x = x_nchw[:, 0, :, :].astype(jnp.float32)
    idx = 0
    for _ in range(5):
        w, b, g, bt = params[idx]; idx += 1
        y = _conv_bn_relu_ref(x, w, b, g, bt)
        N, H, W = y.shape
        x = y.reshape(N, H // 2, 2, W // 2, 2).max(axis=(2, 4))
    w, b, g, bt = params[idx]; idx += 1
    x = _conv_bn_relu_ref(x, w, b, g, bt)
    for _ in range(5):
        w, b, g, bt = params[idx]; idx += 1
        x = _upsample2x(_conv_bn_relu_ref(x, w, b, g, bt))
    w, b, g, bt = params[idx]; idx += 1
    x = _conv_bn_relu_ref(x, w, b, g, bt)
    w, b, g, bt = params[idx]; idx += 1
    x = _conv_bn_relu_ref(x, w, b, g, bt)
    x = x / jnp.max(x)
    return x[:, None, :, :]


# ----------------------------- parameter init --------------------------------
def init_params(key, n_layers=N_LAYERS):
    """13 conv layers (6 encoder + 7 decoder): weight (3,3), bias (), BN gamma/beta."""
    params = []
    bound = 1.0 / 3.0  # PyTorch Conv2d default bound = 1/sqrt(fan_in) = 1/sqrt(9)
    for _ in range(n_layers):
        key, kw, kb = jax.random.split(key, 3)
        w = jax.random.uniform(kw, (3, 3), jnp.float32, -bound, bound)
        b = jax.random.uniform(kb, (), jnp.float32, -bound, bound)
        params.append((w, b, jnp.float32(1.0), jnp.float32(0.0)))
    return params


if __name__ == "__main__":
    key = jax.random.PRNGKey(0)
    kx, kp = jax.random.split(key)

    # spatial must be a multiple of 2**5 = 32 (five MaxPool2d(2,2) stages)
    N, C, H, W = 2, 1, 64, 64
    x = jax.random.normal(kx, (N, C, H, W), jnp.float32)
    params = init_params(kp)

    out = jax.jit(forward)(x, params)
    out = jax.block_until_ready(out)

    ref = forward_ref(x, params)
    assert out.shape == (N, C, H, W), out.shape
    max_err = float(jnp.max(jnp.abs(out - ref)))
    assert jnp.allclose(out, ref, atol=2e-3, rtol=2e-3), f"max_err={max_err}"

    print("KERNEL_OK")
</pallas_src>

<mosaic_0001>
module attributes {stable_mosaic.version = 11 : i64} {
  func.func @_fused_kernel(%arg0: memref<1x64x128xf32, #tpu.memory_space<vmem>>, %arg1: memref<156xf32, #tpu.memory_space<smem>>, %arg2: memref<1x64x128xf32, #tpu.memory_space<vmem>>) attributes {dimension_semantics = [], scalar_prefetch = 0 : i64, scratch_operands = 0 : i64, tpu.core_type = #tpu.core_type<tc>} {
    %0 = tpu.iota {dimensions = array<i32: 1>} : vector<1x64x128xi32>
    %1 = tpu.iota {dimensions = array<i32: 2>} : vector<1x64x128xi32>
    %c63_i32 = arith.constant 63 : i32
    %2 = vector.broadcast %c63_i32 : i32 to vector<1x64x128xi32>
    %3 = arith.andi %1, %2 : vector<1x64x128xi32>
    %c0 = arith.constant 0 : index
    %c0_0 = arith.constant 0 : index
    %c0_1 = arith.constant 0 : index
    %4 = vector.load %arg0[%c0, %c0_0, %c0_1] : memref<1x64x128xf32, #tpu.memory_space<vmem>>, vector<1x64x128xf32>
    %c1_i32 = arith.constant 1 : i32
    %5 = vector.broadcast %c1_i32 : i32 to vector<1x64x128xi32>
    %6 = arith.cmpi sge, %0, %5 : vector<1x64x128xi32>
    %c1_i32_2 = arith.constant 1 : i32
    %7 = tpu.dynamic_rotate %4 by %c1_i32_2 dim 1 : vector<1x64x128xf32>, i32 -> vector<1x64x128xf32>
    %cst = arith.constant 0.000000e+00 : f32
    %8 = vector.broadcast %cst : f32 to vector<1x64x128xf32>
    %9 = arith.select %6, %7, %8 : vector<1x64x128xi1>, vector<1x64x128xf32>
    %c63_i32_3 = arith.constant 63 : i32
    %10 = vector.broadcast %c63_i32_3 : i32 to vector<1x64x128xi32>
    %11 = arith.cmpi slt, %0, %10 : vector<1x64x128xi32>
    %c63_i32_4 = arith.constant 63 : i32
    %12 = tpu.dynamic_rotate %4 by %c63_i32_4 dim 1 : vector<1x64x128xf32>, i32 -> vector<1x64x128xf32>
    %cst_5 = arith.constant 0.000000e+00 : f32
    %13 = vector.broadcast %cst_5 : f32 to vector<1x64x128xf32>
    %14 = arith.select %11, %12, %13 : vector<1x64x128xi1>, vector<1x64x128xf32>
    %c1_i32_6 = arith.constant 1 : i32
    %15 = vector.broadcast %c1_i32_6 : i32 to vector<1x64x128xi32>
    %16 = arith.cmpi sge, %3, %15 : vector<1x64x128xi32>
    %c1_i32_7 = arith.constant 1 : i32
    %17 = tpu.dynamic_rotate %9 by %c1_i32_7 dim 2 : vector<1x64x128xf32>, i32 -> vector<1x64x128xf32>
    %cst_8 = arith.constant 0.000000e+00 : f32
    %18 = vector.broadcast %cst_8 : f32 to vector<1x64x128xf32>
    %19 = arith.select %16, %17, %18 : vector<1x64x128xi1>, vector<1x64x128xf32>
    %c0_9 = arith.constant 0 : index
    %20 = memref.load %arg1[%c0_9] : memref<156xf32, #tpu.memory_space<smem>>
    %21 = vector.broadcast %20 : f32 to vector<1x64x128xf32>
    %22 = arith.mulf %21, %19 : vector<1x64x128xf32>
    %c1 = arith.constant 1 : index
    %23 = memref.load %arg1[%c1] : memref<156xf32, #tpu.memory_space<smem>>
    %24 = vector.broadcast %23 : f32 to vector<1x64x128xf32>
    %25 = arith.mulf %24, %9 : vector<1x64x128xf32>
    %26 = arith.addf %22, %25 : vector<1x64x128xf32>
    %c63_i32_10 = arith.constant 63 : i32
    %27 = vector.broadcast %c63_i32_10 : i32 to vector<1x64x128xi32>
    %28 = arith.cmpi slt, %3, %27 : vector<1x64x128xi32>
    %c127_i32 = arith.constant 127 : i32
    %29 = tpu.dynamic_rotate %9 by %c127_i32 dim 2 : vector<1x64x128xf32>, i32 -> vector<1x64x128xf32>
    %cst_11 = arith.constant 0.000000e+00 : f32
    %30 = vector.broadcast %cst_11 : f32 to vector<1x64x128xf32>
    %31 = arith.select %28, %29, %30 : vector<1x64x128xi1>, vector<1x64x128xf32>
    %c2 = arith.constant 2 : index
    %32 = memref.load %arg1[%c2] : memref<156xf32, #tpu.memory_space<smem>>
    %33 = vector.broadcast %32 : f32 to vector<1x64x128xf32>
    %34 = arith.mulf %33, %31 : vector<1x64x128xf32>
    %35 = arith.addf %26, %34 : vector<1x64x128xf32>
    %c1_i32_12 = arith.constant 1 : i32
    %36 = vector.broadcast %c1_i32_12 : i32 to vector<1x64x128xi32>
    %37 = arith.cmpi sge, %3, %36 : vector<1x64x128xi32>
    %c1_i32_13 = arith.constant 1 : i32
    %38 = tpu.dynamic_rotate %4 by %c1_i32_13 dim 2 : vector<1x64x128xf32>, i32 -> vector<1x64x128xf32>
    %cst_14 = arith.constant 0.000000e+00 : f32
    %39 = vector.broadcast %cst_14 : f32 to vector<1x64x128xf32>
    %40 = arith.select %37, %38, %39 : vector<1x64x128xi1>, vector<1x64x128xf32>
    %c3 = arith.constant 3 : index
    %41 = memref.load %arg1[%c3] : memref<156xf32, #tpu.memory_space<smem>>
    %42 = vector.broadcast %41 : f32 to vector<1x64x128xf32>
    %43 = arith.mulf %42, %40 : vector<1x64x128xf32>
    %44 = arith.addf %35, %43 : vector<1x64x128xf32>
    %c4 = arith.constant 4 : index
    %45 = memref.load %arg1[%c4] : memref<156xf32, #tpu.memory_space<smem>>
    %46 = vector.broadcast %45 : f32 to vector<1x64x128xf32>
    %47 = arith.mulf %46, %4 : vector<1x64x128xf32>
    %48 = arith.addf %44, %47 : vector<1x64x128xf32>
    %c63_i32_15 = arith.constant 63 : i32
    %49 = vector.broadcast %c63_i32_15 : i32 to vector<1x64x128xi32>
    %50 = arith.cmpi slt, %3, %49 : vector<1x64x128xi32>
    %c127_i32_16 = arith.constant 127 : i32
    %51 = tpu.dynamic_rotate %4 by %c127_i32_16 dim 2 : vector<1x64x128xf32>, i32 -> vector<1x64x128xf32>
    %cst_17 = arith.constant 0.000000e+00 : f32
    %52 = vector.broadcast %cst_17 : f32 to vector<1x64x128xf32>
    %53 = arith.select %50, %51, %52 : vector<1x64x128xi1>, vector<1x64x128xf32>
    %c5 = arith.constant 5 : index
    %54 = memref.load %arg1[%c5] : memref<156xf32, #tpu.memory_space<smem>>
    %55 = vector.broadcast %54 : f32 to vector<1x64x128xf32>
    %56 = arith.mulf %55, %53 : vector<1x64x128xf32>
    %57 = arith.addf %48, %56 : vector<1x64x128xf32>
    %c1_i32_18 = arith.constant 1 : i32
    %58 = vector.broadcast %c1_i32_18 : i32 to vector<1x64x128xi32>
    %59 = arith.cmpi sge, %3, %58 : vector<1x64x128xi32>
    %c1_i32_19 = arith.constant 1 : i32
    %60 = tpu.dynamic_rotate %14 by %c1_i32_19 dim 2 : vector<1x64x128xf32>, i32 -> vector<1x64x128xf32>
    %cst_20 = arith.constant 0.000000e+00 : f32
    %61 = vector.broadcast %cst_20 : f32 to vector<1x64x128xf32>
    %62 = arith.select %59, %60, %61 : vector<1x64x128xi1>, vector<1x64x128xf32>
    %c6 = arith.constant 6 : index
    %63 = memref.load %arg1[%c6] : memref<156xf32, #tpu.memory_space<smem>>
    %64 = vector.broadcast %63 : f32 to vector<1x64x128xf32>
    %65 = arith.mulf %64, %62 : vector<1x64x128xf32>
    %66 = arith.addf %57, %65 : vector<1x64x128xf32>
    %c7 = arith.constant 7 : index
    %67 = memref.load %arg1[%c7] : memref<156xf32, #tpu.memory_space<smem>>
    %68 = vector.broadcast %67 : f32 to vector<1x64x128xf32>
    %69 = arith.mulf %68, %14 : vector<1x64x128xf32>
    %70 = arith.addf %66, %69 : vector<1x64x128xf32>
    %c63_i32_21 = arith.constant 63 : i32
    %71 = vector.broadcast %c63_i32_21 : i32 to vector<1x64x128xi32>
    %72 = arith.cmpi slt, %3, %71 : vector<1x64x128xi32>
    %c127_i32_22 = arith.constant 127 : i32
    %73 = tpu.dynamic_rotate %14 by %c127_i32_22 dim 2 : vector<1x64x128xf32>, i32 -> vector<1x64x128xf32>
    %cst_23 = arith.constant 0.000000e+00 : f32
    %74 = vector.broadcast %cst_23 : f32 to vector<1x64x128xf32>
    %75 = arith.select %72, %73, %74 : vector<1x64x128xi1>, vector<1x64x128xf32>
    %c8 = arith.constant 8 : index
    %76 = memref.load %arg1[%c8] : memref<156xf32, #tpu.memory_space<smem>>
    %77 = vector.broadcast %76 : f32 to vector<1x64x128xf32>
    %78 = arith.mulf %77, %75 : vector<1x64x128xf32>
    %79 = arith.addf %70, %78 : vector<1x64x128xf32>
    %80 = vector.shape_cast %79 : vector<1x64x128xf32> to vector<1x1x64x128xf32>
    %cst_24 = arith.constant dense<0.000000e+00> : vector<1xf32>
    %81 = vector.multi_reduction <add>, %80, %cst_24 [1, 2, 3] : vector<1x1x64x128xf32> to vector<1xf32>
    %82 = vector.shape_cast %81 : vector<1xf32> to vector<1x1x1x1xf32>
    %83 = vector.extract %82[0, 0, 0, 0] : f32 from vector<1x1x1x1xf32>
    %cst_25 = arith.constant 1.22070313E-4 : f32
    %84 = arith.mulf %83, %cst_25 : f32
    %85 = vector.broadcast %84 : f32 to vector<1x64x128xf32>
    %86 = arith.subf %79, %85 : vector<1x64x128xf32>
    %87 = arith.mulf %86, %86 : vector<1x64x128xf32>
    %88 = vector.shape_cast %87 : vector<1x64x128xf32> to vector<1x1x64x128xf32>
    %cst_26 = arith.constant dense<0.000000e+00> : vector<1xf32>
    %89 = vector.multi_reduction <add>, %88, %cst_26 [1, 2, 3] : vector<1x1x64x128xf32> to vector<1xf32>
    %90 = vector.shape_cast %89 : vector<1xf32> to vector<1x1x1x1xf32>
    %91 = vector.extract %90[0, 0, 0, 0] : f32 from vector<1x1x1x1xf32>
    %cst_27 = arith.constant 1.22070313E-4 : f32
    %92 = arith.mulf %91, %cst_27 : f32
    %c10 = arith.constant 10 : index
    %93 = memref.load %arg1[%c10] : memref<156xf32, #tpu.memory_space<smem>>
    %cst_28 = arith.constant 9.99999974E-6 : f32
    %94 = arith.addf %92, %cst_28 : f32
    %95 = math.rsqrt %94 : f32
    %96 = arith.mulf %93, %95 : f32
    %97 = vector.broadcast %96 : f32 to vector<1x64x128xf32>
    %98 = arith.mulf %86, %97 : vector<1x64x128xf32>
    %c11 = arith.constant 11 : index
    %99 = memref.load %arg1[%c11] : memref<156xf32, #tpu.memory_space<smem>>
    %100 = vector.broadcast %99 : f32 to vector<1x64x128xf32>
    %101 = arith.addf %98, %100 : vector<1x64x128xf32>
    %cst_29 = arith.constant 0.000000e+00 : f32
    %102 = vector.broadcast %cst_29 : f32 to vector<1x64x128xf32>
    %103 = arith.maximumf %101, %102 : vector<1x64x128xf32>
    %c1_i32_30 = arith.constant 1 : i32
    %104 = vector.broadcast %c1_i32_30 : i32 to vector<1x64x128xi32>
    %105 = arith.andi %3, %104 : vector<1x64x128xi32>
    %c1_i32_31 = arith.constant 1 : i32
    %106 = vector.broadcast %c1_i32_31 : i32 to vector<1x64x128xi32>
    %107 = arith.cmpi slt, %105, %106 : vector<1x64x128xi32>
    %c1_i32_32 = arith.constant 1 : i32
    %108 = vector.broadcast %c1_i32_32 : i32 to vector<1x64x128xi32>
    %109 = arith.andi %0, %108 : vector<1x64x128xi32>
    %c1_i32_33 = arith.constant 1 : i32
    %110 = vector.broadcast %c1_i32_33 : i32 to vector<1x64x128xi32>
    %111 = arith.cmpi slt, %109, %110 : vector<1x64x128xi32>
    %c127_i32_34 = arith.constant 127 : i32
    %112 = tpu.dynamic_rotate %103 by %c127_i32_34 dim 2 : vector<1x64x128xf32>, i32 -> vector<1x64x128xf32>
    %c1_i32_35 = arith.constant 1 : i32
    %113 = tpu.dynamic_rotate %103 by %c1_i32_35 dim 2 : vector<1x64x128xf32>, i32 -> vector<1x64x128xf32>
    %114 = arith.select %107, %112, %113 : vector<1x64x128xi1>, vector<1x64x128xf32>
    %115 = arith.maximumf %103, %114 : vector<1x64x128xf32>
    %c63_i32_36 = arith.constant 63 : i32
    %116 = tpu.dynamic_rotate %115 by %c63_i32_36 dim 1 : vector<1x64x128xf32>, i32 -> vector<1x64x128xf32>
    %c1_i32_37 = arith.constant 1 : i32
    %117 = tpu.dynamic_rotate %115 by %c1_i32_37 dim 1 : vector<1x64x128xf32>, i32 -> vector<1x64x128xf32>
    %118 = arith.select %111, %116, %117 : vector<1x64x128xi1>, vector<1x64x128xf32>
    %119 = arith.maximumf %115, %118 : vector<1x64x128xf32>
    %c2_i32 = arith.constant 2 : i32
    %120 = vector.broadcast %c2_i32 : i32 to vector<1x64x128xi32>
    %121 = arith.cmpi sge, %0, %120 : vector<1x64x128xi32>
    %c2_i32_38 = arith.constant 2 : i32
    %122 = tpu.dynamic_rotate %119 by %c2_i32_38 dim 1 : vector<1x64x128xf32>, i32 -> vector<1x64x128xf32>
    %cst_39 = arith.constant 0.000000e+00 : f32
    %123 = vector.broadcast %cst_39 : f32 to vector<1x64x128xf32>
    %124 = arith.select %121, %122, %123 : vector<1x64x128xi1>, vector<1x64x128xf32>
    %c62_i32 = arith.constant 62 : i32
    %125 = vector.broadcast %c62_i32 : i32 to vector<1x64x128xi32>
    %126 = arith.cmpi slt, %0, %125 : vector<1x64x128xi32>
    %c62_i32_40 = arith.constant 62 : i32
    %127 = tpu.dynamic_rotate %119 by %c62_i32_40 dim 1 : vector<1x64x128xf32>, i32 -> vector<1x64x128xf32>
    %cst_41 = arith.constant 0.000000e+00 : f32
    %128 = vector.broadcast %cst_41 : f32 to vector<1x64x128xf32>
    %129 = arith.select %126, %127, %128 : vector<1x64x128xi1>, vector<1x64x128xf32>
    %c2_i32_42 = arith.constant 2 : i32
    %130 = vector.broadcast %c2_i32_42 : i32 to vector<1x64x128xi32>
    %131 = arith.cmpi sge, %3, %130 : vector<1x64x128xi32>
    %c2_i32_43 = arith.constant 2 : i32
    %132 = tpu.dynamic_rotate %124 by %c2_i32_43 dim 2 : vector<1x64x128xf32>, i32 -> vector<1x64x128xf32>
    %cst_44 = arith.constant 0.000000e+00 : f32
    %133 = vector.broadcast %cst_44 : f32 to vector<1x64x128xf32>
    %134 = arith.select %131, %132, %133 : vector<1x64x128xi1>, vector<1x64x128xf32>
    %c12 = arith.constant 12 : index
    %135 = memref.load %arg1[%c12] : memref<156xf32, #tpu.memory_space<smem>>
    %136 = vector.broadcast %135 : f32 to vector<1x64x128xf32>
    %137 = arith.mulf %136, %134 : vector<1x64x128xf32>
    %c13 = arith.constant 13 : index
    %138 = memref.load %arg1[%c13] : memref<156xf32, #tpu.memory_space<smem>>
    %139 = vector.broadcast %138 : f32 to vector<1x64x128xf32>
    %140 = arith.mulf %139, %124 : vector<1x64x128xf32>
    %141 = arith.addf %137, %140 : vector<1x64x128xf32>
    %c62_i32_45 = arith.constant 62 : i32
    %142 = vector.broadcast %c62_i32_45 : i32 to vector<1x64x128xi32>
    %143 = arith.cmpi slt, %3, %142 : vector<1x64x128xi32>
    %c126_i32 = arith.constant 126 : i32
    %144 = tpu.dynamic_rotate %124 by %c126_i32 dim 2 : vector<1x64x128xf32>, i32 -> vector<1x64x128xf32>
    %cst_46 = arith.constant 0.000000e+00 : f32
    %145 = vector.broadcast %cst_46 : f32 to vector<1x64x128xf32>
    %146 = arith.select %143, %144, %145 : vector<1x64x128xi1>, vector<1x64x128xf32>
    %c14 = arith.constant 14 : index
    %147 = memref.load %arg1[%c14] : memref<156xf32, #tpu.memory_space<smem>>
    %148 = vector.broadcast %147 : f32 to vector<1x64x128xf32>
    %149 = arith.mulf %148, %146 : vector<1x64x128xf32>
    %150 = arith.addf %141, %149 : vector<1x64x128xf32>
    %c2_i32_47 = arith.constant 2 : i32
    %151 = vector.broadcast %c2_i32_47 : i32 to vector<1x64x128xi32>
    %152 = arith.cmpi sge, %3, %151 : vector<1x64x128xi32>
    %c2_i32_48 = arith.constant 2 : i32
    %153 = tpu.dynamic_rotate %119 by %c2_i32_48 dim 2 : vector<1x64x128xf32>, i32 -> vector<1x64x128xf32>
    %cst_49 = arith.constant 0.000000e+00 : f32
    %154 = vector.broadcast %cst_49 : f32 to vector<1x64x128xf32>
    %155 = arith.select %152, %153, %154 : vector<1x64x128xi1>, vector<1x64x128xf32>
    %c15 = arith.constant 15 : index
    %156 = memref.load %arg1[%c15] : memref<156xf32, #tpu.memory_space<smem>>
    %157 = vector.broadcast %156 : f32 to vector<1x64x128xf32>
    %158 = arith.mulf %157, %155 : vector<1x64x128xf32>
    %159 = arith.addf %150, %158 : vector<1x64x128xf32>
    %c16 = arith.constant 16 : index
    %160 = memref.load %arg1[%c16] : memref<156xf32, #tpu.memory_space<smem>>
    %161 = vector.broadcast %160 : f32 to vector<1x64x128xf32>
    %162 = arith.mulf %161, %119 : vector<1x64x128xf32>
    %163 = arith.addf %159, %162 : vector<1x64x128xf32>
    %c62_i32_50 = arith.constant 62 : i32
    %164 = vector.broadcast %c62_i32_50 : i32 to vector<1x64x128xi32>
    %165 = arith.cmpi slt, %3, %164 : vector<1x64x128xi32>
    %c126_i32_51 = arith.constant 126 : i32
    %166 = tpu.dynamic_rotate %119 by %c126_i32_51 dim 2 : vector<1x64x128xf32>, i32 -> vector<1x64x128xf32>
    %cst_52 = arith.constant 0.000000e+00 : f32
    %167 = vector.broadcast %cst_52 : f32 to vector<1x64x128xf32>
    %168 = arith.select %165, %166, %167 : vector<1x64x128xi1>, vector<1x64x128xf32>
    %c17 = arith.constant 17 : index
    %169 = memref.load %arg1[%c17] : memref<156xf32, #tpu.memory_space<smem>>
    %170 = vector.broadcast %169 : f32 to vector<1x64x128xf32>
    %171 = arith.mulf %170, %168 : vector<1x64x128xf32>
    %172 = arith.addf %163, %171 : vector<1x64x128xf32>
    %c2_i32_53 = arith.constant 2 : i32
    %173 = vector.broadcast %c2_i32_53 : i32 to vector<1x64x128xi32>
    %174 = arith.cmpi sge, %3, %173 : vector<1x64x128xi32>
    %c2_i32_54 = arith.constant 2 : i32
    %175 = tpu.dynamic_rotate %129 by %c2_i32_54 dim 2 : vector<1x64x128xf32>, i32 -> vector<1x64x128xf32>
    %cst_55 = arith.constant 0.000000e+00 : f32
    %176 = vector.broadcast %cst_55 : f32 to vector<1x64x128xf32>
    %177 = arith.select %174, %175, %176 : vector<1x64x128xi1>, vector<1x64x128xf32>
    %c18 = arith.constant 18 : index
    %178 = memref.load %arg1[%c18] : memref<156xf32, #tpu.memory_space<smem>>
    %179 = vector.broadcast %178 : f32 to vector<1x64x128xf32>
    %180 = arith.mulf %179, %177 : vector<1x64x128xf32>
    %181 = arith.addf %172, %180 : vector<1x64x128xf32>
    %c19 = arith.constant 19 : index
    %182 = memref.load %arg1[%c19] : memref<156xf32, #tpu.memory_space<smem>>
    %183 = vector.broadcast %182 : f32 to vector<1x64x128xf32>
    %184 = arith.mulf %183, %129 : vector<1x64x128xf32>
    %185 = arith.addf %181, %184 : vector<1x64x128xf32>
    %c62_i32_56 = arith.constant 62 : i32
    %186 = vector.broadcast %c62_i32_56 : i32 to vector<1x64x128xi32>
    %187 = arith.cmpi slt, %3, %186 : vector<1x64x128xi32>
    %c126_i32_57 = arith.constant 126 : i32
    %188 = tpu.dynamic_rotate %129 by %c126_i32_57 dim 2 : vector<1x64x128xf32>, i32 -> vector<1x64x128xf32>
    %cst_58 = arith.constant 0.000000e+00 : f32
    %189 = vector.broadcast %cst_58 : f32 to vector<1x64x128xf32>
    %190 = arith.select %187, %188, %189 : vector<1x64x128xi1>, vector<1x64x128xf32>
    %c20 = arith.constant 20 : index
    %191 = memref.load %arg1[%c20] : memref<156xf32, #tpu.memory_space<smem>>
    %192 = vector.broadcast %191 : f32 to vector<1x64x128xf32>
    %193 = arith.mulf %192, %190 : vector<1x64x128xf32>
    %194 = arith.addf %185, %193 : vector<1x64x128xf32>
    %195 = vector.shape_cast %194 : vector<1x64x128xf32> to vector<1x1x64x128xf32>
    %cst_59 = arith.constant dense<0.000000e+00> : vector<1xf32>
    %196 = vector.multi_reduction <add>, %195, %cst_59 [1, 2, 3] : vector<1x1x64x128xf32> to vector<1xf32>
    %197 = vector.shape_cast %196 : vector<1xf32> to vector<1x1x1x1xf32>
    %198 = vector.extract %197[0, 0, 0, 0] : f32 from vector<1x1x1x1xf32>
    %cst_60 = arith.constant 1.22070313E-4 : f32
    %199 = arith.mulf %198, %cst_60 : f32
    %200 = vector.broadcast %199 : f32 to vector<1x64x128xf32>
    %201 = arith.subf %194, %200 : vector<1x64x128xf32>
    %202 = arith.mulf %201, %201 : vector<1x64x128xf32>
    %203 = vector.shape_cast %202 : vector<1x64x128xf32> to vector<1x1x64x128xf32>
    %cst_61 = arith.constant dense<0.000000e+00> : vector<1xf32>
    %204 = vector.multi_reduction <add>, %203, %cst_61 [1, 2, 3] : vector<1x1x64x128xf32> to vector<1xf32>
    %205 = vector.shape_cast %204 : vector<1xf32> to vector<1x1x1x1xf32>
    %206 = vector.extract %205[0, 0, 0, 0] : f32 from vector<1x1x1x1xf32>
    %cst_62 = arith.constant 1.22070313E-4 : f32
    %207 = arith.mulf %206, %cst_62 : f32
    %c22 = arith.constant 22 : index
    %208 = memref.load %arg1[%c22] : memref<156xf32, #tpu.memory_space<smem>>
    %cst_63 = arith.constant 9.99999974E-6 : f32
    %209 = arith.addf %207, %cst_63 : f32
    %210 = math.rsqrt %209 : f32
    %211 = arith.mulf %208, %210 : f32
    %212 = vector.broadcast %211 : f32 to vector<1x64x128xf32>
    %213 = arith.mulf %201, %212 : vector<1x64x128xf32>
    %c23 = arith.constant 23 : index
    %214 = memref.load %arg1[%c23] : memref<156xf32, #tpu.memory_space<smem>>
    %215 = vector.broadcast %214 : f32 to vector<1x64x128xf32>
    %216 = arith.addf %213, %215 : vector<1x64x128xf32>
    %cst_64 = arith.constant 0.000000e+00 : f32
    %217 = vector.broadcast %cst_64 : f32 to vector<1x64x128xf32>
    %218 = arith.maximumf %216, %217 : vector<1x64x128xf32>
    %c3_i32 = arith.constant 3 : i32
    %219 = vector.broadcast %c3_i32 : i32 to vector<1x64x128xi32>
    %220 = arith.andi %3, %219 : vector<1x64x128xi32>
    %c2_i32_65 = arith.constant 2 : i32
    %221 = vector.broadcast %c2_i32_65 : i32 to vector<1x64x128xi32>
    %222 = arith.cmpi slt, %220, %221 : vector<1x64x128xi32>
    %c3_i32_66 = arith.constant 3 : i32
    %223 = vector.broadcast %c3_i32_66 : i32 to vector<1x64x128xi32>
    %224 = arith.andi %0, %223 : vector<1x64x128xi32>
    %c2_i32_67 = arith.constant 2 : i32
    %225 = vector.broadcast %c2_i32_67 : i32 to vector<1x64x128xi32>
    %226 = arith.cmpi slt, %224, %225 : vector<1x64x128xi32>
    %c126_i32_68 = arith.constant 126 : i32
    %227 = tpu.dynamic_rotate %218 by %c126_i32_68 dim 2 : vector<1x64x128xf32>, i32 -> vector<1x64x128xf32>
    %c2_i32_69 = arith.constant 2 : i32
    %228 = tpu.dynamic_rotate %218 by %c2_i32_69 dim 2 : vector<1x64x128xf32>, i32 -> vector<1x64x128xf32>
    %229 = arith.select %222, %227, %228 : vector<1x64x128xi1>, vector<1x64x128xf32>
    %230 = arith.maximumf %218, %229 : vector<1x64x128xf32>
    %c62_i32_70 = arith.constant 62 : i32
    %231 = tpu.dynamic_rotate %230 by %c62_i32_70 dim 1 : vector<1x64x128xf32>, i32 -> vector<1x64x128xf32>
    %c2_i32_71 = arith.constant 2 : i32
    %232 = tpu.dynamic_rotate %230 by %c2_i32_71 dim 1 : vector<1x64x128xf32>, i32 -> vector<1x64x128xf32>
    %233 = arith.select %226, %231, %232 : vector<1x64x128xi1>, vector<1x64x128xf32>
    %234 = arith.maximumf %230, %233 : vector<1x64x128xf32>
    %c4_i32 = arith.constant 4 : i32
    %235 = vector.broadcast %c4_i32 : i32 to vector<1x64x128xi32>
    %236 = arith.cmpi sge, %0, %235 : vector<1x64x128xi32>
    %c4_i32_72 = arith.constant 4 : i32
    %237 = tpu.dynamic_rotate %234 by %c4_i32_72 dim 1 : vector<1x64x128xf32>, i32 -> vector<1x64x128xf32>
    %cst_73 = arith.constant 0.000000e+00 : f32
    %238 = vector.broadcast %cst_73 : f32 to vector<1x64x128xf32>
    %239 = arith.select %236, %237, %238 : vector<1x64x128xi1>, vector<1x64x128xf32>
    %c60_i32 = arith.constant 60 : i32
    %240 = vector.broadcast %c60_i32 : i32 to vector<1x64x128xi32>
    %241 = arith.cmpi slt, %0, %240 : vector<1x64x128xi32>
    %c60_i32_74 = arith.constant 60 : i32
    %242 = tpu.dynamic_rotate %234 by %c60_i32_74 dim 1 : vector<1x64x128xf32>, i32 -> vector<1x64x128xf32>
    %cst_75 = arith.constant 0.000000e+00 : f32
    %243 = vector.broadcast %cst_75 : f32 to vector<1x64x128xf32>
    %244 = arith.select %241, %242, %243 : vector<1x64x128xi1>, vector<1x64x128xf32>
    %c4_i32_76 = arith.constant 4 : i32
    %245 = vector.broadcast %c4_i32_76 : i32 to vector<1x64x128xi32>
    %246 = arith.cmpi sge, %3, %245 : vector<1x64x128xi32>
    %c4_i32_77 = arith.constant 4 : i32
    %247 = tpu.dynamic_rotate %239 by %c4_i32_77 dim 2 : vector<1x64x128xf32>, i32 -> vector<1x64x128xf32>
    %cst_78 = arith.constant 0.000000e+00 : f32
    %248 = vector.broadcast %cst_78 : f32 to vector<1x64x128xf32>
    %249 = arith.select %246, %247, %248 : vector<1x64x128xi1>, vector<1x64x128xf32>
    %c24 = arith.constant 24 : index
    %250 = memref.load %arg1[%c24] : memref<156xf32, #tpu.memory_space<smem>>
    %251 = vector.broadcast %250 : f32 to vector<1x64x128xf32>
    %252 = arith.mulf %251, %249 : vector<1x64x128xf32>
    %c25 = arith.constant 25 : index
    %253 = memref.load %arg1[%c25] : memref<156xf32, #tpu.memory_space<smem>>
    %254 = vector.broadcast %253 : f32 to vector<1x64x128xf32>
    %255 = arith.mulf %254, %239 : vector<1x64x128xf32>
    %256 = arith.addf %252, %255 : vector<1x64x128xf32>
    %c60_i32_79 = arith.constant 60 : i32
    %257 = vector.broadcast %c60_i32_79 : i32 to vector<1x64x128xi32>
    %258 = arith.cmpi slt, %3, %257 : vector<1x64x128xi32>
    %c124_i32 = arith.constant 124 : i32
    %259 = tpu.dynamic_rotate %239 by %c124_i32 dim 2 : vector<1x64x128xf32>, i32 -> vector<1x64x128xf32>
    %cst_80 = arith.constant 0.000000e+00 : f32
    %260 = vector.broadcast %cst_80 : f32 to vector<1x64x128xf32>
    %261 = arith.select %258, %259, %260 : vector<1x64x128xi1>, vector<1x64x128xf32>
    %c26 = arith.constant 26 : index
    %262 = memref.load %arg1[%c26] : memref<156xf32, #tpu.memory_space<smem>>
    %263 = vector.broadcast %262 : f32 to vector<1x64x128xf32>
    %264 = arith.mulf %263, %261 : vector<1x64x128xf32>
    %265 = arith.addf %256, %264 : vector<1x64x128xf32>
    %c4_i32_81 = arith.constant 4 : i32
    %266 = vector.broadcast %c4_i32_81 : i32 to vector<1x64x128xi32>
    %267 = arith.cmpi sge, %3, %266 : vector<1x64x128xi32>
    %c4_i32_82 = arith.constant 4 : i32
    %268 = tpu.dynamic_rotate %234 by %c4_i32_82 dim 2 : vector<1x64x128xf32>, i32 -> vector<1x64x128xf32>
    %cst_83 = arith.constant 0.000000e+00 : f32
    %269 = vector.broadcast %cst_83 : f32 to vector<1x64x128xf32>
    %270 = arith.select %267, %268, %269 : vector<1x64x128xi1>, vector<1x64x128xf32>
    %c27 = arith.constant 27 : index
    %271 = memref.load %arg1[%c27] : memref<156xf32, #tpu.memory_space<smem>>
    %272 = vector.broadcast %271 : f32 to vector<1x64x128xf32>
    %273 = arith.mulf %272, %270 : vector<1x64x128xf32>
    %274 = arith.addf %265, %273 : vector<1x64x128xf32>
    %c28 = arith.constant 28 : index
    %275 = memref.load %arg1[%c28] : memref<156xf32, #tpu.memory_space<smem>>
    %276 = vector.broadcast %275 : f32 to vector<1x64x128xf32>
    %277 = arith.mulf %276, %234 : vector<1x64x128xf32>
    %278 = arith.addf %274, %277 : vector<1x64x128xf32>
    %c60_i32_84 = arith.constant 60 : i32
    %279 = vector.broadcast %c60_i32_84 : i32 to vector<1x64x128xi32>
    %280 = arith.cmpi slt, %3, %279 : vector<1x64x128xi32>
    %c124_i32_85 = arith.constant 124 : i32
    %281 = tpu.dynamic_rotate %234 by %c124_i32_85 dim 2 : vector<1x64x128xf32>, i32 -> vector<1x64x128xf32>
    %cst_86 = arith.constant 0.000000e+00 : f32
    %282 = vector.broadcast %cst_86 : f32 to vector<1x64x128xf32>
    %283 = arith.select %280, %281, %282 : vector<1x64x128xi1>, vector<1x64x128xf32>
    %c29 = arith.constant 29 : index
    %284 = memref.load %arg1[%c29] : memref<156xf32, #tpu.memory_space<smem>>
    %285 = vector.broadcast %284 : f32 to vector<1x64x128xf32>
    %286 = arith.mulf %285, %283 : vector<1x64x128xf32>
    %287 = arith.addf %278, %286 : vector<1x64x128xf32>
    %c4_i32_87 = arith.constant 4 : i32
    %288 = vector.broadcast %c4_i32_87 : i32 to vector<1x64x128xi32>
    %289 = arith.cmpi sge, %3, %288 : vector<1x64x128xi32>
    %c4_i32_88 = arith.constant 4 : i32
    %290 = tpu.dynamic_rotate %244 by %c4_i32_88 dim 2 : vector<1x64x128xf32>, i32 -> vector<1x64x128xf32>
    %cst_89 = arith.constant 0.000000e+00 : f32
    %291 = vector.broadcast %cst_89 : f32 to vector<1x64x128xf32>
    %292 = arith.select %289, %290, %291 : vector<1x64x128xi1>, vector<1x64x128xf32>
    %c30 = arith.constant 30 : index
    %293 = memref.load %arg1[%c30] : memref<156xf32, #tpu.memory_space<smem>>
    %294 = vector.broadcast %293 : f32 to vector<1x64x128xf32>
    %295 = arith.mulf %294, %292 : vector<1x64x128xf32>
    %296 = arith.addf %287, %295 : vector<1x64x128xf32>
    %c31 = arith.constant 31 : index
    %297 = memref.load %arg1[%c31] : memref<156xf32, #tpu.memory_space<smem>>
    %298 = vector.broadcast %297 : f32 to vector<1x64x128xf32>
    %299 = arith.mulf %298, %244 : vector<1x64x128xf32>
    %300 = arith.addf %296, %299 : vector<1x64x128xf32>
    %c60_i32_90 = arith.constant 60 : i32
    %301 = vector.broadcast %c60_i32_90 : i32 to vector<1x64x128xi32>
    %302 = arith.cmpi slt, %3, %301 : vector<1x64x128xi32>
    %c124_i32_91 = arith.constant 124 : i32
    %303 = tpu.dynamic_rotate %244 by %c124_i32_91 dim 2 : vector<1x64x128xf32>, i32 -> vector<1x64x128xf32>
    %cst_92 = arith.constant 0.000000e+00 : f32
    %304 = vector.broadcast %cst_92 : f32 to vector<1x64x128xf32>
    %305 = arith.select %302, %303, %304 : vector<1x64x128xi1>, vector<1x64x128xf32>
    %c32 = arith.constant 32 : index
    %306 = memref.load %arg1[%c32] : memref<156xf32, #tpu.memory_space<smem>>
    %307 = vector.broadcast %306 : f32 to vector<1x64x128xf32>
    %308 = arith.mulf %307, %305 : vector<1x64x128xf32>
    %309 = arith.addf %300, %308 : vector<1x64x128xf32>
    %310 = vector.shape_cast %309 : vector<1x64x128xf32> to vector<1x1x64x128xf32>
    %cst_93 = arith.constant dense<0.000000e+00> : vector<1xf32>
    %311 = vector.multi_reduction <add>, %310, %cst_93 [1, 2, 3] : vector<1x1x64x128xf32> to vector<1xf32>
    %312 = vector.shape_cast %311 : vector<1xf32> to vector<1x1x1x1xf32>
    %313 = vector.extract %312[0, 0, 0, 0] : f32 from vector<1x1x1x1xf32>
    %cst_94 = arith.constant 1.22070313E-4 : f32
    %314 = arith.mulf %313, %cst_94 : f32
    %315 = vector.broadcast %314 : f32 to vector<1x64x128xf32>
    %316 = arith.subf %309, %315 : vector<1x64x128xf32>
    %317 = arith.mulf %316, %316 : vector<1x64x128xf32>
    %318 = vector.shape_cast %317 : vector<1x64x128xf32> to vector<1x1x64x128xf32>
    %cst_95 = arith.constant dense<0.000000e+00> : vector<1xf32>
    %319 = vector.multi_reduction <add>, %318, %cst_95 [1, 2, 3] : vector<1x1x64x128xf32> to vector<1xf32>
    %320 = vector.shape_cast %319 : vector<1xf32> to vector<1x1x1x1xf32>
    %321 = vector.extract %320[0, 0, 0, 0] : f32 from vector<1x1x1x1xf32>
    %cst_96 = arith.constant 1.22070313E-4 : f32
    %322 = arith.mulf %321, %cst_96 : f32
    %c34 = arith.constant 34 : index
    %323 = memref.load %arg1[%c34] : memref<156xf32, #tpu.memory_space<smem>>
    %cst_97 = arith.constant 9.99999974E-6 : f32
    %324 = arith.addf %322, %cst_97 : f32
    %325 = math.rsqrt %324 : f32
    %326 = arith.mulf %323, %325 : f32
    %327 = vector.broadcast %326 : f32 to vector<1x64x128xf32>
    %328 = arith.mulf %316, %327 : vector<1x64x128xf32>
    %c35 = arith.constant 35 : index
    %329 = memref.load %arg1[%c35] : memref<156xf32, #tpu.memory_space<smem>>
    %330 = vector.broadcast %329 : f32 to vector<1x64x128xf32>
    %331 = arith.addf %328, %330 : vector<1x64x128xf32>
    %cst_98 = arith.constant 0.000000e+00 : f32
    %332 = vector.broadcast %cst_98 : f32 to vector<1x64x128xf32>
    %333 = arith.maximumf %331, %332 : vector<1x64x128xf32>
    %c7_i32 = arith.constant 7 : i32
    %334 = vector.broadcast %c7_i32 : i32 to vector<1x64x128xi32>
    %335 = arith.andi %3, %334 : vector<1x64x128xi32>
    %c4_i32_99 = arith.constant 4 : i32
    %336 = vector.broadcast %c4_i32_99 : i32 to vector<1x64x128xi32>
    %337 = arith.cmpi slt, %335, %336 : vector<1x64x128xi32>
    %c7_i32_100 = arith.constant 7 : i32
    %338 = vector.broadcast %c7_i32_100 : i32 to vector<1x64x128xi32>
    %339 = arith.andi %0, %338 : vector<1x64x128xi32>
    %c4_i32_101 = arith.constant 4 : i32
    %340 = vector.broadcast %c4_i32_101 : i32 to vector<1x64x128xi32>
    %341 = arith.cmpi slt, %339, %340 : vector<1x64x128xi32>
    %c124_i32_102 = arith.constant 124 : i32
    %342 = tpu.dynamic_rotate %333 by %c124_i32_102 dim 2 : vector<1x64x128xf32>, i32 -> vector<1x64x128xf32>
    %c4_i32_103 = arith.constant 4 : i32
    %343 = tpu.dynamic_rotate %333 by %c4_i32_103 dim 2 : vector<1x64x128xf32>, i32 -> vector<1x64x128xf32>
    %344 = arith.select %337, %342, %343 : vector<1x64x128xi1>, vector<1x64x128xf32>
    %345 = arith.maximumf %333, %344 : vector<1x64x128xf32>
    %c60_i32_104 = arith.constant 60 : i32
    %346 = tpu.dynamic_rotate %345 by %c60_i32_104 dim 1 : vector<1x64x128xf32>, i32 -> vector<1x64x128xf32>
    %c4_i32_105 = arith.constant 4 : i32
    %347 = tpu.dynamic_rotate %345 by %c4_i32_105 dim 1 : vector<1x64x128xf32>, i32 -> vector<1x64x128xf32>
    %348 = arith.select %341, %346, %347 : vector<1x64x128xi1>, vector<1x64x128xf32>
    %349 = arith.maximumf %345, %348 : vector<1x64x128xf32>
    %c8_i32 = arith.constant 8 : i32
    %350 = vector.broadcast %c8_i32 : i32 to vector<1x64x128xi32>
    %351 = arith.cmpi sge, %0, %350 : vector<1x64x128xi32>
    %c8_i32_106 = arith.constant 8 : i32
    %352 = tpu.dynamic_rotate %349 by %c8_i32_106 dim 1 : vector<1x64x128xf32>, i32 -> vector<1x64x128xf32>
    %cst_107 = arith.constant 0.000000e+00 : f32
    %353 = vector.broadcast %cst_107 : f32 to vector<1x64x128xf32>
    %354 = arith.select %351, %352, %353 : vector<1x64x128xi1>, vector<1x64x128xf32>
    %c56_i32 = arith.constant 56 : i32
    %355 = vector.broadcast %c56_i32 : i32 to vector<1x64x128xi32>
    %356 = arith.cmpi slt, %0, %355 : vector<1x64x128xi32>
    %c56_i32_108 = arith.constant 56 : i32
    %357 = tpu.dynamic_rotate %349 by %c56_i32_108 dim 1 : vector<1x64x128xf32>, i32 -> vector<1x64x128xf32>
    %cst_109 = arith.constant 0.000000e+00 : f32
    %358 = vector.broadcast %cst_109 : f32 to vector<1x64x128xf32>
    %359 = arith.select %356, %357, %358 : vector<1x64x128xi1>, vector<1x64x128xf32>
    %c8_i32_110 = arith.constant 8 : i32
    %360 = vector.broadcast %c8_i32_110 : i32 to vector<1x64x128xi32>
    %361 = arith.cmpi sge, %3, %360 : vector<1x64x128xi32>
    %c8_i32_111 = arith.constant 8 : i32
    %362 = tpu.dynamic_rotate %354 by %c8_i32_111 dim 2 : vector<1x64x128xf32>, i32 -> vector<1x64x128xf32>
    %cst_112 = arith.constant 0.000000e+00 : f32
    %363 = vector.broadcast %cst_112 : f32 to vector<1x64x128xf32>
    %364 = arith.select %361, %362, %363 : vector<1x64x128xi1>, vector<1x64x128xf32>
    %c36 = arith.constant 36 : index
    %365 = memref.load %arg1[%c36] : memref<156xf32, #tpu.memory_space<smem>>
    %366 = vector.broadcast %365 : f32 to vector<1x64x128xf32>
    %367 = arith.mulf %366, %364 : vector<1x64x128xf32>
    %c37 = arith.constant 37 : index
    %368 = memref.load %arg1[%c37] : memref<156xf32, #tpu.memory_space<smem>>
    %369 = vector.broadcast %368 : f32 to vector<1x64x128xf32>
    %370 = arith.mulf %369, %354 : vector<1x64x128xf32>
    %371 = arith.addf %367, %370 : vector<1x64x128xf32>
    %c56_i32_113 = arith.constant 56 : i32
    %372 = vector.broadcast %c56_i32_113 : i32 to vector<1x64x128xi32>
    %373 = arith.cmpi slt, %3, %372 : vector<1x64x128xi32>
    %c120_i32 = arith.constant 120 : i32
    %374 = tpu.dynamic_rotate %354 by %c120_i32 dim 2 : vector<1x64x128xf32>, i32 -> vector<1x64x128xf32>
    %cst_114 = arith.constant 0.000000e+00 : f32
    %375 = vector.broadcast %cst_114 : f32 to vector<1x64x128xf32>
    %376 = arith.select %373, %374, %375 : vector<1x64x128xi1>, vector<1x64x128xf32>
    %c38 = arith.constant 38 : index
    %377 = memref.load %arg1[%c38] : memref<156xf32, #tpu.memory_space<smem>>
    %378 = vector.broadcast %377 : f32 to vector<1x64x128xf32>
    %379 = arith.mulf %378, %376 : vector<1x64x128xf32>
    %380 = arith.addf %371, %379 : vector<1x64x128xf32>
    %c8_i32_115 = arith.constant 8 : i32
    %381 = vector.broadcast %c8_i32_115 : i32 to vector<1x64x128xi32>
    %382 = arith.cmpi sge, %3, %381 : vector<1x64x128xi32>
    %c8_i32_116 = arith.constant 8 : i32
    %383 = tpu.dynamic_rotate %349 by %c8_i32_116 dim 2 : vector<1x64x128xf32>, i32 -> vector<1x64x128xf32>
    %cst_117 = arith.constant 0.000000e+00 : f32
    %384 = vector.broadcast %cst_117 : f32 to vector<1x64x128xf32>
    %385 = arith.select %382, %383, %384 : vector<1x64x128xi1>, vector<1x64x128xf32>
    %c39 = arith.constant 39 : index
    %386 = memref.load %arg1[%c39] : memref<156xf32, #tpu.memory_space<smem>>
    %387 = vector.broadcast %386 : f32 to vector<1x64x128xf32>
    %388 = arith.mulf %387, %385 : vector<1x64x128xf32>
    %389 = arith.addf %380, %388 : vector<1x64x128xf32>
    %c40 = arith.constant 40 : index
    %390 = memref.load %arg1[%c40] : memref<156xf32, #tpu.memory_space<smem>>
    %391 = vector.broadcast %390 : f32 to vector<1x64x128xf32>
    %392 = arith.mulf %391, %349 : vector<1x64x128xf32>
    %393 = arith.addf %389, %392 : vector<1x64x128xf32>
    %c56_i32_118 = arith.constant 56 : i32
    %394 = vector.broadcast %c56_i32_118 : i32 to vector<1x64x128xi32>
    %395 = arith.cmpi slt, %3, %394 : vector<1x64x128xi32>
    %c120_i32_119 = arith.constant 120 : i32
    %396 = tpu.dynamic_rotate %349 by %c120_i32_119 dim 2 : vector<1x64x128xf32>, i32 -> vector<1x64x128xf32>
    %cst_120 = arith.constant 0.000000e+00 : f32
    %397 = vector.broadcast %cst_120 : f32 to vector<1x64x128xf32>
    %398 = arith.select %395, %396, %397 : vector<1x64x128xi1>, vector<1x64x128xf32>
    %c41 = arith.constant 41 : index
    %399 = memref.load %arg1[%c41] : memref<156xf32, #tpu.memory_space<smem>>
    %400 = vector.broadcast %399 : f32 to vector<1x64x128xf32>
    %401 = arith.mulf %400, %398 : vector<1x64x128xf32>
    %402 = arith.addf %393, %401 : vector<1x64x128xf32>
    %c8_i32_121 = arith.constant 8 : i32
    %403 = vector.broadcast %c8_i32_121 : i32 to vector<1x64x128xi32>
    %404 = arith.cmpi sge, %3, %403 : vector<1x64x128xi32>
    %c8_i32_122 = arith.constant 8 : i32
    %405 = tpu.dynamic_rotate %359 by %c8_i32_122 dim 2 : vector<1x64x128xf32>, i32 -> vector<1x64x128xf32>
    %cst_123 = arith.constant 0.000000e+00 : f32
    %406 = vector.broadcast %cst_123 : f32 to vector<1x64x128xf32>
    %407 = arith.select %404, %405, %406 : vector<1x64x128xi1>, vector<1x64x128xf32>
    %c42 = arith.constant 42 : index
    %408 = memref.load %arg1[%c42] : memref<156xf32, #tpu.memory_space<smem>>
    %409 = vector.broadcast %408 : f32 to vector<1x64x128xf32>
    %410 = arith.mulf %409, %407 : vector<1x64x128xf32>
    %411 = arith.addf %402, %410 : vector<1x64x128xf32>
    %c43 = arith.constant 43 : index
    %412 = memref.load %arg1[%c43] : memref<156xf32, #tpu.memory_space<smem>>
    %413 = vector.broadcast %412 : f32 to vector<1x64x128xf32>
    %414 = arith.mulf %413, %359 : vector<1x64x128xf32>
    %415 = arith.addf %411, %414 : vector<1x64x128xf32>
    %c56_i32_124 = arith.constant 56 : i32
    %416 = vector.broadcast %c56_i32_124 : i32 to vector<1x64x128xi32>
    %417 = arith.cmpi slt, %3, %416 : vector<1x64x128xi32>
    %c120_i32_125 = arith.constant 120 : i32
    %418 = tpu.dynamic_rotate %359 by %c120_i32_125 dim 2 : vector<1x64x128xf32>, i32 -> vector<1x64x128xf32>
    %cst_126 = arith.constant 0.000000e+00 : f32
    %419 = vector.broadcast %cst_126 : f32 to vector<1x64x128xf32>
    %420 = arith.select %417, %418, %419 : vector<1x64x128xi1>, vector<1x64x128xf32>
    %c44 = arith.constant 44 : index
    %421 = memref.load %arg1[%c44] : memref<156xf32, #tpu.memory_space<smem>>
    %422 = vector.broadcast %421 : f32 to vector<1x64x128xf32>
    %423 = arith.mulf %422, %420 : vector<1x64x128xf32>
    %424 = arith.addf %415, %423 : vector<1x64x128xf32>
    %425 = vector.shape_cast %424 : vector<1x64x128xf32> to vector<1x1x64x128xf32>
    %cst_127 = arith.constant dense<0.000000e+00> : vector<1xf32>
    %426 = vector.multi_reduction <add>, %425, %cst_127 [1, 2, 3] : vector<1x1x64x128xf32> to vector<1xf32>
    %427 = vector.shape_cast %426 : vector<1xf32> to vector<1x1x1x1xf32>
    %428 = vector.extract %427[0, 0, 0, 0] : f32 from vector<1x1x1x1xf32>
    %cst_128 = arith.constant 1.22070313E-4 : f32
    %429 = arith.mulf %428, %cst_128 : f32
    %430 = vector.broadcast %429 : f32 to vector<1x64x128xf32>
    %431 = arith.subf %424, %430 : vector<1x64x128xf32>
    %432 = arith.mulf %431, %431 : vector<1x64x128xf32>
    %433 = vector.shape_cast %432 : vector<1x64x128xf32> to vector<1x1x64x128xf32>
    %cst_129 = arith.constant dense<0.000000e+00> : vector<1xf32>
    %434 = vector.multi_reduction <add>, %433, %cst_129 [1, 2, 3] : vector<1x1x64x128xf32> to vector<1xf32>
    %435 = vector.shape_cast %434 : vector<1xf32> to vector<1x1x1x1xf32>
    %436 = vector.extract %435[0, 0, 0, 0] : f32 from vector<1x1x1x1xf32>
    %cst_130 = arith.constant 1.22070313E-4 : f32
    %437 = arith.mulf %436, %cst_130 : f32
    %c46 = arith.constant 46 : index
    %438 = memref.load %arg1[%c46] : memref<156xf32, #tpu.memory_space<smem>>
    %cst_131 = arith.constant 9.99999974E-6 : f32
    %439 = arith.addf %437, %cst_131 : f32
    %440 = math.rsqrt %439 : f32
    %441 = arith.mulf %438, %440 : f32
    %442 = vector.broadcast %441 : f32 to vector<1x64x128xf32>
    %443 = arith.mulf %431, %442 : vector<1x64x128xf32>
    %c47 = arith.constant 47 : index
    %444 = memref.load %arg1[%c47] : memref<156xf32, #tpu.memory_space<smem>>
    %445 = vector.broadcast %444 : f32 to vector<1x64x128xf32>
    %446 = arith.addf %443, %445 : vector<1x64x128xf32>
    %cst_132 = arith.constant 0.000000e+00 : f32
    %447 = vector.broadcast %cst_132 : f32 to vector<1x64x128xf32>
    %448 = arith.maximumf %446, %447 : vector<1x64x128xf32>
    %c15_i32 = arith.constant 15 : i32
    %449 = vector.broadcast %c15_i32 : i32 to vector<1x64x128xi32>
    %450 = arith.andi %3, %449 : vector<1x64x128xi32>
    %c8_i32_133 = arith.constant 8 : i32
    %451 = vector.broadcast %c8_i32_133 : i32 to vector<1x64x128xi32>
    %452 = arith.cmpi slt, %450, %451 : vector<1x64x128xi32>
    %c15_i32_134 = arith.constant 15 : i32
    %453 = vector.broadcast %c15_i32_134 : i32 to vector<1x64x128xi32>
    %454 = arith.andi %0, %453 : vector<1x64x128xi32>
    %c8_i32_135 = arith.constant 8 : i32
    %455 = vector.broadcast %c8_i32_135 : i32 to vector<1x64x128xi32>
    %456 = arith.cmpi slt, %454, %455 : vector<1x64x128xi32>
    %c120_i32_136 = arith.constant 120 : i32
    %457 = tpu.dynamic_rotate %448 by %c120_i32_136 dim 2 : vector<1x64x128xf32>, i32 -> vector<1x64x128xf32>
    %c8_i32_137 = arith.constant 8 : i32
    %458 = tpu.dynamic_rotate %448 by %c8_i32_137 dim 2 : vector<1x64x128xf32>, i32 -> vector<1x64x128xf32>
    %459 = arith.select %452, %457, %458 : vector<1x64x128xi1>, vector<1x64x128xf32>
    %460 = arith.maximumf %448, %459 : vector<1x64x128xf32>
    %c56_i32_138 = arith.constant 56 : i32
    %461 = tpu.dynamic_rotate %460 by %c56_i32_138 dim 1 : vector<1x64x128xf32>, i32 -> vector<1x64x128xf32>
    %c8_i32_139 = arith.constant 8 : i32
    %462 = tpu.dynamic_rotate %460 by %c8_i32_139 dim 1 : vector<1x64x128xf32>, i32 -> vector<1x64x128xf32>
    %463 = arith.select %456, %461, %462 : vector<1x64x128xi1>, vector<1x64x128xf32>
    %464 = arith.maximumf %460, %463 : vector<1x64x128xf32>
    %c16_i32 = arith.constant 16 : i32
    %465 = vector.broadcast %c16_i32 : i32 to vector<1x64x128xi32>
    %466 = arith.cmpi sge, %0, %465 : vector<1x64x128xi32>
    %c16_i32_140 = arith.constant 16 : i32
    %467 = tpu.dynamic_rotate %464 by %c16_i32_140 dim 1 : vector<1x64x128xf32>, i32 -> vector<1x64x128xf32>
    %cst_141 = arith.constant 0.000000e+00 : f32
    %468 = vector.broadcast %cst_141 : f32 to vector<1x64x128xf32>
    %469 = arith.select %466, %467, %468 : vector<1x64x128xi1>, vector<1x64x128xf32>
    %c48_i32 = arith.constant 48 : i32
    %470 = vector.broadcast %c48_i32 : i32 to vector<1x64x128xi32>
    %471 = arith.cmpi slt, %0, %470 : vector<1x64x128xi32>
    %c48_i32_142 = arith.constant 48 : i32
    %472 = tpu.dynamic_rotate %464 by %c48_i32_142 dim 1 : vector<1x64x128xf32>, i32 -> vector<1x64x128xf32>
    %cst_143 = arith.constant 0.000000e+00 : f32
    %473 = vector.broadcast %cst_143 : f32 to vector<1x64x128xf32>
    %474 = arith.select %471, %472, %473 : vector<1x64x128xi1>, vector<1x64x128xf32>
    %c16_i32_144 = arith.constant 16 : i32
    %475 = vector.broadcast %c16_i32_144 : i32 to vector<1x64x128xi32>
    %476 = arith.cmpi sge, %3, %475 : vector<1x64x128xi32>
    %c16_i32_145 = arith.constant 16 : i32
    %477 = tpu.dynamic_rotate %469 by %c16_i32_145 dim 2 : vector<1x64x128xf32>, i32 -> vector<1x64x128xf32>
    %cst_146 = arith.constant 0.000000e+00 : f32
    %478 = vector.broadcast %cst_146 : f32 to vector<1x64x128xf32>
    %479 = arith.select %476, %477, %478 : vector<1x64x128xi1>, vector<1x64x128xf32>
    %c48 = arith.constant 48 : index
    %480 = memref.load %arg1[%c48] : memref<156xf32, #tpu.memory_space<smem>>
    %481 = vector.broadcast %480 : f32 to vector<1x64x128xf32>
    %482 = arith.mulf %481, %479 : vector<1x64x128xf32>
    %c49 = arith.constant 49 : index
    %483 = memref.load %arg1[%c49] : memref<156xf32, #tpu.memory_space<smem>>
    %484 = vector.broadcast %483 : f32 to vector<1x64x128xf32>
    %485 = arith.mulf %484, %469 : vector<1x64x128xf32>
    %486 = arith.addf %482, %485 : vector<1x64x128xf32>
    %c48_i32_147 = arith.constant 48 : i32
    %487 = vector.broadcast %c48_i32_147 : i32 to vector<1x64x128xi32>
    %488 = arith.cmpi slt, %3, %487 : vector<1x64x128xi32>
    %c112_i32 = arith.constant 112 : i32
    %489 = tpu.dynamic_rotate %469 by %c112_i32 dim 2 : vector<1x64x128xf32>, i32 -> vector<1x64x128xf32>
    %cst_148 = arith.constant 0.000000e+00 : f32
    %490 = vector.broadcast %cst_148 : f32 to vector<1x64x128xf32>
    %491 = arith.select %488, %489, %490 : vector<1x64x128xi1>, vector<1x64x128xf32>
    %c50 = arith.constant 50 : index
    %492 = memref.load %arg1[%c50] : memref<156xf32, #tpu.memory_space<smem>>
    %493 = vector.broadcast %492 : f32 to vector<1x64x128xf32>
    %494 = arith.mulf %493, %491 : vector<1x64x128xf32>
    %495 = arith.addf %486, %494 : vector<1x64x128xf32>
    %c16_i32_149 = arith.constant 16 : i32
    %496 = vector.broadcast %c16_i32_149 : i32 to vector<1x64x128xi32>
    %497 = arith.cmpi sge, %3, %496 : vector<1x64x128xi32>
    %c16_i32_150 = arith.constant 16 : i32
    %498 = tpu.dynamic_rotate %464 by %c16_i32_150 dim 2 : vector<1x64x128xf32>, i32 -> vector<1x64x128xf32>
    %cst_151 = arith.constant 0.000000e+00 : f32
    %499 = vector.broadcast %cst_151 : f32 to vector<1x64x128xf32>
    %500 = arith.select %497, %498, %499 : vector<1x64x128xi1>, vector<1x64x128xf32>
    %c51 = arith.constant 51 : index
    %501 = memref.load %arg1[%c51] : memref<156xf32, #tpu.memory_space<smem>>
    %502 = vector.broadcast %501 : f32 to vector<1x64x128xf32>
    %503 = arith.mulf %502, %500 : vector<1x64x128xf32>
    %504 = arith.addf %495, %503 : vector<1x64x128xf32>
    %c52 = arith.constant 52 : index
    %505 = memref.load %arg1[%c52] : memref<156xf32, #tpu.memory_space<smem>>
    %506 = vector.broadcast %505 : f32 to vector<1x64x128xf32>
    %507 = arith.mulf %506, %464 : vector<1x64x128xf32>
    %508 = arith.addf %504, %507 : vector<1x64x128xf32>
    %c48_i32_152 = arith.constant 48 : i32
    %509 = vector.broadcast %c48_i32_152 : i32 to vector<1x64x128xi32>
    %510 = arith.cmpi slt, %3, %509 : vector<1x64x128xi32>
    %c112_i32_153 = arith.constant 112 : i32
    %511 = tpu.dynamic_rotate %464 by %c112_i32_153 dim 2 : vector<1x64x128xf32>, i32 -> vector<1x64x128xf32>
    %cst_154 = arith.constant 0.000000e+00 : f32
    %512 = vector.broadcast %cst_154 : f32 to vector<1x64x128xf32>
    %513 = arith.select %510, %511, %512 : vector<1x64x128xi1>, vector<1x64x128xf32>
    %c53 = arith.constant 53 : index
    %514 = memref.load %arg1[%c53] : memref<156xf32, #tpu.memory_space<smem>>
    %515 = vector.broadcast %514 : f32 to vector<1x64x128xf32>
    %516 = arith.mulf %515, %513 : vector<1x64x128xf32>
    %517 = arith.addf %508, %516 : vector<1x64x128xf32>
    %c16_i32_155 = arith.constant 16 : i32
    %518 = vector.broadcast %c16_i32_155 : i32 to vector<1x64x128xi32>
    %519 = arith.cmpi sge, %3, %518 : vector<1x64x128xi32>
    %c16_i32_156 = arith.constant 16 : i32
    %520 = tpu.dynamic_rotate %474 by %c16_i32_156 dim 2 : vector<1x64x128xf32>, i32 -> vector<1x64x128xf32>
    %cst_157 = arith.constant 0.000000e+00 : f32
    %521 = vector.broadcast %cst_157 : f32 to vector<1x64x128xf32>
    %522 = arith.select %519, %520, %521 : vector<1x64x128xi1>, vector<1x64x128xf32>
    %c54 = arith.constant 54 : index
    %523 = memref.load %arg1[%c54] : memref<156xf32, #tpu.memory_space<smem>>
    %524 = vector.broadcast %523 : f32 to vector<1x64x128xf32>
    %525 = arith.mulf %524, %522 : vector<1x64x128xf32>
    %526 = arith.addf %517, %525 : vector<1x64x128xf32>
    %c55 = arith.constant 55 : index
    %527 = memref.load %arg1[%c55] : memref<156xf32, #tpu.memory_space<smem>>
    %528 = vector.broadcast %527 : f32 to vector<1x64x128xf32>
    %529 = arith.mulf %528, %474 : vector<1x64x128xf32>
    %530 = arith.addf %526, %529 : vector<1x64x128xf32>
    %c48_i32_158 = arith.constant 48 : i32
    %531 = vector.broadcast %c48_i32_158 : i32 to vector<1x64x128xi32>
    %532 = arith.cmpi slt, %3, %531 : vector<1x64x128xi32>
    %c112_i32_159 = arith.constant 112 : i32
    %533 = tpu.dynamic_rotate %474 by %c112_i32_159 dim 2 : vector<1x64x128xf32>, i32 -> vector<1x64x128xf32>
    %cst_160 = arith.constant 0.000000e+00 : f32
    %534 = vector.broadcast %cst_160 : f32 to vector<1x64x128xf32>
    %535 = arith.select %532, %533, %534 : vector<1x64x128xi1>, vector<1x64x128xf32>
    %c56 = arith.constant 56 : index
    %536 = memref.load %arg1[%c56] : memref<156xf32, #tpu.memory_space<smem>>
    %537 = vector.broadcast %536 : f32 to vector<1x64x128xf32>
    %538 = arith.mulf %537, %535 : vector<1x64x128xf32>
    %539 = arith.addf %530, %538 : vector<1x64x128xf32>
    %540 = vector.shape_cast %539 : vector<1x64x128xf32> to vector<1x1x64x128xf32>
    %cst_161 = arith.constant dense<0.000000e+00> : vector<1xf32>
    %541 = vector.multi_reduction <add>, %540, %cst_161 [1, 2, 3] : vector<1x1x64x128xf32> to vector<1xf32>
    %542 = vector.shape_cast %541 : vector<1xf32> to vector<1x1x1x1xf32>
    %543 = vector.extract %542[0, 0, 0, 0] : f32 from vector<1x1x1x1xf32>
    %cst_162 = arith.constant 1.22070313E-4 : f32
    %544 = arith.mulf %543, %cst_162 : f32
    %545 = vector.broadcast %544 : f32 to vector<1x64x128xf32>
    %546 = arith.subf %539, %545 : vector<1x64x128xf32>
    %547 = arith.mulf %546, %546 : vector<1x64x128xf32>
    %548 = vector.shape_cast %547 : vector<1x64x128xf32> to vector<1x1x64x128xf32>
    %cst_163 = arith.constant dense<0.000000e+00> : vector<1xf32>
    %549 = vector.multi_reduction <add>, %548, %cst_163 [1, 2, 3] : vector<1x1x64x128xf32> to vector<1xf32>
    %550 = vector.shape_cast %549 : vector<1xf32> to vector<1x1x1x1xf32>
    %551 = vector.extract %550[0, 0, 0, 0] : f32 from vector<1x1x1x1xf32>
    %cst_164 = arith.constant 1.22070313E-4 : f32
    %552 = arith.mulf %551, %cst_164 : f32
    %c58 = arith.constant 58 : index
    %553 = memref.load %arg1[%c58] : memref<156xf32, #tpu.memory_space<smem>>
    %cst_165 = arith.constant 9.99999974E-6 : f32
    %554 = arith.addf %552, %cst_165 : f32
    %555 = math.rsqrt %554 : f32
    %556 = arith.mulf %553, %555 : f32
    %557 = vector.broadcast %556 : f32 to vector<1x64x128xf32>
    %558 = arith.mulf %546, %557 : vector<1x64x128xf32>
    %c59 = arith.constant 59 : index
    %559 = memref.load %arg1[%c59] : memref<156xf32, #tpu.memory_space<smem>>
    %560 = vector.broadcast %559 : f32 to vector<1x64x128xf32>
    %561 = arith.addf %558, %560 : vector<1x64x128xf32>
    %cst_166 = arith.constant 0.000000e+00 : f32
    %562 = vector.broadcast %cst_166 : f32 to vector<1x64x128xf32>
    %563 = arith.maximumf %561, %562 : vector<1x64x128xf32>
    %c31_i32 = arith.constant 31 : i32
    %564 = vector.broadcast %c31_i32 : i32 to vector<1x64x128xi32>
    %565 = arith.andi %3, %564 : vector<1x64x128xi32>
    %c16_i32_167 = arith.constant 16 : i32
    %566 = vector.broadcast %c16_i32_167 : i32 to vector<1x64x128xi32>
    %567 = arith.cmpi slt, %565, %566 : vector<1x64x128xi32>
    %c31_i32_168 = arith.constant 31 : i32
    %568 = vector.broadcast %c31_i32_168 : i32 to vector<1x64x128xi32>
    %569 = arith.andi %0, %568 : vector<1x64x128xi32>
    %c16_i32_169 = arith.constant 16 : i32
    %570 = vector.broadcast %c16_i32_169 : i32 to vector<1x64x128xi32>
    %571 = arith.cmpi slt, %569, %570 : vector<1x64x128xi32>
    %c112_i32_170 = arith.constant 112 : i32
    %572 = tpu.dynamic_rotate %563 by %c112_i32_170 dim 2 : vector<1x64x128xf32>, i32 -> vector<1x64x128xf32>
    %c16_i32_171 = arith.constant 16 : i32
    %573 = tpu.dynamic_rotate %563 by %c16_i32_171 dim 2 : vector<1x64x128xf32>, i32 -> vector<1x64x128xf32>
    %574 = arith.select %567, %572, %573 : vector<1x64x128xi1>, vector<1x64x128xf32>
    %575 = arith.maximumf %563, %574 : vector<1x64x128xf32>
    %c48_i32_172 = arith.constant 48 : i32
    %576 = tpu.dynamic_rotate %575 by %c48_i32_172 dim 1 : vector<1x64x128xf32>, i32 -> vector<1x64x128xf32>
    %c16_i32_173 = arith.constant 16 : i32
    %577 = tpu.dynamic_rotate %575 by %c16_i32_173 dim 1 : vector<1x64x128xf32>, i32 -> vector<1x64x128xf32>
    %578 = arith.select %571, %576, %577 : vector<1x64x128xi1>, vector<1x64x128xf32>
    %579 = arith.maximumf %575, %578 : vector<1x64x128xf32>
    %c32_i32 = arith.constant 32 : i32
    %580 = vector.broadcast %c32_i32 : i32 to vector<1x64x128xi32>
    %581 = arith.cmpi sge, %0, %580 : vector<1x64x128xi32>
    %c32_i32_174 = arith.constant 32 : i32
    %582 = tpu.dynamic_rotate %579 by %c32_i32_174 dim 1 : vector<1x64x128xf32>, i32 -> vector<1x64x128xf32>
    %cst_175 = arith.constant 0.000000e+00 : f32
    %583 = vector.broadcast %cst_175 : f32 to vector<1x64x128xf32>
    %584 = arith.select %581, %582, %583 : vector<1x64x128xi1>, vector<1x64x128xf32>
    %c32_i32_176 = arith.constant 32 : i32
    %585 = vector.broadcast %c32_i32_176 : i32 to vector<1x64x128xi32>
    %586 = arith.cmpi slt, %0, %585 : vector<1x64x128xi32>
    %c32_i32_177 = arith.constant 32 : i32
    %587 = tpu.dynamic_rotate %579 by %c32_i32_177 dim 1 : vector<1x64x128xf32>, i32 -> vector<1x64x128xf32>
    %cst_178 = arith.constant 0.000000e+00 : f32
    %588 = vector.broadcast %cst_178 : f32 to vector<1x64x128xf32>
    %589 = arith.select %586, %587, %588 : vector<1x64x128xi1>, vector<1x64x128xf32>
    %c32_i32_179 = arith.constant 32 : i32
    %590 = vector.broadcast %c32_i32_179 : i32 to vector<1x64x128xi32>
    %591 = arith.cmpi sge, %3, %590 : vector<1x64x128xi32>
    %c32_i32_180 = arith.constant 32 : i32
    %592 = tpu.dynamic_rotate %584 by %c32_i32_180 dim 2 : vector<1x64x128xf32>, i32 -> vector<1x64x128xf32>
    %cst_181 = arith.constant 0.000000e+00 : f32
    %593 = vector.broadcast %cst_181 : f32 to vector<1x64x128xf32>
    %594 = arith.select %591, %592, %593 : vector<1x64x128xi1>, vector<1x64x128xf32>
    %c60 = arith.constant 60 : index
    %595 = memref.load %arg1[%c60] : memref<156xf32, #tpu.memory_space<smem>>
    %596 = vector.broadcast %595 : f32 to vector<1x64x128xf32>
    %597 = arith.mulf %596, %594 : vector<1x64x128xf32>
    %c61 = arith.constant 61 : index
    %598 = memref.load %arg1[%c61] : memref<156xf32, #tpu.memory_space<smem>>
    %599 = vector.broadcast %598 : f32 to vector<1x64x128xf32>
    %600 = arith.mulf %599, %584 : vector<1x64x128xf32>
    %601 = arith.addf %597, %600 : vector<1x64x128xf32>
    %c32_i32_182 = arith.constant 32 : i32
    %602 = vector.broadcast %c32_i32_182 : i32 to vector<1x64x128xi32>
    %603 = arith.cmpi slt, %3, %602 : vector<1x64x128xi32>
    %c96_i32 = arith.constant 96 : i32
    %604 = tpu.dynamic_rotate %584 by %c96_i32 dim 2 : vector<1x64x128xf32>, i32 -> vector<1x64x128xf32>
    %cst_183 = arith.constant 0.000000e+00 : f32
    %605 = vector.broadcast %cst_183 : f32 to vector<1x64x128xf32>
    %606 = arith.select %603, %604, %605 : vector<1x64x128xi1>, vector<1x64x128xf32>
    %c62 = arith.constant 62 : index
    %607 = memref.load %arg1[%c62] : memref<156xf32, #tpu.memory_space<smem>>
    %608 = vector.broadcast %607 : f32 to vector<1x64x128xf32>
    %609 = arith.mulf %608, %606 : vector<1x64x128xf32>
    %610 = arith.addf %601, %609 : vector<1x64x128xf32>
    %c32_i32_184 = arith.constant 32 : i32
    %611 = vector.broadcast %c32_i32_184 : i32 to vector<1x64x128xi32>
    %612 = arith.cmpi sge, %3, %611 : vector<1x64x128xi32>
    %c32_i32_185 = arith.constant 32 : i32
    %613 = tpu.dynamic_rotate %579 by %c32_i32_185 dim 2 : vector<1x64x128xf32>, i32 -> vector<1x64x128xf32>
    %cst_186 = arith.constant 0.000000e+00 : f32
    %614 = vector.broadcast %cst_186 : f32 to vector<1x64x128xf32>
    %615 = arith.select %612, %613, %614 : vector<1x64x128xi1>, vector<1x64x128xf32>
    %c63 = arith.constant 63 : index
    %616 = memref.load %arg1[%c63] : memref<156xf32, #tpu.memory_space<smem>>
    %617 = vector.broadcast %616 : f32 to vector<1x64x128xf32>
    %618 = arith.mulf %617, %615 : vector<1x64x128xf32>
    %619 = arith.addf %610, %618 : vector<1x64x128xf32>
    %c64 = arith.constant 64 : index
    %620 = memref.load %arg1[%c64] : memref<156xf32, #tpu.memory_space<smem>>
    %621 = vector.broadcast %620 : f32 to vector<1x64x128xf32>
    %622 = arith.mulf %621, %579 : vector<1x64x128xf32>
    %623 = arith.addf %619, %622 : vector<1x64x128xf32>
    %c32_i32_187 = arith.constant 32 : i32
    %624 = vector.broadcast %c32_i32_187 : i32 to vector<1x64x128xi32>
    %625 = arith.cmpi slt, %3, %624 : vector<1x64x128xi32>
    %c96_i32_188 = arith.constant 96 : i32
    %626 = tpu.dynamic_rotate %579 by %c96_i32_188 dim 2 : vector<1x64x128xf32>, i32 -> vector<1x64x128xf32>
    %cst_189 = arith.constant 0.000000e+00 : f32
    %627 = vector.broadcast %cst_189 : f32 to vector<1x64x128xf32>
    %628 = arith.select %625, %626, %627 : vector<1x64x128xi1>, vector<1x64x128xf32>
    %c65 = arith.constant 65 : index
    %629 = memref.load %arg1[%c65] : memref<156xf32, #tpu.memory_space<smem>>
    %630 = vector.broadcast %629 : f32 to vector<1x64x128xf32>
    %631 = arith.mulf %630, %628 : vector<1x64x128xf32>
    %632 = arith.addf %623, %631 : vector<1x64x128xf32>
    %c32_i32_190 = arith.constant 32 : i32
    %633 = vector.broadcast %c32_i32_190 : i32 to vector<1x64x128xi32>
    %634 = arith.cmpi sge, %3, %633 : vector<1x64x128xi32>
    %c32_i32_191 = arith.constant 32 : i32
    %635 = tpu.dynamic_rotate %589 by %c32_i32_191 dim 2 : vector<1x64x128xf32>, i32 -> vector<1x64x128xf32>
    %cst_192 = arith.constant 0.000000e+00 : f32
    %636 = vector.broadcast %cst_192 : f32 to vector<1x64x128xf32>
    %637 = arith.select %634, %635, %636 : vector<1x64x128xi1>, vector<1x64x128xf32>
    %c66 = arith.constant 66 : index
    %638 = memref.load %arg1[%c66] : memref<156xf32, #tpu.memory_space<smem>>
    %639 = vector.broadcast %638 : f32 to vector<1x64x128xf32>
    %640 = arith.mulf %639, %637 : vector<1x64x128xf32>
    %641 = arith.addf %632, %640 : vector<1x64x128xf32>
    %c67 = arith.constant 67 : index
    %642 = memref.load %arg1[%c67] : memref<156xf32, #tpu.memory_space<smem>>
    %643 = vector.broadcast %642 : f32 to vector<1x64x128xf32>
    %644 = arith.mulf %643, %589 : vector<1x64x128xf32>
    %645 = arith.addf %641, %644 : vector<1x64x128xf32>
    %c32_i32_193 = arith.constant 32 : i32
    %646 = vector.broadcast %c32_i32_193 : i32 to vector<1x64x128xi32>
    %647 = arith.cmpi slt, %3, %646 : vector<1x64x128xi32>
    %c96_i32_194 = arith.constant 96 : i32
    %648 = tpu.dynamic_rotate %589 by %c96_i32_194 dim 2 : vector<1x64x128xf32>, i32 -> vector<1x64x128xf32>
    %cst_195 = arith.constant 0.000000e+00 : f32
    %649 = vector.broadcast %cst_195 : f32 to vector<1x64x128xf32>
    %650 = arith.select %647, %648, %649 : vector<1x64x128xi1>, vector<1x64x128xf32>
    %c68 = arith.constant 68 : index
    %651 = memref.load %arg1[%c68] : memref<156xf32, #tpu.memory_space<smem>>
    %652 = vector.broadcast %651 : f32 to vector<1x64x128xf32>
    %653 = arith.mulf %652, %650 : vector<1x64x128xf32>
    %654 = arith.addf %645, %653 : vector<1x64x128xf32>
    %655 = vector.shape_cast %654 : vector<1x64x128xf32> to vector<1x1x64x128xf32>
    %cst_196 = arith.constant dense<0.000000e+00> : vector<1xf32>
    %656 = vector.multi_reduction <add>, %655, %cst_196 [1, 2, 3] : vector<1x1x64x128xf32> to vector<1xf32>
    %657 = vector.shape_cast %656 : vector<1xf32> to vector<1x1x1x1xf32>
    %658 = vector.extract %657[0, 0, 0, 0] : f32 from vector<1x1x1x1xf32>
    %cst_197 = arith.constant 1.22070313E-4 : f32
    %659 = arith.mulf %658, %cst_197 : f32
    %660 = vector.broadcast %659 : f32 to vector<1x64x128xf32>
    %661 = arith.subf %654, %660 : vector<1x64x128xf32>
    %662 = arith.mulf %661, %661 : vector<1x64x128xf32>
    %663 = vector.shape_cast %662 : vector<1x64x128xf32> to vector<1x1x64x128xf32>
    %cst_198 = arith.constant dense<0.000000e+00> : vector<1xf32>
    %664 = vector.multi_reduction <add>, %663, %cst_198 [1, 2, 3] : vector<1x1x64x128xf32> to vector<1xf32>
    %665 = vector.shape_cast %664 : vector<1xf32> to vector<1x1x1x1xf32>
    %666 = vector.extract %665[0, 0, 0, 0] : f32 from vector<1x1x1x1xf32>
    %cst_199 = arith.constant 1.22070313E-4 : f32
    %667 = arith.mulf %666, %cst_199 : f32
    %c70 = arith.constant 70 : index
    %668 = memref.load %arg1[%c70] : memref<156xf32, #tpu.memory_space<smem>>
    %cst_200 = arith.constant 9.99999974E-6 : f32
    %669 = arith.addf %667, %cst_200 : f32
    %670 = math.rsqrt %669 : f32
    %671 = arith.mulf %668, %670 : f32
    %672 = vector.broadcast %671 : f32 to vector<1x64x128xf32>
    %673 = arith.mulf %661, %672 : vector<1x64x128xf32>
    %c71 = arith.constant 71 : index
    %674 = memref.load %arg1[%c71] : memref<156xf32, #tpu.memory_space<smem>>
    %675 = vector.broadcast %674 : f32 to vector<1x64x128xf32>
    %676 = arith.addf %673, %675 : vector<1x64x128xf32>
    %cst_201 = arith.constant 0.000000e+00 : f32
    %677 = vector.broadcast %cst_201 : f32 to vector<1x64x128xf32>
    %678 = arith.maximumf %676, %677 : vector<1x64x128xf32>
    %c32_i32_202 = arith.constant 32 : i32
    %679 = vector.broadcast %c32_i32_202 : i32 to vector<1x64x128xi32>
    %680 = arith.cmpi sge, %0, %679 : vector<1x64x128xi32>
    %c32_i32_203 = arith.constant 32 : i32
    %681 = tpu.dynamic_rotate %678 by %c32_i32_203 dim 1 : vector<1x64x128xf32>, i32 -> vector<1x64x128xf32>
    %cst_204 = arith.constant 0.000000e+00 : f32
    %682 = vector.broadcast %cst_204 : f32 to vector<1x64x128xf32>
    %683 = arith.select %680, %681, %682 : vector<1x64x128xi1>, vector<1x64x128xf32>
    %c32_i32_205 = arith.constant 32 : i32
    %684 = vector.broadcast %c32_i32_205 : i32 to vector<1x64x128xi32>
    %685 = arith.cmpi slt, %0, %684 : vector<1x64x128xi32>
    %c32_i32_206 = arith.constant 32 : i32
    %686 = tpu.dynamic_rotate %678 by %c32_i32_206 dim 1 : vector<1x64x128xf32>, i32 -> vector<1x64x128xf32>
    %cst_207 = arith.constant 0.000000e+00 : f32
    %687 = vector.broadcast %cst_207 : f32 to vector<1x64x128xf32>
    %688 = arith.select %685, %686, %687 : vector<1x64x128xi1>, vector<1x64x128xf32>
    %c32_i32_208 = arith.constant 32 : i32
    %689 = vector.broadcast %c32_i32_208 : i32 to vector<1x64x128xi32>
    %690 = arith.cmpi sge, %3, %689 : vector<1x64x128xi32>
    %c32_i32_209 = arith.constant 32 : i32
    %691 = tpu.dynamic_rotate %683 by %c32_i32_209 dim 2 : vector<1x64x128xf32>, i32 -> vector<1x64x128xf32>
    %cst_210 = arith.constant 0.000000e+00 : f32
    %692 = vector.broadcast %cst_210 : f32 to vector<1x64x128xf32>
    %693 = arith.select %690, %691, %692 : vector<1x64x128xi1>, vector<1x64x128xf32>
    %c72 = arith.constant 72 : index
    %694 = memref.load %arg1[%c72] : memref<156xf32, #tpu.memory_space<smem>>
    %695 = vector.broadcast %694 : f32 to vector<1x64x128xf32>
    %696 = arith.mulf %695, %693 : vector<1x64x128xf32>
    %c73 = arith.constant 73 : index
    %697 = memref.load %arg1[%c73] : memref<156xf32, #tpu.memory_space<smem>>
    %698 = vector.broadcast %697 : f32 to vector<1x64x128xf32>
    %699 = arith.mulf %698, %683 : vector<1x64x128xf32>
    %700 = arith.addf %696, %699 : vector<1x64x128xf32>
    %c32_i32_211 = arith.constant 32 : i32
    %701 = vector.broadcast %c32_i32_211 : i32 to vector<1x64x128xi32>
    %702 = arith.cmpi slt, %3, %701 : vector<1x64x128xi32>
    %c96_i32_212 = arith.constant 96 : i32
    %703 = tpu.dynamic_rotate %683 by %c96_i32_212 dim 2 : vector<1x64x128xf32>, i32 -> vector<1x64x128xf32>
    %cst_213 = arith.constant 0.000000e+00 : f32
    %704 = vector.broadcast %cst_213 : f32 to vector<1x64x128xf32>
    %705 = arith.select %702, %703, %704 : vector<1x64x128xi1>, vector<1x64x128xf32>
    %c74 = arith.constant 74 : index
    %706 = memref.load %arg1[%c74] : memref<156xf32, #tpu.memory_space<smem>>
    %707 = vector.broadcast %706 : f32 to vector<1x64x128xf32>
    %708 = arith.mulf %707, %705 : vector<1x64x128xf32>
    %709 = arith.addf %700, %708 : vector<1x64x128xf32>
    %c32_i32_214 = arith.constant 32 : i32
    %710 = vector.broadcast %c32_i32_214 : i32 to vector<1x64x128xi32>
    %711 = arith.cmpi sge, %3, %710 : vector<1x64x128xi32>
    %c32_i32_215 = arith.constant 32 : i32
    %712 = tpu.dynamic_rotate %678 by %c32_i32_215 dim 2 : vector<1x64x128xf32>, i32 -> vector<1x64x128xf32>
    %cst_216 = arith.constant 0.000000e+00 : f32
    %713 = vector.broadcast %cst_216 : f32 to vector<1x64x128xf32>
    %714 = arith.select %711, %712, %713 : vector<1x64x128xi1>, vector<1x64x128xf32>
    %c75 = arith.constant 75 : index
    %715 = memref.load %arg1[%c75] : memref<156xf32, #tpu.memory_space<smem>>
    %716 = vector.broadcast %715 : f32 to vector<1x64x128xf32>
    %717 = arith.mulf %716, %714 : vector<1x64x128xf32>
    %718 = arith.addf %709, %717 : vector<1x64x128xf32>
    %c76 = arith.constant 76 : index
    %719 = memref.load %arg1[%c76] : memref<156xf32, #tpu.memory_space<smem>>
    %720 = vector.broadcast %719 : f32 to vector<1x64x128xf32>
    %721 = arith.mulf %720, %678 : vector<1x64x128xf32>
    %722 = arith.addf %718, %721 : vector<1x64x128xf32>
    %c32_i32_217 = arith.constant 32 : i32
    %723 = vector.broadcast %c32_i32_217 : i32 to vector<1x64x128xi32>
    %724 = arith.cmpi slt, %3, %723 : vector<1x64x128xi32>
    %c96_i32_218 = arith.constant 96 : i32
    %725 = tpu.dynamic_rotate %678 by %c96_i32_218 dim 2 : vector<1x64x128xf32>, i32 -> vector<1x64x128xf32>
    %cst_219 = arith.constant 0.000000e+00 : f32
    %726 = vector.broadcast %cst_219 : f32 to vector<1x64x128xf32>
    %727 = arith.select %724, %725, %726 : vector<1x64x128xi1>, vector<1x64x128xf32>
    %c77 = arith.constant 77 : index
    %728 = memref.load %arg1[%c77] : memref<156xf32, #tpu.memory_space<smem>>
    %729 = vector.broadcast %728 : f32 to vector<1x64x128xf32>
    %730 = arith.mulf %729, %727 : vector<1x64x128xf32>
    %731 = arith.addf %722, %730 : vector<1x64x128xf32>
    %c32_i32_220 = arith.constant 32 : i32
    %732 = vector.broadcast %c32_i32_220 : i32 to vector<1x64x128xi32>
    %733 = arith.cmpi sge, %3, %732 : vector<1x64x128xi32>
    %c32_i32_221 = arith.constant 32 : i32
    %734 = tpu.dynamic_rotate %688 by %c32_i32_221 dim 2 : vector<1x64x128xf32>, i32 -> vector<1x64x128xf32>
    %cst_222 = arith.constant 0.000000e+00 : f32
    %735 = vector.broadcast %cst_222 : f32 to vector<1x64x128xf32>
    %736 = arith.select %733, %734, %735 : vector<1x64x128xi1>, vector<1x64x128xf32>
    %c78 = arith.constant 78 : index
    %737 = memref.load %arg1[%c78] : memref<156xf32, #tpu.memory_space<smem>>
    %738 = vector.broadcast %737 : f32 to vector<1x64x128xf32>
    %739 = arith.mulf %738, %736 : vector<1x64x128xf32>
    %740 = arith.addf %731, %739 : vector<1x64x128xf32>
    %c79 = arith.constant 79 : index
    %741 = memref.load %arg1[%c79] : memref<156xf32, #tpu.memory_space<smem>>
    %742 = vector.broadcast %741 : f32 to vector<1x64x128xf32>
    %743 = arith.mulf %742, %688 : vector<1x64x128xf32>
    %744 = arith.addf %740, %743 : vector<1x64x128xf32>
    %c32_i32_223 = arith.constant 32 : i32
    %745 = vector.broadcast %c32_i32_223 : i32 to vector<1x64x128xi32>
    %746 = arith.cmpi slt, %3, %745 : vector<1x64x128xi32>
    %c96_i32_224 = arith.constant 96 : i32
    %747 = tpu.dynamic_rotate %688 by %c96_i32_224 dim 2 : vector<1x64x128xf32>, i32 -> vector<1x64x128xf32>
    %cst_225 = arith.constant 0.000000e+00 : f32
    %748 = vector.broadcast %cst_225 : f32 to vector<1x64x128xf32>
    %749 = arith.select %746, %747, %748 : vector<1x64x128xi1>, vector<1x64x128xf32>
    %c80 = arith.constant 80 : index
    %750 = memref.load %arg1[%c80] : memref<156xf32, #tpu.memory_space<smem>>
    %751 = vector.broadcast %750 : f32 to vector<1x64x128xf32>
    %752 = arith.mulf %751, %749 : vector<1x64x128xf32>
    %753 = arith.addf %744, %752 : vector<1x64x128xf32>
    %754 = vector.shape_cast %753 : vector<1x64x128xf32> to vector<1x1x64x128xf32>
    %cst_226 = arith.constant dense<0.000000e+00> : vector<1xf32>
    %755 = vector.multi_reduction <add>, %754, %cst_226 [1, 2, 3] : vector<1x1x64x128xf32> to vector<1xf32>
    %756 = vector.shape_cast %755 : vector<1xf32> to vector<1x1x1x1xf32>
    %757 = vector.extract %756[0, 0, 0, 0] : f32 from vector<1x1x1x1xf32>
    %cst_227 = arith.constant 1.22070313E-4 : f32
    %758 = arith.mulf %757, %cst_227 : f32
    %759 = vector.broadcast %758 : f32 to vector<1x64x128xf32>
    %760 = arith.subf %753, %759 : vector<1x64x128xf32>
    %761 = arith.mulf %760, %760 : vector<1x64x128xf32>
    %762 = vector.shape_cast %761 : vector<1x64x128xf32> to vector<1x1x64x128xf32>
    %cst_228 = arith.constant dense<0.000000e+00> : vector<1xf32>
    %763 = vector.multi_reduction <add>, %762, %cst_228 [1, 2, 3] : vector<1x1x64x128xf32> to vector<1xf32>
    %764 = vector.shape_cast %763 : vector<1xf32> to vector<1x1x1x1xf32>
    %765 = vector.extract %764[0, 0, 0, 0] : f32 from vector<1x1x1x1xf32>
    %cst_229 = arith.constant 1.22070313E-4 : f32
    %766 = arith.mulf %765, %cst_229 : f32
    %c82 = arith.constant 82 : index
    %767 = memref.load %arg1[%c82] : memref<156xf32, #tpu.memory_space<smem>>
    %cst_230 = arith.constant 9.99999974E-6 : f32
    %768 = arith.addf %766, %cst_230 : f32
    %769 = math.rsqrt %768 : f32
    %770 = arith.mulf %767, %769 : f32
    %771 = vector.broadcast %770 : f32 to vector<1x64x128xf32>
    %772 = arith.mulf %760, %771 : vector<1x64x128xf32>
    %c83 = arith.constant 83 : index
    %773 = memref.load %arg1[%c83] : memref<156xf32, #tpu.memory_space<smem>>
    %774 = vector.broadcast %773 : f32 to vector<1x64x128xf32>
    %775 = arith.addf %772, %774 : vector<1x64x128xf32>
    %cst_231 = arith.constant 0.000000e+00 : f32
    %776 = vector.broadcast %cst_231 : f32 to vector<1x64x128xf32>
    %777 = arith.maximumf %775, %776 : vector<1x64x128xf32>
    %c16_i32_232 = arith.constant 16 : i32
    %778 = vector.broadcast %c16_i32_232 : i32 to vector<1x64x128xi32>
    %779 = arith.cmpi sge, %0, %778 : vector<1x64x128xi32>
    %c16_i32_233 = arith.constant 16 : i32
    %780 = tpu.dynamic_rotate %777 by %c16_i32_233 dim 1 : vector<1x64x128xf32>, i32 -> vector<1x64x128xf32>
    %cst_234 = arith.constant 0.000000e+00 : f32
    %781 = vector.broadcast %cst_234 : f32 to vector<1x64x128xf32>
    %782 = arith.select %779, %780, %781 : vector<1x64x128xi1>, vector<1x64x128xf32>
    %c48_i32_235 = arith.constant 48 : i32
    %783 = vector.broadcast %c48_i32_235 : i32 to vector<1x64x128xi32>
    %784 = arith.cmpi slt, %0, %783 : vector<1x64x128xi32>
    %c48_i32_236 = arith.constant 48 : i32
    %785 = tpu.dynamic_rotate %777 by %c48_i32_236 dim 1 : vector<1x64x128xf32>, i32 -> vector<1x64x128xf32>
    %cst_237 = arith.constant 0.000000e+00 : f32
    %786 = vector.broadcast %cst_237 : f32 to vector<1x64x128xf32>
    %787 = arith.select %784, %785, %786 : vector<1x64x128xi1>, vector<1x64x128xf32>
    %c16_i32_238 = arith.constant 16 : i32
    %788 = vector.broadcast %c16_i32_238 : i32 to vector<1x64x128xi32>
    %789 = arith.cmpi sge, %3, %788 : vector<1x64x128xi32>
    %c16_i32_239 = arith.constant 16 : i32
    %790 = tpu.dynamic_rotate %782 by %c16_i32_239 dim 2 : vector<1x64x128xf32>, i32 -> vector<1x64x128xf32>
    %cst_240 = arith.constant 0.000000e+00 : f32
    %791 = vector.broadcast %cst_240 : f32 to vector<1x64x128xf32>
    %792 = arith.select %789, %790, %791 : vector<1x64x128xi1>, vector<1x64x128xf32>
    %c84 = arith.constant 84 : index
    %793 = memref.load %arg1[%c84] : memref<156xf32, #tpu.memory_space<smem>>
    %794 = vector.broadcast %793 : f32 to vector<1x64x128xf32>
    %795 = arith.mulf %794, %792 : vector<1x64x128xf32>
    %c85 = arith.constant 85 : index
    %796 = memref.load %arg1[%c85] : memref<156xf32, #tpu.memory_space<smem>>
    %797 = vector.broadcast %796 : f32 to vector<1x64x128xf32>
    %798 = arith.mulf %797, %782 : vector<1x64x128xf32>
    %799 = arith.addf %795, %798 : vector<1x64x128xf32>
    %c48_i32_241 = arith.constant 48 : i32
    %800 = vector.broadcast %c48_i32_241 : i32 to vector<1x64x128xi32>
    %801 = arith.cmpi slt, %3, %800 : vector<1x64x128xi32>
    %c112_i32_242 = arith.constant 112 : i32
    %802 = tpu.dynamic_rotate %782 by %c112_i32_242 dim 2 : vector<1x64x128xf32>, i32 -> vector<1x64x128xf32>
    %cst_243 = arith.constant 0.000000e+00 : f32
    %803 = vector.broadcast %cst_243 : f32 to vector<1x64x128xf32>
    %804 = arith.select %801, %802, %803 : vector<1x64x128xi1>, vector<1x64x128xf32>
    %c86 = arith.constant 86 : index
    %805 = memref.load %arg1[%c86] : memref<156xf32, #tpu.memory_space<smem>>
    %806 = vector.broadcast %805 : f32 to vector<1x64x128xf32>
    %807 = arith.mulf %806, %804 : vector<1x64x128xf32>
    %808 = arith.addf %799, %807 : vector<1x64x128xf32>
    %c16_i32_244 = arith.constant 16 : i32
    %809 = vector.broadcast %c16_i32_244 : i32 to vector<1x64x128xi32>
    %810 = arith.cmpi sge, %3, %809 : vector<1x64x128xi32>
    %c16_i32_245 = arith.constant 16 : i32
    %811 = tpu.dynamic_rotate %777 by %c16_i32_245 dim 2 : vector<1x64x128xf32>, i32 -> vector<1x64x128xf32>
    %cst_246 = arith.constant 0.000000e+00 : f32
    %812 = vector.broadcast %cst_246 : f32 to vector<1x64x128xf32>
    %813 = arith.select %810, %811, %812 : vector<1x64x128xi1>, vector<1x64x128xf32>
    %c87 = arith.constant 87 : index
    %814 = memref.load %arg1[%c87] : memref<156xf32, #tpu.memory_space<smem>>
    %815 = vector.broadcast %814 : f32 to vector<1x64x128xf32>
    %816 = arith.mulf %815, %813 : vector<1x64x128xf32>
    %817 = arith.addf %808, %816 : vector<1x64x128xf32>
    %c88 = arith.constant 88 : index
    %818 = memref.load %arg1[%c88] : memref<156xf32, #tpu.memory_space<smem>>
    %819 = vector.broadcast %818 : f32 to vector<1x64x128xf32>
    %820 = arith.mulf %819, %777 : vector<1x64x128xf32>
    %821 = arith.addf %817, %820 : vector<1x64x128xf32>
    %c48_i32_247 = arith.constant 48 : i32
    %822 = vector.broadcast %c48_i32_247 : i32 to vector<1x64x128xi32>
    %823 = arith.cmpi slt, %3, %822 : vector<1x64x128xi32>
    %c112_i32_248 = arith.constant 112 : i32
    %824 = tpu.dynamic_rotate %777 by %c112_i32_248 dim 2 : vector<1x64x128xf32>, i32 -> vector<1x64x128xf32>
    %cst_249 = arith.constant 0.000000e+00 : f32
    %825 = vector.broadcast %cst_249 : f32 to vector<1x64x128xf32>
    %826 = arith.select %823, %824, %825 : vector<1x64x128xi1>, vector<1x64x128xf32>
    %c89 = arith.constant 89 : index
    %827 = memref.load %arg1[%c89] : memref<156xf32, #tpu.memory_space<smem>>
    %828 = vector.broadcast %827 : f32 to vector<1x64x128xf32>
    %829 = arith.mulf %828, %826 : vector<1x64x128xf32>
    %830 = arith.addf %821, %829 : vector<1x64x128xf32>
    %c16_i32_250 = arith.constant 16 : i32
    %831 = vector.broadcast %c16_i32_250 : i32 to vector<1x64x128xi32>
    %832 = arith.cmpi sge, %3, %831 : vector<1x64x128xi32>
    %c16_i32_251 = arith.constant 16 : i32
    %833 = tpu.dynamic_rotate %787 by %c16_i32_251 dim 2 : vector<1x64x128xf32>, i32 -> vector<1x64x128xf32>
    %cst_252 = arith.constant 0.000000e+00 : f32
    %834 = vector.broadcast %cst_252 : f32 to vector<1x64x128xf32>
    %835 = arith.select %832, %833, %834 : vector<1x64x128xi1>, vector<1x64x128xf32>
    %c90 = arith.constant 90 : index
    %836 = memref.load %arg1[%c90] : memref<156xf32, #tpu.memory_space<smem>>
    %837 = vector.broadcast %836 : f32 to vector<1x64x128xf32>
    %838 = arith.mulf %837, %835 : vector<1x64x128xf32>
    %839 = arith.addf %830, %838 : vector<1x64x128xf32>
    %c91 = arith.constant 91 : index
    %840 = memref.load %arg1[%c91] : memref<156xf32, #tpu.memory_space<smem>>
    %841 = vector.broadcast %840 : f32 to vector<1x64x128xf32>
    %842 = arith.mulf %841, %787 : vector<1x64x128xf32>
    %843 = arith.addf %839, %842 : vector<1x64x128xf32>
    %c48_i32_253 = arith.constant 48 : i32
    %844 = vector.broadcast %c48_i32_253 : i32 to vector<1x64x128xi32>
    %845 = arith.cmpi slt, %3, %844 : vector<1x64x128xi32>
    %c112_i32_254 = arith.constant 112 : i32
    %846 = tpu.dynamic_rotate %787 by %c112_i32_254 dim 2 : vector<1x64x128xf32>, i32 -> vector<1x64x128xf32>
    %cst_255 = arith.constant 0.000000e+00 : f32
    %847 = vector.broadcast %cst_255 : f32 to vector<1x64x128xf32>
    %848 = arith.select %845, %846, %847 : vector<1x64x128xi1>, vector<1x64x128xf32>
    %c92 = arith.constant 92 : index
    %849 = memref.load %arg1[%c92] : memref<156xf32, #tpu.memory_space<smem>>
    %850 = vector.broadcast %849 : f32 to vector<1x64x128xf32>
    %851 = arith.mulf %850, %848 : vector<1x64x128xf32>
    %852 = arith.addf %843, %851 : vector<1x64x128xf32>
    %853 = vector.shape_cast %852 : vector<1x64x128xf32> to vector<1x1x64x128xf32>
    %cst_256 = arith.constant dense<0.000000e+00> : vector<1xf32>
    %854 = vector.multi_reduction <add>, %853, %cst_256 [1, 2, 3] : vector<1x1x64x128xf32> to vector<1xf32>
    %855 = vector.shape_cast %854 : vector<1xf32> to vector<1x1x1x1xf32>
    %856 = vector.extract %855[0, 0, 0, 0] : f32 from vector<1x1x1x1xf32>
    %cst_257 = arith.constant 1.22070313E-4 : f32
    %857 = arith.mulf %856, %cst_257 : f32
    %858 = vector.broadcast %857 : f32 to vector<1x64x128xf32>
    %859 = arith.subf %852, %858 : vector<1x64x128xf32>
    %860 = arith.mulf %859, %859 : vector<1x64x128xf32>
    %861 = vector.shape_cast %860 : vector<1x64x128xf32> to vector<1x1x64x128xf32>
    %cst_258 = arith.constant dense<0.000000e+00> : vector<1xf32>
    %862 = vector.multi_reduction <add>, %861, %cst_258 [1, 2, 3] : vector<1x1x64x128xf32> to vector<1xf32>
    %863 = vector.shape_cast %862 : vector<1xf32> to vector<1x1x1x1xf32>
    %864 = vector.extract %863[0, 0, 0, 0] : f32 from vector<1x1x1x1xf32>
    %cst_259 = arith.constant 1.22070313E-4 : f32
    %865 = arith.mulf %864, %cst_259 : f32
    %c94 = arith.constant 94 : index
    %866 = memref.load %arg1[%c94] : memref<156xf32, #tpu.memory_space<smem>>
    %cst_260 = arith.constant 9.99999974E-6 : f32
    %867 = arith.addf %865, %cst_260 : f32
    %868 = math.rsqrt %867 : f32
    %869 = arith.mulf %866, %868 : f32
    %870 = vector.broadcast %869 : f32 to vector<1x64x128xf32>
    %871 = arith.mulf %859, %870 : vector<1x64x128xf32>
    %c95 = arith.constant 95 : index
    %872 = memref.load %arg1[%c95] : memref<156xf32, #tpu.memory_space<smem>>
    %873 = vector.broadcast %872 : f32 to vector<1x64x128xf32>
    %874 = arith.addf %871, %873 : vector<1x64x128xf32>
    %cst_261 = arith.constant 0.000000e+00 : f32
    %875 = vector.broadcast %cst_261 : f32 to vector<1x64x128xf32>
    %876 = arith.maximumf %874, %875 : vector<1x64x128xf32>
    %c8_i32_262 = arith.constant 8 : i32
    %877 = vector.broadcast %c8_i32_262 : i32 to vector<1x64x128xi32>
    %878 = arith.cmpi sge, %0, %877 : vector<1x64x128xi32>
    %c8_i32_263 = arith.constant 8 : i32
    %879 = tpu.dynamic_rotate %876 by %c8_i32_263 dim 1 : vector<1x64x128xf32>, i32 -> vector<1x64x128xf32>
    %cst_264 = arith.constant 0.000000e+00 : f32
    %880 = vector.broadcast %cst_264 : f32 to vector<1x64x128xf32>
    %881 = arith.select %878, %879, %880 : vector<1x64x128xi1>, vector<1x64x128xf32>
    %c56_i32_265 = arith.constant 56 : i32
    %882 = vector.broadcast %c56_i32_265 : i32 to vector<1x64x128xi32>
    %883 = arith.cmpi slt, %0, %882 : vector<1x64x128xi32>
    %c56_i32_266 = arith.constant 56 : i32
    %884 = tpu.dynamic_rotate %876 by %c56_i32_266 dim 1 : vector<1x64x128xf32>, i32 -> vector<1x64x128xf32>
    %cst_267 = arith.constant 0.000000e+00 : f32
    %885 = vector.broadcast %cst_267 : f32 to vector<1x64x128xf32>
    %886 = arith.select %883, %884, %885 : vector<1x64x128xi1>, vector<1x64x128xf32>
    %c8_i32_268 = arith.constant 8 : i32
    %887 = vector.broadcast %c8_i32_268 : i32 to vector<1x64x128xi32>
    %888 = arith.cmpi sge, %3, %887 : vector<1x64x128xi32>
    %c8_i32_269 = arith.constant 8 : i32
    %889 = tpu.dynamic_rotate %881 by %c8_i32_269 dim 2 : vector<1x64x128xf32>, i32 -> vector<1x64x128xf32>
    %cst_270 = arith.constant 0.000000e+00 : f32
    %890 = vector.broadcast %cst_270 : f32 to vector<1x64x128xf32>
    %891 = arith.select %888, %889, %890 : vector<1x64x128xi1>, vector<1x64x128xf32>
    %c96 = arith.constant 96 : index
    %892 = memref.load %arg1[%c96] : memref<156xf32, #tpu.memory_space<smem>>
    %893 = vector.broadcast %892 : f32 to vector<1x64x128xf32>
    %894 = arith.mulf %893, %891 : vector<1x64x128xf32>
    %c97 = arith.constant 97 : index
    %895 = memref.load %arg1[%c97] : memref<156xf32, #tpu.memory_space<smem>>
    %896 = vector.broadcast %895 : f32 to vector<1x64x128xf32>
    %897 = arith.mulf %896, %881 : vector<1x64x128xf32>
    %898 = arith.addf %894, %897 : vector<1x64x128xf32>
    %c56_i32_271 = arith.constant 56 : i32
    %899 = vector.broadcast %c56_i32_271 : i32 to vector<1x64x128xi32>
    %900 = arith.cmpi slt, %3, %899 : vector<1x64x128xi32>
    %c120_i32_272 = arith.constant 120 : i32
    %901 = tpu.dynamic_rotate %881 by %c120_i32_272 dim 2 : vector<1x64x128xf32>, i32 -> vector<1x64x128xf32>
    %cst_273 = arith.constant 0.000000e+00 : f32
    %902 = vector.broadcast %cst_273 : f32 to vector<1x64x128xf32>
    %903 = arith.select %900, %901, %902 : vector<1x64x128xi1>, vector<1x64x128xf32>
    %c98 = arith.constant 98 : index
    %904 = memref.load %arg1[%c98] : memref<156xf32, #tpu.memory_space<smem>>
    %905 = vector.broadcast %904 : f32 to vector<1x64x128xf32>
    %906 = arith.mulf %905, %903 : vector<1x64x128xf32>
    %907 = arith.addf %898, %906 : vector<1x64x128xf32>
    %c8_i32_274 = arith.constant 8 : i32
    %908 = vector.broadcast %c8_i32_274 : i32 to vector<1x64x128xi32>
    %909 = arith.cmpi sge, %3, %908 : vector<1x64x128xi32>
    %c8_i32_275 = arith.constant 8 : i32
    %910 = tpu.dynamic_rotate %876 by %c8_i32_275 dim 2 : vector<1x64x128xf32>, i32 -> vector<1x64x128xf32>
    %cst_276 = arith.constant 0.000000e+00 : f32
    %911 = vector.broadcast %cst_276 : f32 to vector<1x64x128xf32>
    %912 = arith.select %909, %910, %911 : vector<1x64x128xi1>, vector<1x64x128xf32>
    %c99 = arith.constant 99 : index
    %913 = memref.load %arg1[%c99] : memref<156xf32, #tpu.memory_space<smem>>
    %914 = vector.broadcast %913 : f32 to vector<1x64x128xf32>
    %915 = arith.mulf %914, %912 : vector<1x64x128xf32>
    %916 = arith.addf %907, %915 : vector<1x64x128xf32>
    %c100 = arith.constant 100 : index
    %917 = memref.load %arg1[%c100] : memref<156xf32, #tpu.memory_space<smem>>
    %918 = vector.broadcast %917 : f32 to vector<1x64x128xf32>
    %919 = arith.mulf %918, %876 : vector<1x64x128xf32>
    %920 = arith.addf %916, %919 : vector<1x64x128xf32>
    %c56_i32_277 = arith.constant 56 : i32
    %921 = vector.broadcast %c56_i32_277 : i32 to vector<1x64x128xi32>
    %922 = arith.cmpi slt, %3, %921 : vector<1x64x128xi32>
    %c120_i32_278 = arith.constant 120 : i32
    %923 = tpu.dynamic_rotate %876 by %c120_i32_278 dim 2 : vector<1x64x128xf32>, i32 -> vector<1x64x128xf32>
    %cst_279 = arith.constant 0.000000e+00 : f32
    %924 = vector.broadcast %cst_279 : f32 to vector<1x64x128xf32>
    %925 = arith.select %922, %923, %924 : vector<1x64x128xi1>, vector<1x64x128xf32>
    %c101 = arith.constant 101 : index
    %926 = memref.load %arg1[%c101] : memref<156xf32, #tpu.memory_space<smem>>
    %927 = vector.broadcast %926 : f32 to vector<1x64x128xf32>
    %928 = arith.mulf %927, %925 : vector<1x64x128xf32>
    %929 = arith.addf %920, %928 : vector<1x64x128xf32>
    %c8_i32_280 = arith.constant 8 : i32
    %930 = vector.broadcast %c8_i32_280 : i32 to vector<1x64x128xi32>
    %931 = arith.cmpi sge, %3, %930 : vector<1x64x128xi32>
    %c8_i32_281 = arith.constant 8 : i32
    %932 = tpu.dynamic_rotate %886 by %c8_i32_281 dim 2 : vector<1x64x128xf32>, i32 -> vector<1x64x128xf32>
    %cst_282 = arith.constant 0.000000e+00 : f32
    %933 = vector.broadcast %cst_282 : f32 to vector<1x64x128xf32>
    %934 = arith.select %931, %932, %933 : vector<1x64x128xi1>, vector<1x64x128xf32>
    %c102 = arith.constant 102 : index
    %935 = memref.load %arg1[%c102] : memref<156xf32, #tpu.memory_space<smem>>
    %936 = vector.broadcast %935 : f32 to vector<1x64x128xf32>
    %937 = arith.mulf %936, %934 : vector<1x64x128xf32>
    %938 = arith.addf %929, %937 : vector<1x64x128xf32>
    %c103 = arith.constant 103 : index
    %939 = memref.load %arg1[%c103] : memref<156xf32, #tpu.memory_space<smem>>
    %940 = vector.broadcast %939 : f32 to vector<1x64x128xf32>
    %941 = arith.mulf %940, %886 : vector<1x64x128xf32>
    %942 = arith.addf %938, %941 : vector<1x64x128xf32>
    %c56_i32_283 = arith.constant 56 : i32
    %943 = vector.broadcast %c56_i32_283 : i32 to vector<1x64x128xi32>
    %944 = arith.cmpi slt, %3, %943 : vector<1x64x128xi32>
    %c120_i32_284 = arith.constant 120 : i32
    %945 = tpu.dynamic_rotate %886 by %c120_i32_284 dim 2 : vector<1x64x128xf32>, i32 -> vector<1x64x128xf32>
    %cst_285 = arith.constant 0.000000e+00 : f32
    %946 = vector.broadcast %cst_285 : f32 to vector<1x64x128xf32>
    %947 = arith.select %944, %945, %946 : vector<1x64x128xi1>, vector<1x64x128xf32>
    %c104 = arith.constant 104 : index
    %948 = memref.load %arg1[%c104] : memref<156xf32, #tpu.memory_space<smem>>
    %949 = vector.broadcast %948 : f32 to vector<1x64x128xf32>
    %950 = arith.mulf %949, %947 : vector<1x64x128xf32>
    %951 = arith.addf %942, %950 : vector<1x64x128xf32>
    %952 = vector.shape_cast %951 : vector<1x64x128xf32> to vector<1x1x64x128xf32>
    %cst_286 = arith.constant dense<0.000000e+00> : vector<1xf32>
    %953 = vector.multi_reduction <add>, %952, %cst_286 [1, 2, 3] : vector<1x1x64x128xf32> to vector<1xf32>
    %954 = vector.shape_cast %953 : vector<1xf32> to vector<1x1x1x1xf32>
    %955 = vector.extract %954[0, 0, 0, 0] : f32 from vector<1x1x1x1xf32>
    %cst_287 = arith.constant 1.22070313E-4 : f32
    %956 = arith.mulf %955, %cst_287 : f32
    %957 = vector.broadcast %956 : f32 to vector<1x64x128xf32>
    %958 = arith.subf %951, %957 : vector<1x64x128xf32>
    %959 = arith.mulf %958, %958 : vector<1x64x128xf32>
    %960 = vector.shape_cast %959 : vector<1x64x128xf32> to vector<1x1x64x128xf32>
    %cst_288 = arith.constant dense<0.000000e+00> : vector<1xf32>
    %961 = vector.multi_reduction <add>, %960, %cst_288 [1, 2, 3] : vector<1x1x64x128xf32> to vector<1xf32>
    %962 = vector.shape_cast %961 : vector<1xf32> to vector<1x1x1x1xf32>
    %963 = vector.extract %962[0, 0, 0, 0] : f32 from vector<1x1x1x1xf32>
    %cst_289 = arith.constant 1.22070313E-4 : f32
    %964 = arith.mulf %963, %cst_289 : f32
    %c106 = arith.constant 106 : index
    %965 = memref.load %arg1[%c106] : memref<156xf32, #tpu.memory_space<smem>>
    %cst_290 = arith.constant 9.99999974E-6 : f32
    %966 = arith.addf %964, %cst_290 : f32
    %967 = math.rsqrt %966 : f32
    %968 = arith.mulf %965, %967 : f32
    %969 = vector.broadcast %968 : f32 to vector<1x64x128xf32>
    %970 = arith.mulf %958, %969 : vector<1x64x128xf32>
    %c107 = arith.constant 107 : index
    %971 = memref.load %arg1[%c107] : memref<156xf32, #tpu.memory_space<smem>>
    %972 = vector.broadcast %971 : f32 to vector<1x64x128xf32>
    %973 = arith.addf %970, %972 : vector<1x64x128xf32>
    %cst_291 = arith.constant 0.000000e+00 : f32
    %974 = vector.broadcast %cst_291 : f32 to vector<1x64x128xf32>
    %975 = arith.maximumf %973, %974 : vector<1x64x128xf32>
    %c4_i32_292 = arith.constant 4 : i32
    %976 = vector.broadcast %c4_i32_292 : i32 to vector<1x64x128xi32>
    %977 = arith.cmpi sge, %0, %976 : vector<1x64x128xi32>
    %c4_i32_293 = arith.constant 4 : i32
    %978 = tpu.dynamic_rotate %975 by %c4_i32_293 dim 1 : vector<1x64x128xf32>, i32 -> vector<1x64x128xf32>
    %cst_294 = arith.constant 0.000000e+00 : f32
    %979 = vector.broadcast %cst_294 : f32 to vector<1x64x128xf32>
    %980 = arith.select %977, %978, %979 : vector<1x64x128xi1>, vector<1x64x128xf32>
    %c60_i32_295 = arith.constant 60 : i32
    %981 = vector.broadcast %c60_i32_295 : i32 to vector<1x64x128xi32>
    %982 = arith.cmpi slt, %0, %981 : vector<1x64x128xi32>
    %c60_i32_296 = arith.constant 60 : i32
    %983 = tpu.dynamic_rotate %975 by %c60_i32_296 dim 1 : vector<1x64x128xf32>, i32 -> vector<1x64x128xf32>
    %cst_297 = arith.constant 0.000000e+00 : f32
    %984 = vector.broadcast %cst_297 : f32 to vector<1x64x128xf32>
    %985 = arith.select %982, %983, %984 : vector<1x64x128xi1>, vector<1x64x128xf32>
    %c4_i32_298 = arith.constant 4 : i32
    %986 = vector.broadcast %c4_i32_298 : i32 to vector<1x64x128xi32>
    %987 = arith.cmpi sge, %3, %986 : vector<1x64x128xi32>
    %c4_i32_299 = arith.constant 4 : i32
    %988 = tpu.dynamic_rotate %980 by %c4_i32_299 dim 2 : vector<1x64x128xf32>, i32 -> vector<1x64x128xf32>
    %cst_300 = arith.constant 0.000000e+00 : f32
    %989 = vector.broadcast %cst_300 : f32 to vector<1x64x128xf32>
    %990 = arith.select %987, %988, %989 : vector<1x64x128xi1>, vector<1x64x128xf32>
    %c108 = arith.constant 108 : index
    %991 = memref.load %arg1[%c108] : memref<156xf32, #tpu.memory_space<smem>>
    %992 = vector.broadcast %991 : f32 to vector<1x64x128xf32>
    %993 = arith.mulf %992, %990 : vector<1x64x128xf32>
    %c109 = arith.constant 109 : index
    %994 = memref.load %arg1[%c109] : memref<156xf32, #tpu.memory_space<smem>>
    %995 = vector.broadcast %994 : f32 to vector<1x64x128xf32>
    %996 = arith.mulf %995, %980 : vector<1x64x128xf32>
    %997 = arith.addf %993, %996 : vector<1x64x128xf32>
    %c60_i32_301 = arith.constant 60 : i32
    %998 = vector.broadcast %c60_i32_301 : i32 to vector<1x64x128xi32>
    %999 = arith.cmpi slt, %3, %998 : vector<1x64x128xi32>
    %c124_i32_302 = arith.constant 124 : i32
    %1000 = tpu.dynamic_rotate %980 by %c124_i32_302 dim 2 : vector<1x64x128xf32>, i32 -> vector<1x64x128xf32>
    %cst_303 = arith.constant 0.000000e+00 : f32
    %1001 = vector.broadcast %cst_303 : f32 to vector<1x64x128xf32>
    %1002 = arith.select %999, %1000, %1001 : vector<1x64x128xi1>, vector<1x64x128xf32>
    %c110 = arith.constant 110 : index
    %1003 = memref.load %arg1[%c110] : memref<156xf32, #tpu.memory_space<smem>>
    %1004 = vector.broadcast %1003 : f32 to vector<1x64x128xf32>
    %1005 = arith.mulf %1004, %1002 : vector<1x64x128xf32>
    %1006 = arith.addf %997, %1005 : vector<1x64x128xf32>
    %c4_i32_304 = arith.constant 4 : i32
    %1007 = vector.broadcast %c4_i32_304 : i32 to vector<1x64x128xi32>
    %1008 = arith.cmpi sge, %3, %1007 : vector<1x64x128xi32>
    %c4_i32_305 = arith.constant 4 : i32
    %1009 = tpu.dynamic_rotate %975 by %c4_i32_305 dim 2 : vector<1x64x128xf32>, i32 -> vector<1x64x128xf32>
    %cst_306 = arith.constant 0.000000e+00 : f32
    %1010 = vector.broadcast %cst_306 : f32 to vector<1x64x128xf32>
    %1011 = arith.select %1008, %1009, %1010 : vector<1x64x128xi1>, vector<1x64x128xf32>
    %c111 = arith.constant 111 : index
    %1012 = memref.load %arg1[%c111] : memref<156xf32, #tpu.memory_space<smem>>
    %1013 = vector.broadcast %1012 : f32 to vector<1x64x128xf32>
    %1014 = arith.mulf %1013, %1011 : vector<1x64x128xf32>
    %1015 = arith.addf %1006, %1014 : vector<1x64x128xf32>
    %c112 = arith.constant 112 : index
    %1016 = memref.load %arg1[%c112] : memref<156xf32, #tpu.memory_space<smem>>
    %1017 = vector.broadcast %1016 : f32 to vector<1x64x128xf32>
    %1018 = arith.mulf %1017, %975 : vector<1x64x128xf32>
    %1019 = arith.addf %1015, %1018 : vector<1x64x128xf32>
    %c60_i32_307 = arith.constant 60 : i32
    %1020 = vector.broadcast %c60_i32_307 : i32 to vector<1x64x128xi32>
    %1021 = arith.cmpi slt, %3, %1020 : vector<1x64x128xi32>
    %c124_i32_308 = arith.constant 124 : i32
    %1022 = tpu.dynamic_rotate %975 by %c124_i32_308 dim 2 : vector<1x64x128xf32>, i32 -> vector<1x64x128xf32>
    %cst_309 = arith.constant 0.000000e+00 : f32
    %1023 = vector.broadcast %cst_309 : f32 to vector<1x64x128xf32>
    %1024 = arith.select %1021, %1022, %1023 : vector<1x64x128xi1>, vector<1x64x128xf32>
    %c113 = arith.constant 113 : index
    %1025 = memref.load %arg1[%c113] : memref<156xf32, #tpu.memory_space<smem>>
    %1026 = vector.broadcast %1025 : f32 to vector<1x64x128xf32>
    %1027 = arith.mulf %1026, %1024 : vector<1x64x128xf32>
    %1028 = arith.addf %1019, %1027 : vector<1x64x128xf32>
    %c4_i32_310 = arith.constant 4 : i32
    %1029 = vector.broadcast %c4_i32_310 : i32 to vector<1x64x128xi32>
    %1030 = arith.cmpi sge, %3, %1029 : vector<1x64x128xi32>
    %c4_i32_311 = arith.constant 4 : i32
    %1031 = tpu.dynamic_rotate %985 by %c4_i32_311 dim 2 : vector<1x64x128xf32>, i32 -> vector<1x64x128xf32>
    %cst_312 = arith.constant 0.000000e+00 : f32
    %1032 = vector.broadcast %cst_312 : f32 to vector<1x64x128xf32>
    %1033 = arith.select %1030, %1031, %1032 : vector<1x64x128xi1>, vector<1x64x128xf32>
    %c114 = arith.constant 114 : index
    %1034 = memref.load %arg1[%c114] : memref<156xf32, #tpu.memory_space<smem>>
    %1035 = vector.broadcast %1034 : f32 to vector<1x64x128xf32>
    %1036 = arith.mulf %1035, %1033 : vector<1x64x128xf32>
    %1037 = arith.addf %1028, %1036 : vector<1x64x128xf32>
    %c115 = arith.constant 115 : index
    %1038 = memref.load %arg1[%c115] : memref<156xf32, #tpu.memory_space<smem>>
    %1039 = vector.broadcast %1038 : f32 to vector<1x64x128xf32>
    %1040 = arith.mulf %1039, %985 : vector<1x64x128xf32>
    %1041 = arith.addf %1037, %1040 : vector<1x64x128xf32>
    %c60_i32_313 = arith.constant 60 : i32
    %1042 = vector.broadcast %c60_i32_313 : i32 to vector<1x64x128xi32>
    %1043 = arith.cmpi slt, %3, %1042 : vector<1x64x128xi32>
    %c124_i32_314 = arith.constant 124 : i32
    %1044 = tpu.dynamic_rotate %985 by %c124_i32_314 dim 2 : vector<1x64x128xf32>, i32 -> vector<1x64x128xf32>
    %cst_315 = arith.constant 0.000000e+00 : f32
    %1045 = vector.broadcast %cst_315 : f32 to vector<1x64x128xf32>
    %1046 = arith.select %1043, %1044, %1045 : vector<1x64x128xi1>, vector<1x64x128xf32>
    %c116 = arith.constant 116 : index
    %1047 = memref.load %arg1[%c116] : memref<156xf32, #tpu.memory_space<smem>>
    %1048 = vector.broadcast %1047 : f32 to vector<1x64x128xf32>
    %1049 = arith.mulf %1048, %1046 : vector<1x64x128xf32>
    %1050 = arith.addf %1041, %1049 : vector<1x64x128xf32>
    %1051 = vector.shape_cast %1050 : vector<1x64x128xf32> to vector<1x1x64x128xf32>
    %cst_316 = arith.constant dense<0.000000e+00> : vector<1xf32>
    %1052 = vector.multi_reduction <add>, %1051, %cst_316 [1, 2, 3] : vector<1x1x64x128xf32> to vector<1xf32>
    %1053 = vector.shape_cast %1052 : vector<1xf32> to vector<1x1x1x1xf32>
    %1054 = vector.extract %1053[0, 0, 0, 0] : f32 from vector<1x1x1x1xf32>
    %cst_317 = arith.constant 1.22070313E-4 : f32
    %1055 = arith.mulf %1054, %cst_317 : f32
    %1056 = vector.broadcast %1055 : f32 to vector<1x64x128xf32>
    %1057 = arith.subf %1050, %1056 : vector<1x64x128xf32>
    %1058 = arith.mulf %1057, %1057 : vector<1x64x128xf32>
    %1059 = vector.shape_cast %1058 : vector<1x64x128xf32> to vector<1x1x64x128xf32>
    %cst_318 = arith.constant dense<0.000000e+00> : vector<1xf32>
    %1060 = vector.multi_reduction <add>, %1059, %cst_318 [1, 2, 3] : vector<1x1x64x128xf32> to vector<1xf32>
    %1061 = vector.shape_cast %1060 : vector<1xf32> to vector<1x1x1x1xf32>
    %1062 = vector.extract %1061[0, 0, 0, 0] : f32 from vector<1x1x1x1xf32>
    %cst_319 = arith.constant 1.22070313E-4 : f32
    %1063 = arith.mulf %1062, %cst_319 : f32
    %c118 = arith.constant 118 : index
    %1064 = memref.load %arg1[%c118] : memref<156xf32, #tpu.memory_space<smem>>
    %cst_320 = arith.constant 9.99999974E-6 : f32
    %1065 = arith.addf %1063, %cst_320 : f32
    %1066 = math.rsqrt %1065 : f32
    %1067 = arith.mulf %1064, %1066 : f32
    %1068 = vector.broadcast %1067 : f32 to vector<1x64x128xf32>
    %1069 = arith.mulf %1057, %1068 : vector<1x64x128xf32>
    %c119 = arith.constant 119 : index
    %1070 = memref.load %arg1[%c119] : memref<156xf32, #tpu.memory_space<smem>>
    %1071 = vector.broadcast %1070 : f32 to vector<1x64x128xf32>
    %1072 = arith.addf %1069, %1071 : vector<1x64x128xf32>
    %cst_321 = arith.constant 0.000000e+00 : f32
    %1073 = vector.broadcast %cst_321 : f32 to vector<1x64x128xf32>
    %1074 = arith.maximumf %1072, %1073 : vector<1x64x128xf32>
    %c2_i32_322 = arith.constant 2 : i32
    %1075 = vector.broadcast %c2_i32_322 : i32 to vector<1x64x128xi32>
    %1076 = arith.cmpi sge, %0, %1075 : vector<1x64x128xi32>
    %c2_i32_323 = arith.constant 2 : i32
    %1077 = tpu.dynamic_rotate %1074 by %c2_i32_323 dim 1 : vector<1x64x128xf32>, i32 -> vector<1x64x128xf32>
    %cst_324 = arith.constant 0.000000e+00 : f32
    %1078 = vector.broadcast %cst_324 : f32 to vector<1x64x128xf32>
    %1079 = arith.select %1076, %1077, %1078 : vector<1x64x128xi1>, vector<1x64x128xf32>
    %c62_i32_325 = arith.constant 62 : i32
    %1080 = vector.broadcast %c62_i32_325 : i32 to vector<1x64x128xi32>
    %1081 = arith.cmpi slt, %0, %1080 : vector<1x64x128xi32>
    %c62_i32_326 = arith.constant 62 : i32
    %1082 = tpu.dynamic_rotate %1074 by %c62_i32_326 dim 1 : vector<1x64x128xf32>, i32 -> vector<1x64x128xf32>
    %cst_327 = arith.constant 0.000000e+00 : f32
    %1083 = vector.broadcast %cst_327 : f32 to vector<1x64x128xf32>
    %1084 = arith.select %1081, %1082, %1083 : vector<1x64x128xi1>, vector<1x64x128xf32>
    %c2_i32_328 = arith.constant 2 : i32
    %1085 = vector.broadcast %c2_i32_328 : i32 to vector<1x64x128xi32>
    %1086 = arith.cmpi sge, %3, %1085 : vector<1x64x128xi32>
    %c2_i32_329 = arith.constant 2 : i32
    %1087 = tpu.dynamic_rotate %1079 by %c2_i32_329 dim 2 : vector<1x64x128xf32>, i32 -> vector<1x64x128xf32>
    %cst_330 = arith.constant 0.000000e+00 : f32
    %1088 = vector.broadcast %cst_330 : f32 to vector<1x64x128xf32>
    %1089 = arith.select %1086, %1087, %1088 : vector<1x64x128xi1>, vector<1x64x128xf32>
    %c120 = arith.constant 120 : index
    %1090 = memref.load %arg1[%c120] : memref<156xf32, #tpu.memory_space<smem>>
    %1091 = vector.broadcast %1090 : f32 to vector<1x64x128xf32>
    %1092 = arith.mulf %1091, %1089 : vector<1x64x128xf32>
    %c121 = arith.constant 121 : index
    %1093 = memref.load %arg1[%c121] : memref<156xf32, #tpu.memory_space<smem>>
    %1094 = vector.broadcast %1093 : f32 to vector<1x64x128xf32>
    %1095 = arith.mulf %1094, %1079 : vector<1x64x128xf32>
    %1096 = arith.addf %1092, %1095 : vector<1x64x128xf32>
    %c62_i32_331 = arith.constant 62 : i32
    %1097 = vector.broadcast %c62_i32_331 : i32 to vector<1x64x128xi32>
    %1098 = arith.cmpi slt, %3, %1097 : vector<1x64x128xi32>
    %c126_i32_332 = arith.constant 126 : i32
    %1099 = tpu.dynamic_rotate %1079 by %c126_i32_332 dim 2 : vector<1x64x128xf32>, i32 -> vector<1x64x128xf32>
    %cst_333 = arith.constant 0.000000e+00 : f32
    %1100 = vector.broadcast %cst_333 : f32 to vector<1x64x128xf32>
    %1101 = arith.select %1098, %1099, %1100 : vector<1x64x128xi1>, vector<1x64x128xf32>
    %c122 = arith.constant 122 : index
    %1102 = memref.load %arg1[%c122] : memref<156xf32, #tpu.memory_space<smem>>
    %1103 = vector.broadcast %1102 : f32 to vector<1x64x128xf32>
    %1104 = arith.mulf %1103, %1101 : vector<1x64x128xf32>
    %1105 = arith.addf %1096, %1104 : vector<1x64x128xf32>
    %c2_i32_334 = arith.constant 2 : i32
    %1106 = vector.broadcast %c2_i32_334 : i32 to vector<1x64x128xi32>
    %1107 = arith.cmpi sge, %3, %1106 : vector<1x64x128xi32>
    %c2_i32_335 = arith.constant 2 : i32
    %1108 = tpu.dynamic_rotate %1074 by %c2_i32_335 dim 2 : vector<1x64x128xf32>, i32 -> vector<1x64x128xf32>
    %cst_336 = arith.constant 0.000000e+00 : f32
    %1109 = vector.broadcast %cst_336 : f32 to vector<1x64x128xf32>
    %1110 = arith.select %1107, %1108, %1109 : vector<1x64x128xi1>, vector<1x64x128xf32>
    %c123 = arith.constant 123 : index
    %1111 = memref.load %arg1[%c123] : memref<156xf32, #tpu.memory_space<smem>>
    %1112 = vector.broadcast %1111 : f32 to vector<1x64x128xf32>
    %1113 = arith.mulf %1112, %1110 : vector<1x64x128xf32>
    %1114 = arith.addf %1105, %1113 : vector<1x64x128xf32>
    %c124 = arith.constant 124 : index
    %1115 = memref.load %arg1[%c124] : memref<156xf32, #tpu.memory_space<smem>>
    %1116 = vector.broadcast %1115 : f32 to vector<1x64x128xf32>
    %1117 = arith.mulf %1116, %1074 : vector<1x64x128xf32>
    %1118 = arith.addf %1114, %1117 : vector<1x64x128xf32>
    %c62_i32_337 = arith.constant 62 : i32
    %1119 = vector.broadcast %c62_i32_337 : i32 to vector<1x64x128xi32>
    %1120 = arith.cmpi slt, %3, %1119 : vector<1x64x128xi32>
    %c126_i32_338 = arith.constant 126 : i32
    %1121 = tpu.dynamic_rotate %1074 by %c126_i32_338 dim 2 : vector<1x64x128xf32>, i32 -> vector<1x64x128xf32>
    %cst_339 = arith.constant 0.000000e+00 : f32
    %1122 = vector.broadcast %cst_339 : f32 to vector<1x64x128xf32>
    %1123 = arith.select %1120, %1121, %1122 : vector<1x64x128xi1>, vector<1x64x128xf32>
    %c125 = arith.constant 125 : index
    %1124 = memref.load %arg1[%c125] : memref<156xf32, #tpu.memory_space<smem>>
    %1125 = vector.broadcast %1124 : f32 to vector<1x64x128xf32>
    %1126 = arith.mulf %1125, %1123 : vector<1x64x128xf32>
    %1127 = arith.addf %1118, %1126 : vector<1x64x128xf32>
    %c2_i32_340 = arith.constant 2 : i32
    %1128 = vector.broadcast %c2_i32_340 : i32 to vector<1x64x128xi32>
    %1129 = arith.cmpi sge, %3, %1128 : vector<1x64x128xi32>
    %c2_i32_341 = arith.constant 2 : i32
    %1130 = tpu.dynamic_rotate %1084 by %c2_i32_341 dim 2 : vector<1x64x128xf32>, i32 -> vector<1x64x128xf32>
    %cst_342 = arith.constant 0.000000e+00 : f32
    %1131 = vector.broadcast %cst_342 : f32 to vector<1x64x128xf32>
    %1132 = arith.select %1129, %1130, %1131 : vector<1x64x128xi1>, vector<1x64x128xf32>
    %c126 = arith.constant 126 : index
    %1133 = memref.load %arg1[%c126] : memref<156xf32, #tpu.memory_space<smem>>
    %1134 = vector.broadcast %1133 : f32 to vector<1x64x128xf32>
    %1135 = arith.mulf %1134, %1132 : vector<1x64x128xf32>
    %1136 = arith.addf %1127, %1135 : vector<1x64x128xf32>
    %c127 = arith.constant 127 : index
    %1137 = memref.load %arg1[%c127] : memref<156xf32, #tpu.memory_space<smem>>
    %1138 = vector.broadcast %1137 : f32 to vector<1x64x128xf32>
    %1139 = arith.mulf %1138, %1084 : vector<1x64x128xf32>
    %1140 = arith.addf %1136, %1139 : vector<1x64x128xf32>
    %c62_i32_343 = arith.constant 62 : i32
    %1141 = vector.broadcast %c62_i32_343 : i32 to vector<1x64x128xi32>
    %1142 = arith.cmpi slt, %3, %1141 : vector<1x64x128xi32>
    %c126_i32_344 = arith.constant 126 : i32
    %1143 = tpu.dynamic_rotate %1084 by %c126_i32_344 dim 2 : vector<1x64x128xf32>, i32 -> vector<1x64x128xf32>
    %cst_345 = arith.constant 0.000000e+00 : f32
    %1144 = vector.broadcast %cst_345 : f32 to vector<1x64x128xf32>
    %1145 = arith.select %1142, %1143, %1144 : vector<1x64x128xi1>, vector<1x64x128xf32>
    %c128 = arith.constant 128 : index
    %1146 = memref.load %arg1[%c128] : memref<156xf32, #tpu.memory_space<smem>>
    %1147 = vector.broadcast %1146 : f32 to vector<1x64x128xf32>
    %1148 = arith.mulf %1147, %1145 : vector<1x64x128xf32>
    %1149 = arith.addf %1140, %1148 : vector<1x64x128xf32>
    %1150 = vector.shape_cast %1149 : vector<1x64x128xf32> to vector<1x1x64x128xf32>
    %cst_346 = arith.constant dense<0.000000e+00> : vector<1xf32>
    %1151 = vector.multi_reduction <add>, %1150, %cst_346 [1, 2, 3] : vector<1x1x64x128xf32> to vector<1xf32>
    %1152 = vector.shape_cast %1151 : vector<1xf32> to vector<1x1x1x1xf32>
    %1153 = vector.extract %1152[0, 0, 0, 0] : f32 from vector<1x1x1x1xf32>
    %cst_347 = arith.constant 1.22070313E-4 : f32
    %1154 = arith.mulf %1153, %cst_347 : f32
    %1155 = vector.broadcast %1154 : f32 to vector<1x64x128xf32>
    %1156 = arith.subf %1149, %1155 : vector<1x64x128xf32>
    %1157 = arith.mulf %1156, %1156 : vector<1x64x128xf32>
    %1158 = vector.shape_cast %1157 : vector<1x64x128xf32> to vector<1x1x64x128xf32>
    %cst_348 = arith.constant dense<0.000000e+00> : vector<1xf32>
    %1159 = vector.multi_reduction <add>, %1158, %cst_348 [1, 2, 3] : vector<1x1x64x128xf32> to vector<1xf32>
    %1160 = vector.shape_cast %1159 : vector<1xf32> to vector<1x1x1x1xf32>
    %1161 = vector.extract %1160[0, 0, 0, 0] : f32 from vector<1x1x1x1xf32>
    %cst_349 = arith.constant 1.22070313E-4 : f32
    %1162 = arith.mulf %1161, %cst_349 : f32
    %c130 = arith.constant 130 : index
    %1163 = memref.load %arg1[%c130] : memref<156xf32, #tpu.memory_space<smem>>
    %cst_350 = arith.constant 9.99999974E-6 : f32
    %1164 = arith.addf %1162, %cst_350 : f32
    %1165 = math.rsqrt %1164 : f32
    %1166 = arith.mulf %1163, %1165 : f32
    %1167 = vector.broadcast %1166 : f32 to vector<1x64x128xf32>
    %1168 = arith.mulf %1156, %1167 : vector<1x64x128xf32>
    %c131 = arith.constant 131 : index
    %1169 = memref.load %arg1[%c131] : memref<156xf32, #tpu.memory_space<smem>>
    %1170 = vector.broadcast %1169 : f32 to vector<1x64x128xf32>
    %1171 = arith.addf %1168, %1170 : vector<1x64x128xf32>
    %cst_351 = arith.constant 0.000000e+00 : f32
    %1172 = vector.broadcast %cst_351 : f32 to vector<1x64x128xf32>
    %1173 = arith.maximumf %1171, %1172 : vector<1x64x128xf32>
    %c1_i32_352 = arith.constant 1 : i32
    %1174 = vector.broadcast %c1_i32_352 : i32 to vector<1x64x128xi32>
    %1175 = arith.cmpi sge, %0, %1174 : vector<1x64x128xi32>
    %c1_i32_353 = arith.constant 1 : i32
    %1176 = tpu.dynamic_rotate %1173 by %c1_i32_353 dim 1 : vector<1x64x128xf32>, i32 -> vector<1x64x128xf32>
    %cst_354 = arith.constant 0.000000e+00 : f32
    %1177 = vector.broadcast %cst_354 : f32 to vector<1x64x128xf32>
    %1178 = arith.select %1175, %1176, %1177 : vector<1x64x128xi1>, vector<1x64x128xf32>
    %c63_i32_355 = arith.constant 63 : i32
    %1179 = vector.broadcast %c63_i32_355 : i32 to vector<1x64x128xi32>
    %1180 = arith.cmpi slt, %0, %1179 : vector<1x64x128xi32>
    %c63_i32_356 = arith.constant 63 : i32
    %1181 = tpu.dynamic_rotate %1173 by %c63_i32_356 dim 1 : vector<1x64x128xf32>, i32 -> vector<1x64x128xf32>
    %cst_357 = arith.constant 0.000000e+00 : f32
    %1182 = vector.broadcast %cst_357 : f32 to vector<1x64x128xf32>
    %1183 = arith.select %1180, %1181, %1182 : vector<1x64x128xi1>, vector<1x64x128xf32>
    %c1_i32_358 = arith.constant 1 : i32
    %1184 = vector.broadcast %c1_i32_358 : i32 to vector<1x64x128xi32>
    %1185 = arith.cmpi sge, %3, %1184 : vector<1x64x128xi32>
    %c1_i32_359 = arith.constant 1 : i32
    %1186 = tpu.dynamic_rotate %1178 by %c1_i32_359 dim 2 : vector<1x64x128xf32>, i32 -> vector<1x64x128xf32>
    %cst_360 = arith.constant 0.000000e+00 : f32
    %1187 = vector.broadcast %cst_360 : f32 to vector<1x64x128xf32>
    %1188 = arith.select %1185, %1186, %1187 : vector<1x64x128xi1>, vector<1x64x128xf32>
    %c132 = arith.constant 132 : index
    %1189 = memref.load %arg1[%c132] : memref<156xf32, #tpu.memory_space<smem>>
    %1190 = vector.broadcast %1189 : f32 to vector<1x64x128xf32>
    %1191 = arith.mulf %1190, %1188 : vector<1x64x128xf32>
    %c133 = arith.constant 133 : index
    %1192 = memref.load %arg1[%c133] : memref<156xf32, #tpu.memory_space<smem>>
    %1193 = vector.broadcast %1192 : f32 to vector<1x64x128xf32>
    %1194 = arith.mulf %1193, %1178 : vector<1x64x128xf32>
    %1195 = arith.addf %1191, %1194 : vector<1x64x128xf32>
    %c63_i32_361 = arith.constant 63 : i32
    %1196 = vector.broadcast %c63_i32_361 : i32 to vector<1x64x128xi32>
    %1197 = arith.cmpi slt, %3, %1196 : vector<1x64x128xi32>
    %c127_i32_362 = arith.constant 127 : i32
    %1198 = tpu.dynamic_rotate %1178 by %c127_i32_362 dim 2 : vector<1x64x128xf32>, i32 -> vector<1x64x128xf32>
    %cst_363 = arith.constant 0.000000e+00 : f32
    %1199 = vector.broadcast %cst_363 : f32 to vector<1x64x128xf32>
    %1200 = arith.select %1197, %1198, %1199 : vector<1x64x128xi1>, vector<1x64x128xf32>
    %c134 = arith.constant 134 : index
    %1201 = memref.load %arg1[%c134] : memref<156xf32, #tpu.memory_space<smem>>
    %1202 = vector.broadcast %1201 : f32 to vector<1x64x128xf32>
    %1203 = arith.mulf %1202, %1200 : vector<1x64x128xf32>
    %1204 = arith.addf %1195, %1203 : vector<1x64x128xf32>
    %c1_i32_364 = arith.constant 1 : i32
    %1205 = vector.broadcast %c1_i32_364 : i32 to vector<1x64x128xi32>
    %1206 = arith.cmpi sge, %3, %1205 : vector<1x64x128xi32>
    %c1_i32_365 = arith.constant 1 : i32
    %1207 = tpu.dynamic_rotate %1173 by %c1_i32_365 dim 2 : vector<1x64x128xf32>, i32 -> vector<1x64x128xf32>
    %cst_366 = arith.constant 0.000000e+00 : f32
    %1208 = vector.broadcast %cst_366 : f32 to vector<1x64x128xf32>
    %1209 = arith.select %1206, %1207, %1208 : vector<1x64x128xi1>, vector<1x64x128xf32>
    %c135 = arith.constant 135 : index
    %1210 = memref.load %arg1[%c135] : memref<156xf32, #tpu.memory_space<smem>>
    %1211 = vector.broadcast %1210 : f32 to vector<1x64x128xf32>
    %1212 = arith.mulf %1211, %1209 : vector<1x64x128xf32>
    %1213 = arith.addf %1204, %1212 : vector<1x64x128xf32>
    %c136 = arith.constant 136 : index
    %1214 = memref.load %arg1[%c136] : memref<156xf32, #tpu.memory_space<smem>>
    %1215 = vector.broadcast %1214 : f32 to vector<1x64x128xf32>
    %1216 = arith.mulf %1215, %1173 : vector<1x64x128xf32>
    %1217 = arith.addf %1213, %1216 : vector<1x64x128xf32>
    %c63_i32_367 = arith.constant 63 : i32
    %1218 = vector.broadcast %c63_i32_367 : i32 to vector<1x64x128xi32>
    %1219 = arith.cmpi slt, %3, %1218 : vector<1x64x128xi32>
    %c127_i32_368 = arith.constant 127 : i32
    %1220 = tpu.dynamic_rotate %1173 by %c127_i32_368 dim 2 : vector<1x64x128xf32>, i32 -> vector<1x64x128xf32>
    %cst_369 = arith.constant 0.000000e+00 : f32
    %1221 = vector.broadcast %cst_369 : f32 to vector<1x64x128xf32>
    %1222 = arith.select %1219, %1220, %1221 : vector<1x64x128xi1>, vector<1x64x128xf32>
    %c137 = arith.constant 137 : index
    %1223 = memref.load %arg1[%c137] : memref<156xf32, #tpu.memory_space<smem>>
    %1224 = vector.broadcast %1223 : f32 to vector<1x64x128xf32>
    %1225 = arith.mulf %1224, %1222 : vector<1x64x128xf32>
    %1226 = arith.addf %1217, %1225 : vector<1x64x128xf32>
    %c1_i32_370 = arith.constant 1 : i32
    %1227 = vector.broadcast %c1_i32_370 : i32 to vector<1x64x128xi32>
    %1228 = arith.cmpi sge, %3, %1227 : vector<1x64x128xi32>
    %c1_i32_371 = arith.constant 1 : i32
    %1229 = tpu.dynamic_rotate %1183 by %c1_i32_371 dim 2 : vector<1x64x128xf32>, i32 -> vector<1x64x128xf32>
    %cst_372 = arith.constant 0.000000e+00 : f32
    %1230 = vector.broadcast %cst_372 : f32 to vector<1x64x128xf32>
    %1231 = arith.select %1228, %1229, %1230 : vector<1x64x128xi1>, vector<1x64x128xf32>
    %c138 = arith.constant 138 : index
    %1232 = memref.load %arg1[%c138] : memref<156xf32, #tpu.memory_space<smem>>
    %1233 = vector.broadcast %1232 : f32 to vector<1x64x128xf32>
    %1234 = arith.mulf %1233, %1231 : vector<1x64x128xf32>
    %1235 = arith.addf %1226, %1234 : vector<1x64x128xf32>
    %c139 = arith.constant 139 : index
    %1236 = memref.load %arg1[%c139] : memref<156xf32, #tpu.memory_space<smem>>
    %1237 = vector.broadcast %1236 : f32 to vector<1x64x128xf32>
    %1238 = arith.mulf %1237, %1183 : vector<1x64x128xf32>
    %1239 = arith.addf %1235, %1238 : vector<1x64x128xf32>
    %c63_i32_373 = arith.constant 63 : i32
    %1240 = vector.broadcast %c63_i32_373 : i32 to vector<1x64x128xi32>
    %1241 = arith.cmpi slt, %3, %1240 : vector<1x64x128xi32>
    %c127_i32_374 = arith.constant 127 : i32
    %1242 = tpu.dynamic_rotate %1183 by %c127_i32_374 dim 2 : vector<1x64x128xf32>, i32 -> vector<1x64x128xf32>
    %cst_375 = arith.constant 0.000000e+00 : f32
    %1243 = vector.broadcast %cst_375 : f32 to vector<1x64x128xf32>
    %1244 = arith.select %1241, %1242, %1243 : vector<1x64x128xi1>, vector<1x64x128xf32>
    %c140 = arith.constant 140 : index
    %1245 = memref.load %arg1[%c140] : memref<156xf32, #tpu.memory_space<smem>>
    %1246 = vector.broadcast %1245 : f32 to vector<1x64x128xf32>
    %1247 = arith.mulf %1246, %1244 : vector<1x64x128xf32>
    %1248 = arith.addf %1239, %1247 : vector<1x64x128xf32>
    %1249 = vector.shape_cast %1248 : vector<1x64x128xf32> to vector<1x1x64x128xf32>
    %cst_376 = arith.constant dense<0.000000e+00> : vector<1xf32>
    %1250 = vector.multi_reduction <add>, %1249, %cst_376 [1, 2, 3] : vector<1x1x64x128xf32> to vector<1xf32>
    %1251 = vector.shape_cast %1250 : vector<1xf32> to vector<1x1x1x1xf32>
    %1252 = vector.extract %1251[0, 0, 0, 0] : f32 from vector<1x1x1x1xf32>
    %cst_377 = arith.constant 1.22070313E-4 : f32
    %1253 = arith.mulf %1252, %cst_377 : f32
    %1254 = vector.broadcast %1253 : f32 to vector<1x64x128xf32>
    %1255 = arith.subf %1248, %1254 : vector<1x64x128xf32>
    %1256 = arith.mulf %1255, %1255 : vector<1x64x128xf32>
    %1257 = vector.shape_cast %1256 : vector<1x64x128xf32> to vector<1x1x64x128xf32>
    %cst_378 = arith.constant dense<0.000000e+00> : vector<1xf32>
    %1258 = vector.multi_reduction <add>, %1257, %cst_378 [1, 2, 3] : vector<1x1x64x128xf32> to vector<1xf32>
    %1259 = vector.shape_cast %1258 : vector<1xf32> to vector<1x1x1x1xf32>
    %1260 = vector.extract %1259[0, 0, 0, 0] : f32 from vector<1x1x1x1xf32>
    %cst_379 = arith.constant 1.22070313E-4 : f32
    %1261 = arith.mulf %1260, %cst_379 : f32
    %c142 = arith.constant 142 : index
    %1262 = memref.load %arg1[%c142] : memref<156xf32, #tpu.memory_space<smem>>
    %cst_380 = arith.constant 9.99999974E-6 : f32
    %1263 = arith.addf %1261, %cst_380 : f32
    %1264 = math.rsqrt %1263 : f32
    %1265 = arith.mulf %1262, %1264 : f32
    %1266 = vector.broadcast %1265 : f32 to vector<1x64x128xf32>
    %1267 = arith.mulf %1255, %1266 : vector<1x64x128xf32>
    %c143 = arith.constant 143 : index
    %1268 = memref.load %arg1[%c143] : memref<156xf32, #tpu.memory_space<smem>>
    %1269 = vector.broadcast %1268 : f32 to vector<1x64x128xf32>
    %1270 = arith.addf %1267, %1269 : vector<1x64x128xf32>
    %cst_381 = arith.constant 0.000000e+00 : f32
    %1271 = vector.broadcast %cst_381 : f32 to vector<1x64x128xf32>
    %1272 = arith.maximumf %1270, %1271 : vector<1x64x128xf32>
    %c1_i32_382 = arith.constant 1 : i32
    %1273 = vector.broadcast %c1_i32_382 : i32 to vector<1x64x128xi32>
    %1274 = arith.cmpi sge, %0, %1273 : vector<1x64x128xi32>
    %c1_i32_383 = arith.constant 1 : i32
    %1275 = tpu.dynamic_rotate %1272 by %c1_i32_383 dim 1 : vector<1x64x128xf32>, i32 -> vector<1x64x128xf32>
    %cst_384 = arith.constant 0.000000e+00 : f32
    %1276 = vector.broadcast %cst_384 : f32 to vector<1x64x128xf32>
    %1277 = arith.select %1274, %1275, %1276 : vector<1x64x128xi1>, vector<1x64x128xf32>
    %c63_i32_385 = arith.constant 63 : i32
    %1278 = vector.broadcast %c63_i32_385 : i32 to vector<1x64x128xi32>
    %1279 = arith.cmpi slt, %0, %1278 : vector<1x64x128xi32>
    %c63_i32_386 = arith.constant 63 : i32
    %1280 = tpu.dynamic_rotate %1272 by %c63_i32_386 dim 1 : vector<1x64x128xf32>, i32 -> vector<1x64x128xf32>
    %cst_387 = arith.constant 0.000000e+00 : f32
    %1281 = vector.broadcast %cst_387 : f32 to vector<1x64x128xf32>
    %1282 = arith.select %1279, %1280, %1281 : vector<1x64x128xi1>, vector<1x64x128xf32>
    %c1_i32_388 = arith.constant 1 : i32
    %1283 = vector.broadcast %c1_i32_388 : i32 to vector<1x64x128xi32>
    %1284 = arith.cmpi sge, %3, %1283 : vector<1x64x128xi32>
    %c1_i32_389 = arith.constant 1 : i32
    %1285 = tpu.dynamic_rotate %1277 by %c1_i32_389 dim 2 : vector<1x64x128xf32>, i32 -> vector<1x64x128xf32>
    %cst_390 = arith.constant 0.000000e+00 : f32
    %1286 = vector.broadcast %cst_390 : f32 to vector<1x64x128xf32>
    %1287 = arith.select %1284, %1285, %1286 : vector<1x64x128xi1>, vector<1x64x128xf32>
    %c144 = arith.constant 144 : index
    %1288 = memref.load %arg1[%c144] : memref<156xf32, #tpu.memory_space<smem>>
    %1289 = vector.broadcast %1288 : f32 to vector<1x64x128xf32>
    %1290 = arith.mulf %1289, %1287 : vector<1x64x128xf32>
    %c145 = arith.constant 145 : index
    %1291 = memref.load %arg1[%c145] : memref<156xf32, #tpu.memory_space<smem>>
    %1292 = vector.broadcast %1291 : f32 to vector<1x64x128xf32>
    %1293 = arith.mulf %1292, %1277 : vector<1x64x128xf32>
    %1294 = arith.addf %1290, %1293 : vector<1x64x128xf32>
    %c63_i32_391 = arith.constant 63 : i32
    %1295 = vector.broadcast %c63_i32_391 : i32 to vector<1x64x128xi32>
    %1296 = arith.cmpi slt, %3, %1295 : vector<1x64x128xi32>
    %c127_i32_392 = arith.constant 127 : i32
    %1297 = tpu.dynamic_rotate %1277 by %c127_i32_392 dim 2 : vector<1x64x128xf32>, i32 -> vector<1x64x128xf32>
    %cst_393 = arith.constant 0.000000e+00 : f32
    %1298 = vector.broadcast %cst_393 : f32 to vector<1x64x128xf32>
    %1299 = arith.select %1296, %1297, %1298 : vector<1x64x128xi1>, vector<1x64x128xf32>
    %c146 = arith.constant 146 : index
    %1300 = memref.load %arg1[%c146] : memref<156xf32, #tpu.memory_space<smem>>
    %1301 = vector.broadcast %1300 : f32 to vector<1x64x128xf32>
    %1302 = arith.mulf %1301, %1299 : vector<1x64x128xf32>
    %1303 = arith.addf %1294, %1302 : vector<1x64x128xf32>
    %c1_i32_394 = arith.constant 1 : i32
    %1304 = vector.broadcast %c1_i32_394 : i32 to vector<1x64x128xi32>
    %1305 = arith.cmpi sge, %3, %1304 : vector<1x64x128xi32>
    %c1_i32_395 = arith.constant 1 : i32
    %1306 = tpu.dynamic_rotate %1272 by %c1_i32_395 dim 2 : vector<1x64x128xf32>, i32 -> vector<1x64x128xf32>
    %cst_396 = arith.constant 0.000000e+00 : f32
    %1307 = vector.broadcast %cst_396 : f32 to vector<1x64x128xf32>
    %1308 = arith.select %1305, %1306, %1307 : vector<1x64x128xi1>, vector<1x64x128xf32>
    %c147 = arith.constant 147 : index
    %1309 = memref.load %arg1[%c147] : memref<156xf32, #tpu.memory_space<smem>>
    %1310 = vector.broadcast %1309 : f32 to vector<1x64x128xf32>
    %1311 = arith.mulf %1310, %1308 : vector<1x64x128xf32>
    %1312 = arith.addf %1303, %1311 : vector<1x64x128xf32>
    %c148 = arith.constant 148 : index
    %1313 = memref.load %arg1[%c148] : memref<156xf32, #tpu.memory_space<smem>>
    %1314 = vector.broadcast %1313 : f32 to vector<1x64x128xf32>
    %1315 = arith.mulf %1314, %1272 : vector<1x64x128xf32>
    %1316 = arith.addf %1312, %1315 : vector<1x64x128xf32>
    %c63_i32_397 = arith.constant 63 : i32
    %1317 = vector.broadcast %c63_i32_397 : i32 to vector<1x64x128xi32>
    %1318 = arith.cmpi slt, %3, %1317 : vector<1x64x128xi32>
    %c127_i32_398 = arith.constant 127 : i32
    %1319 = tpu.dynamic_rotate %1272 by %c127_i32_398 dim 2 : vector<1x64x128xf32>, i32 -> vector<1x64x128xf32>
    %cst_399 = arith.constant 0.000000e+00 : f32
    %1320 = vector.broadcast %cst_399 : f32 to vector<1x64x128xf32>
    %1321 = arith.select %1318, %1319, %1320 : vector<1x64x128xi1>, vector<1x64x128xf32>
    %c149 = arith.constant 149 : index
    %1322 = memref.load %arg1[%c149] : memref<156xf32, #tpu.memory_space<smem>>
    %1323 = vector.broadcast %1322 : f32 to vector<1x64x128xf32>
    %1324 = arith.mulf %1323, %1321 : vector<1x64x128xf32>
    %1325 = arith.addf %1316, %1324 : vector<1x64x128xf32>
    %c1_i32_400 = arith.constant 1 : i32
    %1326 = vector.broadcast %c1_i32_400 : i32 to vector<1x64x128xi32>
    %1327 = arith.cmpi sge, %3, %1326 : vector<1x64x128xi32>
    %c1_i32_401 = arith.constant 1 : i32
    %1328 = tpu.dynamic_rotate %1282 by %c1_i32_401 dim 2 : vector<1x64x128xf32>, i32 -> vector<1x64x128xf32>
    %cst_402 = arith.constant 0.000000e+00 : f32
    %1329 = vector.broadcast %cst_402 : f32 to vector<1x64x128xf32>
    %1330 = arith.select %1327, %1328, %1329 : vector<1x64x128xi1>, vector<1x64x128xf32>
    %c150 = arith.constant 150 : index
    %1331 = memref.load %arg1[%c150] : memref<156xf32, #tpu.memory_space<smem>>
    %1332 = vector.broadcast %1331 : f32 to vector<1x64x128xf32>
    %1333 = arith.mulf %1332, %1330 : vector<1x64x128xf32>
    %1334 = arith.addf %1325, %1333 : vector<1x64x128xf32>
    %c151 = arith.constant 151 : index
    %1335 = memref.load %arg1[%c151] : memref<156xf32, #tpu.memory_space<smem>>
    %1336 = vector.broadcast %1335 : f32 to vector<1x64x128xf32>
    %1337 = arith.mulf %1336, %1282 : vector<1x64x128xf32>
    %1338 = arith.addf %1334, %1337 : vector<1x64x128xf32>
    %c63_i32_403 = arith.constant 63 : i32
    %1339 = vector.broadcast %c63_i32_403 : i32 to vector<1x64x128xi32>
    %1340 = arith.cmpi slt, %3, %1339 : vector<1x64x128xi32>
    %c127_i32_404 = arith.constant 127 : i32
    %1341 = tpu.dynamic_rotate %1282 by %c127_i32_404 dim 2 : vector<1x64x128xf32>, i32 -> vector<1x64x128xf32>
    %cst_405 = arith.constant 0.000000e+00 : f32
    %1342 = vector.broadcast %cst_405 : f32 to vector<1x64x128xf32>
    %1343 = arith.select %1340, %1341, %1342 : vector<1x64x128xi1>, vector<1x64x128xf32>
    %c152 = arith.constant 152 : index
    %1344 = memref.load %arg1[%c152] : memref<156xf32, #tpu.memory_space<smem>>
    %1345 = vector.broadcast %1344 : f32 to vector<1x64x128xf32>
    %1346 = arith.mulf %1345, %1343 : vector<1x64x128xf32>
    %1347 = arith.addf %1338, %1346 : vector<1x64x128xf32>
    %1348 = vector.shape_cast %1347 : vector<1x64x128xf32> to vector<1x1x64x128xf32>
    %cst_406 = arith.constant dense<0.000000e+00> : vector<1xf32>
    %1349 = vector.multi_reduction <add>, %1348, %cst_406 [1, 2, 3] : vector<1x1x64x128xf32> to vector<1xf32>
    %1350 = vector.shape_cast %1349 : vector<1xf32> to vector<1x1x1x1xf32>
    %1351 = vector.extract %1350[0, 0, 0, 0] : f32 from vector<1x1x1x1xf32>
    %cst_407 = arith.constant 1.22070313E-4 : f32
    %1352 = arith.mulf %1351, %cst_407 : f32
    %1353 = vector.broadcast %1352 : f32 to vector<1x64x128xf32>
    %1354 = arith.subf %1347, %1353 : vector<1x64x128xf32>
    %1355 = arith.mulf %1354, %1354 : vector<1x64x128xf32>
    %1356 = vector.shape_cast %1355 : vector<1x64x128xf32> to vector<1x1x64x128xf32>
    %cst_408 = arith.constant dense<0.000000e+00> : vector<1xf32>
    %1357 = vector.multi_reduction <add>, %1356, %cst_408 [1, 2, 3] : vector<1x1x64x128xf32> to vector<1xf32>
    %1358 = vector.shape_cast %1357 : vector<1xf32> to vector<1x1x1x1xf32>
    %1359 = vector.extract %1358[0, 0, 0, 0] : f32 from vector<1x1x1x1xf32>
    %cst_409 = arith.constant 1.22070313E-4 : f32
    %1360 = arith.mulf %1359, %cst_409 : f32
    %c154 = arith.constant 154 : index
    %1361 = memref.load %arg1[%c154] : memref<156xf32, #tpu.memory_space<smem>>
    %cst_410 = arith.constant 9.99999974E-6 : f32
    %1362 = arith.addf %1360, %cst_410 : f32
    %1363 = math.rsqrt %1362 : f32
    %1364 = arith.mulf %1361, %1363 : f32
    %1365 = vector.broadcast %1364 : f32 to vector<1x64x128xf32>
    %1366 = arith.mulf %1354, %1365 : vector<1x64x128xf32>
    %c155 = arith.constant 155 : index
    %1367 = memref.load %arg1[%c155] : memref<156xf32, #tpu.memory_space<smem>>
    %1368 = vector.broadcast %1367 : f32 to vector<1x64x128xf32>
    %1369 = arith.addf %1366, %1368 : vector<1x64x128xf32>
    %cst_411 = arith.constant 0.000000e+00 : f32
    %1370 = vector.broadcast %cst_411 : f32 to vector<1x64x128xf32>
    %1371 = arith.maximumf %1369, %1370 : vector<1x64x128xf32>
    %1372 = vector.shape_cast %1371 : vector<1x64x128xf32> to vector<1x1x64x128xf32>
    %cst_412 = arith.constant dense<0xFF800000> : vector<1xf32>
    %1373 = vector.multi_reduction <maximumf>, %1372, %cst_412 [1, 2, 3] : vector<1x1x64x128xf32> to vector<1xf32>
    %1374 = vector.shape_cast %1373 : vector<1xf32> to vector<1x1x1x1xf32>
    %1375 = vector.extract %1374[0, 0, 0, 0] : f32 from vector<1x1x1x1xf32>
    %cst_413 = arith.constant 1.000000e+00 : f32
    %1376 = arith.divf %cst_413, %1375 : f32
    %1377 = vector.broadcast %1376 : f32 to vector<1x64x128xf32>
    %1378 = arith.mulf %1371, %1377 : vector<1x64x128xf32>
    %c0_414 = arith.constant 0 : index
    %c0_415 = arith.constant 0 : index
    %c0_416 = arith.constant 0 : index
    %1379 = vector.load %arg2[%c0_414, %c0_415, %c0_416] : memref<1x64x128xf32, #tpu.memory_space<vmem>>, vector<1x64x128xf32>
    tpu.vector_store %arg2[%c0_414, %c0_415, %c0_416], %1378 {strides = array<i32>} : memref<1x64x128xf32, #tpu.memory_space<vmem>>, vector<1x64x128xf32>,
    return
  }
}

</mosaic_0001>

<bundles_post_ra>
// kernel: forward.1
= control target key start
LH: loop header
LB: loop body
LE: loop exit
PB: predicated region body
PF: predicated region fallthrough
CT: control target
= control target key end

     0   :  { %7 = vsyncpa [#allocation3], 0  ;;  %s12507_s0 = inlined_call_operand.vmem [shape: f32[1,64,128], index: 0, kind: input, shape index: {}, may-alias: {0,2}]   ;;  %s12508_s1 = inlined_call_operand.vmem [shape: f32[156], index: 1, kind: input, shape index: {}]   ;;  %s12509_s2 = inlined_call_operand.vmem [shape: f32[1,64,128], index: 2, kind: output, shape index: {}, may-alias: {0,2}]  }
   0x1   :  { %s16_s11 = sshll.u32 %s12508_s1, 4  ;;  %s17_s11 = int_to_ptr.vmem [resolvable:$true] %s16_s11 }
   0x2   :  { %s6410_s12 = scalar_lea.vmem %s17_s11, 32  ;;  %p6415_p1 = scmp.lt.s32.totalorder %s17_s11, %s17_s11 }
   0x3   :  { %p6411_p0 = scmp.ne.s32.totalorder %s17_s11, %s6410_s12  ;;  %p6416_p2 = scmp.lt.s32.totalorder %s6410_s12, %s6410_s12 }
   0x5   :  { %p6417_p3 = por %p6416_p2, %p6415_p1 }
   0x7   :  { %p6418_p4 = pnand %p6417_p3, %p6411_p0 }
   0x9   :  { %6421 = shalt.err (!%p6418_p4)
}
   0xa   :  { %s6424_s13 = smov [#allocation2]  }
   0xb   :  { %19 = dma.vmem_to_smem %s17_s11, 32, %s6424_s13, [#allocation3]  }
   0xc   :  { %6422 = dma.done.wait [#allocation3], 32  }
   0xd   :  { %6423 = vsyncadd [#allocation3], 4294967264 }
   0xe   :  { %23 = sfence }
   0xf   :  { %v24_v0 = vlaneseq  ;;  %v6459_v1 = vld [vmem:[%s12507_s0] sm:$0xff]  ;;  %v6464_v2 = vld [vmem:[%s12507_s0 + $0x8] sm:$0xff]  ;;  %v6469_v3 = vld [vmem:[%s12507_s0 + $0x10] sm:$0xff]  ;;  %s6425_s23 = smov 1   ;;  %s6426_s24 = smov 127  }
  0x10   :  { %v52_v4 = vrot.slane %v6459_v1, 7  ;;  %v53_v5 = vrot.slane %v6464_v2, 7  ;;  %v54_v6 = vrot.slane %v6469_v3, 7  ;;  %v6477_v7 = vld [vmem:[%s12507_s0 + $0x38] sm:$0xff]  ;;  %v6520_v17 = vld [vmem:[%s12507_s0 + $0x20] sm:$0xff]  ;;  %v6538_v20 = vld [vmem:[%s12507_s0 + $0x28] sm:$0xff] }
  0x11   :  { %v6480_v8 = vshrl.u32 %v24_v0, 7  ;;  %v59_v9 = vrot.slane %v6477_v7, 7  ;;  %v6487_v10 = vld [vmem:[%s12507_s0 + $0x18] sm:$0xff]  ;;  %v56_v18 = vrot.slane %v6520_v17, 7  ;;  %v57_v21 = vrot.slane %v6538_v20, 7  ;;  %v6556_v23 = vld [vmem:[%s12507_s0 + $0x30] sm:$0xff] }
  0x12   :  { %v55_v14 = vrot.slane %v6487_v10, 7  ;;  %v58_v24 = vrot.slane %v6556_v23, 7  ;;  %v85_v26 = vrot.slane %v6459_v1, 1  ;;  %v86_v27 = vrot.slane %v6464_v2, 1  ;;  %s6054_s0 = sld [smem:[#allocation2 + $0x1]]  ;;  %s135_s3 = sld [smem:[#allocation2]] }
  0x13   :  { %vm12525_vm0 = vcmp.lt.s32.totalorder %v6480_v8, 1  ;;  %vm12523_vm1 = vcmp.ge.s32.totalorder %v6480_v8, 1  ;;  %vm12524_vm2 = vcmp.lt.s32.totalorder %v6480_v8, 7  ;;  %v87_v29 = vrot.slane %v6469_v3, 1  ;;  %s6055_s4 = sld [smem:[#allocation2 + $0x2]]  ;;  %s6056_s5 = sld [smem:[#allocation2 + $0x3]] }
  0x14   :  { %v6491_v11 = vsel %vm12525_vm0, %v52_v4, %v53_v5  ;;  %v6495_v12 = vsel %vm12525_vm0, %v53_v5, %v54_v6  ;;  %v68_v13 = vsel %vm12525_vm0, %v59_v9, %v52_v4  ;;  %v6515_v16 = vsel %vm12525_vm0, %v54_v6, %v55_v14  ;;  %s6057_s6 = sld [smem:[#allocation2 + $0x4]]  ;;  %s6058_s7 = sld [smem:[#allocation2 + $0x5]] }
  0x15   :  { %113 = vrot.lane.b32.xlu0 %v6491_v11, %s6425_s23  ;;  %115 = vrot.lane.b32.xlu1 %v6495_v12, %s6425_s23  ;;  %v6507_v15 = vsel %vm12523_vm1, %v68_v13, 0.0  ;;  %v6533_v19 = vsel %vm12525_vm0, %v55_v14, %v56_v18  ;;  %v6551_v22 = vsel %vm12525_vm0, %v56_v18, %v57_v21  ;;  %v6569_v25 = vsel %vm12525_vm0, %v57_v21, %v58_v24  ;;  %s6060_s8 = sld [smem:[#allocation2 + $0x7]]  ;;  %s6059_s9 = sld [smem:[#allocation2 + $0x6]] }
  0x16   :  { %v6584_v28 = vsel %vm12524_vm2, %v85_v26, %v86_v27  ;;  %v6593_v30 = vsel %vm12525_vm0, %v58_v24, %v59_v9  ;;  %v6597_v31 = vsel %vm12524_vm2, %v86_v27, %v87_v29  ;;  %v88_v32 = vrot.slane %v6487_v10, 1  ;;  %s6828_s10 = sld [smem:[#allocation2 + $0x8]]  ;;  %s6062_s1 = sld [smem:[#allocation2 + $0xa]] }
  0x17   :  { %v89_v34 = vrot.slane %v6520_v17, 1  ;;  %v90_v36 = vrot.slane %v6538_v20, 1  ;;  %v91_v38 = vrot.slane %v6556_v23, 1  ;;  %v92_v40 = vrot.slane %v6477_v7, 1  ;;  %s6063_s16 = sld [smem:[#allocation2 + $0xb]]  ;;  %s6427_s19 = smov 2  }
  0x18   :  { %v6610_v33 = vsel %vm12524_vm2, %v87_v29, %v88_v32  ;;  %v6657_v41 = vadd.s32 56, %v6480_v8  ;;  %v34_v53 = vand.u32 127, %v24_v0  ;;  %v6703_v62 = vstv %s6054_s0  ;;  %s6428_s20 = smov 126   ;;  %s6064_s21 = sld [smem:[#allocation2 + $0xc]] }
  0x19   :  { %164 = vrot.lane.b32.xlu1 %v6507_v15, %s6426_s24  ;;  %111 = vrot.lane.b32.xlu0 %v6507_v15, %s6425_s23  ;;  %v6623_v35 = vsel %vm12524_vm2, %v88_v32, %v89_v34  ;;  %v6640_v37 = vsel %vm12524_vm2, %v89_v34, %v90_v36  ;;  %v6649_v39 = vsel %vm12524_vm2, %v90_v36, %v91_v38  ;;  %v6705_v63 = vstv %s135_s3  ;;  %s6065_s22 = sld [smem:[#allocation2 + $0xd]]  ;;  %s6066_s25 = sld [smem:[#allocation2 + $0xe]] }
  0x1a   :  { %12527 = vst [vmem:[#allocation5_spill] sm:$0xff] %v6657_v41  ;;  %v6665_v42 = vsel %vm12524_vm2, %v91_v38, %v92_v40  ;;  %vm12522_vm3 = vcmp.lt.s32.totalorder %v6657_v41, 63  ;;  %v101_v43 = vsel %vm12524_vm2, %v92_v40, %v85_v26  ;;  %v6691_v56 = vand.u32 63, %v34_v53  ;;  %s6068_s26 = sld [smem:[#allocation2 + $0x10]]  ;;  %s6067_s27 = sld [smem:[#allocation2 + $0xf]] }
  0x1b   :  { %v6676_v44 = vsel %vm12522_vm3, %v101_v43, 0.0  ;;  %v147_v0 = vmul.f32 %v6703_v62, %v6507_v15  ;;  %v6710_v5 = vstv %s6055_s4  ;;  %v6718_v18 = vstv %s6056_s5  ;;  %s6069_s28 = sld [smem:[#allocation2 + $0x11]]  ;;  %s6070_s29 = sld [smem:[#allocation2 + $0x12]] }
  0x1c   :  { %vm12521_vm4 = vcmp.ge.s32.totalorder %v6691_v56, 1  ;;  %vm12520_vm5 = vcmp.lt.s32.totalorder %v6691_v56, 63  ;;  %v148_v27 = vmul.f32 %v6703_v62, %v6491_v11  ;;  %v6733_v40 = vstv %s6057_s6  ;;  %s6071_s30 = sld [smem:[#allocation2 + $0x13]]  ;;  %s6072_s0 = sld [smem:[#allocation2 + $0x14]] }
  0x1d   :  { %117 = vrot.lane.b32.xlu1 %v6515_v16, %s6425_s23  ;;  %166 = vrot.lane.b32.xlu0 %v6491_v11, %s6426_s24  ;;  %v250_v53 = vmul.f32 %v6733_v40, %v6459_v1  ;;  %vm624_vm15 = vcmp.lt.s32.totalorder %v6480_v8, 2 }
  0x21   :  { %206 = vrot.lane.b32.xlu1 %v6459_v1, %s6425_s23  ;;  %168 = vrot.lane.b32.xlu0 %v6495_v12, %s6426_s24 }
  0x25   :  { %119 = vrot.lane.b32.xlu1 %v6533_v19, %s6425_s23  ;;  %208 = vrot.lane.b32.xlu0 %v6464_v2, %s6425_s23 }
  0x29   :  { %210 = vrot.lane.b32.xlu1 %v6469_v3, %s6425_s23  ;;  %170 = vrot.lane.b32.xlu0 %v6515_v16, %s6426_s24 }
  0x2d   :  { %172 = vrot.lane.b32.xlu1 %v6533_v19, %s6426_s24  ;;  %121 = vrot.lane.b32.xlu0 %v6551_v22, %s6425_s23 }
  0x31   :  { %266 = vrot.lane.b32.xlu1 %v6459_v1, %s6426_s24  ;;  %212 = vrot.lane.b32.xlu0 %v6487_v10, %s6425_s23 }
  0x35   :  { %123 = vrot.lane.b32.xlu1 %v6569_v25, %s6425_s23  ;;  %268 = vrot.lane.b32.xlu0 %v6464_v2, %s6426_s24 }
  0x39   :  { %214 = vrot.lane.b32.xlu1 %v6520_v17, %s6425_s23  ;;  %174 = vrot.lane.b32.xlu0 %v6551_v22, %s6426_s24 }
  0x3d   :  { %308 = vrot.lane.b32.xlu1 %v6584_v28, %s6425_s23  ;;  %270 = vrot.lane.b32.xlu0 %v6469_v3, %s6426_s24 }
  0x41   :  { %125 = vrot.lane.b32.xlu1 %v6593_v30, %s6425_s23  ;;  %310 = vrot.lane.b32.xlu0 %v6597_v31, %s6425_s23 }
  0x45   :  { %216 = vrot.lane.b32.xlu1 %v6538_v20, %s6425_s23  ;;  %176 = vrot.lane.b32.xlu0 %v6569_v25, %s6426_s24 }
  0x49   :  { %312 = vrot.lane.b32.xlu1 %v6610_v33, %s6425_s23  ;;  %272 = vrot.lane.b32.xlu0 %v6487_v10, %s6426_s24 }
  0x4d   :  { %218 = vrot.lane.b32.xlu1 %v6556_v23, %s6425_s23  ;;  %178 = vrot.lane.b32.xlu0 %v6593_v30, %s6426_s24 }
  0x51   :  { %314 = vrot.lane.b32.xlu1 %v6623_v35, %s6425_s23  ;;  %274 = vrot.lane.b32.xlu0 %v6520_v17, %s6426_s24 }
  0x55   :  { %370 = vrot.lane.b32.xlu1 %v6597_v31, %s6426_s24  ;;  %368 = vrot.lane.b32.xlu0 %v6584_v28, %s6426_s24 }
  0x59   :  { %276 = vrot.lane.b32.xlu1 %v6538_v20, %s6426_s24  ;;  %220 = vrot.lane.b32.xlu0 %v6477_v7, %s6425_s23 }
  0x5d   :  { %372 = vrot.lane.b32.xlu1 %v6610_v33, %s6426_s24  ;;  %316 = vrot.lane.b32.xlu0 %v6640_v37, %s6425_s23 }
  0x61   :  { %318 = vrot.lane.b32.xlu1 %v6649_v39, %s6425_s23  ;;  %278 = vrot.lane.b32.xlu0 %v6556_v23, %s6426_s24 }
  0x65   :  { %280 = vrot.lane.b32.xlu1 %v6477_v7, %s6426_s24  ;;  %374 = vrot.lane.b32.xlu0 %v6623_v35, %s6426_s24 }
  0x69   :  { %376 = vrot.lane.b32.xlu1 %v6640_v37, %s6426_s24  ;;  %320 = vrot.lane.b32.xlu0 %v6665_v42, %s6425_s23 }
  0x6d   :  { %378 = vrot.lane.b32.xlu1 %v6649_v39, %s6426_s24  ;;  %322 = vrot.lane.b32.xlu0 %v6676_v44, %s6425_s23 }
  0x71   :  { %382 = vrot.lane.b32.xlu1 %v6676_v44, %s6426_s24  ;;  %380 = vrot.lane.b32.xlu0 %v6665_v42, %s6426_s24 }
  0x87   :  { %v114_v45 = vpop.permute.xlu0 %113  ;;  %v116_v46 = vpop.permute.xlu1 %115 }
  0x88   :  { %v128_v14 = vsel %vm12521_vm4, %v114_v45, 0.0 }
  0x89   :  { %v138_v29 = vmul.f32 %v6705_v63, %v128_v14 }
  0x8b   :  { %v165_v47 = vpop.permute.xlu1 %164  ;;  %v112_v48 = vpop.permute.xlu0 %111 }
  0x8c   :  { %v127_v59 = vsel %vm12521_vm4, %v112_v48, 0.0  ;;  %v180_v6 = vsel %vm12520_vm5, %v165_v47, 0.0  ;;  %v6736_v47 = vstv %s6058_s7  ;;  %v156_v48 = vadd.f32 %v148_v27, %v138_v29 }
  0x8d   :  { %v137_v4 = vmul.f32 %v6705_v63, %v127_v59  ;;  %v190_v15 = vmul.f32 %v6710_v5, %v180_v6  ;;  %v251_v27 = vmul.f32 %v6733_v40, %v6464_v2 }
  0x8f   :  { %v6686_v49 = vpop.permute.xlu1 %117  ;;  %v167_v50 = vpop.permute.xlu0 %166  ;;  %v155_v24 = vadd.f32 %v147_v0, %v137_v4  ;;  %v129_v0 = vsel %vm12521_vm4, %v116_v46, 0.0  ;;  %v6749_v4 = vstv %s6060_s8  ;;  %s6073_s8 = sld [smem:[#allocation2 + $0x16]] }
  0x90   :  { %v181_v26 = vsel %vm12520_vm5, %v167_v50, 0.0 }
  0x91   :  { %v191_v43 = vmul.f32 %v6710_v5, %v181_v26  ;;  %v198_v45 = vadd.f32 %v190_v15, %v155_v24  ;;  %v6758_v15 = vstv %s6059_s9  ;;  %v139_v24 = vmul.f32 %v6705_v63, %v129_v0  ;;  %s6074_s9 = sld [smem:[#allocation2 + $0x17]] }
  0x93   :  { %v207_v51 = vpop.permute.xlu1 %206  ;;  %v169_v52 = vpop.permute.xlu0 %168  ;;  %v199_v6 = vadd.f32 %v191_v43, %v156_v48 }
  0x94   :  { %v222_v21 = vsel %vm12521_vm4, %v207_v51, 0.0 }
  0x95   :  { %v232_v32 = vmul.f32 %v6718_v18, %v222_v21  ;;  %v182_v21 = vsel %vm12520_vm5, %v169_v52, 0.0 }
  0x97   :  { %v6689_v54 = vpop.permute.xlu1 %119  ;;  %v209_v55 = vpop.permute.xlu0 %208  ;;  %v240_v50 = vadd.f32 %v232_v32, %v198_v45 }
  0x98   :  { %v223_v38 = vsel %vm12521_vm4, %v209_v55, 0.0 }
  0x99   :  { %v233_v51 = vmul.f32 %v6718_v18, %v223_v38  ;;  %v258_v46 = vadd.f32 %v250_v53, %v240_v50  ;;  %v192_v38 = vmul.f32 %v6710_v5, %v182_v21 }
  0x9b   :  { %v211_v57 = vpop.permute.xlu1 %210  ;;  %v6693_v58 = vpop.permute.xlu0 %170  ;;  %v241_v26 = vadd.f32 %v233_v51, %v199_v6 }
  0x9c   :  { %v224_v52 = vsel %vm12521_vm4, %v211_v57, 0.0  ;;  %v353_v57 = vmul.f32 %v6749_v4, %v6597_v31 }
  0x9d   :  { %v234_v2 = vmul.f32 %v6718_v18, %v224_v52  ;;  %v259_v50 = vadd.f32 %v251_v27, %v241_v26  ;;  %v252_v26 = vmul.f32 %v6733_v40, %v6469_v3 }
  0x9f   :  { %v6699_v60 = vpop.permute.xlu1 %172  ;;  %v6701_v61 = vpop.permute.xlu0 %121 }
  0xa3   :  { %v267_v9 = vpop.permute.xlu1 %266  ;;  %v6714_v13 = vpop.permute.xlu0 %212 }
  0xa4   :  { %v282_v11 = vsel %vm12520_vm5, %v267_v9, 0.0  ;;  %v149_v9 = vmul.f32 %v6703_v62, %v6495_v12  ;;  %v352_v12 = vmul.f32 %v6749_v4, %v6584_v28 }
  0xa5   :  { %v292_v14 = vmul.f32 %v6736_v47, %v282_v11 }
  0xa6   :  { %v157_v48 = vadd.f32 %v149_v9, %v139_v24 }
  0xa7   :  { %v6729_v34 = vpop.permute.xlu1 %123  ;;  %v269_v36 = vpop.permute.xlu0 %268  ;;  %v300_v43 = vadd.f32 %v292_v14, %v258_v46 }
  0xa8   :  { %v283_v1 = vsel %vm12520_vm5, %v269_v36, 0.0  ;;  %v200_v6 = vadd.f32 %v192_v38, %v157_v48 }
  0xa9   :  { %v293_v45 = vmul.f32 %v6736_v47, %v283_v1 }
  0xaa   :  { %v242_v24 = vadd.f32 %v234_v2, %v200_v6 }
  0xab   :  { %v6743_v59 = vpop.permute.xlu1 %214  ;;  %v6745_v55 = vpop.permute.xlu0 %174  ;;  %v301_v14 = vadd.f32 %v293_v45, %v259_v50  ;;  %v130_v50 = vsel %vm12521_vm4, %v6686_v49, 0.0  ;;  %v151_v49 = vmul.f32 %v6703_v62, %v6533_v19 }
  0xac   :  { %v226_v19 = vsel %vm12521_vm4, %v6743_v59, 0.0 }
  0xaf   :  { %v309_v29 = vpop.permute.xlu1 %308  ;;  %v271_v32 = vpop.permute.xlu0 %270 }
  0xb0   :  { %v324_v36 = vsel %vm12521_vm4, %v309_v29, 0.0  ;;  %v284_v9 = vsel %vm12520_vm5, %v271_v32, 0.0  ;;  %v354_v32 = vmul.f32 %v6749_v4, %v6610_v33  ;;  %v183_v33 = vsel %vm12520_vm5, %v6693_v58, 0.0 }
  0xb1   :  { %v334_v11 = vmul.f32 %v6758_v15, %v324_v36  ;;  %v294_v31 = vmul.f32 %v6736_v47, %v284_v9  ;;  %v260_v36 = vadd.f32 %v252_v26, %v242_v24  ;;  %v225_v58 = vsel %vm12521_vm4, %v6714_v13, 0.0 }
  0xb2   :  { %v193_v9 = vmul.f32 %v6710_v5, %v183_v33  ;;  %v152_v13 = vmul.f32 %v6703_v62, %v6551_v22  ;;  %v154_v22 = vmul.f32 %v6703_v62, %v6593_v30  ;;  %v6857_v30 = vmul.f32 %v6749_v4, %v6640_v37 }
  0xb3   :  { %v342_v51 = vadd.f32 %v334_v11, %v300_v43  ;;  %v6773_v53 = vpop.permute.xlu1 %125  ;;  %v311_v28 = vpop.permute.xlu0 %310  ;;  %v302_v45 = vadd.f32 %v294_v31, %v260_v36 }
  0xb4   :  { %v325_v0 = vsel %vm12521_vm4, %v311_v28, 0.0  ;;  %v134_v37 = vsel %vm12521_vm4, %v6773_v53, 0.0 }
  0xb5   :  { %v335_v21 = vmul.f32 %v6758_v15, %v325_v0  ;;  %v6780_v1 = vadd.f32 %v352_v12, %v342_v51  ;;  %v131_v51 = vsel %vm12521_vm4, %v6689_v54, 0.0  ;;  %v140_v0 = vmul.f32 %v6705_v63, %v130_v50 }
  0xb6   :  { %v184_v54 = vsel %vm12520_vm5, %v6699_v60, 0.0 }
  0xb7   :  { %v343_v46 = vadd.f32 %v335_v21, %v301_v14  ;;  %v217_v27 = vpop.permute.xlu1 %216  ;;  %v177_v29 = vpop.permute.xlu0 %176  ;;  %v141_v21 = vmul.f32 %v6705_v63, %v131_v51  ;;  %v194_v26 = vmul.f32 %v6710_v5, %v184_v54 }
  0xb9   :  { %v6787_v52 = vadd.f32 %v353_v57, %v343_v46  ;;  %v150_v57 = vmul.f32 %v6703_v62, %v6515_v16  ;;  %v132_v16 = vsel %vm12521_vm4, %v6701_v61, 0.0  ;;  %v235_v46 = vmul.f32 %v6718_v18, %v225_v58 }
  0xba   :  { %v159_v36 = vadd.f32 %v151_v49, %v141_v21  ;;  %v185_v61 = vsel %vm12520_vm5, %v6745_v55, 0.0  ;;  %v142_v59 = vmul.f32 %v6705_v63, %v132_v16  ;;  %v253_v55 = vmul.f32 %v6733_v40, %v6487_v10 }
  0xbb   :  { %v313_v38 = vpop.permute.xlu1 %312  ;;  %v273_v43 = vpop.permute.xlu0 %272  ;;  %v158_v24 = vadd.f32 %v150_v57, %v140_v0  ;;  %v195_v51 = vmul.f32 %v6710_v5, %v185_v61 }
  0xbc   :  { %v326_v12 = vsel %vm12521_vm4, %v313_v38, 0.0  ;;  %v285_v49 = vsel %vm12520_vm5, %v273_v43, 0.0  ;;  %v256_v43 = vmul.f32 %v6733_v40, %v6556_v23 }
  0xbd   :  { %v336_v11 = vmul.f32 %v6758_v15, %v326_v12  ;;  %v201_v38 = vadd.f32 %v193_v9, %v158_v24  ;;  %v133_v12 = vsel %vm12521_vm4, %v6729_v34, 0.0  ;;  %v186_v34 = vsel %vm12520_vm5, %v177_v29, 0.0 }
  0xbe   :  { %v143_v10 = vmul.f32 %v6705_v63, %v133_v12  ;;  %v196_v21 = vmul.f32 %v6710_v5, %v186_v34  ;;  %v6876_v9 = vstv %s6828_s10  ;;  %v295_v24 = vmul.f32 %v6736_v47, %v285_v49 }
  0xbf   :  { %v344_v3 = vadd.f32 %v336_v11, %v302_v45  ;;  %v219_v48 = vpop.permute.xlu1 %218  ;;  %v6794_v2 = vpop.permute.xlu0 %178  ;;  %v153_v45 = vmul.f32 %v6703_v62, %v6569_v25  ;;  %v227_v11 = vsel %vm12521_vm4, %v217_v27, 0.0  ;;  %v243_v50 = vadd.f32 %v235_v46, %v201_v38 }
  0xc0   :  { %v6853_v25 = vmul.f32 %v6749_v4, %v6623_v35  ;;  %v254_v62 = vmul.f32 %v6733_v40, %v6520_v17  ;;  %v160_v27 = vadd.f32 %v152_v13, %v142_v59  ;;  %v237_v29 = vmul.f32 %v6718_v18, %v227_v11 }
  0xc1   :  { %v6802_v28 = vadd.f32 %v354_v32, %v344_v3  ;;  %v236_v32 = vmul.f32 %v6718_v18, %v226_v19  ;;  %v202_v3 = vadd.f32 %v194_v26, %v159_v36  ;;  %v6867_v35 = vmul.f32 %v6749_v4, %v6649_v39 }
  0xc2   :  { %v255_v17 = vmul.f32 %v6733_v40, %v6538_v20  ;;  %v203_v54 = vadd.f32 %v195_v51, %v160_v27  ;;  %v261_v58 = vadd.f32 %v253_v55, %v243_v50  ;;  %v161_v39 = vadd.f32 %v153_v45, %v143_v10 }
  0xc3   :  { %v315_v6 = vpop.permute.xlu1 %314  ;;  %v275_v14 = vpop.permute.xlu0 %274  ;;  %v244_v0 = vadd.f32 %v236_v32, %v202_v3  ;;  %v228_v53 = vsel %vm12521_vm4, %v219_v48, 0.0  ;;  %v144_v20 = vmul.f32 %v6705_v63, %v134_v37  ;;  %v187_v23 = vsel %vm12520_vm5, %v6794_v2, 0.0 }
  0xc4   :  { %v327_v26 = vsel %vm12521_vm4, %v315_v6, 0.0  ;;  %v245_v46 = vadd.f32 %v237_v29, %v203_v54  ;;  %v286_v36 = vsel %vm12520_vm5, %v275_v14, 0.0  ;;  %v204_v61 = vadd.f32 %v196_v21, %v161_v39 }
  0xc5   :  { %v262_v13 = vadd.f32 %v254_v62, %v244_v0  ;;  %v238_v6 = vmul.f32 %v6718_v18, %v228_v53  ;;  %v337_v63 = vmul.f32 %v6758_v15, %v327_v26  ;;  %v303_v45 = vadd.f32 %v295_v24, %v261_v58 }
  0xc6   :  { %v296_v2 = vmul.f32 %v6736_v47, %v286_v36  ;;  %v197_v11 = vmul.f32 %v6710_v5, %v187_v23  ;;  %v162_v51 = vadd.f32 %v154_v22, %v144_v20  ;;  %v263_v34 = vadd.f32 %v255_v17, %v245_v46 }
  0xc7   :  { %v371_v60 = vpop.permute.xlu1 %370  ;;  %v369_v31 = vpop.permute.xlu0 %368  ;;  %v246_v62 = vadd.f32 %v238_v6, %v204_v61  ;;  %v359_v6 = vmul.f32 %v6749_v4, %v6676_v44 }
  0xc8   :  { %v385_v38 = vsel %vm12520_vm5, %v371_v60, 0.0  ;;  %v384_v48 = vsel %vm12520_vm5, %v369_v31, 0.0  ;;  %v304_v49 = vadd.f32 %v296_v2, %v262_v13  ;;  %v205_v17 = vadd.f32 %v197_v11, %v162_v51 }
  0xc9   :  { %v395_v55 = vmul.f32 %v6876_v9, %v385_v38  ;;  %v394_v3 = vmul.f32 %v6876_v9, %v384_v48  ;;  %v264_v20 = vadd.f32 %v256_v43, %v246_v62  ;;  %v358_v38 = vmul.f32 %v6749_v4, %v6665_v42 }
  0xcb   :  { %v277_v33 = vpop.permute.xlu1 %276  ;;  %v221_v57 = vpop.permute.xlu0 %220  ;;  %v6921_v54 = vadd.f32 %v395_v55, %v6787_v52  ;;  %v6924_v58 = vadd.f32 %v394_v3, %v6780_v1 }
  0xcc   :  { %v287_v59 = vsel %vm12520_vm5, %v277_v33, 0.0  ;;  %v229_v60 = vsel %vm12521_vm4, %v221_v57, 0.0  ;;  %v345_v57 = vadd.f32 %v337_v63, %v303_v45 }
  0xcd   :  { %v297_v33 = vmul.f32 %v6736_v47, %v287_v59  ;;  %v239_v27 = vmul.f32 %v6718_v18, %v229_v60  ;;  %v257_v18 = vmul.f32 %v6733_v40, %v6477_v7  ;;  %v410_v61 = vadd.f32 %v6921_v54, %v6924_v58 }
  0xce   :  { %v363_v36 = vadd.f32 %v6853_v25, %v345_v57 }
  0xcf   :  { %v373_v16 = vpop.permute.xlu1 %372  ;;  %v317_v19 = vpop.permute.xlu0 %316  ;;  %v247_v53 = vadd.f32 %v239_v27, %v205_v17 }
  0xd0   :  { %v328_v14 = vsel %vm12521_vm4, %v317_v19, 0.0  ;;  %v386_v31 = vsel %vm12520_vm5, %v373_v16, 0.0  ;;  %v305_v16 = vadd.f32 %v297_v33, %v263_v34 }
  0xd1   :  { %v338_v10 = vmul.f32 %v6758_v15, %v328_v14  ;;  %v396_v0 = vmul.f32 %v6876_v9, %v386_v31  ;;  %v265_v14 = vadd.f32 %v257_v18, %v247_v53 }
  0xd3   :  { %v319_v12 = vpop.permute.xlu1 %318  ;;  %v279_v32 = vpop.permute.xlu0 %278  ;;  %v346_v19 = vadd.f32 %v338_v10, %v304_v49  ;;  %v404_v26 = vadd.f32 %v396_v0, %v6802_v28 }
  0xd4   :  { %v329_v50 = vsel %vm12521_vm4, %v319_v12, 0.0  ;;  %v288_v21 = vsel %vm12520_vm5, %v279_v32, 0.0 }
  0xd5   :  { %v339_v37 = vmul.f32 %v6758_v15, %v329_v50  ;;  %v298_v52 = vmul.f32 %v6736_v47, %v288_v21  ;;  %v364_v25 = vadd.f32 %v6857_v30, %v346_v19  ;;  %v411_v63 = vadd.f32 %v410_v61, %v404_v26 }
  0xd7   :  { %v281_v5 = vpop.permute.xlu1 %280  ;;  %v375_v29 = vpop.permute.xlu0 %374  ;;  %v347_v1 = vadd.f32 %v339_v37, %v305_v16  ;;  %v306_v59 = vadd.f32 %v298_v52, %v264_v20 }
  0xd8   :  { %v387_v22 = vsel %vm12520_vm5, %v375_v29, 0.0  ;;  %v289_v39 = vsel %vm12520_vm5, %v281_v5, 0.0 }
  0xd9   :  { %v397_v24 = vmul.f32 %v6876_v9, %v387_v22  ;;  %v299_v23 = vmul.f32 %v6736_v47, %v289_v39  ;;  %v365_v47 = vadd.f32 %v6867_v35, %v347_v1 }
  0xdb   :  { %v377_v46 = vpop.permute.xlu1 %376  ;;  %v321_v13 = vpop.permute.xlu0 %320  ;;  %v405_v48 = vadd.f32 %v397_v24, %v363_v36  ;;  %v307_v60 = vadd.f32 %v299_v23, %v265_v14 }
  0xdc   :  { %v388_v7 = vsel %vm12520_vm5, %v377_v46, 0.0  ;;  %v330_v40 = vsel %vm12521_vm4, %v321_v13, 0.0 }
  0xdd   :  { %v398_v28 = vmul.f32 %v6876_v9, %v388_v7  ;;  %v340_v43 = vmul.f32 %v6758_v15, %v330_v40  ;;  %v412_v4 = vadd.f32 %v411_v63, %v405_v48 }
  0xdf   :  { %v379_v12 = vpop.permute.xlu1 %378  ;;  %v323_v32 = vpop.permute.xlu0 %322  ;;  %v406_v45 = vadd.f32 %v398_v28, %v364_v25  ;;  %v348_v31 = vadd.f32 %v340_v43, %v306_v59 }
  0xe0   :  { %v389_v2 = vsel %vm12520_vm5, %v379_v12, 0.0  ;;  %v331_v42 = vsel %vm12521_vm4, %v323_v32, 0.0 }
  0xe1   :  { %v399_v30 = vmul.f32 %v6876_v9, %v389_v2  ;;  %v341_v44 = vmul.f32 %v6758_v15, %v331_v42  ;;  %v413_v51 = vadd.f32 %v412_v4, %v406_v45  ;;  %v366_v10 = vadd.f32 %v358_v38, %v348_v31 }
  0xe2   :  { %v477_v31 = vstv %s6063_s16  ;;  %s6078_s16 = sld [smem:[#allocation2 + $0x1b]] }
  0xe3   :  { %v407_v11 = vadd.f32 %v399_v30, %v365_v47  ;;  %v349_v55 = vadd.f32 %v341_v44, %v307_v60  ;;  %v383_v3 = vpop.permute.xlu1 %382  ;;  %v381_v50 = vpop.permute.xlu0 %380 }
  0xe4   :  { %v391_v35 = vsel %vm12520_vm5, %v383_v3, 0.0  ;;  %v390_v34 = vsel %vm12520_vm5, %v381_v50, 0.0  ;;  %vm1274_vm5 = vcmp.lt.s32.totalorder %v6691_v56, 60 }
  0xe5   :  { %v401_v33 = vmul.f32 %v6876_v9, %v391_v35  ;;  %v400_v62 = vmul.f32 %v6876_v9, %v390_v34  ;;  %v367_v57 = vadd.f32 %v359_v6, %v349_v55  ;;  %v414_v15 = vadd.f32 %v413_v51, %v407_v11 }
  0xe7   :  { %v408_v27 = vadd.f32 %v400_v62, %v366_v10  ;;  %v409_v0 = vadd.f32 %v401_v33, %v367_v57 }
  0xe9   :  { %v415_v5 = vadd.f32 %v414_v15, %v408_v27 }
  0xeb   :  { %v416_v29 = vadd.f32 %v415_v5, %v409_v0 }
  0xed   :  { %417 = vadd.xlane.f32.xlu0 %v416_v29 }
 0x17a   :  { %v418_v49 = vpop.xlane.xlu0 %417 }
 0x17b   :  { %v419_v37 = vrot.slane %v418_v49, 4 }
 0x17d   :  { %v420_v21 = vadd.f32 %v419_v37, %v418_v49 }
 0x17f   :  { %v421_v22 = vrot.slane %v420_v21, 2 }
 0x181   :  { %v422_v17 = vadd.f32 %v421_v22, %v420_v21 }
 0x183   :  { %v423_v18 = vrot.slane %v422_v17, 1 }
 0x185   :  { %v424_v16 = vadd.f32 %v423_v18, %v422_v17 }
 0x187   :  { %6196 = vpush %v424_v16 }
 0x1b8   :  { %s6197_s11 = spop %6196 }
 0x1b9   :  { %s426_s12 = smul.f32 0.00012207031, %s6197_s11 }
 0x1bb   :  { %v427_v19 = vstv %s426_s12  ;;  %s6429_s12 = smov 4  }
 0x1bc   :  { %v428_v9 = vsub.f32 %v6924_v58, %v427_v19  ;;  %v429_v39 = vsub.f32 %v6921_v54, %v427_v19  ;;  %v430_v24 = vsub.f32 %v404_v26, %v427_v19  ;;  %v431_v53 = vsub.f32 %v405_v48, %v427_v19 }
 0x1bd   :  { %v6963_v46 = vsub.f32 %v406_v45, %v427_v19  ;;  %v6965_v36 = vsub.f32 %v407_v11, %v427_v19  ;;  %v434_v61 = vsub.f32 %v408_v27, %v427_v19  ;;  %v435_v58 = vsub.f32 %v409_v0, %v427_v19 }
 0x1be   :  { %v436_v20 = vmul.f32 %v428_v9, %v428_v9  ;;  %v437_v52 = vmul.f32 %v429_v39, %v429_v39  ;;  %v438_v13 = vmul.f32 %v430_v24, %v430_v24  ;;  %v439_v7 = vmul.f32 %v431_v53, %v431_v53 }
 0x1bf   :  { %v440_v23 = vmul.f32 %v6963_v46, %v6963_v46  ;;  %v441_v54 = vmul.f32 %v6965_v36, %v6965_v36  ;;  %v442_v43 = vmul.f32 %v434_v61, %v434_v61  ;;  %v443_v48 = vmul.f32 %v435_v58, %v435_v58 }
 0x1c0   :  { %v444_v1 = vadd.f32 %v437_v52, %v436_v20  ;;  %v494_v19 = vand.u32 1, %v6691_v56 }
 0x1c2   :  { %v445_v40 = vadd.f32 %v444_v1, %v438_v13  ;;  %vm7002_vm6 = vcmp.lt.s32.totalorder %v494_v19, 1 }
 0x1c4   :  { %v446_v28 = vadd.f32 %v445_v40, %v439_v7  ;;  %v496_v40 = vand.u32 1, %v6480_v8 }
 0x1c6   :  { %v447_v26 = vadd.f32 %v446_v28, %v440_v23  ;;  %v7016_v23 = vadd.s32 8, %v6480_v8  ;;  %vm504_vm7 = vcmp.lt.s32.totalorder %v496_v40, 1 }
 0x1c8   :  { %v448_v38 = vadd.f32 %v447_v26, %v441_v54 }
 0x1ca   :  { %v449_v25 = vadd.f32 %v448_v38, %v442_v43 }
 0x1cc   :  { %v450_v6 = vadd.f32 %v449_v25, %v443_v48  ;;  %v7024_v25 = vadd.s32 16, %v6480_v8 }
 0x1ce   :  { %451 = vadd.xlane.f32.xlu1 %v450_v6 }
 0x25b   :  { %v452_v63 = vpop.xlane.xlu1 %451 }
 0x25c   :  { %v453_v59 = vrot.slane %v452_v63, 4 }
 0x25e   :  { %v454_v14 = vadd.f32 %v453_v59, %v452_v63  ;;  %v497_v63 = vand.u32 1, %v7016_v23 }
 0x260   :  { %v455_v12 = vrot.slane %v454_v14, 2  ;;  %vm7046_vm8 = vcmp.lt.s32.totalorder %v497_v63, 1 }
 0x262   :  { %v456_v32 = vadd.f32 %v455_v12, %v454_v14 }
 0x264   :  { %v457_v45 = vrot.slane %v456_v32, 1 }
 0x266   :  { %v458_v47 = vadd.f32 %v457_v45, %v456_v32 }
 0x268   :  { %6198 = vpush %v458_v47 }
 0x299   :  { %s6199_s13 = spop %6198 }
 0x29a   :  { %s460_s14 = smul.f32 0.00012207031, %s6199_s13  ;;  %s6430_s13 = smov 124  }
 0x29c   :  { %s462_s15 = sadd.f32 1e-05, %s460_s14  ;;  %s6075_s14 = sld [smem:[#allocation2 + $0x18]] }
 0x29e   :  { %v463_v2 = vstv %s462_s15  ;;  %s6076_s15 = sld [smem:[#allocation2 + $0x19]] }
 0x29f   :  { %6382 = vrsqrt.f32 %v463_v2 }
 0x2a9   :  { %v6383_v42 = vpop.eup %6382 }
 0x2aa   :  { %6200 = vpush %v6383_v42 }
 0x2db   :  { %s6201_s17 = spop %6200 }
 0x2dc   :  { %s466_s18 = smul.f32 %s6201_s17, %s6062_s1  ;;  %s6077_s1 = sld [smem:[#allocation2 + $0x1a]] }
 0x2dd   :  { %s6079_s17 = sld [smem:[#allocation2 + $0x1c]] }
 0x2de   :  { %v467_v60 = vstv %s466_s18  ;;  %s6080_s18 = sld [smem:[#allocation2 + $0x1d]] }
 0x2df   :  { %v469_v30 = vmul.f32 %v467_v60, %v429_v39  ;;  %v468_v44 = vmul.f32 %v467_v60, %v428_v9  ;;  %v475_v4 = vmul.f32 %v467_v60, %v435_v58  ;;  %v474_v11 = vmul.f32 %v467_v60, %v434_v61 }
 0x2e0   :  { %v470_v62 = vmul.f32 %v467_v60, %v430_v24  ;;  %v471_v27 = vmul.f32 %v467_v60, %v431_v53  ;;  %v472_v5 = vmul.f32 %v467_v60, %v6963_v46  ;;  %v473_v37 = vmul.f32 %v467_v60, %v6965_v36 }
 0x2e1   :  { %v479_v55 = vadd.f32 %v477_v31, %v469_v30  ;;  %v478_v3 = vadd.f32 %v477_v31, %v468_v44  ;;  %v485_v35 = vadd.f32 %v477_v31, %v475_v4  ;;  %v484_v34 = vadd.f32 %v477_v31, %v474_v11 }
 0x2e2   :  { %v480_v57 = vadd.f32 %v477_v31, %v470_v62  ;;  %v481_v0 = vadd.f32 %v477_v31, %v471_v27  ;;  %v482_v49 = vadd.f32 %v477_v31, %v472_v5  ;;  %v483_v22 = vadd.f32 %v477_v31, %v473_v37 }
 0x2e3   :  { %v487_v50 = vmax.f32 %v479_v55, 0.0  ;;  %v486_v51 = vmax.f32 %v478_v3, 0.0  ;;  %v493_v33 = vmax.f32 %v485_v35, 0.0  ;;  %v6973_v10 = vmax.f32 %v484_v34, 0.0 }
 0x2e4   :  { %v488_v15 = vmax.f32 %v480_v57, 0.0  ;;  %v489_v29 = vmax.f32 %v481_v0, 0.0  ;;  %v6989_v21 = vmax.f32 %v482_v49, 0.0  ;;  %v6995_v17 = vmax.f32 %v483_v22, 0.0 }
 0x2e5   :  { %514 = vrot.lane.b32.xlu1 %v487_v50, %s6426_s24  ;;  %512 = vrot.lane.b32.xlu0 %v486_v51, %s6426_s24  ;;  %v498_v60 = vand.u32 1, %v7024_v25  ;;  %v7042_v31 = vadd.s32 24, %v6480_v8 }
 0x2e7   :  { %12530 = vst [vmem:[#allocation6_spill] sm:$0xff] %v7042_v31  ;;  %vm7061_vm9 = vcmp.lt.s32.totalorder %v498_v60, 1  ;;  %v499_v27 = vand.u32 1, %v7042_v31 }
 0x2e9   :  { %526 = vrot.lane.b32.xlu1 %v493_v33, %s6426_s24  ;;  %524 = vrot.lane.b32.xlu0 %v6973_v10, %s6426_s24  ;;  %vm507_vm10 = vcmp.lt.s32.totalorder %v499_v27, 1 }
 0x2ed   :  { %530 = vrot.lane.b32.xlu1 %v487_v50, %s6425_s23  ;;  %528 = vrot.lane.b32.xlu0 %v486_v51, %s6425_s23 }
 0x2f1   :  { %542 = vrot.lane.b32.xlu1 %v493_v33, %s6425_s23  ;;  %540 = vrot.lane.b32.xlu0 %v6973_v10, %s6425_s23 }
 0x2f5   :  { %532 = vrot.lane.b32.xlu1 %v488_v15, %s6425_s23  ;;  %516 = vrot.lane.b32.xlu0 %v488_v15, %s6426_s24 }
 0x2f9   :  { %534 = vrot.lane.b32.xlu1 %v489_v29, %s6425_s23  ;;  %518 = vrot.lane.b32.xlu0 %v489_v29, %s6426_s24 }
 0x2fd   :  { %536 = vrot.lane.b32.xlu1 %v6989_v21, %s6425_s23  ;;  %520 = vrot.lane.b32.xlu0 %v6989_v21, %s6426_s24 }
 0x301   :  { %538 = vrot.lane.b32.xlu1 %v6995_v17, %s6425_s23  ;;  %522 = vrot.lane.b32.xlu0 %v6995_v17, %s6426_s24 }
 0x357   :  { %v515_v18 = vpop.permute.xlu1 %514  ;;  %v513_v16 = vpop.permute.xlu0 %512 }
 0x35b   :  { %v527_v9 = vpop.permute.xlu1 %526  ;;  %v525_v39 = vpop.permute.xlu0 %524 }
 0x35f   :  { %v531_v53 = vpop.permute.xlu1 %530  ;;  %v529_v20 = vpop.permute.xlu0 %528 }
 0x360   :  { %v545_v52 = vsel %vm7002_vm6, %v515_v18, %v531_v53  ;;  %v544_v46 = vsel %vm7002_vm6, %v513_v16, %v529_v20 }
 0x361   :  { %v553_v13 = vmax.f32 %v487_v50, %v545_v52  ;;  %v7010_v1 = vmax.f32 %v486_v51, %v544_v46  ;;  %v7057_v51 = vadd.s32 32, %v6480_v8 }
 0x363   :  { %v543_v36 = vpop.permute.xlu1 %542  ;;  %v541_v7 = vpop.permute.xlu0 %540  ;;  %v561_v28 = vrot.slane %v553_v13, 1  ;;  %v560_v58 = vrot.slane %v7010_v1, 1  ;;  %v576_v26 = vrot.slane %v7010_v1, 7  ;;  %v577_v12 = vrot.slane %v553_v13, 7  ;;  %12533 = vst [vmem:[#allocation7_spill] sm:$0xff] %v7057_v51 }
 0x364   :  { %v551_v61 = vsel %vm7002_vm6, %v527_v9, %v543_v36  ;;  %v500_v19 = vand.u32 1, %v7057_v51 }
 0x365   :  { %v7019_v54 = vmax.f32 %v493_v33, %v551_v61  ;;  %v574_v59 = vsel %vm12524_vm2, %v560_v58, %v561_v28  ;;  %v590_v3 = vsel %vm12525_vm0, %v576_v26, %v577_v12 }
 0x366   :  { %vm7101_vm11 = vcmp.lt.s32.totalorder %v500_v19, 1 }
 0x367   :  { %v583_v43 = vrot.slane %v7019_v54, 7  ;;  %v533_v38 = vpop.permute.xlu1 %532  ;;  %v517_v48 = vpop.permute.xlu0 %516 }
 0x368   :  { %v546_v6 = vsel %vm7002_vm6, %v517_v48, %v533_v38 }
 0x369   :  { %v591_v14 = vsel %vm12525_vm0, %v583_v43, %v576_v26  ;;  %v554_v32 = vmax.f32 %v488_v15, %v546_v6  ;;  %v550_v15 = vsel %vm7002_vm6, %v525_v39, %v541_v7 }
 0x36a   :  { %v592_v45 = vsel %vm504_vm7, %v574_v59, %v591_v14  ;;  %v558_v9 = vmax.f32 %v6973_v10, %v550_v15  ;;  %vm608_vm7 = vcmp.ge.s32.totalorder %v6480_v8, 2 }
 0x36b   :  { %v535_v47 = vpop.permute.xlu1 %534  ;;  %v519_v2 = vpop.permute.xlu0 %518  ;;  %v7038_v42 = vmax.f32 %v7010_v1, %v592_v45  ;;  %v562_v30 = vrot.slane %v554_v32, 1  ;;  %v578_v11 = vrot.slane %v554_v32, 7  ;;  %v567_v45 = vrot.slane %v7019_v54, 1 }
 0x36c   :  { %v547_v44 = vsel %vm7002_vm6, %v519_v2, %v535_v47  ;;  %v566_v24 = vrot.slane %v558_v9, 1  ;;  %v582_v47 = vrot.slane %v558_v9, 7 }
 0x36d   :  { %v555_v55 = vmax.f32 %v489_v29, %v547_v44  ;;  %770 = vrot.lane.b32.xlu1 %v7038_v42, %s6427_s19  ;;  %v573_v50 = vsel %vm12524_vm2, %v561_v28, %v562_v30  ;;  %v7073_v29 = vadd.s32 40, %v6480_v8  ;;  %v589_v49 = vsel %vm12525_vm0, %v577_v12, %v578_v11 }
 0x36e   :  { %v593_v62 = vsel %vm7046_vm8, %v573_v50, %v590_v3  ;;  %v568_v44 = vsel %vm12524_vm2, %v566_v24, %v567_v45  ;;  %v575_v50 = vsel %vm12524_vm2, %v567_v45, %v560_v58  ;;  %v616_v1 = vrot.slane %v7038_v42, 6 }
 0x36f   :  { %v563_v35 = vrot.slane %v555_v55, 1  ;;  %v537_v34 = vpop.permute.xlu1 %536  ;;  %v521_v33 = vpop.permute.xlu0 %520  ;;  %v7070_v5 = vmax.f32 %v553_v13, %v593_v62  ;;  %12536 = vst [vmem:[#allocation8_spill] sm:$0xff] %v7073_v29  ;;  %v579_v22 = vrot.slane %v555_v55, 7  ;;  %v501_v46 = vand.u32 1, %v7073_v29 }
 0x370   :  { %v548_v0 = vsel %vm7002_vm6, %v521_v33, %v537_v34  ;;  %v7092_v13 = vadd.s32 48, %v6480_v8  ;;  %vm648_vm8 = vcmp.lt.s32.totalorder %v6657_v41, 62 }
 0x371   :  { %v572_v37 = vsel %vm12524_vm2, %v562_v30, %v563_v35  ;;  %v556_v18 = vmax.f32 %v6989_v21, %v548_v0  ;;  %772 = vrot.lane.b32.xlu0 %v7070_v5, %s6427_s19  ;;  %v588_v36 = vsel %vm12525_vm0, %v578_v11, %v579_v22  ;;  %vm7107_vm12 = vcmp.lt.s32.totalorder %v501_v46, 1 }
 0x372   :  { %v594_v16 = vsel %vm7061_vm9, %v572_v37, %v589_v49  ;;  %12537 = vst [vmem:[#allocation9_spill] sm:$0xff] %v7092_v13  ;;  %v502_v63 = vand.u32 1, %v7092_v13  ;;  %v617_v34 = vrot.slane %v7070_v5, 6  ;;  %vm674_vm9 = vcmp.ge.s32.totalorder %v6691_v56, 2 }
 0x373   :  { %v564_v39 = vrot.slane %v556_v18, 1  ;;  %v539_v53 = vpop.permute.xlu1 %538  ;;  %v523_v20 = vpop.permute.xlu0 %522  ;;  %v7086_v52 = vmax.f32 %v554_v32, %v594_v16  ;;  %v580_v7 = vrot.slane %v556_v18, 7  ;;  %v649_v16 = vrot.slane %v7038_v42, 2 }
 0x374   :  { %v549_v21 = vsel %vm7002_vm6, %v523_v20, %v539_v53  ;;  %vm510_vm13 = vcmp.lt.s32.totalorder %v502_v63, 1  ;;  %vm657_vm6 = vcmp.lt.s32.totalorder %v6480_v8, 6 }
 0x375   :  { %v571_v10 = vsel %vm12524_vm2, %v563_v35, %v564_v39  ;;  %v557_v40 = vmax.f32 %v6995_v17, %v549_v21  ;;  %774 = vrot.lane.b32.xlu1 %v7086_v52, %s6427_s19  ;;  %v587_v17 = vsel %vm12525_vm0, %v579_v22, %v580_v7  ;;  %v584_v35 = vsel %vm12525_vm0, %v582_v47, %v583_v43 }
 0x376   :  { %v595_v61 = vsel %vm507_vm10, %v571_v10, %v588_v36  ;;  %v7172_v43 = vsel %vm624_vm15, %v616_v1, %v617_v34  ;;  %v618_v57 = vrot.slane %v7086_v52, 6  ;;  %v651_v46 = vrot.slane %v7086_v52, 2 }
 0x377   :  { %v565_v26 = vrot.slane %v557_v40, 1  ;;  %v581_v38 = vrot.slane %v557_v40, 7  ;;  %v7105_v48 = vmax.f32 %v555_v55, %v595_v61  ;;  %v503_v55 = vand.u32 1, %v6657_v41 }
 0x378   :  { %v7189_v15 = vsel %vm624_vm15, %v617_v34, %v618_v57  ;;  %vm12526_vm10 = vcmp.lt.s32.totalorder %v6691_v56, 62 }
 0x379   :  { %v569_v59 = vsel %vm12524_vm2, %v565_v26, %v566_v24  ;;  %v570_v14 = vsel %vm12524_vm2, %v564_v39, %v565_v26  ;;  %v586_v12 = vsel %vm12525_vm0, %v580_v7, %v581_v38  ;;  %830 = vrot.lane.b32.xlu1 %v7038_v42, %s6428_s20  ;;  %776 = vrot.lane.b32.xlu0 %v7105_v48, %s6427_s19  ;;  %vm511_vm14 = vcmp.lt.s32.totalorder %v503_v55, 1 }
 0x37a   :  { %v596_v32 = vsel %vm7101_vm11, %v570_v14, %v587_v17  ;;  %v597_v60 = vsel %vm7107_vm12, %v569_v59, %v586_v12  ;;  %v585_v30 = vsel %vm12525_vm0, %v581_v38, %v582_v47  ;;  %v599_v33 = vsel %vm511_vm14, %v575_v50, %v584_v35 }
 0x37b   :  { %v7127_v2 = vmax.f32 %v556_v18, %v596_v32  ;;  %v7139_v4 = vmax.f32 %v557_v40, %v597_v60  ;;  %v598_v11 = vsel %vm510_vm13, %v568_v44, %v585_v30  ;;  %v7168_v58 = vmax.f32 %v7019_v54, %v599_v33 }
 0x37c   :  { %v7146_v3 = vmax.f32 %v558_v9, %v598_v11  ;;  %v619_v62 = vrot.slane %v7105_v48, 6  ;;  %v650_v18 = vrot.slane %v7070_v5, 2  ;;  %v652_v20 = vrot.slane %v7105_v48, 2 }
 0x37d   :  { %778 = vrot.lane.b32.xlu1 %v7127_v2, %s6427_s19  ;;  %832 = vrot.lane.b32.xlu0 %v7070_v5, %s6428_s20  ;;  %v620_v54 = vrot.slane %v7127_v2, 6  ;;  %v621_v49 = vrot.slane %v7139_v4, 6  ;;  %v623_v39 = vrot.slane %v7168_v58, 6  ;;  %v653_v36 = vrot.slane %v7127_v2, 2 }
 0x37e   :  { %v7182_v27 = vsel %vm624_vm15, %v618_v57, %v619_v62  ;;  %v622_v37 = vrot.slane %v7146_v3, 6  ;;  %v7220_v19 = vsel %vm657_vm6, %v649_v16, %v650_v18  ;;  %v7243_v21 = vsel %vm657_vm6, %v651_v46, %v652_v20 }
 0x37f   :  { %v7195_v0 = vsel %vm624_vm15, %v619_v62, %v620_v54  ;;  %v7226_v9 = vsel %vm624_vm15, %v620_v54, %v621_v49  ;;  %v7250_v10 = vsel %vm657_vm6, %v650_v18, %v651_v46  ;;  %v7256_v7 = vsel %vm657_vm6, %v652_v20, %v653_v36 }
 0x380   :  { %v7209_v22 = vsel %vm624_vm15, %v621_v49, %v622_v37  ;;  %v7233_v53 = vsel %vm624_vm15, %v622_v37, %v623_v39  ;;  %v632_v40 = vsel %vm624_vm15, %v623_v39, %v616_v1  ;;  %v654_v28 = vrot.slane %v7139_v4, 2 }
 0x381   :  { %780 = vrot.lane.b32.xlu1 %v7139_v4, %s6427_s19  ;;  %834 = vrot.lane.b32.xlu0 %v7086_v52, %s6428_s20  ;;  %v7271_v61 = vsel %vm608_vm7, %v632_v40, 0.0  ;;  %v655_v24 = vrot.slane %v7146_v3, 2  ;;  %v656_v6 = vrot.slane %v7168_v58, 2  ;;  %v7348_v62 = vstv %s6064_s21  ;;  %s6081_s21 = sld [smem:[#allocation2 + $0x1e]] }
 0x382   :  { %v7291_v38 = vsel %vm657_vm6, %v653_v36, %v654_v28  ;;  %v7353_v18 = vstv %s6065_s22  ;;  %v7357_v20 = vstv %s6066_s25  ;;  %s6082_s22 = sld [smem:[#allocation2 + $0x1f]]  ;;  %s6083_s25 = sld [smem:[#allocation2 + $0x20]] }
 0x383   :  { %v7285_v26 = vsel %vm657_vm6, %v654_v28, %v655_v24  ;;  %v7308_v63 = vsel %vm657_vm6, %v655_v24, %v656_v6  ;;  %v665_v17 = vsel %vm657_vm6, %v656_v6, %v649_v16  ;;  %v712_v46 = vmul.f32 %v7353_v18, %v7172_v43 }
 0x384   :  { %v7317_v59 = vsel %vm648_vm8, %v665_v17, 0.0  ;;  %v7369_v17 = vstv %s6068_s26 }
 0x385   :  { %782 = vrot.lane.b32.xlu1 %v7146_v3, %s6427_s19  ;;  %836 = vrot.lane.b32.xlu0 %v7105_v48, %s6428_s20 }
 0x389   :  { %840 = vrot.lane.b32.xlu1 %v7139_v4, %s6428_s20  ;;  %838 = vrot.lane.b32.xlu0 %v7127_v2, %s6428_s20 }
 0x38d   :  { %677 = vrot.lane.b32.xlu1 %v7172_v43, %s6427_s19  ;;  %784 = vrot.lane.b32.xlu0 %v7168_v58, %s6427_s19 }
 0x391   :  { %681 = vrot.lane.b32.xlu1 %v7182_v27, %s6427_s19  ;;  %679 = vrot.lane.b32.xlu0 %v7189_v15, %s6427_s19 }
 0x395   :  { %683 = vrot.lane.b32.xlu1 %v7195_v0, %s6427_s19  ;;  %730 = vrot.lane.b32.xlu0 %v7172_v43, %s6428_s20 }
 0x399   :  { %736 = vrot.lane.b32.xlu1 %v7195_v0, %s6428_s20  ;;  %732 = vrot.lane.b32.xlu0 %v7189_v15, %s6428_s20 }
 0x39d   :  { %687 = vrot.lane.b32.xlu1 %v7209_v22, %s6427_s19  ;;  %734 = vrot.lane.b32.xlu0 %v7182_v27, %s6428_s20 }
 0x3a1   :  { %872 = vrot.lane.b32.xlu1 %v7220_v19, %s6427_s19  ;;  %685 = vrot.lane.b32.xlu0 %v7226_v9, %s6427_s19 }
 0x3a5   :  { %689 = vrot.lane.b32.xlu1 %v7233_v53, %s6427_s19  ;;  %738 = vrot.lane.b32.xlu0 %v7226_v9, %s6428_s20 }
 0x3a9   :  { %876 = vrot.lane.b32.xlu1 %v7243_v21, %s6427_s19  ;;  %874 = vrot.lane.b32.xlu0 %v7250_v10, %s6427_s19 }
 0x3ad   :  { %878 = vrot.lane.b32.xlu1 %v7256_v7, %s6427_s19  ;;  %740 = vrot.lane.b32.xlu0 %v7209_v22, %s6428_s20 }
 0x3b1   :  { %934 = vrot.lane.b32.xlu1 %v7250_v10, %s6428_s20  ;;  %742 = vrot.lane.b32.xlu0 %v7233_v53, %s6428_s20 }
 0x3b5   :  { %728 = vrot.lane.b32.xlu1 %v7271_v61, %s6428_s20  ;;  %932 = vrot.lane.b32.xlu0 %v7220_v19, %s6428_s20 }
 0x3b9   :  { %936 = vrot.lane.b32.xlu1 %v7243_v21, %s6428_s20  ;;  %675 = vrot.lane.b32.xlu0 %v7271_v61, %s6427_s19 }
 0x3bd   :  { %882 = vrot.lane.b32.xlu1 %v7285_v26, %s6427_s19  ;;  %880 = vrot.lane.b32.xlu0 %v7291_v38, %s6427_s19 }
 0x3c1   :  { %844 = vrot.lane.b32.xlu1 %v7168_v58, %s6428_s20  ;;  %842 = vrot.lane.b32.xlu0 %v7146_v3, %s6428_s20 }
 0x3c5   :  { %940 = vrot.lane.b32.xlu1 %v7291_v38, %s6428_s20  ;;  %938 = vrot.lane.b32.xlu0 %v7256_v7, %s6428_s20 }
 0x3c9   :  { %942 = vrot.lane.b32.xlu1 %v7285_v26, %s6428_s20  ;;  %884 = vrot.lane.b32.xlu0 %v7308_v63, %s6427_s19 }
 0x3cd   :  { %946 = vrot.lane.b32.xlu1 %v7317_v59, %s6428_s20  ;;  %886 = vrot.lane.b32.xlu0 %v7317_v59, %s6427_s19 }
 0x3d1   :  { %944 = vrot.lane.b32.xlu0 %v7308_v63, %s6428_s20 }
 0x3df   :  { %v7325_v14 = vpop.permute.xlu1 %770 }
 0x3e3   :  { %v773_v32 = vpop.permute.xlu0 %772 }
 0x3e4   :  { %v787_v28 = vsel %vm674_vm9, %v773_v32, 0.0  ;;  %v715_v32 = vmul.f32 %v7353_v18, %v7195_v0 }
 0x3e7   :  { %v775_v12 = vpop.permute.xlu1 %774 }
 0x3e8   :  { %v788_v0 = vsel %vm674_vm9, %v775_v12, 0.0  ;;  %v714_v12 = vmul.f32 %v7353_v18, %v7182_v27 }
 0x3eb   :  { %v7327_v45 = vpop.permute.xlu1 %830  ;;  %v7329_v47 = vpop.permute.xlu0 %776 }
 0x3ef   :  { %v779_v60 = vpop.permute.xlu1 %778  ;;  %v7331_v30 = vpop.permute.xlu0 %832 }
 0x3f3   :  { %v7333_v44 = vpop.permute.xlu1 %780  ;;  %v7335_v11 = vpop.permute.xlu0 %834 }
 0x3f7   :  { %v7337_v55 = vpop.permute.xlu1 %782  ;;  %v7339_v50 = vpop.permute.xlu0 %836 }
 0x3fb   :  { %v7341_v35 = vpop.permute.xlu1 %840  ;;  %v7343_v34 = vpop.permute.xlu0 %838 }
 0x3ff   :  { %v678_v33 = vpop.permute.xlu1 %677  ;;  %v7345_v1 = vpop.permute.xlu0 %784 }
 0x400   :  { %v692_v57 = vsel %vm674_vm9, %v678_v33, 0.0  ;;  %v7371_v33 = vstv %s6067_s27 }
 0x401   :  { %v702_v37 = vmul.f32 %v7348_v62, %v692_v57  ;;  %v797_v13 = vmul.f32 %v7371_v33, %v787_v28 }
 0x403   :  { %v682_v54 = vpop.permute.xlu1 %681  ;;  %v680_v49 = vpop.permute.xlu0 %679  ;;  %v720_v57 = vadd.f32 %v712_v46, %v702_v37  ;;  %v790_v37 = vsel %vm674_vm9, %v779_v60, 0.0 }
 0x404   :  { %v693_v16 = vsel %vm674_vm9, %v680_v49, 0.0 }
 0x405   :  { %v703_v49 = vmul.f32 %v7348_v62, %v693_v16 }
 0x407   :  { %v684_v39 = vpop.permute.xlu1 %683  ;;  %v731_v40 = vpop.permute.xlu0 %730 }
 0x408   :  { %v695_v36 = vsel %vm674_vm9, %v684_v39, 0.0  ;;  %v745_v6 = vsel %vm12526_vm10, %v731_v40, 0.0  ;;  %v713_v39 = vmul.f32 %v7353_v18, %v7189_v15  ;;  %v815_v40 = vmul.f32 %v7369_v17, %v7070_v5 }
 0x409   :  { %v705_v24 = vmul.f32 %v7348_v62, %v695_v36  ;;  %v755_v43 = vmul.f32 %v7357_v20, %v745_v6  ;;  %v694_v36 = vsel %vm674_vm9, %v682_v54, 0.0 }
 0x40a   :  { %v704_v5 = vmul.f32 %v7348_v62, %v694_v36  ;;  %v721_v28 = vadd.f32 %v713_v39, %v703_v49  ;;  %v789_v49 = vsel %vm674_vm9, %v7329_v47, 0.0  ;;  %v818_v39 = vmul.f32 %v7369_v17, %v7127_v2 }
 0x40b   :  { %v737_v41 = vpop.permute.xlu1 %736  ;;  %v763_v16 = vadd.f32 %v755_v43, %v720_v57  ;;  %v733_v15 = vpop.permute.xlu0 %732  ;;  %v723_v6 = vadd.f32 %v715_v32, %v705_v24  ;;  %v800_v57 = vmul.f32 %v7371_v33, %v790_v37  ;;  %v798_v24 = vmul.f32 %v7371_v33, %v788_v0 }
 0x40c   :  { %v748_v46 = vsel %vm12526_vm10, %v737_v41, 0.0  ;;  %v746_v29 = vsel %vm12526_vm10, %v733_v15, 0.0  ;;  %v722_v36 = vadd.f32 %v714_v12, %v704_v5  ;;  %v799_v47 = vmul.f32 %v7371_v33, %v789_v49 }
 0x40d   :  { %v758_v54 = vmul.f32 %v7357_v20, %v748_v46  ;;  %v805_v51 = vadd.f32 %v797_v13, %v763_v16  ;;  %v756_v60 = vmul.f32 %v7357_v20, %v746_v29  ;;  %v816_v16 = vmul.f32 %v7369_v17, %v7086_v52 }
 0x40e   :  { %v817_v52 = vmul.f32 %v7369_v17, %v7105_v48 }
 0x40f   :  { %v766_v43 = vadd.f32 %v758_v54, %v723_v6  ;;  %v7396_v41 = vpop.permute.xlu1 %687  ;;  %v764_v32 = vadd.f32 %v756_v60, %v721_v28  ;;  %v735_v46 = vpop.permute.xlu0 %734  ;;  %v823_v31 = vadd.f32 %v815_v40, %v805_v51  ;;  %v716_v60 = vmul.f32 %v7353_v18, %v7226_v9 }
 0x410   :  { %v747_v29 = vsel %vm12526_vm10, %v735_v46, 0.0  ;;  %v7436_v46 = vstv %s6069_s28  ;;  %s6432_s28 = smov 8  }
 0x411   :  { %v808_v13 = vadd.f32 %v800_v57, %v766_v43  ;;  %v806_v37 = vadd.f32 %v798_v24, %v764_v32  ;;  %v757_v27 = vmul.f32 %v7357_v20, %v747_v29  ;;  %v848_v57 = vsel %vm12526_vm10, %v7335_v11, 0.0 }
 0x412   :  { %v847_v24 = vsel %vm12526_vm10, %v7331_v30, 0.0  ;;  %v791_v32 = vsel %vm674_vm9, %v7333_v44, 0.0  ;;  %v858_v11 = vmul.f32 %v7436_v46, %v848_v57 }
 0x413   :  { %v7411_v51 = vpop.permute.xlu1 %872  ;;  %v7413_v40 = vadd.f32 %v818_v39, %v808_v13  ;;  %v765_v15 = vadd.f32 %v757_v27, %v722_v36  ;;  %v686_v0 = vpop.permute.xlu0 %685  ;;  %v824_v6 = vadd.f32 %v816_v16, %v806_v37  ;;  %v7440_v13 = vstv %s6070_s29  ;;  %s6433_s29 = smov 120  }
 0x414   :  { %v696_v2 = vsel %vm674_vm9, %v686_v0, 0.0  ;;  %v857_v39 = vmul.f32 %v7436_v46, %v847_v24  ;;  %v801_v30 = vmul.f32 %v7371_v33, %v791_v32  ;;  %v7446_v27 = vstv %s6071_s30 }
 0x415   :  { %v807_v54 = vadd.f32 %v799_v47, %v765_v15  ;;  %v706_v5 = vmul.f32 %v7348_v62, %v696_v2  ;;  %v866_v16 = vadd.f32 %v858_v11, %v824_v6  ;;  %v917_v6 = vmul.f32 %v7446_v27, %v7250_v10 }
 0x416   :  { %v865_v2 = vadd.f32 %v857_v39, %v823_v31  ;;  %v7471_v10 = vmul.f32 %v7446_v27, %v7220_v19  ;;  %v786_v19 = vsel %vm674_vm9, %v7325_v14, 0.0  ;;  %v7506_v14 = vmul.f32 %v7446_v27, %v7285_v26 }
 0x417   :  { %v690_v28 = vpop.permute.xlu1 %689  ;;  %v739_v43 = vpop.permute.xlu0 %738  ;;  %v7426_v12 = vadd.f32 %v817_v52, %v807_v54  ;;  %v724_v9 = vadd.f32 %v716_v60, %v706_v5  ;;  %v819_v5 = vmul.f32 %v7369_v17, %v7139_v4  ;;  %v918_v52 = vmul.f32 %v7446_v27, %v7243_v21 }
 0x418   :  { %v749_v48 = vsel %vm12526_vm10, %v739_v43, 0.0  ;;  %v697_v21 = vsel %vm674_vm9, %v7396_v41, 0.0  ;;  %v718_v41 = vmul.f32 %v7353_v18, %v7233_v53 }
 0x419   :  { %v759_v49 = vmul.f32 %v7357_v20, %v749_v48 }
 0x41b   :  { %v877_v29 = vpop.permute.xlu1 %876  ;;  %v767_v36 = vadd.f32 %v759_v49, %v724_v9  ;;  %v875_v37 = vpop.permute.xlu0 %874 }
 0x41c   :  { %v890_v44 = vsel %vm674_vm9, %v877_v29, 0.0  ;;  %v889_v15 = vsel %vm674_vm9, %v875_v37, 0.0  ;;  %v711_v29 = vmul.f32 %v7353_v18, %v7271_v61 }
 0x41d   :  { %v900_v47 = vmul.f32 %v7440_v13, %v890_v44  ;;  %v809_v0 = vadd.f32 %v801_v30, %v767_v36  ;;  %v899_v54 = vmul.f32 %v7440_v13, %v889_v15  ;;  %v814_v30 = vmul.f32 %v7369_v17, %v7038_v42 }
 0x41e   :  { %v7481_v36 = vmul.f32 %v7369_v17, %v7168_v58  ;;  %v717_v44 = vmul.f32 %v7353_v18, %v7209_v22  ;;  %v846_v42 = vsel %vm12526_vm10, %v7327_v45, 0.0  ;;  %v707_v58 = vmul.f32 %v7348_v62, %v697_v21 }
 0x41f   :  { %v908_v60 = vadd.f32 %v900_v47, %v866_v16  ;;  %v879_v57 = vpop.permute.xlu1 %878  ;;  %v907_v43 = vadd.f32 %v899_v54, %v865_v2  ;;  %v741_v24 = vpop.permute.xlu0 %740  ;;  %v7458_v32 = vadd.f32 %v819_v5, %v809_v0  ;;  %v7502_v18 = vmul.f32 %v7446_v27, %v7256_v7 }
 0x420   :  { %v750_v61 = vsel %vm12526_vm10, %v741_v24, 0.0  ;;  %v698_v16 = vsel %vm674_vm9, %v690_v28, 0.0  ;;  %v796_v47 = vmul.f32 %v7371_v33, %v786_v19  ;;  %v7513_v0 = vstv %s6072_s0 }
 0x421   :  { %v7460_v48 = vadd.f32 %v918_v52, %v908_v60  ;;  %v7462_v31 = vadd.f32 %v917_v6, %v907_v43  ;;  %v760_v15 = vmul.f32 %v7357_v20, %v750_v61  ;;  %v820_v7 = vmul.f32 %v7369_v17, %v7146_v3 }
 0x422   :  { %v856_v54 = vmul.f32 %v7436_v46, %v846_v42  ;;  %v792_v60 = vsel %vm674_vm9, %v7337_v55, 0.0  ;;  %v849_v6 = vsel %vm12526_vm10, %v7339_v50, 0.0  ;;  %v725_v43 = vadd.f32 %v717_v44, %v707_v58 }
 0x423   :  { %v935_v9 = vpop.permute.xlu1 %934  ;;  %v743_v49 = vpop.permute.xlu0 %742  ;;  %v708_v3 = vmul.f32 %v7348_v62, %v698_v16  ;;  %v851_v17 = vsel %vm12526_vm10, %v7341_v35, 0.0  ;;  %v850_v24 = vsel %vm12526_vm10, %v7343_v34, 0.0  ;;  %v802_v35 = vmul.f32 %v7371_v33, %v792_v60 }
 0x424   :  { %v751_v26 = vsel %vm12526_vm10, %v743_v49, 0.0  ;;  %v793_v49 = vsel %vm674_vm9, %v7345_v1, 0.0  ;;  %v768_v50 = vadd.f32 %v760_v15, %v725_v43  ;;  %v859_v44 = vmul.f32 %v7436_v46, %v849_v6 }
 0x425   :  { %v761_v21 = vmul.f32 %v7357_v20, %v751_v26  ;;  %v888_v34 = vsel %vm674_vm9, %v7411_v51, 0.0  ;;  %v861_v61 = vmul.f32 %v7436_v46, %v851_v17 }
 0x426   :  { %v810_v51 = vadd.f32 %v802_v35, %v768_v50  ;;  %v867_v15 = vadd.f32 %v859_v44, %v7426_v12 }
 0x427   :  { %v729_v4 = vpop.permute.xlu1 %728  ;;  %v7464_v11 = vpop.permute.xlu0 %932 }
 0x428   :  { %v744_v22 = vsel %vm12526_vm10, %v729_v4, 0.0  ;;  %v891_v4 = vsel %vm674_vm9, %v879_v57, 0.0  ;;  %v860_v57 = vmul.f32 %v7436_v46, %v850_v24  ;;  %v828_v6 = vadd.f32 %v820_v7, %v810_v51 }
 0x429   :  { %v754_v5 = vmul.f32 %v7357_v20, %v744_v22  ;;  %v901_v20 = vmul.f32 %v7440_v13, %v891_v4 }
 0x42b   :  { %v7475_v39 = vpop.permute.xlu1 %936  ;;  %v676_v37 = vpop.permute.xlu0 %675 }
 0x42c   :  { %v691_v53 = vsel %vm674_vm9, %v676_v37, 0.0  ;;  %v803_v37 = vmul.f32 %v7371_v33, %v793_v49  ;;  %v869_v33 = vadd.f32 %v861_v61, %v7458_v32 }
 0x42d   :  { %v701_v45 = vmul.f32 %v7348_v62, %v691_v53  ;;  %v949_v62 = vsel %vm12526_vm10, %v935_v9, 0.0  ;;  %v726_v9 = vadd.f32 %v718_v41, %v708_v3  ;;  %v898_v53 = vmul.f32 %v7440_v13, %v888_v34 }
 0x42e   :  { %v959_v42 = vmul.f32 %v7513_v0, %v949_v62 }
 0x42f   :  { %v883_v2 = vpop.permute.xlu1 %882  ;;  %v719_v28 = vadd.f32 %v711_v29, %v701_v45  ;;  %v881_v52 = vpop.permute.xlu0 %880  ;;  %v769_v16 = vadd.f32 %v761_v21, %v726_v9  ;;  %v868_v45 = vadd.f32 %v860_v57, %v7413_v40 }
 0x430   :  { %v892_v22 = vsel %vm674_vm9, %v881_v52, 0.0  ;;  %v893_v41 = vsel %vm674_vm9, %v883_v2, 0.0  ;;  %v7570_v32 = vadd.f32 %v959_v42, %v7462_v31 }
 0x431   :  { %v762_v55 = vadd.f32 %v754_v5, %v719_v28  ;;  %v950_v28 = vsel %vm12526_vm10, %v7475_v39, 0.0  ;;  %v902_v40 = vmul.f32 %v7440_v13, %v892_v22  ;;  %v811_v60 = vadd.f32 %v803_v37, %v769_v16 }
 0x432   :  { %v960_v17 = vmul.f32 %v7513_v0, %v950_v28  ;;  %v922_v16 = vmul.f32 %v7446_v27, %v7308_v63 }
 0x433   :  { %v845_v29 = vpop.permute.xlu1 %844  ;;  %v804_v1 = vadd.f32 %v796_v47, %v762_v55  ;;  %v843_v19 = vpop.permute.xlu0 %842  ;;  %v910_v55 = vadd.f32 %v902_v40, %v868_v45 }
 0x434   :  { %v852_v12 = vsel %vm12526_vm10, %v843_v19, 0.0  ;;  %v853_v2 = vsel %vm12526_vm10, %v845_v29, 0.0 }
 0x435   :  { %v822_v58 = vadd.f32 %v814_v30, %v804_v1  ;;  %v948_v30 = vsel %vm12526_vm10, %v7464_v11, 0.0  ;;  %v903_v11 = vmul.f32 %v7440_v13, %v893_v41  ;;  %v862_v24 = vmul.f32 %v7436_v46, %v852_v12 }
 0x436   :  { %v958_v3 = vmul.f32 %v7513_v0, %v948_v30  ;;  %v863_v4 = vmul.f32 %v7436_v46, %v853_v2  ;;  %v829_v46 = vadd.f32 %v7481_v36, %v811_v60  ;;  %v968_v1 = vadd.f32 %v960_v17, %v7460_v48 }
 0x437   :  { %v941_v47 = vpop.permute.xlu1 %940  ;;  %v864_v26 = vadd.f32 %v856_v54, %v822_v58  ;;  %v939_v5 = vpop.permute.xlu0 %938  ;;  %v909_v54 = vadd.f32 %v901_v20, %v867_v15  ;;  %v911_v44 = vadd.f32 %v903_v11, %v869_v33  ;;  %v870_v19 = vadd.f32 %v862_v24, %v828_v6 }
 0x438   :  { %v951_v39 = vsel %vm12526_vm10, %v939_v5, 0.0  ;;  %v952_v50 = vsel %vm12526_vm10, %v941_v47, 0.0  ;;  %v871_v9 = vadd.f32 %v863_v4, %v829_v46  ;;  %v923_v48 = vmul.f32 %v7446_v27, %v7317_v59 }
 0x439   :  { %v906_v52 = vadd.f32 %v898_v53, %v864_v26  ;;  %v961_v21 = vmul.f32 %v7513_v0, %v951_v39  ;;  %v927_v34 = vadd.f32 %v7502_v18, %v909_v54  ;;  %v962_v61 = vmul.f32 %v7513_v0, %v952_v50 }
 0x43a   :  { %v929_v51 = vadd.f32 %v7506_v14, %v911_v44 }
 0x43b   :  { %v943_v43 = vpop.permute.xlu1 %942  ;;  %v924_v31 = vadd.f32 %v7471_v10, %v906_v52  ;;  %v885_v49 = vpop.permute.xlu0 %884  ;;  %v920_v10 = vmul.f32 %v7446_v27, %v7291_v38  ;;  %v969_v58 = vadd.f32 %v961_v21, %v927_v34 }
 0x43c   :  { %v894_v7 = vsel %vm674_vm9, %v885_v49, 0.0  ;;  %v953_v29 = vsel %vm12526_vm10, %v943_v43, 0.0 }
 0x43d   :  { %v966_v62 = vadd.f32 %v958_v3, %v924_v31  ;;  %v904_v35 = vmul.f32 %v7440_v13, %v894_v7  ;;  %v928_v20 = vadd.f32 %v920_v10, %v910_v55  ;;  %v963_v42 = vmul.f32 %v7513_v0, %v953_v29 }
 0x43f   :  { %v974_v57 = vadd.f32 %v7570_v32, %v966_v62  ;;  %v887_v37 = vpop.permute.xlu0 %886  ;;  %v912_v36 = vadd.f32 %v904_v35, %v870_v19  ;;  %v947_v53 = vpop.permute.xlu1 %946  ;;  %v970_v45 = vadd.f32 %v962_v61, %v928_v20  ;;  %v971_v33 = vadd.f32 %v963_v42, %v929_v51 }
 0x440   :  { %v895_v38 = vsel %vm674_vm9, %v887_v37, 0.0  ;;  %v955_v41 = vsel %vm12526_vm10, %v947_v53, 0.0  ;;  %v1041_v51 = vstv %s6074_s9  ;;  %s6087_s9 = sld [smem:[#allocation2 + $0x25]] }
 0x441   :  { %v975_v22 = vadd.f32 %v974_v57, %v968_v1  ;;  %v905_v18 = vmul.f32 %v7440_v13, %v895_v38  ;;  %v930_v28 = vadd.f32 %v922_v16, %v912_v36  ;;  %v965_v40 = vmul.f32 %v7513_v0, %v955_v41 }
 0x443   :  { %v976_v47 = vadd.f32 %v975_v22, %v969_v58  ;;  %v913_v15 = vadd.f32 %v905_v18, %v871_v9  ;;  %v945_v26 = vpop.permute.xlu0 %944 }
 0x444   :  { %v954_v5 = vsel %vm12526_vm10, %v945_v26, 0.0  ;;  %vm2784_vm10 = vcmp.lt.s32.totalorder %v6691_v56, 32 }
 0x445   :  { %v977_v13 = vadd.f32 %v976_v47, %v970_v45  ;;  %v931_v30 = vadd.f32 %v923_v48, %v913_v15  ;;  %v964_v59 = vmul.f32 %v7513_v0, %v954_v5 }
 0x447   :  { %v978_v14 = vadd.f32 %v977_v13, %v971_v33  ;;  %v972_v63 = vadd.f32 %v964_v59, %v930_v28  ;;  %v973_v27 = vadd.f32 %v965_v40, %v931_v30 }
 0x449   :  { %v979_v12 = vadd.f32 %v978_v14, %v972_v63 }
 0x44b   :  { %v980_v54 = vadd.f32 %v979_v12, %v973_v27 }
 0x44d   :  { %981 = vadd.xlane.f32.xlu0 %v980_v54 }
 0x4da   :  { %v982_v52 = vpop.xlane.xlu0 %981 }
 0x4db   :  { %v983_v2 = vrot.slane %v982_v52, 4 }
 0x4dd   :  { %v984_v60 = vadd.f32 %v983_v2, %v982_v52 }
 0x4df   :  { %v985_v11 = vrot.slane %v984_v60, 2 }
 0x4e1   :  { %v986_v6 = vadd.f32 %v985_v11, %v984_v60 }
 0x4e3   :  { %v987_v39 = vrot.slane %v986_v6, 1 }
 0x4e5   :  { %v988_v43 = vadd.f32 %v987_v39, %v986_v6 }
 0x4e7   :  { %6202 = vpush %v988_v43 }
 0x518   :  { %s6203_s3 = spop %6202 }
 0x519   :  { %s990_s4 = smul.f32 0.00012207031, %s6203_s3 }
 0x51b   :  { %v991_v3 = vstv %s990_s4  ;;  %s6084_s4 = sld [smem:[#allocation2 + $0x22]] }
 0x51c   :  { %v992_v17 = vsub.f32 %v966_v62, %v991_v3  ;;  %v993_v24 = vsub.f32 %v7570_v32, %v991_v3  ;;  %v994_v0 = vsub.f32 %v968_v1, %v991_v3  ;;  %v995_v31 = vsub.f32 %v969_v58, %v991_v3 }
 0x51d   :  { %v7613_v4 = vsub.f32 %v970_v45, %v991_v3  ;;  %v7615_v21 = vsub.f32 %v971_v33, %v991_v3  ;;  %v998_v10 = vsub.f32 %v972_v63, %v991_v3  ;;  %v999_v62 = vsub.f32 %v973_v27, %v991_v3 }
 0x51e   :  { %v1000_v49 = vmul.f32 %v992_v17, %v992_v17  ;;  %v1001_v55 = vmul.f32 %v993_v24, %v993_v24  ;;  %v1002_v50 = vmul.f32 %v994_v0, %v994_v0  ;;  %v1003_v29 = vmul.f32 %v995_v31, %v995_v31 }
 0x51f   :  { %v1004_v44 = vmul.f32 %v7613_v4, %v7613_v4  ;;  %v1005_v32 = vmul.f32 %v7615_v21, %v7615_v21  ;;  %v1006_v1 = vmul.f32 %v998_v10, %v998_v10  ;;  %v1007_v61 = vmul.f32 %v999_v62, %v999_v62 }
 0x520   :  { %v1008_v7 = vadd.f32 %v1001_v55, %v1000_v49 }
 0x522   :  { %v1009_v35 = vadd.f32 %v1008_v7, %v1002_v50 }
 0x524   :  { %v1010_v46 = vadd.f32 %v1009_v35, %v1003_v29 }
 0x526   :  { %v1011_v34 = vadd.f32 %v1010_v46, %v1004_v44 }
 0x528   :  { %v1012_v19 = vadd.f32 %v1011_v34, %v1005_v32 }
 0x52a   :  { %v1013_v57 = vadd.f32 %v1012_v19, %v1006_v1 }
 0x52c   :  { %v1014_v37 = vadd.f32 %v1013_v57, %v1007_v61  ;;  %v1061_v57 = vand.u32 3, %v7016_v23 }
 0x52e   :  { %1015 = vadd.xlane.f32.xlu1 %v1014_v37  ;;  %vm1069_vm13 = vcmp.lt.s32.totalorder %v1061_v57, 2  ;;  %v12551_v57 = vld [vmem:[#allocation9_spill] sm:$0xff] }
 0x5bb   :  { %v1016_v9 = vpop.xlane.xlu1 %1015 }
 0x5bc   :  { %v1017_v20 = vrot.slane %v1016_v9, 4 }
 0x5be   :  { %v1018_v42 = vadd.f32 %v1017_v20, %v1016_v9 }
 0x5c0   :  { %v1019_v38 = vrot.slane %v1018_v42, 2 }
 0x5c2   :  { %v1020_v58 = vadd.f32 %v1019_v38, %v1018_v42 }
 0x5c4   :  { %v1021_v22 = vrot.slane %v1020_v58, 1 }
 0x5c6   :  { %v1022_v36 = vadd.f32 %v1021_v22, %v1020_v58 }
 0x5c8   :  { %6204 = vpush %v1022_v36 }
 0x5f9   :  { %s6205_s5 = spop %6204 }
 0x5fa   :  { %s1024_s6 = smul.f32 0.00012207031, %s6205_s5  ;;  %s6085_s5 = sld [smem:[#allocation2 + $0x23]] }
 0x5fc   :  { %s1026_s7 = sadd.f32 1e-05, %s1024_s6 }
 0x5fe   :  { %v1027_v53 = vstv %s1026_s7 }
 0x5ff   :  { %6384 = vrsqrt.f32 %v1027_v53 }
 0x609   :  { %v6385_v18 = vpop.eup %6384 }
 0x60a   :  { %6206 = vpush %v6385_v18 }
 0x63b   :  { %s6207_s10 = spop %6206 }
 0x63c   :  { %s1030_s11 = smul.f32 %s6207_s10, %s6073_s8  ;;  %s6086_s8 = sld [smem:[#allocation2 + $0x24]] }
 0x63d   :  { %s6088_s10 = sld [smem:[#allocation2 + $0x26]] }
 0x63e   :  { %v1031_v48 = vstv %s1030_s11  ;;  %s6089_s11 = sld [smem:[#allocation2 + $0x27]] }
 0x63f   :  { %v1033_v16 = vmul.f32 %v1031_v48, %v993_v24  ;;  %v1032_v45 = vmul.f32 %v1031_v48, %v992_v17  ;;  %v1039_v47 = vmul.f32 %v1031_v48, %v999_v62  ;;  %v1038_v15 = vmul.f32 %v1031_v48, %v998_v10 }
 0x640   :  { %v1034_v14 = vmul.f32 %v1031_v48, %v994_v0  ;;  %v1035_v63 = vmul.f32 %v1031_v48, %v995_v31  ;;  %v1036_v54 = vmul.f32 %v1031_v48, %v7613_v4  ;;  %v1037_v60 = vmul.f32 %v1031_v48, %v7615_v21 }
 0x641   :  { %v1043_v26 = vadd.f32 %v1041_v51, %v1033_v16  ;;  %v1042_v33 = vadd.f32 %v1041_v51, %v1032_v45  ;;  %v1049_v13 = vadd.f32 %v1041_v51, %v1039_v47  ;;  %v1048_v30 = vadd.f32 %v1041_v51, %v1038_v15 }
 0x642   :  { %v1044_v40 = vadd.f32 %v1041_v51, %v1034_v14  ;;  %v1045_v12 = vadd.f32 %v1041_v51, %v1035_v63  ;;  %v1046_v2 = vadd.f32 %v1041_v51, %v1036_v54  ;;  %v1047_v6 = vadd.f32 %v1041_v51, %v1037_v60 }
 0x643   :  { %v1051_v41 = vmax.f32 %v1043_v26, 0.0  ;;  %v1050_v5 = vmax.f32 %v1042_v33, 0.0  ;;  %v1057_v28 = vmax.f32 %v1049_v13, 0.0  ;;  %v7623_v59 = vmax.f32 %v1048_v30, 0.0  ;;  %v12544_v30 = vld [vmem:[#allocation6_spill] sm:$0xff] }
 0x644   :  { %v1052_v27 = vmax.f32 %v1044_v40, 0.0  ;;  %v1053_v52 = vmax.f32 %v1045_v12, 0.0  ;;  %v1054_v11 = vmax.f32 %v1046_v2, 0.0  ;;  %v7641_v39 = vmax.f32 %v1047_v6, 0.0  ;;  %v12545_v2 = vld [vmem:[#allocation7_spill] sm:$0xff] }
 0x645   :  { %1078 = vrot.lane.b32.xlu1 %v1051_v41, %s6428_s20  ;;  %1076 = vrot.lane.b32.xlu0 %v1050_v5, %s6428_s20  ;;  %v1058_v17 = vand.u32 3, %v6691_v56  ;;  %v1060_v10 = vand.u32 3, %v6480_v8  ;;  %v1062_v48 = vand.u32 3, %v7024_v25  ;;  %v1064_v60 = vand.u32 3, %v12545_v2 }
 0x647   :  { %vm7648_vm11 = vcmp.lt.s32.totalorder %v1058_v17, 2  ;;  %vm1068_vm12 = vcmp.lt.s32.totalorder %v1060_v10, 2  ;;  %vm1070_vm14 = vcmp.lt.s32.totalorder %v1062_v48, 2 }
 0x649   :  { %1090 = vrot.lane.b32.xlu1 %v1057_v28, %s6428_s20  ;;  %1088 = vrot.lane.b32.xlu0 %v7623_v59, %s6428_s20 }
 0x64d   :  { %1094 = vrot.lane.b32.xlu1 %v1051_v41, %s6427_s19  ;;  %1092 = vrot.lane.b32.xlu0 %v1050_v5, %s6427_s19 }
 0x651   :  { %1106 = vrot.lane.b32.xlu1 %v1057_v28, %s6427_s19  ;;  %1104 = vrot.lane.b32.xlu0 %v7623_v59, %s6427_s19 }
 0x655   :  { %1096 = vrot.lane.b32.xlu1 %v1052_v27, %s6427_s19  ;;  %1080 = vrot.lane.b32.xlu0 %v1052_v27, %s6428_s20 }
 0x659   :  { %1098 = vrot.lane.b32.xlu1 %v1053_v52, %s6427_s19  ;;  %1082 = vrot.lane.b32.xlu0 %v1053_v52, %s6428_s20 }
 0x65d   :  { %1100 = vrot.lane.b32.xlu1 %v1054_v11, %s6427_s19  ;;  %1084 = vrot.lane.b32.xlu0 %v1054_v11, %s6428_s20 }
 0x661   :  { %1102 = vrot.lane.b32.xlu1 %v7641_v39, %s6427_s19  ;;  %1086 = vrot.lane.b32.xlu0 %v7641_v39, %s6428_s20 }
 0x6b7   :  { %v1079_v43 = vpop.permute.xlu1 %1078  ;;  %v1077_v3 = vpop.permute.xlu0 %1076 }
 0x6bb   :  { %v1091_v24 = vpop.permute.xlu1 %1090  ;;  %v1089_v0 = vpop.permute.xlu0 %1088 }
 0x6bf   :  { %v1095_v49 = vpop.permute.xlu1 %1094  ;;  %v1093_v55 = vpop.permute.xlu0 %1092 }
 0x6c0   :  { %v1109_v4 = vsel %vm7648_vm11, %v1079_v43, %v1095_v49  ;;  %v1108_v50 = vsel %vm7648_vm11, %v1077_v3, %v1093_v55 }
 0x6c1   :  { %v1117_v7 = vmax.f32 %v1051_v41, %v1109_v4  ;;  %v7656_v21 = vmax.f32 %v1050_v5, %v1108_v50 }
 0x6c3   :  { %v1107_v29 = vpop.permute.xlu1 %1106  ;;  %v1105_v35 = vpop.permute.xlu0 %1104  ;;  %v1125_v46 = vrot.slane %v1117_v7, 2  ;;  %v1124_v62 = vrot.slane %v7656_v21, 2  ;;  %v1140_v34 = vrot.slane %v7656_v21, 6  ;;  %v1141_v9 = vrot.slane %v1117_v7, 6 }
 0x6c4   :  { %v1115_v44 = vsel %vm7648_vm11, %v1091_v24, %v1107_v29  ;;  %v1114_v14 = vsel %vm7648_vm11, %v1089_v0, %v1105_v35  ;;  %v12546_v0 = vld [vmem:[#allocation8_spill] sm:$0xff] }
 0x6c5   :  { %v7662_v32 = vmax.f32 %v1057_v28, %v1115_v44  ;;  %v1138_v42 = vsel %vm657_vm6, %v1124_v62, %v1125_v46  ;;  %v1154_v15 = vsel %vm624_vm15, %v1140_v34, %v1141_v9  ;;  %v1063_v28 = vand.u32 3, %v12544_v30 }
 0x6c6   :  { %v1122_v6 = vmax.f32 %v7623_v59, %v1114_v14  ;;  %v1065_v49 = vand.u32 3, %v12546_v0 }
 0x6c7   :  { %v1147_v1 = vrot.slane %v7662_v32, 6  ;;  %v1097_v19 = vpop.permute.xlu1 %1096  ;;  %v1081_v61 = vpop.permute.xlu0 %1080 }
 0x6c8   :  { %v1110_v37 = vsel %vm7648_vm11, %v1081_v61, %v1097_v19  ;;  %v1130_v35 = vrot.slane %v1122_v6, 2 }
 0x6c9   :  { %v1118_v20 = vmax.f32 %v1052_v27, %v1110_v37  ;;  %v1155_v38 = vsel %vm624_vm15, %v1147_v1, %v1140_v34  ;;  %v1066_v37 = vand.u32 3, %v12551_v57 }
 0x6ca   :  { %v1156_v58 = vsel %vm1068_vm12, %v1138_v42, %v1155_v38  ;;  %vm1071_vm12 = vcmp.lt.s32.totalorder %v1063_v28, 2  ;;  %v1146_v42 = vrot.slane %v1122_v6, 6 }
 0x6cb   :  { %v1126_v22 = vrot.slane %v1118_v20, 2  ;;  %v1099_v36 = vpop.permute.xlu1 %1098  ;;  %v1083_v53 = vpop.permute.xlu0 %1082  ;;  %v7678_v18 = vmax.f32 %v7656_v21, %v1156_v58  ;;  %v1142_v16 = vrot.slane %v1118_v20, 6 }
 0x6cc   :  { %v1111_v51 = vsel %vm7648_vm11, %v1083_v53, %v1099_v36 }
 0x6cd   :  { %v1119_v45 = vmax.f32 %v1053_v52, %v1111_v51  ;;  %1317 = vrot.lane.b32.xlu1 %v7678_v18, %s6429_s12  ;;  %v1137_v47 = vsel %vm657_vm6, %v1125_v46, %v1126_v22  ;;  %v1153_v54 = vsel %vm624_vm15, %v1141_v9, %v1142_v16  ;;  %v12552_v51 = vld [vmem:[#allocation5_spill] sm:$0xff] }
 0x6ce   :  { %v1157_v26 = vsel %vm1069_vm13, %v1137_v47, %v1154_v15  ;;  %vm7716_vm13 = vcmp.lt.s32.totalorder %v1064_v60, 2  ;;  %v1148_v15 = vsel %vm624_vm15, %v1146_v42, %v1147_v1 }
 0x6cf   :  { %v1127_v33 = vrot.slane %v1119_v45, 2  ;;  %v1101_v41 = vpop.permute.xlu1 %1100  ;;  %v1085_v5 = vpop.permute.xlu0 %1084  ;;  %v7689_v13 = vmax.f32 %v1117_v7, %v1157_v26  ;;  %v1143_v63 = vrot.slane %v1119_v45, 6 }
 0x6d0   :  { %v1112_v40 = vsel %vm7648_vm11, %v1085_v5, %v1101_v41  ;;  %v1180_v41 = vrot.slane %v7678_v18, 4 }
 0x6d1   :  { %v1120_v27 = vmax.f32 %v1054_v11, %v1112_v40  ;;  %1319 = vrot.lane.b32.xlu0 %v7689_v13, %s6429_s12  ;;  %v1136_v12 = vsel %vm657_vm6, %v1126_v22, %v1127_v33  ;;  %v1152_v50 = vsel %vm624_vm15, %v1142_v16, %v1143_v63  ;;  %v1067_v16 = vand.u32 3, %v12552_v51 }
 0x6d2   :  { %v1158_v52 = vsel %vm1070_vm14, %v1136_v12, %v1153_v54  ;;  %vm1074_vm14 = vcmp.lt.s32.totalorder %v1066_v37, 2 }
 0x6d3   :  { %v1128_v43 = vrot.slane %v1120_v27, 2  ;;  %v1103_v3 = vpop.permute.xlu1 %1102  ;;  %v1087_v17 = vpop.permute.xlu0 %1086  ;;  %v7704_v24 = vmax.f32 %v1118_v20, %v1158_v52  ;;  %v1144_v11 = vrot.slane %v1120_v27, 6  ;;  %v1131_v20 = vrot.slane %v7662_v32, 2 }
 0x6d4   :  { %v1113_v55 = vsel %vm7648_vm11, %v1087_v17, %v1103_v3  ;;  %vm7722_vm11 = vcmp.lt.s32.totalorder %v1065_v49, 2 }
 0x6d5   :  { %v1121_v4 = vmax.f32 %v7641_v39, %v1113_v55  ;;  %1321 = vrot.lane.b32.xlu1 %v7704_v24, %s6429_s12  ;;  %v1135_v59 = vsel %vm657_vm6, %v1127_v33, %v1128_v43  ;;  %v1151_v46 = vsel %vm624_vm15, %v1143_v63, %v1144_v11  ;;  %v1132_v53 = vsel %vm657_vm6, %v1130_v35, %v1131_v20 }
 0x6d6   :  { %v1159_v7 = vsel %vm1071_vm12, %v1135_v59, %v1152_v50  ;;  %vm1075_vm12 = vcmp.lt.s32.totalorder %v1067_v16, 2  ;;  %v1139_v47 = vsel %vm657_vm6, %v1131_v20, %v1124_v62  ;;  %v1181_v33 = vrot.slane %v7689_v13, 4 }
 0x6d7   :  { %v1129_v10 = vrot.slane %v1121_v4, 2  ;;  %v1145_v31 = vrot.slane %v1121_v4, 6  ;;  %v7720_v44 = vmax.f32 %v1119_v45, %v1159_v7  ;;  %v1163_v26 = vsel %vm1075_vm12, %v1139_v47, %v1148_v15 }
 0x6d8   :  { %v7782_v21 = vmax.f32 %v7662_v32, %v1163_v26  ;;  %v1182_v1 = vrot.slane %v7704_v24, 4  ;;  %vm1221_vm12 = vcmp.ge.s32.totalorder %v6691_v56, 4  ;;  %v7938_v16 = vstv %s6077_s1  ;;  %s6092_s1 = sld [smem:[#allocation2 + $0x2a]] }
 0x6d9   :  { %v1133_v34 = vsel %vm657_vm6, %v1129_v10, %v1130_v35  ;;  %v1150_v19 = vsel %vm624_vm15, %v1144_v11, %v1145_v31  ;;  %1377 = vrot.lane.b32.xlu1 %v7678_v18, %s6430_s13  ;;  %1323 = vrot.lane.b32.xlu0 %v7720_v44, %s6429_s12  ;;  %v1134_v61 = vsel %vm657_vm6, %v1128_v43, %v1129_v10  ;;  %v1183_v5 = vrot.slane %v7720_v44, 4 }
 0x6da   :  { %v1160_v9 = vsel %vm7716_vm13, %v1134_v61, %v1151_v46  ;;  %v1161_v58 = vsel %vm7722_vm11, %v1133_v34, %v1150_v19  ;;  %v1149_v22 = vsel %vm624_vm15, %v1145_v31, %v1146_v42  ;;  %vm1188_vm13 = vcmp.lt.s32.totalorder %v6480_v8, 4 }
 0x6db   :  { %v7742_v38 = vmax.f32 %v1120_v27, %v1160_v9  ;;  %v7752_v36 = vmax.f32 %v1121_v4, %v1161_v58  ;;  %v1162_v48 = vsel %vm1074_vm14, %v1132_v53, %v1149_v22  ;;  %v7787_v62 = vsel %vm1188_vm13, %v1180_v41, %v1181_v33 }
 0x6dc   :  { %v7761_v45 = vmax.f32 %v1122_v6, %v1162_v48  ;;  %v7797_v32 = vsel %vm1188_vm13, %v1181_v33, %v1182_v1  ;;  %v7801_v28 = vsel %vm1188_vm13, %v1182_v1, %v1183_v5  ;;  %v1187_v52 = vrot.slane %v7782_v21, 4 }
 0x6dd   :  { %1379 = vrot.lane.b32.xlu0 %v7689_v13, %s6430_s13  ;;  %1325 = vrot.lane.b32.xlu1 %v7742_v38, %s6429_s12  ;;  %v1184_v14 = vrot.slane %v7742_v38, 4  ;;  %v1185_v63 = vrot.slane %v7752_v36, 4  ;;  %vm1172_vm11 = vcmp.ge.s32.totalorder %v6480_v8, 4  ;;  %vm1212_vm14 = vcmp.lt.s32.totalorder %v12552_v51, 60 }
 0x6de   :  { %v1186_v27 = vrot.slane %v7761_v45, 4  ;;  %v1196_v6 = vsel %vm1188_vm13, %v1187_v52, %v1180_v41  ;;  %v7928_v42 = vstv %s6075_s14  ;;  %v7934_v53 = vstv %s6076_s15  ;;  %s6090_s14 = sld [smem:[#allocation2 + $0x28]]  ;;  %s6091_s15 = sld [smem:[#allocation2 + $0x29]] }
 0x6df   :  { %v7810_v40 = vsel %vm1188_vm13, %v1183_v5, %v1184_v14  ;;  %v7832_v54 = vsel %vm1188_vm13, %v1184_v14, %v1185_v63  ;;  %v7864_v43 = vsel %vm1172_vm11, %v1196_v6, 0.0  ;;  %v7893_v3 = vsel %vm1212_vm14, %v1196_v6, 0.0 }
 0x6e0   :  { %v7824_v12 = vsel %vm1188_vm13, %v1185_v63, %v1186_v27  ;;  %v7841_v60 = vsel %vm1188_vm13, %v1186_v27, %v1187_v52  ;;  %v1260_v26 = vmul.f32 %v7934_v53, %v7797_v32  ;;  %v1259_v5 = vmul.f32 %v7934_v53, %v7787_v62 }
 0x6e1   :  { %1381 = vrot.lane.b32.xlu0 %v7704_v24, %s6430_s13  ;;  %1327 = vrot.lane.b32.xlu1 %v7752_v36, %s6429_s12 }
 0x6e5   :  { %1383 = vrot.lane.b32.xlu0 %v7720_v44, %s6430_s13  ;;  %1329 = vrot.lane.b32.xlu1 %v7761_v45, %s6429_s12 }
 0x6e9   :  { %1385 = vrot.lane.b32.xlu0 %v7742_v38, %s6430_s13  ;;  %1387 = vrot.lane.b32.xlu1 %v7752_v36, %s6430_s13 }
 0x6ed   :  { %1331 = vrot.lane.b32.xlu0 %v7782_v21, %s6429_s12  ;;  %1224 = vrot.lane.b32.xlu1 %v7787_v62, %s6429_s12 }
 0x6f1   :  { %1226 = vrot.lane.b32.xlu0 %v7797_v32, %s6429_s12  ;;  %1228 = vrot.lane.b32.xlu1 %v7801_v28, %s6429_s12 }
 0x6f5   :  { %1277 = vrot.lane.b32.xlu0 %v7787_v62, %s6430_s13  ;;  %1230 = vrot.lane.b32.xlu1 %v7810_v40, %s6429_s12 }
 0x6f9   :  { %1279 = vrot.lane.b32.xlu0 %v7797_v32, %s6430_s13  ;;  %1283 = vrot.lane.b32.xlu1 %v7810_v40, %s6430_s13 }
 0x6fd   :  { %1281 = vrot.lane.b32.xlu0 %v7801_v28, %s6430_s13  ;;  %1234 = vrot.lane.b32.xlu1 %v7824_v12, %s6429_s12 }
 0x701   :  { %1232 = vrot.lane.b32.xlu0 %v7832_v54, %s6429_s12  ;;  %1419 = vrot.lane.b32.xlu1 %v7787_v62, %s6429_s12 }
 0x705   :  { %1285 = vrot.lane.b32.xlu0 %v7832_v54, %s6430_s13  ;;  %1236 = vrot.lane.b32.xlu1 %v7841_v60, %s6429_s12 }
 0x709   :  { %1421 = vrot.lane.b32.xlu0 %v7797_v32, %s6429_s12  ;;  %1423 = vrot.lane.b32.xlu1 %v7801_v28, %s6429_s12 }
 0x70d   :  { %1287 = vrot.lane.b32.xlu0 %v7824_v12, %s6430_s13  ;;  %1425 = vrot.lane.b32.xlu1 %v7810_v40, %s6429_s12 }
 0x711   :  { %1289 = vrot.lane.b32.xlu0 %v7841_v60, %s6430_s13  ;;  %1481 = vrot.lane.b32.xlu1 %v7797_v32, %s6430_s13 }
 0x715   :  { %1479 = vrot.lane.b32.xlu0 %v7787_v62, %s6430_s13  ;;  %1275 = vrot.lane.b32.xlu1 %v7864_v43, %s6430_s13 }
 0x719   :  { %1222 = vrot.lane.b32.xlu0 %v7864_v43, %s6429_s12  ;;  %1483 = vrot.lane.b32.xlu1 %v7801_v28, %s6430_s13 }
 0x71d   :  { %1427 = vrot.lane.b32.xlu0 %v7832_v54, %s6429_s12  ;;  %1429 = vrot.lane.b32.xlu1 %v7824_v12, %s6429_s12 }
 0x721   :  { %1389 = vrot.lane.b32.xlu0 %v7761_v45, %s6430_s13  ;;  %1391 = vrot.lane.b32.xlu1 %v7782_v21, %s6430_s13 }
 0x725   :  { %1485 = vrot.lane.b32.xlu0 %v7810_v40, %s6430_s13  ;;  %1487 = vrot.lane.b32.xlu1 %v7832_v54, %s6430_s13 }
 0x729   :  { %1431 = vrot.lane.b32.xlu0 %v7841_v60, %s6429_s12  ;;  %1489 = vrot.lane.b32.xlu1 %v7824_v12, %s6430_s13 }
 0x72d   :  { %1433 = vrot.lane.b32.xlu0 %v7893_v3, %s6429_s12  ;;  %1493 = vrot.lane.b32.xlu1 %v7893_v3, %s6430_s13 }
 0x731   :  { %1491 = vrot.lane.b32.xlu0 %v7841_v60, %s6430_s13 }
 0x73f   :  { %v7901_v17 = vpop.permute.xlu1 %1317 }
 0x743   :  { %v1320_v11 = vpop.permute.xlu0 %1319 }
 0x747   :  { %v1322_v49 = vpop.permute.xlu1 %1321 }
 0x748   :  { %v1335_v1 = vsel %vm1221_vm12, %v1322_v49, 0.0 }
 0x74b   :  { %v7903_v55 = vpop.permute.xlu1 %1377  ;;  %v1324_v4 = vpop.permute.xlu0 %1323 }
 0x74f   :  { %v7905_v59 = vpop.permute.xlu1 %1325  ;;  %v7907_v50 = vpop.permute.xlu0 %1379 }
 0x753   :  { %v7909_v7 = vpop.permute.xlu1 %1327  ;;  %v7911_v29 = vpop.permute.xlu0 %1381 }
 0x757   :  { %v7913_v35 = vpop.permute.xlu1 %1329  ;;  %v7915_v10 = vpop.permute.xlu0 %1383 }
 0x75b   :  { %v7917_v31 = vpop.permute.xlu1 %1387  ;;  %v7919_v39 = vpop.permute.xlu0 %1385 }
 0x75f   :  { %v1225_v46 = vpop.permute.xlu1 %1224  ;;  %v7921_v34 = vpop.permute.xlu0 %1331 }
 0x760   :  { %v1239_v58 = vsel %vm1221_vm12, %v1225_v46, 0.0  ;;  %v7956_v46 = vstv %s6078_s16  ;;  %s6093_s16 = sld [smem:[#allocation2 + $0x2b]] }
 0x761   :  { %v1249_v15 = vmul.f32 %v7928_v42, %v1239_v58 }
 0x763   :  { %v1229_v19 = vpop.permute.xlu1 %1228  ;;  %v1227_v61 = vpop.permute.xlu0 %1226  ;;  %v1267_v49 = vadd.f32 %v1259_v5, %v1249_v15 }
 0x764   :  { %v1240_v37 = vsel %vm1221_vm12, %v1227_v61, 0.0  ;;  %v1241_v48 = vsel %vm1221_vm12, %v1229_v19, 0.0  ;;  %v7958_v19 = vstv %s6079_s17  ;;  %v1345_v61 = vmul.f32 %v7956_v46, %v1335_v1  ;;  %s6094_s17 = sld [smem:[#allocation2 + $0x2c]] }
 0x765   :  { %v1250_v22 = vmul.f32 %v7928_v42, %v1240_v37  ;;  %v1251_v63 = vmul.f32 %v7928_v42, %v1241_v48  ;;  %v1261_v37 = vmul.f32 %v7934_v53, %v7801_v28  ;;  %v1336_v48 = vsel %vm1221_vm12, %v1324_v4, 0.0 }
 0x767   :  { %v7926_v9 = vpop.permute.xlu1 %1230  ;;  %v1278_v20 = vpop.permute.xlu0 %1277  ;;  %v1268_v27 = vadd.f32 %v1260_v26, %v1250_v22  ;;  %v1334_v22 = vsel %vm1221_vm12, %v1320_v11, 0.0  ;;  %v1363_v26 = vmul.f32 %v7958_v19, %v7704_v24  ;;  %v1269_v15 = vadd.f32 %v1261_v37, %v1251_v63 }
 0x768   :  { %v1292_v47 = vsel %vm1274_vm5, %v1278_v20, 0.0  ;;  %v1364_v24 = vmul.f32 %v7958_v19, %v7720_v44  ;;  %v1394_v37 = vsel %vm1274_vm5, %v7907_v50, 0.0 }
 0x769   :  { %v1302_v52 = vmul.f32 %v7938_v16, %v1292_v47 }
 0x76b   :  { %v7945_v33 = vpop.permute.xlu1 %1283  ;;  %v1280_v41 = vpop.permute.xlu0 %1279  ;;  %v1310_v1 = vadd.f32 %v1302_v52, %v1267_v49 }
 0x76c   :  { %v1293_v14 = vsel %vm1274_vm5, %v1280_v41, 0.0 }
 0x76d   :  { %v1303_v6 = vmul.f32 %v7938_v16, %v1293_v14 }
 0x76f   :  { %v1311_v20 = vadd.f32 %v1303_v6, %v1268_v27  ;;  %v7963_v58 = vpop.permute.xlu1 %1234  ;;  %v1282_v41 = vpop.permute.xlu0 %1281  ;;  %v1344_v27 = vmul.f32 %v7956_v46, %v1334_v22  ;;  %v1346_v6 = vmul.f32 %v7956_v46, %v1336_v48  ;;  %v7992_v48 = vstv %s6080_s18 }
 0x770   :  { %v1294_v47 = vsel %vm1274_vm5, %v1282_v41, 0.0  ;;  %v1404_v44 = vmul.f32 %v7992_v48, %v1394_v37 }
 0x771   :  { %v1353_v5 = vadd.f32 %v1345_v61, %v1311_v20  ;;  %v1304_v14 = vmul.f32 %v7938_v16, %v1294_v47  ;;  %v1352_v41 = vadd.f32 %v1344_v27, %v1310_v1  ;;  %v1362_v61 = vmul.f32 %v7958_v19, %v7689_v13 }
 0x772   :  { %v1395_v20 = vsel %vm1274_vm5, %v7911_v29, 0.0  ;;  %v7996_v13 = vstv %s6081_s21  ;;  %v8004_v27 = vstv %s6082_s22  ;;  %s6434_s22 = smov 16  }
 0x773   :  { %v1312_v11 = vadd.f32 %v1304_v14, %v1269_v15  ;;  %v7976_v57 = vpop.permute.xlu1 %1419  ;;  %v1233_v4 = vpop.permute.xlu0 %1232  ;;  %v1371_v0 = vadd.f32 %v1363_v26, %v1353_v5  ;;  %v1370_v22 = vadd.f32 %v1362_v61, %v1352_v41  ;;  %v1405_v47 = vmul.f32 %v7992_v48, %v1395_v20 }
 0x774   :  { %v1464_v61 = vmul.f32 %v8004_v27, %v7797_v32  ;;  %v1465_v37 = vmul.f32 %v8004_v27, %v7801_v28 }
 0x775   :  { %v1354_v2 = vadd.f32 %v1346_v6, %v1312_v11  ;;  %v1413_v1 = vadd.f32 %v1405_v47, %v1371_v0  ;;  %v1412_v5 = vadd.f32 %v1404_v44, %v1370_v22  ;;  %v1242_v0 = vsel %vm1221_vm12, %v7926_v9, 0.0 }
 0x776   :  { %v1295_v44 = vsel %vm1274_vm5, %v7945_v33, 0.0  ;;  %v1243_v47 = vsel %vm1221_vm12, %v1233_v4, 0.0  ;;  %v1252_v32 = vmul.f32 %v7928_v42, %v1242_v0  ;;  %v8035_v33 = vmul.f32 %v7958_v19, %v7678_v18 }
 0x777   :  { %v7980_v63 = vpop.permute.xlu1 %1236  ;;  %v1286_v52 = vpop.permute.xlu0 %1285  ;;  %v7984_v49 = vadd.f32 %v1364_v24, %v1354_v2  ;;  %v1258_v4 = vmul.f32 %v7934_v53, %v7864_v43  ;;  %v1265_v43 = vmul.f32 %v7934_v53, %v7841_v60 }
 0x778   :  { %v1296_v9 = vsel %vm1274_vm5, %v1286_v52, 0.0  ;;  %v8043_v52 = vmul.f32 %v7958_v19, %v7782_v21  ;;  %v1337_v21 = vsel %vm1221_vm12, %v7905_v59, 0.0 }
 0x779   :  { %v1306_v18 = vmul.f32 %v7938_v16, %v1296_v9 }
 0x77b   :  { %v1424_v26 = vpop.permute.xlu1 %1423  ;;  %v1422_v15 = vpop.permute.xlu0 %1421 }
 0x77c   :  { %v1437_v2 = vsel %vm1221_vm12, %v1424_v26, 0.0  ;;  %v1436_v50 = vsel %vm1221_vm12, %v1422_v15, 0.0  ;;  %v1262_v15 = vmul.f32 %v7934_v53, %v7810_v40 }
 0x77d   :  { %v1447_v29 = vmul.f32 %v7996_v13, %v1437_v2  ;;  %v1446_v14 = vmul.f32 %v7996_v13, %v1436_v50  ;;  %v1305_v2 = vmul.f32 %v7938_v16, %v1295_v44  ;;  %v1253_v50 = vmul.f32 %v7928_v42, %v1243_v47 }
 0x77e   :  { %v1333_v44 = vsel %vm1221_vm12, %v7901_v17, 0.0  ;;  %v8076_v47 = vstv %s6083_s25  ;;  %s6435_s25 = smov 112  }
 0x77f   :  { %v1455_v6 = vadd.f32 %v1447_v29, %v1413_v1  ;;  %v1454_v11 = vadd.f32 %v1446_v14, %v1412_v5  ;;  %v8006_v41 = vpop.permute.xlu1 %1425  ;;  %v1288_v24 = vpop.permute.xlu0 %1287  ;;  %v1366_v1 = vmul.f32 %v7958_v19, %v7752_v36  ;;  %v8047_v29 = vmul.f32 %v8004_v27, %v7787_v62 }
 0x780   :  { %v1270_v5 = vadd.f32 %v1262_v15, %v1252_v32  ;;  %v1263_v14 = vmul.f32 %v7934_v53, %v7832_v54  ;;  %v1365_v36 = vmul.f32 %v7958_v19, %v7742_v38  ;;  %v1264_v62 = vmul.f32 %v7934_v53, %v7824_v12 }
 0x781   :  { %v8015_v20 = vadd.f32 %v1464_v61, %v1454_v11  ;;  %v8017_v22 = vadd.f32 %v1465_v37, %v1455_v6  ;;  %v8065_v61 = vmul.f32 %v7958_v19, %v7761_v45  ;;  %v1338_v37 = vsel %vm1221_vm12, %v7909_v7, 0.0 }
 0x782   :  { %v1313_v0 = vadd.f32 %v1305_v2, %v1270_v5  ;;  %v1244_v38 = vsel %vm1221_vm12, %v7963_v58, 0.0  ;;  %v1271_v59 = vadd.f32 %v1263_v14, %v1253_v50  ;;  %v8080_v45 = vmul.f32 %v8004_v27, %v7832_v54 }
 0x783   :  { %v8025_v26 = vpop.permute.xlu1 %1481  ;;  %v1290_v28 = vpop.permute.xlu0 %1289  ;;  %v8084_v53 = vmul.f32 %v8004_v27, %v7810_v40  ;;  %v1393_v7 = vsel %vm1274_vm5, %v7903_v55, 0.0  ;;  %v1347_v19 = vmul.f32 %v7956_v46, %v1337_v21  ;;  %v1297_v17 = vsel %vm1274_vm5, %v1288_v24, 0.0 }
 0x784   :  { %v1314_v58 = vadd.f32 %v1306_v18, %v1271_v59  ;;  %v1348_v15 = vmul.f32 %v7956_v46, %v1338_v37  ;;  %v1254_v54 = vmul.f32 %v7928_v42, %v1244_v38  ;;  %v1339_v55 = vsel %vm1221_vm12, %v7913_v35, 0.0 }
 0x785   :  { %v1355_v50 = vadd.f32 %v1347_v19, %v1313_v0  ;;  %v1245_v24 = vsel %vm1221_vm12, %v7980_v63, 0.0  ;;  %v1343_v14 = vmul.f32 %v7956_v46, %v1333_v44  ;;  %v1403_v18 = vmul.f32 %v7992_v48, %v1393_v7 }
 0x786   :  { %v1307_v21 = vmul.f32 %v7938_v16, %v1297_v17  ;;  %v1356_v37 = vadd.f32 %v1348_v15, %v1314_v58  ;;  %v1298_v35 = vsel %vm1274_vm5, %v1290_v28, 0.0  ;;  %v1349_v19 = vmul.f32 %v7956_v46, %v1339_v55 }
 0x787   :  { %v1276_v6 = vpop.permute.xlu1 %1275  ;;  %v8052_v11 = vpop.permute.xlu0 %1479  ;;  %v1398_v44 = vsel %vm1274_vm5, %v7917_v31, 0.0  ;;  %v1272_v7 = vadd.f32 %v1264_v62, %v1254_v54  ;;  %v1397_v58 = vsel %vm1274_vm5, %v7919_v39, 0.0  ;;  %v1340_v28 = vsel %vm1221_vm12, %v7921_v34, 0.0 }
 0x788   :  { %v1291_v40 = vsel %vm1274_vm5, %v1276_v6, 0.0  ;;  %v1396_v6 = vsel %vm1274_vm5, %v7915_v10, 0.0  ;;  %v1255_v10 = vmul.f32 %v7928_v42, %v1245_v24  ;;  %v1373_v17 = vadd.f32 %v1365_v36, %v1355_v50 }
 0x789   :  { %v1301_v0 = vmul.f32 %v7938_v16, %v1291_v40  ;;  %v1315_v15 = vadd.f32 %v1307_v21, %v1272_v7  ;;  %v1496_v31 = vsel %vm1274_vm5, %v8025_v26, 0.0  ;;  %v1406_v62 = vmul.f32 %v7992_v48, %v1396_v6 }
 0x78a   :  { %v1435_v39 = vsel %vm1221_vm12, %v7976_v57, 0.0  ;;  %v1374_v54 = vadd.f32 %v1366_v1, %v1356_v37  ;;  %v1350_v55 = vmul.f32 %v7956_v46, %v1340_v28  ;;  %v1273_v50 = vadd.f32 %v1265_v43, %v1255_v10 }
 0x78b   :  { %v1484_v32 = vpop.permute.xlu1 %1483  ;;  %v1223_v9 = vpop.permute.xlu0 %1222  ;;  %v1445_v1 = vmul.f32 %v7996_v13, %v1435_v39  ;;  %v1414_v21 = vadd.f32 %v1406_v62, %v7984_v49 }
 0x78c   :  { %v1238_v2 = vsel %vm1221_vm12, %v1223_v9, 0.0  ;;  %v1438_v9 = vsel %vm1221_vm12, %v8006_v41, 0.0  ;;  %v1407_v41 = vmul.f32 %v7992_v48, %v1397_v58 }
 0x78d   :  { %v1248_v5 = vmul.f32 %v7928_v42, %v1238_v2  ;;  %v1308_v42 = vmul.f32 %v7938_v16, %v1298_v35  ;;  %v1408_v2 = vmul.f32 %v7992_v48, %v1398_v44  ;;  %v1448_v26 = vmul.f32 %v7996_v13, %v1438_v9 }
 0x78e   :  { %v1506_v16 = vmul.f32 %v8076_v47, %v1496_v31  ;;  %v1415_v6 = vadd.f32 %v1407_v41, %v1373_v17 }
 0x78f   :  { %v1266_v38 = vadd.f32 %v1258_v4, %v1248_v5  ;;  %v1430_v63 = vpop.permute.xlu1 %1429  ;;  %v1428_v59 = vpop.permute.xlu0 %1427  ;;  %v1357_v5 = vadd.f32 %v1349_v19, %v1315_v15  ;;  %v1416_v35 = vadd.f32 %v1408_v2, %v1374_v54  ;;  %v1456_v49 = vadd.f32 %v1448_v26, %v1414_v21 }
 0x790   :  { %v1439_v57 = vsel %vm1221_vm12, %v1428_v59, 0.0  ;;  %v1440_v46 = vsel %vm1221_vm12, %v1430_v63, 0.0 }
 0x791   :  { %v1309_v4 = vadd.f32 %v1301_v0, %v1266_v38  ;;  %v1497_v38 = vsel %vm1274_vm5, %v1484_v32, 0.0  ;;  %v1449_v59 = vmul.f32 %v7996_v13, %v1439_v57  ;;  %v1450_v10 = vmul.f32 %v7996_v13, %v1440_v46 }
 0x792   :  { %v1507_v28 = vmul.f32 %v8076_v47, %v1497_v38 }
 0x793   :  { %v1351_v34 = vadd.f32 %v1343_v14, %v1309_v4  ;;  %v1392_v36 = vpop.permute.xlu1 %1391  ;;  %v1390_v40 = vpop.permute.xlu0 %1389  ;;  %v1316_v14 = vadd.f32 %v1308_v42, %v1273_v50  ;;  %v1457_v15 = vadd.f32 %v1449_v59, %v1415_v6 }
 0x794   :  { %v1399_v19 = vsel %vm1274_vm5, %v1390_v40, 0.0  ;;  %v1400_v63 = vsel %vm1274_vm5, %v1392_v36, 0.0  ;;  %v1474_v40 = vadd.f32 %v8084_v53, %v1456_v49  ;;  %v1515_v2 = vadd.f32 %v1507_v28, %v8017_v22 }
 0x795   :  { %v1369_v24 = vadd.f32 %v8035_v33, %v1351_v34  ;;  %v1495_v33 = vsel %vm1274_vm5, %v8052_v11, 0.0  ;;  %v1358_v7 = vadd.f32 %v1350_v55, %v1316_v14  ;;  %v1375_v11 = vadd.f32 %v8065_v61, %v1357_v5 }
 0x796   :  { %v1505_v58 = vmul.f32 %v8076_v47, %v1495_v33  ;;  %v1409_v4 = vmul.f32 %v7992_v48, %v1399_v19  ;;  %v1410_v31 = vmul.f32 %v7992_v48, %v1400_v63  ;;  %v1468_v48 = vmul.f32 %v8004_v27, %v7824_v12 }
 0x797   :  { %v1411_v37 = vadd.f32 %v1403_v18, %v1369_v24  ;;  %v1488_v43 = vpop.permute.xlu1 %1487  ;;  %v1486_v0 = vpop.permute.xlu0 %1485  ;;  %v8157_v18 = vadd.f32 %v1506_v16, %v8015_v20  ;;  %v1376_v36 = vadd.f32 %v8043_v52, %v1358_v7  ;;  %v1475_v24 = vadd.f32 %v8080_v45, %v1457_v15 }
 0x798   :  { %v1498_v32 = vsel %vm1274_vm5, %v1486_v0, 0.0  ;;  %v1499_v42 = vsel %vm1274_vm5, %v1488_v43, 0.0  ;;  %v1417_v41 = vadd.f32 %v1409_v4, %v1375_v11  ;;  %v1470_v14 = vmul.f32 %v8004_v27, %v7893_v3 }
 0x799   :  { %v1453_v44 = vadd.f32 %v1445_v1, %v1411_v37  ;;  %v1508_v39 = vmul.f32 %v8076_v47, %v1498_v32  ;;  %v1509_v55 = vmul.f32 %v8076_v47, %v1499_v42  ;;  %v1418_v16 = vadd.f32 %v1410_v31, %v1376_v36 }
 0x79a   :  { %v1469_v45 = vmul.f32 %v8004_v27, %v7841_v60 }
 0x79b   :  { %v1471_v20 = vadd.f32 %v8047_v29, %v1453_v44  ;;  %v1490_v17 = vpop.permute.xlu1 %1489  ;;  %v1432_v9 = vpop.permute.xlu0 %1431  ;;  %v1458_v29 = vadd.f32 %v1450_v10, %v1416_v35  ;;  %v1516_v1 = vadd.f32 %v1508_v39, %v1474_v40  ;;  %v1517_v21 = vadd.f32 %v1509_v55, %v1475_v24 }
 0x79c   :  { %v1441_v61 = vsel %vm1221_vm12, %v1432_v9, 0.0  ;;  %v1500_v34 = vsel %vm1274_vm5, %v1490_v17, 0.0 }
 0x79d   :  { %v1513_v62 = vadd.f32 %v1505_v58, %v1471_v20  ;;  %v1451_v54 = vmul.f32 %v7996_v13, %v1441_v61  ;;  %v1510_v57 = vmul.f32 %v8076_v47, %v1500_v34  ;;  %v1476_v6 = vadd.f32 %v1468_v48, %v1458_v29 }
 0x79f   :  { %v1521_v50 = vadd.f32 %v8157_v18, %v1513_v62  ;;  %v1434_v26 = vpop.permute.xlu0 %1433  ;;  %v1459_v5 = vadd.f32 %v1451_v54, %v1417_v41  ;;  %v1494_v12 = vpop.permute.xlu1 %1493  ;;  %v1518_v43 = vadd.f32 %v1510_v57, %v1476_v6 }
 0x7a0   :  { %v1442_v52 = vsel %vm1221_vm12, %v1434_v26, 0.0  ;;  %v1502_v0 = vsel %vm1274_vm5, %v1494_v12, 0.0 }
 0x7a1   :  { %v1522_v53 = vadd.f32 %v1521_v50, %v1515_v2  ;;  %v1452_v22 = vmul.f32 %v7996_v13, %v1442_v52  ;;  %v1477_v59 = vadd.f32 %v1469_v45, %v1459_v5  ;;  %v1512_v49 = vmul.f32 %v8076_v47, %v1502_v0 }
 0x7a3   :  { %v1523_v37 = vadd.f32 %v1522_v53, %v1516_v1  ;;  %v1460_v35 = vadd.f32 %v1452_v22, %v1418_v16  ;;  %v1492_v46 = vpop.permute.xlu0 %1491 }
 0x7a4   :  { %v1501_v33 = vsel %vm1274_vm5, %v1492_v46, 0.0 }
 0x7a5   :  { %v1524_v38 = vadd.f32 %v1523_v37, %v1517_v21  ;;  %v1478_v13 = vadd.f32 %v1470_v14, %v1460_v35  ;;  %v1511_v3 = vmul.f32 %v8076_v47, %v1501_v33  ;;  %v1588_v35 = vstv %s6085_s5 }
 0x7a7   :  { %v1525_v19 = vadd.f32 %v1524_v38, %v1518_v43  ;;  %v1519_v44 = vadd.f32 %v1511_v3, %v1477_v59  ;;  %v1520_v63 = vadd.f32 %v1512_v49, %v1478_v13 }
 0x7a9   :  { %v1526_v7 = vadd.f32 %v1525_v19, %v1519_v44 }
 0x7ab   :  { %v1527_v60 = vadd.f32 %v1526_v7, %v1520_v63 }
 0x7ad   :  { %1528 = vadd.xlane.f32.xlu0 %v1527_v60 }
 0x83a   :  { %v1529_v27 = vpop.xlane.xlu0 %1528 }
 0x83b   :  { %v1530_v10 = vrot.slane %v1529_v27, 4 }
 0x83d   :  { %v1531_v11 = vadd.f32 %v1530_v10, %v1529_v27 }
 0x83f   :  { %v1532_v32 = vrot.slane %v1531_v11, 2 }
 0x841   :  { %v1533_v58 = vadd.f32 %v1532_v32, %v1531_v11 }
 0x843   :  { %v1534_v28 = vrot.slane %v1533_v58, 1 }
 0x845   :  { %v1535_v4 = vadd.f32 %v1534_v28, %v1533_v58 }
 0x847   :  { %6208 = vpush %v1535_v4 }
 0x878   :  { %s6209_s26 = spop %6208 }
 0x879   :  { %s1537_s27 = smul.f32 0.00012207031, %s6209_s26 }
 0x87b   :  { %v1538_v20 = vstv %s1537_s27 }
 0x87c   :  { %v1539_v17 = vsub.f32 %v1513_v62, %v1538_v20  ;;  %v1540_v9 = vsub.f32 %v8157_v18, %v1538_v20  ;;  %v1541_v47 = vsub.f32 %v1515_v2, %v1538_v20  ;;  %v8201_v15 = vsub.f32 %v1516_v1, %v1538_v20 }
 0x87d   :  { %v8203_v61 = vsub.f32 %v1517_v21, %v1538_v20  ;;  %v8205_v54 = vsub.f32 %v1518_v43, %v1538_v20  ;;  %v8209_v40 = vsub.f32 %v1519_v44, %v1538_v20  ;;  %v1546_v48 = vsub.f32 %v1520_v63, %v1538_v20 }
 0x87e   :  { %v1547_v31 = vmul.f32 %v1539_v17, %v1539_v17  ;;  %v1548_v42 = vmul.f32 %v1540_v9, %v1540_v9  ;;  %v1549_v39 = vmul.f32 %v1541_v47, %v1541_v47  ;;  %v1550_v29 = vmul.f32 %v8201_v15, %v8201_v15 }
 0x87f   :  { %v1551_v18 = vmul.f32 %v8203_v61, %v8203_v61  ;;  %v1552_v2 = vmul.f32 %v8205_v54, %v8205_v54  ;;  %v1553_v55 = vmul.f32 %v8209_v40, %v8209_v40  ;;  %v1554_v26 = vmul.f32 %v1546_v48, %v1546_v48 }
 0x880   :  { %v1555_v34 = vadd.f32 %v1548_v42, %v1547_v31  ;;  %v6431_v1 = vmov 0.0   ;;  %v1605_v31 = vand.u32 7, %v6691_v56 }
 0x881   :  { %1736 = vrot.lane.b32.xlu0 %v6431_v1, %s6432_s28 }
 0x882   :  { %v1556_v36 = vadd.f32 %v1555_v34, %v1549_v39  ;;  %vm8258_vm4 = vcmp.lt.s32.totalorder %v1605_v31, 4 }
 0x884   :  { %v1557_v62 = vadd.f32 %v1556_v36, %v1550_v29  ;;  %v1607_v36 = vand.u32 7, %v6480_v8 }
 0x885   :  { %1947 = vrot.lane.b32.xlu0 %v6431_v1, %s6432_s28 }
 0x886   :  { %v1558_v41 = vadd.f32 %v1557_v62, %v1551_v18  ;;  %vm1615_vm3 = vcmp.lt.s32.totalorder %v1607_v36, 4 }
 0x888   :  { %v1559_v50 = vadd.f32 %v1558_v41, %v1552_v2 }
 0x88a   :  { %v1560_v16 = vadd.f32 %v1559_v50, %v1553_v55 }
 0x88c   :  { %v1561_v24 = vadd.f32 %v1560_v16, %v1554_v26 }
 0x88e   :  { %1562 = vadd.xlane.f32.xlu1 %v1561_v24 }
 0x89f   :  { %1789 = vrot.lane.b32.xlu1 %v6431_v1, %s6433_s29 }
 0x91b   :  { %v1563_v57 = vpop.xlane.xlu1 %1562 }
 0x91c   :  { %v1564_v52 = vrot.slane %v1563_v57, 4 }
 0x91e   :  { %v1565_v53 = vadd.f32 %v1564_v52, %v1563_v57  ;;  %v1608_v57 = vand.u32 7, %v7016_v23 }
 0x920   :  { %v1566_v5 = vrot.slane %v1565_v53, 2  ;;  %vm1616_vm1 = vcmp.lt.s32.totalorder %v1608_v57, 4 }
 0x922   :  { %v1567_v12 = vadd.f32 %v1566_v5, %v1565_v53 }
 0x924   :  { %v1568_v22 = vrot.slane %v1567_v12, 1 }
 0x926   :  { %v1569_v14 = vadd.f32 %v1568_v22, %v1567_v12 }
 0x928   :  { %6210 = vpush %v1569_v14 }
 0x959   :  { %s6211_s30 = spop %6210 }
 0x95a   :  { %s1571_s0 = smul.f32 0.00012207031, %s6211_s30 }
 0x95c   :  { %s1573_s3 = sadd.f32 1e-05, %s1571_s0  ;;  %s6095_s0 = sld [smem:[#allocation2 + $0x2e]] }
 0x95e   :  { %v1574_v6 = vstv %s1573_s3  ;;  %s6096_s3 = sld [smem:[#allocation2 + $0x2f]] }
 0x95f   :  { %6386 = vrsqrt.f32 %v1574_v6 }
 0x969   :  { %v6387_v21 = vpop.eup %6386 }
 0x96a   :  { %6212 = vpush %v6387_v21 }
 0x99b   :  { %s6213_s6 = spop %6212 }
 0x99c   :  { %s1577_s7 = smul.f32 %s6213_s6, %s6084_s4  ;;  %s6097_s6 = sld [smem:[#allocation2 + $0x30]] }
 0x99e   :  { %v1578_v37 = vstv %s1577_s7  ;;  %s6098_s7 = sld [smem:[#allocation2 + $0x31]] }
 0x99f   :  { %v1580_v45 = vmul.f32 %v1578_v37, %v1540_v9  ;;  %v1579_v46 = vmul.f32 %v1578_v37, %v1539_v17  ;;  %v1586_v43 = vmul.f32 %v1578_v37, %v1546_v48  ;;  %v1581_v19 = vmul.f32 %v1578_v37, %v1541_v47  ;;  %v8251_v9 = vpop.permute.xlu0 %1736 }
 0x9a0   :  { %v1582_v44 = vmul.f32 %v1578_v37, %v8201_v15  ;;  %v1583_v60 = vmul.f32 %v1578_v37, %v8203_v61  ;;  %v1584_v11 = vmul.f32 %v1578_v37, %v8205_v54  ;;  %v1585_v28 = vmul.f32 %v1578_v37, %v8209_v40  ;;  %v8255_v15 = vpop.permute.xlu1 %1789 }
 0x9a1   :  { %v1590_v0 = vadd.f32 %v1588_v35, %v1580_v45  ;;  %v1589_v33 = vadd.f32 %v1588_v35, %v1579_v46  ;;  %v1596_v59 = vadd.f32 %v1588_v35, %v1586_v43  ;;  %v1591_v49 = vadd.f32 %v1588_v35, %v1581_v19 }
 0x9a2   :  { %v1592_v7 = vadd.f32 %v1588_v35, %v1582_v44  ;;  %v1593_v10 = vadd.f32 %v1588_v35, %v1583_v60  ;;  %v1594_v58 = vadd.f32 %v1588_v35, %v1584_v11  ;;  %v1595_v20 = vadd.f32 %v1588_v35, %v1585_v28 }
 0x9a3   :  { %v1598_v38 = vmax.f32 %v1590_v0, 0.0  ;;  %v1597_v13 = vmax.f32 %v1589_v33, 0.0  ;;  %v1604_v3 = vmax.f32 %v1596_v59, 0.0  ;;  %v1599_v63 = vmax.f32 %v1591_v49, 0.0  ;;  %v8253_v47 = vpop.permute.xlu0 %1947 }
 0x9a4   :  { %v1600_v27 = vmax.f32 %v1592_v7, 0.0  ;;  %v1601_v32 = vmax.f32 %v1593_v10, 0.0  ;;  %v8239_v4 = vmax.f32 %v1594_v58, 0.0  ;;  %v8245_v17 = vmax.f32 %v1595_v20, 0.0 }
 0x9a5   :  { %1625 = vrot.lane.b32.xlu1 %v1598_v38, %s6430_s13  ;;  %1623 = vrot.lane.b32.xlu0 %v1597_v13, %s6430_s13  ;;  %v1609_v35 = vand.u32 7, %v7024_v25  ;;  %v1610_v19 = vand.u32 7, %v12544_v30 }
 0x9a9   :  { %1639 = vrot.lane.b32.xlu1 %v1597_v13, %s6429_s12  ;;  %1637 = vrot.lane.b32.xlu0 %v1604_v3, %s6430_s13 }
 0x9ad   :  { %1653 = vrot.lane.b32.xlu1 %v1604_v3, %s6429_s12  ;;  %1641 = vrot.lane.b32.xlu0 %v1598_v38, %s6429_s12 }
 0x9b1   :  { %1643 = vrot.lane.b32.xlu1 %v1599_v63, %s6429_s12  ;;  %1627 = vrot.lane.b32.xlu0 %v1599_v63, %s6430_s13 }
 0x9b5   :  { %1645 = vrot.lane.b32.xlu1 %v1600_v27, %s6429_s12  ;;  %1629 = vrot.lane.b32.xlu0 %v1600_v27, %s6430_s13 }
 0x9b9   :  { %1647 = vrot.lane.b32.xlu1 %v1601_v32, %s6429_s12  ;;  %1631 = vrot.lane.b32.xlu0 %v1601_v32, %s6430_s13 }
 0x9bd   :  { %1649 = vrot.lane.b32.xlu1 %v8239_v4, %s6429_s12  ;;  %1633 = vrot.lane.b32.xlu0 %v8239_v4, %s6430_s13 }
 0x9c1   :  { %1651 = vrot.lane.b32.xlu1 %v8245_v17, %s6429_s12  ;;  %1635 = vrot.lane.b32.xlu0 %v8245_v17, %s6430_s13 }
 0xa17   :  { %v1626_v42 = vpop.permute.xlu1 %1625  ;;  %v1624_v61 = vpop.permute.xlu0 %1623 }
 0xa1b   :  { %v1640_v34 = vpop.permute.xlu1 %1639  ;;  %v1638_v54 = vpop.permute.xlu0 %1637 }
 0xa1c   :  { %v1655_v29 = vsel %vm8258_vm4, %v1624_v61, %v1640_v34 }
 0xa1d   :  { %v1663_v40 = vmax.f32 %v1597_v13, %v1655_v29 }
 0xa1f   :  { %v1654_v18 = vpop.permute.xlu1 %1653  ;;  %v1642_v62 = vpop.permute.xlu0 %1641  ;;  %v1671_v50 = vrot.slane %v1663_v40, 4 }
 0xa20   :  { %v1662_v48 = vsel %vm8258_vm4, %v1638_v54, %v1654_v18  ;;  %v1656_v2 = vsel %vm8258_vm4, %v1626_v42, %v1642_v62  ;;  %v12555_v42 = vld [vmem:[#allocation7_spill] sm:$0xff]  ;;  %v12556_v62 = vld [vmem:[#allocation8_spill] sm:$0xff] }
 0xa21   :  { %v8269_v41 = vmax.f32 %v1604_v3, %v1662_v48  ;;  %v1664_v55 = vmax.f32 %v1598_v38, %v1656_v2  ;;  %v1611_v61 = vand.u32 7, %v12555_v42  ;;  %v1612_v48 = vand.u32 7, %v12556_v62 }
 0xa23   :  { %v1678_v26 = vrot.slane %v8269_v41, 4  ;;  %v1672_v16 = vrot.slane %v1664_v55, 4  ;;  %v1644_v24 = vpop.permute.xlu1 %1643  ;;  %v1628_v52 = vpop.permute.xlu0 %1627  ;;  %vm1619_vm2 = vcmp.lt.s32.totalorder %v1611_v61, 4 }
 0xa24   :  { %v1657_v53 = vsel %vm8258_vm4, %v1628_v52, %v1644_v24 }
 0xa25   :  { %v1686_v5 = vsel %vm1188_vm13, %v1678_v26, %v1671_v50  ;;  %v1685_v12 = vsel %vm1188_vm13, %v1671_v50, %v1672_v16  ;;  %v1665_v22 = vmax.f32 %v1599_v63, %v1657_v53 }
 0xa26   :  { %v1687_v14 = vsel %vm1615_vm3, %v1685_v12, %v1686_v5  ;;  %vm1617_vm3 = vcmp.lt.s32.totalorder %v1609_v35, 4 }
 0xa27   :  { %v8279_v6 = vmax.f32 %v1663_v40, %v1687_v14  ;;  %v1673_v21 = vrot.slane %v1665_v22, 4  ;;  %v1646_v37 = vpop.permute.xlu1 %1645  ;;  %v1630_v23 = vpop.permute.xlu0 %1629  ;;  %v8418_v14 = vstv %s6086_s8  ;;  %s6099_s8 = sld [smem:[#allocation2 + $0x32]] }
 0xa28   :  { %v1658_v45 = vsel %vm8258_vm4, %v1630_v23, %v1646_v37 }
 0xa29   :  { %v1684_v46 = vsel %vm1188_vm13, %v1672_v16, %v1673_v21  ;;  %v1666_v43 = vmax.f32 %v1600_v27, %v1658_v45  ;;  %1738 = vrot.lane.b32.xlu1 %v8279_v6, %s6432_s28  ;;  %v8423_v45 = vstv %s6087_s9  ;;  %s6100_s9 = sld [smem:[#allocation2 + $0x33]] }
 0xa2a   :  { %v1688_v0 = vsel %vm1616_vm1, %v1684_v46, %v1685_v12  ;;  %vm1618_vm1 = vcmp.lt.s32.totalorder %v1610_v19, 4 }
 0xa2b   :  { %v8288_v33 = vmax.f32 %v1664_v55, %v1688_v0  ;;  %v1674_v38 = vrot.slane %v1666_v43, 4  ;;  %v1648_v13 = vpop.permute.xlu1 %1647  ;;  %v1632_v59 = vpop.permute.xlu0 %1631  ;;  %v1773_v0 = vmul.f32 %v8423_v45, %v8279_v6 }
 0xa2c   :  { %v1659_v25 = vsel %vm8258_vm4, %v1632_v59, %v1648_v13 }
 0xa2d   :  { %v1683_v3 = vsel %vm1188_vm13, %v1673_v21, %v1674_v38  ;;  %v1667_v49 = vmax.f32 %v1601_v32, %v1659_v25  ;;  %1740 = vrot.lane.b32.xlu0 %v8288_v33, %s6432_s28  ;;  %v1614_v32 = vand.u32 7, %v12552_v51 }
 0xa2e   :  { %v1689_v44 = vsel %vm1617_vm3, %v1683_v3, %v1684_v46  ;;  %v8425_v46 = vstv %s6088_s10  ;;  %s6101_s10 = sld [smem:[#allocation2 + $0x34]] }
 0xa2f   :  { %v8297_v63 = vmax.f32 %v1665_v22, %v1689_v44  ;;  %v1675_v7 = vrot.slane %v1667_v49, 4  ;;  %v1650_v60 = vpop.permute.xlu1 %1649  ;;  %v1634_v27 = vpop.permute.xlu0 %1633  ;;  %vm1622_vm3 = vcmp.lt.s32.totalorder %v1614_v32, 4 }
 0xa30   :  { %v1660_v10 = vsel %vm8258_vm4, %v1634_v27, %v1650_v60 }
 0xa31   :  { %v1682_v11 = vsel %vm1188_vm13, %v1674_v38, %v1675_v7  ;;  %v1668_v58 = vmax.f32 %v8239_v4, %v1660_v10  ;;  %1791 = vrot.lane.b32.xlu0 %v8279_v6, %s6433_s29  ;;  %1742 = vrot.lane.b32.xlu1 %v8297_v63, %s6432_s28 }
 0xa32   :  { %v1690_v20 = vsel %vm1618_vm1, %v1682_v11, %v1683_v3  ;;  %vm1735_vm1 = vcmp.ge.s32.totalorder %v6691_v56, 8 }
 0xa33   :  { %v1652_v30 = vpop.permute.xlu1 %1651  ;;  %v1636_v28 = vpop.permute.xlu0 %1635  ;;  %v1676_v34 = vrot.slane %v1668_v58, 4  ;;  %v8317_v4 = vmax.f32 %v1666_v43, %v1690_v20 }
 0xa34   :  { %v1661_v31 = vsel %vm8258_vm4, %v1636_v28, %v1652_v30  ;;  %vm1620_vm4 = vcmp.lt.s32.totalorder %v1612_v48, 4 }
 0xa35   :  { %v1669_v54 = vmax.f32 %v8245_v17, %v1661_v31  ;;  %1793 = vrot.lane.b32.xlu0 %v8288_v33, %s6433_s29  ;;  %1831 = vrot.lane.b32.xlu1 %v8279_v6, %s6432_s28  ;;  %v1681_v39 = vsel %vm1188_vm13, %v1675_v7, %v1676_v34  ;;  %v1774_v7 = vmul.f32 %v8423_v45, %v8288_v33 }
 0xa36   :  { %v1691_v18 = vsel %vm1619_vm2, %v1681_v39, %v1682_v11  ;;  %v8443_v11 = vstv %s6090_s14  ;;  %s6103_s14 = sld [smem:[#allocation2 + $0x36]] }
 0xa37   :  { %v1677_v29 = vrot.slane %v1669_v54, 4  ;;  %v8335_v2 = vmax.f32 %v1667_v49, %v1691_v18  ;;  %v8435_v49 = vstv %s6089_s11  ;;  %v1876_v20 = vmul.f32 %v8443_v11, %v8288_v33  ;;  %s6102_s11 = sld [smem:[#allocation2 + $0x35]] }
 0xa38   :  { %v1877_v48 = vmul.f32 %v8443_v11, %v8297_v63 }
 0xa39   :  { %v1679_v36 = vsel %vm1188_vm13, %v1677_v29, %v1678_v26  ;;  %1833 = vrot.lane.b32.xlu0 %v8288_v33, %s6432_s28  ;;  %1744 = vrot.lane.b32.xlu1 %v8317_v4, %s6432_s28  ;;  %v1680_v55 = vsel %vm1188_vm13, %v1676_v34, %v1677_v29  ;;  %v12557_v26 = vld [vmem:[#allocation9_spill] sm:$0xff]  ;;  %v1752_v29 = vsel %vm1735_vm1, %v8251_v9, 0.0 }
 0xa3a   :  { %v1694_v17 = vsel %vm1622_vm3, %v1686_v5, %v1679_v36  ;;  %v1613_v16 = vand.u32 7, %v12557_v26  ;;  %vm1788_vm3 = vcmp.lt.s32.totalorder %v6691_v56, 56  ;;  %v1775_v26 = vmul.f32 %v8423_v45, %v8297_v63 }
 0xa3b   :  { %v8328_v40 = vmax.f32 %v8269_v41, %v1694_v17  ;;  %v1692_v41 = vsel %vm1620_vm4, %v1680_v55, %v1681_v39 }
 0xa3c   :  { %v8347_v50 = vmax.f32 %v1668_v58, %v1692_v41  ;;  %vm1621_vm2 = vcmp.lt.s32.totalorder %v1613_v16, 4  ;;  %v1762_v41 = vmul.f32 %v8418_v14, %v1752_v29 }
 0xa3d   :  { %1795 = vrot.lane.b32.xlu0 %v8297_v63, %s6433_s29  ;;  %1835 = vrot.lane.b32.xlu1 %v8297_v63, %s6432_s28  ;;  %v1693_v24 = vsel %vm1621_vm2, %v1679_v36, %v1680_v55  ;;  %v1772_v55 = vmul.f32 0.0, %v8423_v45  ;;  %vm2233_vm2 = vcmp.ge.s32.totalorder %v6691_v56, 16 }
 0xa3e   :  { %v8362_v57 = vmax.f32 %v1669_v54, %v1693_v24  ;;  %v1805_v24 = vsel %vm1788_vm3, %v8255_v15, 0.0 }
 0xa41   :  { %1797 = vrot.lane.b32.xlu1 %v8317_v4, %s6433_s29  ;;  %1746 = vrot.lane.b32.xlu0 %v8335_v2, %s6432_s28 }
 0xa45   :  { %1891 = vrot.lane.b32.xlu1 %v8279_v6, %s6433_s29  ;;  %1837 = vrot.lane.b32.xlu0 %v8317_v4, %s6432_s28 }
 0xa49   :  { %1893 = vrot.lane.b32.xlu0 %v8288_v33, %s6433_s29  ;;  %1748 = vrot.lane.b32.xlu1 %v8347_v50, %s6432_s28 }
 0xa4d   :  { %1799 = vrot.lane.b32.xlu0 %v8335_v2, %s6433_s29  ;;  %1839 = vrot.lane.b32.xlu1 %v8335_v2, %s6432_s28 }
 0xa51   :  { %1895 = vrot.lane.b32.xlu0 %v8297_v63, %s6433_s29  ;;  %1933 = vrot.lane.b32.xlu1 %v8288_v33, %s6432_s28 }
 0xa55   :  { %1935 = vrot.lane.b32.xlu0 %v8297_v63, %s6432_s28  ;;  %1750 = vrot.lane.b32.xlu1 %v8362_v57, %s6432_s28 }
 0xa59   :  { %1801 = vrot.lane.b32.xlu0 %v8347_v50, %s6433_s29  ;;  %1841 = vrot.lane.b32.xlu1 %v8347_v50, %s6432_s28 }
 0xa5d   :  { %1897 = vrot.lane.b32.xlu0 %v8317_v4, %s6433_s29  ;;  %1937 = vrot.lane.b32.xlu1 %v8317_v4, %s6432_s28 }
 0xa61   :  { %1803 = vrot.lane.b32.xlu0 %v8362_v57, %s6433_s29  ;;  %1843 = vrot.lane.b32.xlu1 %v8362_v57, %s6432_s28 }
 0xa65   :  { %1899 = vrot.lane.b32.xlu0 %v8335_v2, %s6433_s29  ;;  %1939 = vrot.lane.b32.xlu1 %v8335_v2, %s6432_s28 }
 0xa69   :  { %1993 = vrot.lane.b32.xlu0 %v8288_v33, %s6433_s29  ;;  %1995 = vrot.lane.b32.xlu1 %v8297_v63, %s6433_s29 }
 0xa6d   :  { %1845 = vrot.lane.b32.xlu0 %v8328_v40, %s6432_s28  ;;  %1901 = vrot.lane.b32.xlu1 %v8347_v50, %s6433_s29 }
 0xa71   :  { %1941 = vrot.lane.b32.xlu0 %v8347_v50, %s6432_s28  ;;  %1997 = vrot.lane.b32.xlu1 %v8317_v4, %s6433_s29 }
 0xa75   :  { %1903 = vrot.lane.b32.xlu0 %v8362_v57, %s6433_s29  ;;  %1943 = vrot.lane.b32.xlu1 %v8362_v57, %s6432_s28 }
 0xa79   :  { %1999 = vrot.lane.b32.xlu0 %v8335_v2, %s6433_s29  ;;  %1905 = vrot.lane.b32.xlu1 %v8328_v40, %s6433_s29 }
 0xa7d   :  { %1945 = vrot.lane.b32.xlu0 %v8328_v40, %s6432_s28  ;;  %2001 = vrot.lane.b32.xlu1 %v8347_v50, %s6433_s29 }
 0xa81   :  { %2005 = vrot.lane.b32.xlu0 %v8328_v40, %s6433_s29  ;;  %2003 = vrot.lane.b32.xlu1 %v8362_v57, %s6433_s29 }
 0xa85   :  { %2007 = vrot.lane.b32.xlu1 %v6431_v1, %s6433_s29 }
 0xa9b   :  { %v1739_v52 = vpop.permute.xlu1 %1738 }
 0xa9c   :  { %v1753_v22 = vsel %vm1735_vm1, %v1739_v52, 0.0 }
 0xa9d   :  { %v1763_v37 = vmul.f32 %v8418_v14, %v1753_v22 }
 0xa9f   :  { %v1741_v53 = vpop.permute.xlu0 %1740  ;;  %v1781_v59 = vadd.f32 %v1773_v0, %v1763_v37  ;;  %v1780_v37 = vadd.f32 %v1772_v55, %v1762_v41  ;;  %v8507_v55 = vstv %s6092_s1  ;;  %s6105_s1 = sld [smem:[#allocation2 + $0x38]] }
 0xaa0   :  { %v1754_v43 = vsel %vm1735_vm1, %v1741_v53, 0.0 }
 0xaa1   :  { %v1764_v25 = vmul.f32 %v8418_v14, %v1754_v43 }
 0xaa3   :  { %v1743_v5 = vpop.permute.xlu1 %1742  ;;  %v1792_v12 = vpop.permute.xlu0 %1791  ;;  %v1782_v58 = vadd.f32 %v1774_v7, %v1764_v25 }
 0xaa4   :  { %v1806_v21 = vsel %vm1788_vm3, %v1792_v12, 0.0  ;;  %v1755_v31 = vsel %vm1735_vm1, %v1743_v5, 0.0 }
 0xaa5   :  { %v1816_v38 = vmul.f32 %v8425_v46, %v1806_v21  ;;  %v1765_v36 = vmul.f32 %v8418_v14, %v1755_v31 }
 0xaa7   :  { %v1832_v35 = vpop.permute.xlu1 %1831  ;;  %v1794_v23 = vpop.permute.xlu0 %1793  ;;  %v1824_v60 = vadd.f32 %v1816_v38, %v1781_v59  ;;  %v1783_v52 = vadd.f32 %v1775_v26, %v1765_v36  ;;  %v8513_v26 = vstv %s6093_s16 }
 0xaa8   :  { %v1807_v13 = vsel %vm1788_vm3, %v1794_v23, 0.0  ;;  %v1847_v12 = vsel %vm1735_vm1, %v1832_v35, 0.0  ;;  %v1815_v23 = vmul.f32 %v8425_v46, %v1805_v24 }
 0xaa9   :  { %v1817_v27 = vmul.f32 %v8425_v46, %v1807_v13  ;;  %v1857_v38 = vmul.f32 %v8435_v49, %v1847_v12 }
 0xaab   :  { %v1745_v3 = vpop.permute.xlu1 %1744  ;;  %v1834_v19 = vpop.permute.xlu0 %1833  ;;  %v1825_v61 = vadd.f32 %v1817_v27, %v1782_v58  ;;  %v8493_v27 = vstv %s6091_s15  ;;  %s6104_s15 = sld [smem:[#allocation2 + $0x37]] }
 0xaac   :  { %v1848_v44 = vsel %vm1735_vm1, %v1834_v19, 0.0  ;;  %v1756_v22 = vsel %vm1735_vm1, %v1745_v3, 0.0  ;;  %v1878_v3 = vmul.f32 %v8443_v11, %v8317_v4  ;;  %v1823_v19 = vadd.f32 %v1815_v23, %v1780_v37 }
 0xaad   :  { %v1858_v10 = vmul.f32 %v8435_v49, %v1848_v44  ;;  %v1766_v13 = vmul.f32 %v8418_v14, %v1756_v22  ;;  %v1776_v44 = vmul.f32 %v8423_v45, %v8317_v4  ;;  %v1977_v37 = vmul.f32 %v8513_v26, %v8288_v33 }
 0xaae   :  { %v1865_v58 = vadd.f32 %v1857_v38, %v1823_v19  ;;  %v1777_v23 = vmul.f32 %v8423_v45, %v8335_v2 }
 0xaaf   :  { %v1866_v30 = vadd.f32 %v1858_v10, %v1824_v60  ;;  %v1836_v32 = vpop.permute.xlu1 %1835  ;;  %v1796_v28 = vpop.permute.xlu0 %1795 }
 0xab0   :  { %v1849_v42 = vsel %vm1735_vm1, %v1836_v32, 0.0  ;;  %v1808_v39 = vsel %vm1788_vm3, %v1796_v28, 0.0 }
 0xab1   :  { %v1859_v34 = vmul.f32 %v8435_v49, %v1849_v42  ;;  %v8452_v54 = vadd.f32 %v1876_v20, %v1866_v30  ;;  %v1818_v9 = vmul.f32 %v8425_v46, %v1808_v39  ;;  %v1784_v30 = vadd.f32 %v1776_v44, %v1766_v13 }
 0xab2   :  { %v1875_v42 = vmul.f32 %v8443_v11, %v8279_v6  ;;  %v1978_v44 = vmul.f32 %v8513_v26, %v8297_v63 }
 0xab3   :  { %v1867_v17 = vadd.f32 %v1859_v34, %v1825_v61  ;;  %v1798_v18 = vpop.permute.xlu1 %1797  ;;  %v1747_v62 = vpop.permute.xlu0 %1746  ;;  %v1826_v43 = vadd.f32 %v1818_v9, %v1783_v52 }
 0xab4   :  { %v1809_v15 = vsel %vm1788_vm3, %v1798_v18, 0.0  ;;  %v1883_v39 = vadd.f32 %v1875_v42, %v1865_v58  ;;  %v1757_v41 = vsel %vm1735_vm1, %v1747_v62, 0.0 }
 0xab5   :  { %v8467_v16 = vadd.f32 %v1877_v48, %v1867_v17  ;;  %v1819_v7 = vmul.f32 %v8425_v46, %v1809_v15  ;;  %v1879_v48 = vmul.f32 %v8443_v11, %v8335_v2  ;;  %v1767_v12 = vmul.f32 %v8418_v14, %v1757_v41 }
 0xab7   :  { %v1892_v53 = vpop.permute.xlu1 %1891  ;;  %v1838_v5 = vpop.permute.xlu0 %1837  ;;  %v1827_v31 = vadd.f32 %v1819_v7, %v1784_v30 }
 0xab8   :  { %v1850_v21 = vsel %vm1735_vm1, %v1838_v5, 0.0  ;;  %v1907_v10 = vsel %vm1788_vm3, %v1892_v53, 0.0 }
 0xab9   :  { %v1860_v0 = vmul.f32 %v8435_v49, %v1850_v21  ;;  %v1917_v61 = vmul.f32 %v8493_v27, %v1907_v10 }
 0xabb   :  { %v1868_v35 = vadd.f32 %v1860_v0, %v1826_v43  ;;  %v8484_v59 = vpop.permute.xlu1 %1748  ;;  %v1894_v25 = vpop.permute.xlu0 %1893  ;;  %v1925_v9 = vadd.f32 %v1917_v61, %v1883_v39 }
 0xabc   :  { %v1908_v29 = vsel %vm1788_vm3, %v1894_v25, 0.0  ;;  %v1785_v25 = vadd.f32 %v1777_v23, %v1767_v12  ;;  %v1758_v23 = vsel %vm1735_vm1, %v8484_v59, 0.0 }
 0xabd   :  { %v8491_v60 = vadd.f32 %v1878_v3, %v1868_v35  ;;  %v1918_v24 = vmul.f32 %v8493_v27, %v1908_v29 }
 0xabf   :  { %v1840_v32 = vpop.permute.xlu1 %1839  ;;  %v1800_v28 = vpop.permute.xlu0 %1799  ;;  %v1926_v0 = vadd.f32 %v1918_v24, %v8452_v54 }
 0xac0   :  { %v1851_v20 = vsel %vm1735_vm1, %v1840_v32, 0.0  ;;  %v1810_v5 = vsel %vm1788_vm3, %v1800_v28, 0.0 }
 0xac1   :  { %v1861_v34 = vmul.f32 %v8435_v49, %v1851_v20  ;;  %v1820_v15 = vmul.f32 %v8425_v46, %v1810_v5 }
 0xac3   :  { %v1869_v36 = vadd.f32 %v1861_v34, %v1827_v31  ;;  %v1934_v17 = vpop.permute.xlu1 %1933  ;;  %v1896_v18 = vpop.permute.xlu0 %1895  ;;  %v1828_v54 = vadd.f32 %v1820_v15, %v1785_v25  ;;  %v1880_v31 = vmul.f32 %v8443_v11, %v8347_v50 }
 0xac4   :  { %v1949_v6 = vsel %vm1735_vm1, %v1934_v17, 0.0  ;;  %v1909_v35 = vsel %vm1788_vm3, %v1896_v18, 0.0  ;;  %v1979_v18 = vmul.f32 %v8513_v26, %v8317_v4  ;;  %v1980_v4 = vmul.f32 %v8513_v26, %v8335_v2 }
 0xac5   :  { %v1959_v52 = vmul.f32 %v8507_v55, %v1949_v6  ;;  %v8517_v53 = vadd.f32 %v1879_v48, %v1869_v36  ;;  %v1919_v10 = vmul.f32 %v8493_v27, %v1909_v35  ;;  %v1768_v2 = vmul.f32 %v8418_v14, %v1758_v23 }
 0xac6   :  { %v1778_v35 = vmul.f32 %v8423_v45, %v8347_v50 }
 0xac7   :  { %v1967_v22 = vadd.f32 %v1959_v52, %v1925_v9  ;;  %v1751_v21 = vpop.permute.xlu1 %1750  ;;  %v1936_v62 = vpop.permute.xlu0 %1935  ;;  %v1927_v63 = vadd.f32 %v1919_v10, %v8467_v16 }
 0xac8   :  { %v1950_v43 = vsel %vm1735_vm1, %v1936_v62, 0.0 }
 0xac9   :  { %v1960_v38 = vmul.f32 %v8507_v55, %v1950_v43  ;;  %v8531_v13 = vadd.f32 %v1977_v37, %v1967_v22 }
 0xacb   :  { %v1968_v3 = vadd.f32 %v1960_v38, %v1926_v0  ;;  %v1842_v33 = vpop.permute.xlu1 %1841  ;;  %v1802_v19 = vpop.permute.xlu0 %1801 }
 0xacc   :  { %v1852_v7 = vsel %vm1735_vm1, %v1842_v33, 0.0  ;;  %v1811_v59 = vsel %vm1788_vm3, %v1802_v19, 0.0  ;;  %v8586_v33 = vstv %s6094_s17 }
 0xacd   :  { %v1862_v58 = vmul.f32 %v8435_v49, %v1852_v7  ;;  %v8541_v30 = vadd.f32 %v1978_v44, %v1968_v3 }
 0xacf   :  { %v1870_v32 = vadd.f32 %v1862_v58, %v1828_v54  ;;  %v1938_v28 = vpop.permute.xlu1 %1937  ;;  %v1898_v20 = vpop.permute.xlu0 %1897  ;;  %v1821_v58 = vmul.f32 %v8425_v46, %v1811_v59 }
 0xad0   :  { %v1951_v42 = vsel %vm1735_vm1, %v1938_v28, 0.0  ;;  %v1910_v29 = vsel %vm1788_vm3, %v1898_v20, 0.0  ;;  %v1981_v20 = vmul.f32 %v8513_v26, %v8347_v50 }
 0xad1   :  { %v1961_v61 = vmul.f32 %v8507_v55, %v1951_v42  ;;  %v8549_v34 = vadd.f32 %v1880_v31, %v1870_v32  ;;  %v1920_v48 = vmul.f32 %v8493_v27, %v1910_v29  ;;  %v1786_v31 = vadd.f32 %v1778_v35, %v1768_v2 }
 0xad3   :  { %v1969_v39 = vadd.f32 %v1961_v61, %v1927_v63  ;;  %v1844_v36 = vpop.permute.xlu1 %1843  ;;  %v1804_v17 = vpop.permute.xlu0 %1803  ;;  %v1928_v24 = vadd.f32 %v1920_v48, %v8491_v60  ;;  %v1759_v60 = vsel %vm1735_vm1, %v1751_v21, 0.0  ;;  %v1779_v21 = vmul.f32 %v8423_v45, %v8362_v57 }
 0xad4   :  { %v1812_v15 = vsel %vm1788_vm3, %v1804_v17, 0.0  ;;  %v1769_v25 = vmul.f32 %v8418_v14, %v1759_v60  ;;  %v1853_v3 = vsel %vm1735_vm1, %v1844_v36, 0.0  ;;  %v1829_v48 = vadd.f32 %v1821_v58, %v1786_v31 }
 0xad5   :  { %v8556_v41 = vadd.f32 %v1979_v18, %v1969_v39  ;;  %v1822_v10 = vmul.f32 %v8425_v46, %v1812_v15  ;;  %v1863_v63 = vmul.f32 %v8435_v49, %v1853_v3  ;;  %v1882_v60 = vmul.f32 %v8443_v11, %v8328_v40 }
 0xad6   :  { %v1787_v42 = vadd.f32 %v1779_v21, %v1769_v25  ;;  %v1956_v25 = vsel %vm1735_vm1, %v8253_v47, 0.0  ;;  %v1983_v58 = vmul.f32 %v8513_v26, %v8328_v40 }
 0xad7   :  { %v1940_v6 = vpop.permute.xlu1 %1939  ;;  %v1900_v9 = vpop.permute.xlu0 %1899 }
 0xad8   :  { %v1952_v16 = vsel %vm1735_vm1, %v1940_v6, 0.0  ;;  %v1911_v37 = vsel %vm1788_vm3, %v1900_v9, 0.0  ;;  %v1830_v18 = vadd.f32 %v1822_v10, %v1787_v42 }
 0xad9   :  { %v1962_v52 = vmul.f32 %v8507_v55, %v1952_v16  ;;  %v1921_v38 = vmul.f32 %v8493_v27, %v1911_v37 }
 0xadb   :  { %v1970_v5 = vadd.f32 %v1962_v52, %v1928_v24  ;;  %v1996_v12 = vpop.permute.xlu1 %1995  ;;  %v1994_v22 = vpop.permute.xlu0 %1993  ;;  %v1929_v32 = vadd.f32 %v1921_v38, %v8517_v53  ;;  %v1871_v52 = vadd.f32 %v1863_v63, %v1829_v48  ;;  %v1984_v63 = vmul.f32 0.0, %v8513_v26 }
 0xadc   :  { %v2010_v14 = vsel %vm1788_vm3, %v1996_v12, 0.0  ;;  %v2009_v19 = vsel %vm1788_vm3, %v1994_v22, 0.0 }
 0xadd   :  { %v8564_v62 = vadd.f32 %v1980_v4, %v1970_v5  ;;  %v2020_v29 = vmul.f32 %v8586_v33, %v2010_v14  ;;  %v2019_v39 = vmul.f32 %v8586_v33, %v2009_v19 }
 0xadf   :  { %v1902_v43 = vpop.permute.xlu1 %1901  ;;  %v1846_v0 = vpop.permute.xlu0 %1845  ;;  %v8616_v5 = vadd.f32 %v2020_v29, %v8541_v30  ;;  %v8619_v12 = vadd.f32 %v2019_v39, %v8531_v13  ;;  %v1881_v30 = vmul.f32 %v8443_v11, %v8362_v57 }
 0xae0   :  { %v1854_v44 = vsel %vm1735_vm1, %v1846_v0, 0.0  ;;  %v1912_v46 = vsel %vm1788_vm3, %v1902_v43, 0.0 }
 0xae1   :  { %v1864_v61 = vmul.f32 %v8435_v49, %v1854_v44  ;;  %v1922_v49 = vmul.f32 %v8493_v27, %v1912_v46  ;;  %v2035_v59 = vadd.f32 %v8616_v5, %v8619_v12  ;;  %v1889_v3 = vadd.f32 %v1881_v30, %v1871_v52 }
 0xae3   :  { %v1998_v7 = vpop.permute.xlu1 %1997  ;;  %v1942_v54 = vpop.permute.xlu0 %1941  ;;  %v1872_v16 = vadd.f32 %v1864_v61, %v1830_v18  ;;  %v1930_v2 = vadd.f32 %v1922_v49, %v8549_v34 }
 0xae4   :  { %v1953_v45 = vsel %vm1735_vm1, %v1942_v54, 0.0  ;;  %v2011_v50 = vsel %vm1788_vm3, %v1998_v7, 0.0 }
 0xae5   :  { %v1963_v28 = vmul.f32 %v8507_v55, %v1953_v45  ;;  %v2021_v22 = vmul.f32 %v8586_v33, %v2011_v50  ;;  %v1890_v35 = vadd.f32 %v1882_v60, %v1872_v16  ;;  %v1982_v45 = vmul.f32 %v8513_v26, %v8362_v57 }
 0xae7   :  { %v1971_v36 = vadd.f32 %v1963_v28, %v1929_v32  ;;  %v1944_v53 = vpop.permute.xlu1 %1943  ;;  %v1904_v17 = vpop.permute.xlu0 %1903  ;;  %v2029_v21 = vadd.f32 %v2021_v22, %v8556_v41  ;;  %v1966_v41 = vmul.f32 %v8507_v55, %v1956_v25 }
 0xae8   :  { %v1954_v6 = vsel %vm1735_vm1, %v1944_v53, 0.0  ;;  %v1913_v24 = vsel %vm1788_vm3, %v1904_v17, 0.0 }
 0xae9   :  { %v1989_v9 = vadd.f32 %v1981_v20, %v1971_v36  ;;  %v1964_v23 = vmul.f32 %v8507_v55, %v1954_v6  ;;  %v1923_v13 = vmul.f32 %v8493_v27, %v1913_v24  ;;  %v2036_v32 = vadd.f32 %v2035_v59, %v2029_v21 }
 0xaeb   :  { %v1906_v4 = vpop.permute.xlu1 %1905  ;;  %v2000_v37 = vpop.permute.xlu0 %1999  ;;  %v1972_v7 = vadd.f32 %v1964_v23, %v1930_v2  ;;  %v1931_v10 = vadd.f32 %v1923_v13, %v1889_v3 }
 0xaec   :  { %v1914_v43 = vsel %vm1788_vm3, %v1906_v4, 0.0  ;;  %v2012_v0 = vsel %vm1788_vm3, %v2000_v37, 0.0 }
 0xaed   :  { %v1924_v15 = vmul.f32 %v8493_v27, %v1914_v43  ;;  %v2022_v38 = vmul.f32 %v8586_v33, %v2012_v0  ;;  %v1990_v61 = vadd.f32 %v1982_v45, %v1972_v7 }
 0xaef   :  { %v2002_v11 = vpop.permute.xlu1 %2001  ;;  %v1946_v44 = vpop.permute.xlu0 %1945  ;;  %v1932_v54 = vadd.f32 %v1924_v15, %v1890_v35  ;;  %v2030_v14 = vadd.f32 %v2022_v38, %v8564_v62 }
 0xaf0   :  { %v2013_v27 = vsel %vm1788_vm3, %v2002_v11, 0.0  ;;  %v1955_v34 = vsel %vm1735_vm1, %v1946_v44, 0.0 }
 0xaf1   :  { %v2023_v47 = vmul.f32 %v8586_v33, %v2013_v27  ;;  %v1965_v19 = vmul.f32 %v8507_v55, %v1955_v34  ;;  %v1974_v62 = vadd.f32 %v1966_v41, %v1932_v54  ;;  %v2037_v39 = vadd.f32 %v2036_v32, %v2030_v14 }
 0xaf3   :  { %v2031_v28 = vadd.f32 %v2023_v47, %v1989_v9  ;;  %v1973_v20 = vadd.f32 %v1965_v19, %v1931_v10  ;;  %v2004_v31 = vpop.permute.xlu1 %2003  ;;  %v2006_v42 = vpop.permute.xlu0 %2005  ;;  %v1992_v48 = vadd.f32 %v1984_v63, %v1974_v62  ;;  %v2102_v62 = vstv %s6096_s3 }
 0xaf4   :  { %v2014_v29 = vsel %vm1788_vm3, %v2004_v31, 0.0  ;;  %v2015_v55 = vsel %vm1788_vm3, %v2006_v42, 0.0 }
 0xaf5   :  { %v2024_v57 = vmul.f32 %v8586_v33, %v2014_v29  ;;  %v1991_v46 = vadd.f32 %v1983_v58, %v1973_v20  ;;  %v2025_v40 = vmul.f32 %v8586_v33, %v2015_v55  ;;  %v2038_v36 = vadd.f32 %v2037_v39, %v2031_v28 }
 0xaf7   :  { %v2032_v53 = vadd.f32 %v2024_v57, %v1990_v61  ;;  %v2008_v17 = vpop.permute.xlu1 %2007  ;;  %v2033_v50 = vadd.f32 %v2025_v40, %v1991_v46 }
 0xaf8   :  { %v2016_v26 = vsel %vm1788_vm3, %v2008_v17, 0.0 }
 0xaf9   :  { %v2039_v18 = vadd.f32 %v2038_v36, %v2032_v53  ;;  %v2026_v6 = vmul.f32 %v8586_v33, %v2016_v26 }
 0xafb   :  { %v2034_v9 = vadd.f32 %v2026_v6, %v1992_v48  ;;  %v2040_v49 = vadd.f32 %v2039_v18, %v2033_v50 }
 0xafd   :  { %v2041_v16 = vadd.f32 %v2040_v49, %v2034_v9 }
 0xaff   :  { %2042 = vadd.xlane.f32.xlu0 %v2041_v16 }
 0xb15   :  { %6293 = vrot.lane.b32.xlu0 %v6431_v1, %s6434_s22 }
 0xb19   :  { %6298 = vrot.lane.b32.xlu0 %v6431_v1, %s6435_s25 }
 0xb1d   :  { %6303 = vrot.lane.b32.xlu0 %v6431_v1, %s6434_s22 }
 0xb8c   :  { %v2043_v24 = vpop.xlane.xlu0 %2042 }
 0xb8d   :  { %v2044_v52 = vrot.slane %v2043_v24, 4 }
 0xb8f   :  { %v2045_v22 = vadd.f32 %v2044_v52, %v2043_v24 }
 0xb91   :  { %v2046_v4 = vrot.slane %v2045_v22, 2 }
 0xb93   :  { %v2047_v37 = vadd.f32 %v2046_v4, %v2045_v22 }
 0xb95   :  { %v2048_v23 = vrot.slane %v2047_v37, 1 }
 0xb97   :  { %v2049_v60 = vadd.f32 %v2048_v23, %v2047_v37 }
 0xb99   :  { %6214 = vpush %v2049_v60  ;;  %v8700_v60 = vpop.permute.xlu0 %6293 }
 0xbca   :  { %s6215_s18 = spop %6214 }
 0xbcb   :  { %s2051_s21 = smul.f32 0.00012207031, %s6215_s18  ;;  %s6436_s18 = smov 32  }
 0xbcd   :  { %v2052_v43 = vstv %s2051_s21 }
 0xbce   :  { %v2053_v0 = vsub.f32 %v8619_v12, %v2052_v43  ;;  %v2054_v30 = vsub.f32 %v8616_v5, %v2052_v43  ;;  %v2055_v33 = vsub.f32 %v2029_v21, %v2052_v43  ;;  %v2056_v13 = vsub.f32 %v2030_v14, %v2052_v43 }
 0xbcf   :  { %v2057_v2 = vsub.f32 %v2031_v28, %v2052_v43  ;;  %v2058_v59 = vsub.f32 %v2032_v53, %v2052_v43  ;;  %v8665_v44 = vsub.f32 %v2033_v50, %v2052_v43  ;;  %v2060_v27 = vsub.f32 %v2034_v9, %v2052_v43  ;;  %v8702_v43 = vpop.permute.xlu0 %6298 }
 0xbd0   :  { %v2061_v15 = vmul.f32 %v2053_v0, %v2053_v0  ;;  %v2062_v38 = vmul.f32 %v2054_v30, %v2054_v30  ;;  %v2063_v35 = vmul.f32 %v2055_v33, %v2055_v33  ;;  %v2064_v3 = vmul.f32 %v2056_v13, %v2056_v13 }
 0xbd1   :  { %v2065_v7 = vmul.f32 %v2057_v2, %v2057_v2  ;;  %v2066_v34 = vmul.f32 %v2058_v59, %v2058_v59  ;;  %v2067_v5 = vmul.f32 %v8665_v44, %v8665_v44  ;;  %v2068_v21 = vmul.f32 %v2060_v27, %v2060_v27 }
 0xbd2   :  { %v2069_v25 = vadd.f32 %v2062_v38, %v2061_v15  ;;  %v8849_v15 = vstv %s6099_s8  ;;  %s6110_s8 = sld [smem:[#allocation2 + $0x3e]] }
 0xbd4   :  { %v2070_v11 = vadd.f32 %v2069_v25, %v2063_v35 }
 0xbd6   :  { %v2071_v54 = vadd.f32 %v2070_v11, %v2064_v3 }
 0xbd8   :  { %v2072_v10 = vadd.f32 %v2071_v54, %v2065_v7 }
 0xbda   :  { %v2073_v12 = vadd.f32 %v2072_v10, %v2066_v34 }
 0xbdc   :  { %v2074_v14 = vadd.f32 %v2073_v12, %v2067_v5 }
 0xbde   :  { %v2075_v47 = vadd.f32 %v2074_v14, %v2068_v21 }
 0xbe0   :  { %2076 = vadd.xlane.f32.xlu1 %v2075_v47 }
 0xc6d   :  { %v2077_v19 = vpop.xlane.xlu1 %2076 }
 0xc6e   :  { %v2078_v41 = vrot.slane %v2077_v19, 4 }
 0xc70   :  { %v2079_v45 = vadd.f32 %v2078_v41, %v2077_v19 }
 0xc72   :  { %v2080_v58 = vrot.slane %v2079_v45, 2 }
 0xc74   :  { %v2081_v32 = vadd.f32 %v2080_v58, %v2079_v45 }
 0xc76   :  { %v2082_v28 = vrot.slane %v2081_v32, 1 }
 0xc78   :  { %v2083_v20 = vadd.f32 %v2082_v28, %v2081_v32 }
 0xc7a   :  { %6216 = vpush %v2083_v20 }
 0xcab   :  { %s6217_s26 = spop %6216 }
 0xcac   :  { %s2085_s27 = smul.f32 0.00012207031, %s6217_s26 }
 0xcae   :  { %s2087_s30 = sadd.f32 1e-05, %s2085_s27 }
 0xcb0   :  { %v2088_v31 = vstv %s2087_s30  ;;  %s6106_s30 = sld [smem:[#allocation2 + $0x3a]] }
 0xcb1   :  { %6388 = vrsqrt.f32 %v2088_v31 }
 0xcbb   :  { %v6389_v42 = vpop.eup %6388 }
 0xcbc   :  { %6218 = vpush %v6389_v42 }
 0xced   :  { %s6219_s4 = spop %6218 }
 0xcee   :  { %s2091_s5 = smul.f32 %s6219_s4, %s6095_s0  ;;  %s6107_s0 = sld [smem:[#allocation2 + $0x3b]] }
 0xcf0   :  { %v2092_v63 = vstv %s2091_s5  ;;  %s6437_s5 = smov 96  }
 0xcf1   :  { %v2094_v61 = vmul.f32 %v2092_v63, %v2054_v30  ;;  %v2093_v29 = vmul.f32 %v2092_v63, %v2053_v0  ;;  %v2096_v40 = vmul.f32 %v2092_v63, %v2056_v13  ;;  %v2095_v36 = vmul.f32 %v2092_v63, %v2055_v33  ;;  %v8704_v0 = vpop.permute.xlu0 %6303 }
 0xcf2   :  { %v2098_v50 = vmul.f32 %v2092_v63, %v2058_v59  ;;  %v2097_v48 = vmul.f32 %v2092_v63, %v2057_v2  ;;  %v2100_v24 = vmul.f32 %v2092_v63, %v2060_v27  ;;  %v2099_v52 = vmul.f32 %v2092_v63, %v8665_v44 }
 0xcf3   :  { %v2104_v55 = vadd.f32 %v2102_v62, %v2094_v61  ;;  %v2103_v39 = vadd.f32 %v2102_v62, %v2093_v29  ;;  %v2106_v53 = vadd.f32 %v2102_v62, %v2096_v40  ;;  %v2105_v17 = vadd.f32 %v2102_v62, %v2095_v36 }
 0xcf4   :  { %v2108_v6 = vadd.f32 %v2102_v62, %v2098_v50  ;;  %v2107_v9 = vadd.f32 %v2102_v62, %v2097_v48  ;;  %v2110_v22 = vadd.f32 %v2102_v62, %v2100_v24  ;;  %v2109_v4 = vadd.f32 %v2102_v62, %v2099_v52 }
 0xcf5   :  { %v2112_v57 = vmax.f32 %v2104_v55, 0.0  ;;  %v2111_v46 = vmax.f32 %v2103_v39, 0.0  ;;  %v2114_v26 = vmax.f32 %v2106_v53, 0.0  ;;  %v2113_v18 = vmax.f32 %v2105_v17, 0.0 }
 0xcf6   :  { %v2116_v49 = vmax.f32 %v2108_v6, 0.0  ;;  %v2115_v16 = vmax.f32 %v2107_v9, 0.0  ;;  %v8688_v37 = vmax.f32 %v2110_v22, 0.0  ;;  %v8690_v23 = vmax.f32 %v2109_v4, 0.0 }
 0xcf7   :  { %2139 = vrot.lane.b32.xlu1 %v2112_v57, %s6433_s29  ;;  %2137 = vrot.lane.b32.xlu0 %v2111_v46, %s6433_s29  ;;  %v2119_v30 = vand.u32 15, %v6691_v56  ;;  %v6296_v24 = vunpack.i.h.bf16 %v8700_v60  ;;  %v8839_v22 = vstv %s6098_s7  ;;  %s6109_s7 = sld [smem:[#allocation2 + $0x3d]] }
 0xcf9   :  { %vm8707_vm4 = vcmp.lt.s32.totalorder %v2119_v30, 8 }
 0xcfb   :  { %2155 = vrot.lane.b32.xlu1 %v2112_v57, %s6432_s28  ;;  %2153 = vrot.lane.b32.xlu0 %v2111_v46, %s6432_s28 }
 0xcff   :  { %2143 = vrot.lane.b32.xlu1 %v2114_v26, %s6433_s29  ;;  %2141 = vrot.lane.b32.xlu0 %v2113_v18, %s6433_s29 }
 0xd03   :  { %2159 = vrot.lane.b32.xlu1 %v2114_v26, %s6432_s28  ;;  %2157 = vrot.lane.b32.xlu0 %v2113_v18, %s6432_s28 }
 0xd07   :  { %2147 = vrot.lane.b32.xlu1 %v2116_v49, %s6433_s29  ;;  %2145 = vrot.lane.b32.xlu0 %v2115_v16, %s6433_s29 }
 0xd0b   :  { %2163 = vrot.lane.b32.xlu1 %v2116_v49, %s6432_s28  ;;  %2161 = vrot.lane.b32.xlu0 %v2115_v16, %s6432_s28 }
 0xd0f   :  { %2151 = vrot.lane.b32.xlu1 %v8688_v37, %s6433_s29  ;;  %2149 = vrot.lane.b32.xlu0 %v8690_v23, %s6433_s29 }
 0xd13   :  { %2167 = vrot.lane.b32.xlu1 %v8688_v37, %s6432_s28  ;;  %2165 = vrot.lane.b32.xlu0 %v8690_v23, %s6432_s28 }
 0xd69   :  { %v2140_v33 = vpop.permute.xlu1 %2139  ;;  %v2138_v13 = vpop.permute.xlu0 %2137 }
 0xd6d   :  { %v2156_v38 = vpop.permute.xlu1 %2155  ;;  %v2154_v2 = vpop.permute.xlu0 %2153 }
 0xd6e   :  { %v2170_v35 = vsel %vm8707_vm4, %v2140_v33, %v2156_v38  ;;  %v2169_v25 = vsel %vm8707_vm4, %v2138_v13, %v2154_v2  ;;  %v2251_v2 = vsel %vm2233_vm2, %v6296_v24, 0.0 }
 0xd6f   :  { %v2178_v59 = vmax.f32 %v2112_v57, %v2170_v35  ;;  %v2177_v3 = vmax.f32 %v2111_v46, %v2169_v25 }
 0xd71   :  { %v8715_v11 = vmax.f32 %v2177_v3, %v2178_v59  ;;  %v2144_v44 = vpop.permute.xlu1 %2143  ;;  %v2142_v7 = vpop.permute.xlu0 %2141  ;;  %v8721_v54 = vmax.f32 %v2178_v59, %v2177_v3  ;;  %v6301_v59 = vunpack.i.h.bf16 %v8702_v43  ;;  %v2270_v3 = vmul.f32 0.0, %v8839_v22 }
 0xd73   :  { %2291 = vrot.lane.b32.xlu0 %v8715_v11, %s6435_s25  ;;  %2238 = vrot.lane.b32.xlu1 %v8715_v11, %s6434_s22 }
 0xd75   :  { %v2160_v27 = vpop.permute.xlu1 %2159  ;;  %v2158_v34 = vpop.permute.xlu0 %2157 }
 0xd76   :  { %v2172_v10 = vsel %vm8707_vm4, %v2144_v44, %v2160_v27  ;;  %v2171_v5 = vsel %vm8707_vm4, %v2142_v7, %v2158_v34 }
 0xd77   :  { %2331 = vrot.lane.b32.xlu0 %v8721_v54, %s6434_s22  ;;  %2240 = vrot.lane.b32.xlu1 %v8721_v54, %s6434_s22  ;;  %v2180_v12 = vmax.f32 %v2114_v26, %v2172_v10  ;;  %v2179_v21 = vmax.f32 %v2113_v18, %v2171_v5 }
 0xd79   :  { %v8735_v14 = vmax.f32 %v2179_v21, %v2180_v12  ;;  %v8737_v47 = vmax.f32 %v2180_v12, %v2179_v21  ;;  %v2148_v19 = vpop.permute.xlu1 %2147  ;;  %v2146_v41 = vpop.permute.xlu0 %2145  ;;  %v8864_v12 = vstv %s6100_s9  ;;  %s6111_s9 = sld [smem:[#allocation2 + $0x3f]] }
 0xd7b   :  { %2293 = vrot.lane.b32.xlu0 %v8721_v54, %s6435_s25  ;;  %2329 = vrot.lane.b32.xlu1 %v8715_v11, %s6434_s22 }
 0xd7d   :  { %v2164_v45 = vpop.permute.xlu1 %2163  ;;  %v2162_v58 = vpop.permute.xlu0 %2161 }
 0xd7e   :  { %v2174_v32 = vsel %vm8707_vm4, %v2148_v19, %v2164_v45  ;;  %v2173_v28 = vsel %vm8707_vm4, %v2146_v41, %v2162_v58 }
 0xd7f   :  { %2244 = vrot.lane.b32.xlu0 %v8737_v47, %s6434_s22  ;;  %2242 = vrot.lane.b32.xlu1 %v8735_v14, %s6434_s22  ;;  %v2182_v20 = vmax.f32 %v2116_v49, %v2174_v32  ;;  %v2181_v31 = vmax.f32 %v2115_v16, %v2173_v28  ;;  %v8832_v49 = vstv %s6097_s6  ;;  %s6108_s6 = sld [smem:[#allocation2 + $0x3c]] }
 0xd80   :  { %v2261_v5 = vmul.f32 %v8832_v49, %v2251_v2  ;;  %v8900_v2 = vstv %s6102_s11  ;;  %s6113_s11 = sld [smem:[#allocation2 + $0x41]] }
 0xd81   :  { %v8759_v42 = vmax.f32 %v2181_v31, %v2182_v20  ;;  %v2152_v63 = vpop.permute.xlu1 %2151  ;;  %v2150_v62 = vpop.permute.xlu0 %2149  ;;  %v8773_v61 = vmax.f32 %v2182_v20, %v2181_v31  ;;  %v6300_v20 = vunpack.i.l.bf16 %v8702_v43  ;;  %v8875_v31 = vstv %s6101_s10  ;;  %s6112_s10 = sld [smem:[#allocation2 + $0x40]] }
 0xd83   :  { %2335 = vrot.lane.b32.xlu0 %v8737_v47, %s6434_s22  ;;  %2333 = vrot.lane.b32.xlu1 %v8735_v14, %s6434_s22 }
 0xd85   :  { %v2168_v29 = vpop.permute.xlu1 %2167  ;;  %v2166_v55 = vpop.permute.xlu0 %2165 }
 0xd86   :  { %v2176_v39 = vsel %vm8707_vm4, %v2152_v63, %v2168_v29  ;;  %v2175_v57 = vsel %vm8707_vm4, %v2150_v62, %v2166_v55  ;;  %vm2286_vm4 = vcmp.lt.s32.totalorder %v6691_v56, 48 }
 0xd87   :  { %2391 = vrot.lane.b32.xlu0 %v8721_v54, %s6435_s25  ;;  %2295 = vrot.lane.b32.xlu1 %v8735_v14, %s6435_s25  ;;  %v2184_v46 = vmax.f32 %v8688_v37, %v2176_v39  ;;  %v2183_v40 = vmax.f32 %v8690_v23, %v2175_v57  ;;  %v6295_v37 = vunpack.i.l.bf16 %v8700_v60  ;;  %v2272_v23 = vmul.f32 %v8839_v22, %v8715_v11 }
 0xd88   :  { %v2273_v60 = vmul.f32 %v8839_v22, %v8721_v54  ;;  %v2304_v28 = vsel %vm2286_vm4, %v6301_v59, 0.0  ;;  %v2375_v39 = vmul.f32 %v8875_v31, %v8735_v14  ;;  %v2376_v57 = vmul.f32 %v8875_v31, %v8737_v47 }
 0xd89   :  { %v8793_v36 = vmax.f32 %v2183_v40, %v2184_v46  ;;  %v8799_v53 = vmax.f32 %v2184_v46, %v2183_v40  ;;  %v2250_v44 = vsel %vm2233_vm2, %v6295_v37, 0.0  ;;  %v2314_v43 = vmul.f32 %v8849_v15, %v2304_v28 }
 0xd8a   :  { %v2260_v46 = vmul.f32 %v8832_v49, %v2250_v44  ;;  %v2373_v28 = vmul.f32 %v8875_v31, %v8715_v11 }
 0xd8b   :  { %2297 = vrot.lane.b32.xlu0 %v8737_v47, %s6435_s25  ;;  %2389 = vrot.lane.b32.xlu1 %v8715_v11, %s6435_s25 }
 0xd8f   :  { %2393 = vrot.lane.b32.xlu0 %v8735_v14, %s6435_s25  ;;  %2246 = vrot.lane.b32.xlu1 %v8759_v42, %s6434_s22 }
 0xd93   :  { %2433 = vrot.lane.b32.xlu0 %v8737_v47, %s6434_s22  ;;  %2337 = vrot.lane.b32.xlu1 %v8759_v42, %s6434_s22 }
 0xd97   :  { %2299 = vrot.lane.b32.xlu0 %v8759_v42, %s6435_s25  ;;  %2431 = vrot.lane.b32.xlu1 %v8735_v14, %s6434_s22 }
 0xd9b   :  { %2395 = vrot.lane.b32.xlu0 %v8737_v47, %s6435_s25  ;;  %2248 = vrot.lane.b32.xlu1 %v8773_v61, %s6434_s22 }
 0xd9f   :  { %2301 = vrot.lane.b32.xlu0 %v8773_v61, %s6435_s25  ;;  %2339 = vrot.lane.b32.xlu1 %v8773_v61, %s6434_s22 }
 0xda3   :  { %2397 = vrot.lane.b32.xlu0 %v8759_v42, %s6435_s25  ;;  %2435 = vrot.lane.b32.xlu1 %v8759_v42, %s6434_s22 }
 0xda7   :  { %2491 = vrot.lane.b32.xlu0 %v8735_v14, %s6435_s25  ;;  %2341 = vrot.lane.b32.xlu1 %v8793_v36, %s6434_s22 }
 0xdab   :  { %2343 = vrot.lane.b32.xlu0 %v8799_v53, %s6434_s22  ;;  %2437 = vrot.lane.b32.xlu1 %v8773_v61, %s6434_s22 }
 0xdaf   :  { %2439 = vrot.lane.b32.xlu0 %v8793_v36, %s6434_s22  ;;  %2493 = vrot.lane.b32.xlu1 %v8737_v47, %s6435_s25 }
 0xdb3   :  { %2401 = vrot.lane.b32.xlu0 %v8793_v36, %s6435_s25  ;;  %2399 = vrot.lane.b32.xlu1 %v8773_v61, %s6435_s25 }
 0xdb7   :  { %2497 = vrot.lane.b32.xlu0 %v8773_v61, %s6435_s25  ;;  %2495 = vrot.lane.b32.xlu1 %v8759_v42, %s6435_s25 }
 0xdbb   :  { %2501 = vrot.lane.b32.xlu0 %v8799_v53, %s6435_s25  ;;  %2441 = vrot.lane.b32.xlu1 %v8799_v53, %s6434_s22 }
 0xdbf   :  { %2403 = vrot.lane.b32.xlu1 %v8799_v53, %s6435_s25  ;;  %2505 = vrot.lane.b32.xlu0 %v6431_v1, %s6435_s25 }
 0xdc3   :  { %2499 = vrot.lane.b32.xlu1 %v8793_v36, %s6435_s25 }
 0xdc7   :  { %2503 = vrot.lane.b32.xlu1 %v6431_v1, %s6435_s25 }
 0xde5   :  { %v2239_v17 = vpop.permute.xlu1 %2238  ;;  %v2292_v26 = vpop.permute.xlu0 %2291 }
 0xde6   :  { %v2252_v48 = vsel %vm2233_vm2, %v2239_v17, 0.0  ;;  %v2305_v38 = vsel %vm2286_vm4, %v2292_v26, 0.0  ;;  %v2279_v17 = vadd.f32 %v2270_v3, %v2261_v5  ;;  %v8913_v5 = vstv %s6103_s14  ;;  %s9241_s14 = sld [smem:[#allocation2 + $0x43]] }
 0xde7   :  { %v2262_v52 = vmul.f32 %v8832_v49, %v2252_v48  ;;  %v2315_v7 = vmul.f32 %v8849_v15, %v2305_v38  ;;  %v2303_v48 = vsel %vm2286_vm4, %v6300_v20, 0.0 }
 0xde8   :  { %v2313_v37 = vmul.f32 %v8849_v15, %v2303_v48 }
 0xde9   :  { %v2241_v18 = vpop.permute.xlu1 %2240  ;;  %v2332_v50 = vpop.permute.xlu0 %2331  ;;  %v2280_v35 = vadd.f32 %v2272_v23, %v2262_v52  ;;  %v2322_v23 = vadd.f32 %v2314_v43, %v2279_v17  ;;  %v2377_v43 = vmul.f32 %v8875_v31, %v8759_v42 }
 0xdea   :  { %v2253_v16 = vsel %vm2233_vm2, %v2241_v18, 0.0  ;;  %v2346_v40 = vsel %vm2233_vm2, %v2332_v50, 0.0 }
 0xdeb   :  { %v2263_v30 = vmul.f32 %v8832_v49, %v2253_v16  ;;  %v2323_v41 = vadd.f32 %v2315_v7, %v2280_v35  ;;  %v2374_v7 = vmul.f32 %v8875_v31, %v8721_v54 }
 0xded   :  { %v2330_v6 = vpop.permute.xlu1 %2329  ;;  %v2294_v9 = vpop.permute.xlu0 %2293  ;;  %v2281_v27 = vadd.f32 %v2273_v60, %v2263_v30 }
 0xdee   :  { %v2306_v4 = vsel %vm2286_vm4, %v2294_v9, 0.0  ;;  %v2356_v9 = vmul.f32 %v8864_v12, %v2346_v40  ;;  %v2345_v50 = vsel %vm2233_vm2, %v2330_v6, 0.0  ;;  %v2274_v6 = vmul.f32 %v8839_v22, %v8735_v14 }
 0xdef   :  { %v2316_v25 = vmul.f32 %v8849_v15, %v2306_v4  ;;  %v2278_v4 = vadd.f32 %v2270_v3, %v2260_v46  ;;  %v2355_v60 = vmul.f32 %v8864_v12, %v2345_v50 }
 0xdf0   :  { %v2364_v35 = vadd.f32 %v2356_v9, %v2322_v23 }
 0xdf1   :  { %v2243_v33 = vpop.permute.xlu1 %2242  ;;  %v8847_v13 = vpop.permute.xlu0 %2244  ;;  %v2324_v45 = vadd.f32 %v2316_v25, %v2281_v27  ;;  %v2321_v44 = vadd.f32 %v2313_v37, %v2278_v4 }
 0xdf2   :  { %v2254_v16 = vsel %vm2233_vm2, %v2243_v33, 0.0  ;;  %v2255_v48 = vsel %vm2233_vm2, %v8847_v13, 0.0 }
 0xdf3   :  { %v2264_v38 = vmul.f32 %v8832_v49, %v2254_v16  ;;  %v2265_v23 = vmul.f32 %v8832_v49, %v2255_v48 }
 0xdf5   :  { %v2334_v34 = vpop.permute.xlu1 %2333  ;;  %v2336_v10 = vpop.permute.xlu0 %2335 }
 0xdf6   :  { %v2347_v21 = vsel %vm2233_vm2, %v2334_v34, 0.0  ;;  %v2348_v19 = vsel %vm2233_vm2, %v2336_v10, 0.0  ;;  %v2282_v34 = vadd.f32 %v2274_v6, %v2264_v38 }
 0xdf7   :  { %v2357_v58 = vmul.f32 %v8864_v12, %v2347_v21  ;;  %v2358_v32 = vmul.f32 %v8864_v12, %v2348_v19  ;;  %v2363_v21 = vadd.f32 %v2355_v60, %v2321_v44  ;;  %v2382_v19 = vadd.f32 %v2374_v7, %v2364_v35 }
 0xdf8   :  { %v2275_v35 = vmul.f32 %v8839_v22, %v8737_v47 }
 0xdf9   :  { %v2365_v63 = vadd.f32 %v2357_v58, %v2323_v41  ;;  %v2366_v62 = vadd.f32 %v2358_v32, %v2324_v45  ;;  %v2296_v29 = vpop.permute.xlu1 %2295  ;;  %v2392_v55 = vpop.permute.xlu0 %2391  ;;  %v8915_v58 = vstv %s6104_s15  ;;  %s9251_s15 = sld [smem:[#allocation2 + $0x42]] }
 0xdfa   :  { %v2307_v30 = vsel %vm2286_vm4, %v2296_v29, 0.0  ;;  %v2406_v33 = vsel %vm2286_vm4, %v2392_v55, 0.0  ;;  %v2475_v13 = vmul.f32 %v8915_v58, %v8735_v14  ;;  %v2283_v44 = vadd.f32 %v2275_v35, %v2265_v23 }
 0xdfb   :  { %v8885_v26 = vadd.f32 %v2375_v39, %v2365_v63  ;;  %v8887_v18 = vadd.f32 %v2376_v57, %v2366_v62  ;;  %v2317_v3 = vmul.f32 %v8849_v15, %v2307_v30  ;;  %v2416_v27 = vmul.f32 %v8900_v2, %v2406_v33 }
 0xdfc   :  { %v2476_v39 = vmul.f32 %v8915_v58, %v8737_v47  ;;  %v2381_v57 = vadd.f32 %v2373_v28, %v2363_v21  ;;  %v2276_v28 = vmul.f32 %v8839_v22, %v8759_v42 }
 0xdfd   :  { %v2390_v24 = vpop.permute.xlu1 %2389  ;;  %v2298_v52 = vpop.permute.xlu0 %2297  ;;  %v2325_v32 = vadd.f32 %v2317_v3, %v2282_v34  ;;  %v2424_v63 = vadd.f32 %v2416_v27, %v2382_v19 }
 0xdfe   :  { %v2405_v10 = vsel %vm2286_vm4, %v2390_v24, 0.0  ;;  %v2308_v37 = vsel %vm2286_vm4, %v2298_v52, 0.0 }
 0xdff   :  { %v2415_v62 = vmul.f32 %v8900_v2, %v2405_v10  ;;  %v2318_v60 = vmul.f32 %v8849_v15, %v2308_v37 }
 0xe01   :  { %v2247_v25 = vpop.permute.xlu1 %2246  ;;  %v2394_v59 = vpop.permute.xlu0 %2393  ;;  %v2423_v16 = vadd.f32 %v2415_v62, %v2381_v57  ;;  %v2326_v10 = vadd.f32 %v2318_v60, %v2283_v44 }
 0xe02   :  { %v2407_v6 = vsel %vm2286_vm4, %v2394_v59, 0.0  ;;  %v2256_v27 = vsel %vm2233_vm2, %v2247_v25, 0.0  ;;  %v2378_v25 = vmul.f32 %v8875_v31, %v8773_v61 }
 0xe03   :  { %v2417_v34 = vmul.f32 %v8900_v2, %v2407_v6  ;;  %v2266_v59 = vmul.f32 %v8832_v49, %v2256_v27 }
 0xe05   :  { %v2338_v41 = vpop.permute.xlu1 %2337  ;;  %v2434_v45 = vpop.permute.xlu0 %2433 }
 0xe06   :  { %v2349_v54 = vsel %vm2233_vm2, %v2338_v41, 0.0  ;;  %v2448_v20 = vsel %vm2233_vm2, %v2434_v45, 0.0 }
 0xe07   :  { %v2359_v29 = vmul.f32 %v8864_v12, %v2349_v54  ;;  %v2458_v55 = vmul.f32 %v8913_v5, %v2448_v20  ;;  %v2425_v54 = vadd.f32 %v2417_v34, %v8885_v26 }
 0xe09   :  { %v2367_v46 = vadd.f32 %v2359_v29, %v2325_v32  ;;  %v2466_v40 = vadd.f32 %v2458_v55, %v2424_v63  ;;  %v2432_v11 = vpop.permute.xlu1 %2431  ;;  %v2300_v17 = vpop.permute.xlu0 %2299 }
 0xe0a   :  { %v2447_v9 = vsel %vm2233_vm2, %v2432_v11, 0.0  ;;  %v2309_v47 = vsel %vm2286_vm4, %v2300_v17, 0.0  ;;  %v2477_v17 = vmul.f32 %v8915_v58, %v8759_v42 }
 0xe0b   :  { %v2457_v24 = vmul.f32 %v8913_v5, %v2447_v9  ;;  %v8936_v50 = vadd.f32 %v2377_v43, %v2367_v46  ;;  %v8938_v4 = vadd.f32 %v2476_v39, %v2466_v40  ;;  %v2319_v20 = vmul.f32 %v8849_v15, %v2309_v47 }
 0xe0c   :  { %v2284_v46 = vadd.f32 %v2276_v28, %v2266_v59  ;;  %v2277_v43 = vmul.f32 %v8839_v22, %v8773_v61  ;;  %v2379_v22 = vmul.f32 %v8875_v31, %v8793_v36  ;;  %v2380_v47 = vmul.f32 %v8875_v31, %v8799_v53 }
 0xe0d   :  { %v2465_v30 = vadd.f32 %v2457_v24, %v2423_v16  ;;  %v2249_v38 = vpop.permute.xlu1 %2248  ;;  %v2396_v33 = vpop.permute.xlu0 %2395  ;;  %v2479_v28 = vmul.f32 %v8915_v58, %v8793_v36 }
 0xe0e   :  { %v2257_v19 = vsel %vm2233_vm2, %v2249_v38, 0.0  ;;  %v2408_v62 = vsel %vm2286_vm4, %v2396_v33, 0.0  ;;  %v2327_v24 = vadd.f32 %v2319_v20, %v2284_v46  ;;  %v6305_v46 = vunpack.i.l.bf16 %v8704_v0 }
 0xe0f   :  { %v8950_v3 = vadd.f32 %v2475_v13, %v2465_v30  ;;  %v2267_v57 = vmul.f32 %v8832_v49, %v2257_v19  ;;  %v2418_v48 = vmul.f32 %v8900_v2, %v2408_v62 }
 0xe11   :  { %v2340_v52 = vpop.permute.xlu1 %2339  ;;  %v2302_v7 = vpop.permute.xlu0 %2301  ;;  %v2285_v23 = vadd.f32 %v2277_v43, %v2267_v57  ;;  %v2426_v13 = vadd.f32 %v2418_v48, %v8887_v18  ;;  %v2478_v18 = vmul.f32 %v8915_v58, %v8773_v61  ;;  %v6306_v43 = vunpack.i.h.bf16 %v8704_v0 }
 0xe12   :  { %v2350_v14 = vsel %vm2233_vm2, %v2340_v52, 0.0  ;;  %v2310_v29 = vsel %vm2286_vm4, %v2302_v7, 0.0 }
 0xe13   :  { %v2360_v21 = vmul.f32 %v8864_v12, %v2350_v14  ;;  %v2320_v9 = vmul.f32 %v8849_v15, %v2310_v29 }
 0xe15   :  { %v2368_v41 = vadd.f32 %v2360_v21, %v2326_v10  ;;  %v2436_v45 = vpop.permute.xlu1 %2435  ;;  %v2398_v32 = vpop.permute.xlu0 %2397  ;;  %v2328_v15 = vadd.f32 %v2320_v9, %v2285_v23 }
 0xe16   :  { %v2449_v63 = vsel %vm2233_vm2, %v2436_v45, 0.0  ;;  %v2409_v30 = vsel %vm2286_vm4, %v2398_v32, 0.0 }
 0xe17   :  { %v2459_v55 = vmul.f32 %v8913_v5, %v2449_v63  ;;  %v8976_v39 = vadd.f32 %v2378_v25, %v2368_v41  ;;  %v2419_v6 = vmul.f32 %v8900_v2, %v2409_v30  ;;  %v2516_v63 = vstv %s6105_s1  ;;  %s6116_s1 = sld [smem:[#allocation2 + $0x44]] }
 0xe19   :  { %v2467_v40 = vadd.f32 %v2459_v55, %v2425_v54  ;;  %v2342_v26 = vpop.permute.xlu1 %2341  ;;  %v2492_v11 = vpop.permute.xlu0 %2491  ;;  %v2427_v59 = vadd.f32 %v2419_v6, %v8936_v50 }
 0xe1a   :  { %v2351_v16 = vsel %vm2233_vm2, %v2342_v26, 0.0  ;;  %v2507_v50 = vsel %vm2286_vm4, %v2492_v11, 0.0 }
 0xe1b   :  { %v2361_v49 = vmul.f32 %v8864_v12, %v2351_v16  ;;  %v2485_v37 = vadd.f32 %v2477_v17, %v2467_v40  ;;  %v2517_v40 = vmul.f32 %v2516_v63, %v2507_v50 }
 0xe1d   :  { %v2369_v38 = vadd.f32 %v2361_v49, %v2327_v24  ;;  %v2438_v42 = vpop.permute.xlu1 %2437  ;;  %v2344_v33 = vpop.permute.xlu0 %2343  ;;  %v2453_v49 = vsel %vm2233_vm2, %v6305_v46, 0.0  ;;  %v2525_v0 = vadd.f32 %v2517_v40, %v8950_v3 }
 0xe1e   :  { %v2450_v35 = vsel %vm2233_vm2, %v2438_v42, 0.0  ;;  %v2352_v60 = vsel %vm2233_vm2, %v2344_v33, 0.0  ;;  %v2480_v33 = vmul.f32 %v8915_v58, %v8799_v53  ;;  %v2463_v3 = vmul.f32 %v8913_v5, %v2453_v49 }
 0xe1f   :  { %v2460_v44 = vmul.f32 %v8913_v5, %v2450_v35  ;;  %v2362_v52 = vmul.f32 %v8864_v12, %v2352_v60  ;;  %v2387_v7 = vadd.f32 %v2379_v22, %v2369_v38 }
 0xe21   :  { %v2468_v27 = vadd.f32 %v2460_v44, %v2426_v13  ;;  %v2370_v34 = vadd.f32 %v2362_v52, %v2328_v15  ;;  %v2494_v14 = vpop.permute.xlu1 %2493  ;;  %v2440_v10 = vpop.permute.xlu0 %2439 }
 0xe22   :  { %v2451_v21 = vsel %vm2233_vm2, %v2440_v10, 0.0  ;;  %v2508_v31 = vsel %vm2286_vm4, %v2494_v14, 0.0  ;;  %v2481_v10 = vmul.f32 0.0, %v8915_v58 }
 0xe23   :  { %v2461_v19 = vmul.f32 %v8913_v5, %v2451_v21  ;;  %v2486_v12 = vadd.f32 %v2478_v18, %v2468_v27  ;;  %v2388_v41 = vadd.f32 %v2380_v47, %v2370_v34  ;;  %v2518_v55 = vmul.f32 %v2516_v63, %v2508_v31 }
 0xe25   :  { %v2469_v45 = vadd.f32 %v2461_v19, %v2427_v59  ;;  %v2400_v32 = vpop.permute.xlu1 %2399  ;;  %v2402_v25 = vpop.permute.xlu0 %2401  ;;  %v2526_v9 = vadd.f32 %v2518_v55, %v8938_v4  ;;  %v2454_v4 = vsel %vm2233_vm2, %v6306_v43, 0.0 }
 0xe26   :  { %v2410_v54 = vsel %vm2286_vm4, %v2400_v32, 0.0  ;;  %v2411_v36 = vsel %vm2286_vm4, %v2402_v25, 0.0  ;;  %v2464_v44 = vmul.f32 %v8913_v5, %v2454_v4 }
 0xe27   :  { %v2487_v61 = vadd.f32 %v2479_v28, %v2469_v45  ;;  %v2420_v57 = vmul.f32 %v8900_v2, %v2410_v54  ;;  %v2421_v48 = vmul.f32 %v8900_v2, %v2411_v36  ;;  %v2533_v15 = vadd.f32 %v2526_v9, %v2525_v0 }
 0xe29   :  { %v2496_v20 = vpop.permute.xlu1 %2495  ;;  %v2498_v29 = vpop.permute.xlu0 %2497  ;;  %v2428_v16 = vadd.f32 %v2420_v57, %v8976_v39  ;;  %v2429_v39 = vadd.f32 %v2421_v48, %v2387_v7 }
 0xe2a   :  { %v2509_v62 = vsel %vm2286_vm4, %v2496_v20, 0.0  ;;  %v2510_v23 = vsel %vm2286_vm4, %v2498_v29, 0.0 }
 0xe2b   :  { %v2519_v26 = vmul.f32 %v2516_v63, %v2509_v62  ;;  %v2520_v35 = vmul.f32 %v2516_v63, %v2510_v23  ;;  %v2471_v34 = vadd.f32 %v2463_v3, %v2429_v39 }
 0xe2d   :  { %v2442_v17 = vpop.permute.xlu1 %2441  ;;  %v2502_v30 = vpop.permute.xlu0 %2501  ;;  %v2527_v38 = vadd.f32 %v2519_v26, %v2485_v37  ;;  %v2528_v18 = vadd.f32 %v2520_v35, %v2486_v12  ;;  %v2489_v32 = vadd.f32 %v2481_v10, %v2471_v34 }
 0xe2e   :  { %v2452_v11 = vsel %vm2233_vm2, %v2442_v17, 0.0  ;;  %v2512_v7 = vsel %vm2286_vm4, %v2502_v30, 0.0 }
 0xe2f   :  { %v2462_v24 = vmul.f32 %v8913_v5, %v2452_v11  ;;  %v2534_v52 = vadd.f32 %v2533_v15, %v2527_v38  ;;  %v2522_v5 = vmul.f32 %v2516_v63, %v2512_v7 }
 0xe31   :  { %v2470_v42 = vadd.f32 %v2462_v24, %v2428_v16  ;;  %v2404_v22 = vpop.permute.xlu1 %2403  ;;  %v2506_v37 = vpop.permute.xlu0 %2505  ;;  %v2535_v59 = vadd.f32 %v2534_v52, %v2528_v18 }
 0xe32   :  { %v2412_v13 = vsel %vm2286_vm4, %v2404_v22, 0.0  ;;  %v2514_v21 = vsel %vm2286_vm4, %v2506_v37, 0.0 }
 0xe33   :  { %v2488_v60 = vadd.f32 %v2480_v33, %v2470_v42  ;;  %v2422_v6 = vmul.f32 %v8900_v2, %v2412_v13  ;;  %v2524_v45 = vmul.f32 %v2516_v63, %v2514_v21 }
 0xe35   :  { %v2430_v53 = vadd.f32 %v2422_v6, %v2388_v41  ;;  %v2500_v27 = vpop.permute.xlu1 %2499  ;;  %v2530_v28 = vadd.f32 %v2522_v5, %v2488_v60 }
 0xe36   :  { %v2511_v14 = vsel %vm2286_vm4, %v2500_v27, 0.0 }
 0xe37   :  { %v2472_v47 = vadd.f32 %v2464_v44, %v2430_v53  ;;  %v2521_v2 = vmul.f32 %v2516_v63, %v2511_v14 }
 0xe39   :  { %v2529_v19 = vadd.f32 %v2521_v2, %v2487_v61  ;;  %v2504_v41 = vpop.permute.xlu1 %2503  ;;  %v2490_v54 = vadd.f32 %v2481_v10, %v2472_v47  ;;  %v2600_v47 = vstv %s6107_s0  ;;  %s6118_s0 = sld [smem:[#allocation2 + $0x47]] }
 0xe3a   :  { %v2513_v25 = vsel %vm2286_vm4, %v2504_v41, 0.0 }
 0xe3b   :  { %v2536_v31 = vadd.f32 %v2535_v59, %v2529_v19  ;;  %v2523_v20 = vmul.f32 %v2516_v63, %v2513_v25  ;;  %v2532_v50 = vadd.f32 %v2524_v45, %v2490_v54 }
 0xe3d   :  { %v2531_v58 = vadd.f32 %v2523_v20, %v2489_v32  ;;  %v2537_v12 = vadd.f32 %v2536_v31, %v2530_v28 }
 0xe3f   :  { %v2538_v62 = vadd.f32 %v2537_v12, %v2531_v58 }
 0xe41   :  { %v2539_v29 = vadd.f32 %v2538_v62, %v2532_v50 }
 0xe43   :  { %2540 = vadd.xlane.f32.xlu1 %v2539_v29 }
 0xe54   :  { %6308 = vrot.lane.b32.xlu1 %v6431_v1, %s6436_s18 }
 0xed0   :  { %v2541_v55 = vpop.xlane.xlu1 %2540 }
 0xed1   :  { %v2542_v57 = vrot.slane %v2541_v55, 4 }
 0xed3   :  { %v2543_v36 = vadd.f32 %v2542_v57, %v2541_v55 }
 0xed5   :  { %v2544_v61 = vrot.slane %v2543_v36, 2 }
 0xed7   :  { %v2545_v46 = vadd.f32 %v2544_v61, %v2543_v36 }
 0xed9   :  { %v2546_v40 = vrot.slane %v2545_v46, 1 }
 0xedb   :  { %v2547_v26 = vadd.f32 %v2546_v40, %v2545_v46 }
 0xedd   :  { %6220 = vpush %v2547_v26 }
 0xf0e   :  { %s6221_s16 = spop %6220 }
 0xf0f   :  { %s2549_s17 = smul.f32 0.00012207031, %s6221_s16 }
 0xf11   :  { %v2550_v17 = vstv %s2549_s17 }
 0xf12   :  { %v2551_v43 = vsub.f32 %v2525_v0, %v2550_v17  ;;  %v2552_v48 = vsub.f32 %v2526_v9, %v2550_v17  ;;  %v2553_v63 = vsub.f32 %v2527_v38, %v2550_v17  ;;  %v2554_v11 = vsub.f32 %v2528_v18, %v2550_v17 }
 0xf13   :  { %v2555_v49 = vsub.f32 %v2529_v19, %v2550_v17  ;;  %v2556_v42 = vsub.f32 %v2530_v28, %v2550_v17  ;;  %v2557_v4 = vsub.f32 %v2531_v58, %v2550_v17  ;;  %v2558_v15 = vsub.f32 %v2532_v50, %v2550_v17  ;;  %v9092_v17 = vpop.permute.xlu1 %6308 }
 0xf14   :  { %v2559_v16 = vmul.f32 %v2551_v43, %v2551_v43  ;;  %v2560_v24 = vmul.f32 %v2552_v48, %v2552_v48  ;;  %v2561_v23 = vmul.f32 %v2553_v63, %v2553_v63  ;;  %v2562_v33 = vmul.f32 %v2554_v11, %v2554_v11 }
 0xf15   :  { %v2563_v39 = vmul.f32 %v2555_v49, %v2555_v49  ;;  %v2564_v35 = vmul.f32 %v2556_v42, %v2556_v42  ;;  %v2565_v6 = vmul.f32 %v2557_v4, %v2557_v4  ;;  %v2566_v0 = vmul.f32 %v2558_v15, %v2558_v15 }
 0xf16   :  { %v2567_v30 = vadd.f32 %v2560_v24, %v2559_v16  ;;  %v2617_v16 = vand.u32 31, %v6691_v56 }
 0xf18   :  { %v2568_v22 = vadd.f32 %v2567_v30, %v2561_v23  ;;  %vm9095_vm0 = vcmp.lt.s32.totalorder %v2617_v16, 16 }
 0xf1a   :  { %v2569_v13 = vadd.f32 %v2568_v22, %v2562_v33 }
 0xf1c   :  { %v2570_v60 = vadd.f32 %v2569_v13, %v2563_v39 }
 0xf1e   :  { %v2571_v3 = vadd.f32 %v2570_v60, %v2564_v35 }
 0xf20   :  { %v2572_v9 = vadd.f32 %v2571_v3, %v2565_v6 }
 0xf22   :  { %v2573_v38 = vadd.f32 %v2572_v9, %v2566_v0 }
 0xf24   :  { %2574 = vadd.xlane.f32.xlu0 %v2573_v38 }
 0xf3a   :  { %6313 = vrot.lane.b32.xlu0 %v6431_v1, %s6436_s18 }
 0xfb1   :  { %v2575_v37 = vpop.xlane.xlu0 %2574 }
 0xfb2   :  { %v2576_v44 = vrot.slane %v2575_v37, 4 }
 0xfb4   :  { %v2577_v52 = vadd.f32 %v2576_v44, %v2575_v37 }
 0xfb5   :  { %v9090_v26 = vpop.permute.xlu0 %6313 }
 0xfb6   :  { %v2578_v53 = vrot.slane %v2577_v52, 2 }
 0xfb8   :  { %v2579_v27 = vadd.f32 %v2578_v53, %v2577_v52 }
 0xfba   :  { %v2580_v34 = vrot.slane %v2579_v27, 1 }
 0xfbc   :  { %v2581_v7 = vadd.f32 %v2580_v34, %v2579_v27 }
 0xfbe   :  { %6222 = vpush %v2581_v7 }
 0xfef   :  { %s6223_s21 = spop %6222 }
 0xff0   :  { %s2583_s26 = smul.f32 0.00012207031, %s6223_s21 }
 0xff2   :  { %s2585_s27 = sadd.f32 1e-05, %s2583_s26 }
 0xff4   :  { %v2586_v14 = vstv %s2585_s27 }
 0xff5   :  { %6390 = vrsqrt.f32 %v2586_v14 }
 0xfff   :  { %v6391_v10 = vpop.eup %6390 }
0x1000   :  { %6224 = vpush %v6391_v10 }
0x1031   :  { %s6225_s3 = spop %6224 }
0x1032   :  { %s2589_s4 = smul.f32 %s6225_s3, %s6106_s30  ;;  %s6117_s30 = sld [smem:[#allocation2 + $0x46]] }
0x1034   :  { %v2590_v18 = vstv %s2589_s4 }
0x1035   :  { %v2592_v2 = vmul.f32 %v2590_v18, %v2552_v48  ;;  %v2591_v21 = vmul.f32 %v2590_v18, %v2551_v43  ;;  %v2593_v59 = vmul.f32 %v2590_v18, %v2553_v63  ;;  %v2594_v5 = vmul.f32 %v2590_v18, %v2554_v11 }
0x1036   :  { %v2595_v20 = vmul.f32 %v2590_v18, %v2555_v49  ;;  %v2596_v58 = vmul.f32 %v2590_v18, %v2556_v42  ;;  %v2597_v62 = vmul.f32 %v2590_v18, %v2557_v4  ;;  %v2598_v29 = vmul.f32 %v2590_v18, %v2558_v15 }
0x1037   :  { %v2602_v19 = vadd.f32 %v2600_v47, %v2592_v2  ;;  %v2601_v41 = vadd.f32 %v2600_v47, %v2591_v21  ;;  %v2603_v25 = vadd.f32 %v2600_v47, %v2593_v59  ;;  %v2604_v28 = vadd.f32 %v2600_v47, %v2594_v5 }
0x1038   :  { %v2605_v12 = vadd.f32 %v2600_v47, %v2595_v20  ;;  %v2606_v50 = vadd.f32 %v2600_v47, %v2596_v58  ;;  %v2607_v36 = vadd.f32 %v2600_v47, %v2597_v62  ;;  %v2608_v61 = vadd.f32 %v2600_v47, %v2598_v29 }
0x1039   :  { %v2610_v45 = vmax.f32 %v2602_v19, 0.0  ;;  %v2609_v32 = vmax.f32 %v2601_v41, 0.0  ;;  %v2611_v31 = vmax.f32 %v2603_v25, 0.0  ;;  %v2612_v54 = vmax.f32 %v2604_v28, 0.0 }
0x103a   :  { %v2613_v55 = vmax.f32 %v2605_v12, 0.0  ;;  %v9064_v57 = vmax.f32 %v2606_v50, 0.0  ;;  %v2615_v46 = vmax.f32 %v2607_v36, 0.0  ;;  %v9069_v40 = vmax.f32 %v2608_v61, 0.0 }
0x103b   :  { %2637 = vrot.lane.b32.xlu1 %v2610_v45, %s6435_s25  ;;  %2635 = vrot.lane.b32.xlu0 %v2609_v32, %s6435_s25  ;;  %v6310_v29 = vunpack.i.l.bf16 %v9092_v17  ;;  %v6311_v61 = vunpack.i.h.bf16 %v9092_v17 }
0x103f   :  { %2639 = vrot.lane.b32.xlu1 %v2611_v31, %s6435_s25  ;;  %2641 = vrot.lane.b32.xlu0 %v2612_v54, %s6435_s25 }
0x1043   :  { %2651 = vrot.lane.b32.xlu1 %v2609_v32, %s6434_s22  ;;  %2653 = vrot.lane.b32.xlu0 %v2610_v45, %s6434_s22 }
0x1047   :  { %2655 = vrot.lane.b32.xlu1 %v2611_v31, %s6434_s22  ;;  %2657 = vrot.lane.b32.xlu0 %v2612_v54, %s6434_s22 }
0x104b   :  { %2643 = vrot.lane.b32.xlu1 %v2613_v55, %s6435_s25  ;;  %2645 = vrot.lane.b32.xlu0 %v9064_v57, %s6435_s25 }
0x104f   :  { %2647 = vrot.lane.b32.xlu1 %v2615_v46, %s6435_s25  ;;  %2649 = vrot.lane.b32.xlu0 %v9069_v40, %s6435_s25 }
0x1053   :  { %2659 = vrot.lane.b32.xlu1 %v2613_v55, %s6434_s22  ;;  %2661 = vrot.lane.b32.xlu0 %v9064_v57, %s6434_s22 }
0x1057   :  { %2663 = vrot.lane.b32.xlu1 %v2615_v46, %s6434_s22  ;;  %2665 = vrot.lane.b32.xlu0 %v9069_v40, %s6434_s22 }
0x105b   :  { %6318 = vrot.lane.b32.xlu1 %v6431_v1, %s6437_s5  ;;  %6323 = vrot.lane.b32.xlu0 %v6431_v1, %s6437_s5 }
0x105f   :  { %6328 = vrot.lane.b32.xlu1 %v6431_v1, %s6436_s18  ;;  %6333 = vrot.lane.b32.xlu0 %v6431_v1, %s6436_s18 }
0x1063   :  { %2997 = vrot.lane.b32.xlu1 %v6431_v1, %s6437_s5 }
0x10ad   :  { %v2636_v43 = vpop.permute.xlu0 %2635  ;;  %v2638_v48 = vpop.permute.xlu1 %2637 }
0x10b1   :  { %v2642_v63 = vpop.permute.xlu0 %2641  ;;  %v2640_v11 = vpop.permute.xlu1 %2639 }
0x10b5   :  { %v2654_v49 = vpop.permute.xlu0 %2653  ;;  %v2652_v23 = vpop.permute.xlu1 %2651 }
0x10b6   :  { %v2668_v30 = vsel %vm9095_vm0, %v2638_v48, %v2654_v49  ;;  %v2667_v42 = vsel %vm9095_vm0, %v2636_v43, %v2652_v23  ;;  %v9223_v43 = vstv %s6109_s7  ;;  %v6315_v48 = vunpack.i.l.bf16 %v9090_v26  ;;  %s6121_s7 = sld [smem:[#allocation2 + $0x4a]] }
0x10b7   :  { %v2676_v13 = vmax.f32 %v2610_v45, %v2668_v30  ;;  %v2675_v15 = vmax.f32 %v2609_v32, %v2667_v42  ;;  %v9235_v30 = vstv %s6111_s9  ;;  %s9607_s9 = sld [smem:[#allocation2 + $0x4d]] }
0x10b9   :  { %v2658_v33 = vpop.permute.xlu0 %2657  ;;  %v2656_v22 = vpop.permute.xlu1 %2655 }
0x10ba   :  { %v2670_v4 = vsel %vm9095_vm0, %v2642_v63, %v2658_v33  ;;  %v2669_v39 = vsel %vm9095_vm0, %v2640_v11, %v2656_v22  ;;  %v9226_v63 = vstv %s6110_s8  ;;  %v9244_v22 = vmul.f32 0.0, %v9223_v43  ;;  %s9601_s8 = sld [smem:[#allocation2 + $0x4c]] }
0x10bb   :  { %v2678_v35 = vmax.f32 %v2612_v54, %v2670_v4  ;;  %v2677_v60 = vmax.f32 %v2611_v31, %v2669_v39 }
0x10bd   :  { %v9107_v6 = vmax.f32 %v2676_v13, %v2678_v35  ;;  %v9109_v3 = vmax.f32 %v2675_v15, %v2677_v60  ;;  %v2646_v0 = vpop.permute.xlu0 %2645  ;;  %v2644_v9 = vpop.permute.xlu1 %2643  ;;  %v9115_v38 = vmax.f32 %v2677_v60, %v2675_v15  ;;  %v9125_v53 = vmax.f32 %v2678_v35, %v2676_v13 }
0x10bf   :  { %2829 = vrot.lane.b32.xlu0 %v9107_v6, %s6436_s18  ;;  %2827 = vrot.lane.b32.xlu1 %v9109_v3, %s6436_s18 }
0x10c1   :  { %v2648_v37 = vpop.permute.xlu1 %2647  ;;  %v2650_v44 = vpop.permute.xlu0 %2649 }
0x10c3   :  { %2831 = vrot.lane.b32.xlu0 %v9115_v38, %s6436_s18  ;;  %2740 = vrot.lane.b32.xlu1 %v9109_v3, %s6436_s18 }
0x10c5   :  { %v2660_v52 = vpop.permute.xlu1 %2659  ;;  %v2662_v27 = vpop.permute.xlu0 %2661 }
0x10c6   :  { %v2671_v14 = vsel %vm9095_vm0, %v2644_v9, %v2660_v52  ;;  %v2672_v59 = vsel %vm9095_vm0, %v2646_v0, %v2662_v27 }
0x10c7   :  { %2793 = vrot.lane.b32.xlu0 %v9109_v3, %s6437_s5  ;;  %2742 = vrot.lane.b32.xlu1 %v9107_v6, %s6436_s18  ;;  %v2679_v18 = vmax.f32 %v2613_v55, %v2671_v14  ;;  %v2680_v19 = vmax.f32 %v9064_v57, %v2672_v59  ;;  %v9272_v59 = vstv %s6113_s11  ;;  %s9630_s11 = sld [smem:[#allocation2 + $0x4e]] }
0x10c9   :  { %v2664_v34 = vpop.permute.xlu1 %2663  ;;  %v2666_v47 = vpop.permute.xlu0 %2665 }
0x10ca   :  { %v2673_v7 = vsel %vm9095_vm0, %v2648_v37, %v2664_v34  ;;  %v2674_v21 = vsel %vm9095_vm0, %v2650_v44, %v2666_v47  ;;  %vm2731_vm0 = vcmp.ge.s32.totalorder %v6691_v56, 32  ;;  %v9264_v34 = vstv %s6112_s10  ;;  %s9609_s10 = sld [smem:[#allocation2 + $0x4f]] }
0x10cb   :  { %2887 = vrot.lane.b32.xlu0 %v9109_v3, %s6437_s5  ;;  %2833 = vrot.lane.b32.xlu1 %v9125_v53, %s6436_s18  ;;  %v2681_v10 = vmax.f32 %v2615_v46, %v2673_v7  ;;  %v2682_v5 = vmax.f32 %v9069_v40, %v2674_v21  ;;  %v2748_v46 = vsel %vm2731_vm0, %v6310_v29, 0.0  ;;  %v9221_v40 = vstv %s6108_s6  ;;  %s6120_s6 = sld [smem:[#allocation2 + $0x49]] }
0x10cc   :  { %v2758_v24 = vmul.f32 %v9221_v40, %v2748_v46  ;;  %v2749_v23 = vsel %vm2731_vm0, %v6311_v61, 0.0  ;;  %v2750_v39 = vsel %vm2731_vm0, %v6315_v48, 0.0  ;;  %v6316_v47 = vunpack.i.h.bf16 %v9090_v26 }
0x10cd   :  { %v9139_v2 = vmax.f32 %v2679_v18, %v2681_v10  ;;  %v9155_v41 = vmax.f32 %v2680_v19, %v2682_v5  ;;  %v9165_v45 = vmax.f32 %v2681_v10, %v2679_v18  ;;  %v9175_v32 = vmax.f32 %v2682_v5, %v2680_v19  ;;  %v6319_v25 = vpop.permute.xlu1 %6318  ;;  %v9205_v31 = vpop.permute.xlu0 %6323 }
0x10ce   :  { %v6320_v55 = vunpack.i.l.bf16 %v6319_v25  ;;  %v6321_v11 = vunpack.i.h.bf16 %v6319_v25  ;;  %v2759_v35 = vmul.f32 %v9221_v40, %v2749_v23  ;;  %v2776_v60 = vadd.f32 %v9244_v22, %v2758_v24 }
0x10cf   :  { %2744 = vrot.lane.b32.xlu0 %v9115_v38, %s6436_s18  ;;  %2889 = vrot.lane.b32.xlu1 %v9107_v6, %s6437_s5  ;;  %v6325_v52 = vunpack.i.l.bf16 %v9205_v31  ;;  %v2772_v10 = vmul.f32 %v9223_v43, %v9109_v3  ;;  %v2760_v21 = vmul.f32 %v9221_v40, %v2750_v39  ;;  %v2871_v26 = vmul.f32 %v9264_v34, %v9109_v3 }
0x10d0   :  { %v2801_v16 = vsel %vm2784_vm10, %v6320_v55, 0.0  ;;  %v2802_v13 = vsel %vm2784_vm10, %v6321_v11, 0.0  ;;  %v2777_v19 = vadd.f32 %v9244_v22, %v2759_v35  ;;  %v9285_v61 = vstv %s9241_s14  ;;  %s6127_s14 = sld [smem:[#allocation2 + $0x50]] }
0x10d1   :  { %v9203_v28 = vpop.permute.xlu1 %6328  ;;  %v9207_v54 = vpop.permute.xlu0 %6333  ;;  %v2811_v4 = vmul.f32 %v9226_v63, %v2801_v16  ;;  %v2812_v7 = vmul.f32 %v9226_v63, %v2802_v13  ;;  %v2803_v55 = vsel %vm2784_vm10, %v6325_v52, 0.0  ;;  %v6326_v24 = vunpack.i.h.bf16 %v9205_v31 }
0x10d2   :  { %v2872_v23 = vmul.f32 %v9264_v34, %v9107_v6  ;;  %v2813_v35 = vmul.f32 %v9226_v63, %v2803_v55 }
0x10d3   :  { %2795 = vrot.lane.b32.xlu1 %v9107_v6, %s6437_s5  ;;  %2835 = vrot.lane.b32.xlu0 %v9139_v2, %s6436_s18  ;;  %v2819_v14 = vadd.f32 %v2811_v4, %v2776_v60  ;;  %v2820_v46 = vadd.f32 %v2812_v7, %v2777_v19  ;;  %v2751_v7 = vsel %vm2731_vm0, %v6316_v47, 0.0 }
0x10d5   :  { %v9209_v20 = vpop.permute.xlu1 %2997 }
0x10d7   :  { %2891 = vrot.lane.b32.xlu1 %v9115_v38, %s6437_s5  ;;  %2929 = vrot.lane.b32.xlu0 %v9139_v2, %s6436_s18 }
0x10db   :  { %2931 = vrot.lane.b32.xlu1 %v9155_v41, %s6436_s18  ;;  %2746 = vrot.lane.b32.xlu0 %v9125_v53, %s6436_s18 }
0x10df   :  { %2797 = vrot.lane.b32.xlu1 %v9115_v38, %s6437_s5  ;;  %2837 = vrot.lane.b32.xlu0 %v9155_v41, %s6436_s18 }
0x10e3   :  { %2893 = vrot.lane.b32.xlu1 %v9125_v53, %s6437_s5  ;;  %2933 = vrot.lane.b32.xlu0 %v9165_v45, %s6436_s18 }
0x10e7   :  { %2799 = vrot.lane.b32.xlu1 %v9125_v53, %s6437_s5  ;;  %2839 = vrot.lane.b32.xlu0 %v9165_v45, %s6436_s18 }
0x10eb   :  { %2895 = vrot.lane.b32.xlu1 %v9139_v2, %s6437_s5  ;;  %2935 = vrot.lane.b32.xlu0 %v9175_v32, %s6436_s18 }
0x10ef   :  { %2989 = vrot.lane.b32.xlu1 %v9139_v2, %s6437_s5  ;;  %2991 = vrot.lane.b32.xlu0 %v9155_v41, %s6437_s5 }
0x10f3   :  { %2841 = vrot.lane.b32.xlu1 %v9175_v32, %s6436_s18  ;;  %2897 = vrot.lane.b32.xlu0 %v9155_v41, %s6437_s5 }
0x10f7   :  { %2899 = vrot.lane.b32.xlu1 %v9165_v45, %s6437_s5  ;;  %2993 = vrot.lane.b32.xlu0 %v9165_v45, %s6437_s5 }
0x10fb   :  { %2901 = vrot.lane.b32.xlu1 %v9175_v32, %s6437_s5  ;;  %2995 = vrot.lane.b32.xlu0 %v9175_v32, %s6437_s5 }
0x10ff   :  { %3001 = vrot.lane.b32.xlu1 %v6431_v1, %s6437_s5  ;;  %2999 = vrot.lane.b32.xlu0 %v6431_v1, %s6437_s5 }
0x1103   :  { %3003 = vrot.lane.b32.xlu0 %v6431_v1, %s6437_s5 }
0x1131   :  { %v2830_v58 = vpop.permute.xlu0 %2829  ;;  %v2828_v12 = vpop.permute.xlu1 %2827 }
0x1132   :  { %v2843_v42 = vsel %vm2731_vm0, %v2828_v12, 0.0  ;;  %v2844_v27 = vsel %vm2731_vm0, %v2830_v58, 0.0 }
0x1133   :  { %v2853_v0 = vmul.f32 %v9235_v30, %v2843_v42  ;;  %v2854_v25 = vmul.f32 %v9235_v30, %v2844_v27 }
0x1135   :  { %v9211_v50 = vpop.permute.xlu0 %2831  ;;  %v2741_v62 = vpop.permute.xlu1 %2740  ;;  %v2861_v58 = vadd.f32 %v2853_v0, %v2819_v14  ;;  %v2862_v42 = vadd.f32 %v2854_v25, %v2820_v46  ;;  %v2778_v14 = vadd.f32 %v9244_v22, %v2760_v21  ;;  %v2773_v21 = vmul.f32 %v9223_v43, %v9107_v6 }
0x1136   :  { %v2752_v33 = vsel %vm2731_vm0, %v2741_v62, 0.0  ;;  %v2845_v31 = vsel %vm2731_vm0, %v9211_v50, 0.0  ;;  %v2873_v46 = vmul.f32 %v9264_v34, %v9115_v38 }
0x1137   :  { %v2762_v9 = vmul.f32 %v9221_v40, %v2752_v33  ;;  %v2879_v33 = vadd.f32 %v2871_v26, %v2861_v58  ;;  %v2821_v47 = vadd.f32 %v2813_v35, %v2778_v14 }
0x1139   :  { %v2794_v57 = vpop.permute.xlu0 %2793  ;;  %v9216_v36 = vpop.permute.xlu1 %2742  ;;  %v2780_v12 = vadd.f32 %v2772_v10, %v2762_v9  ;;  %v2855_v10 = vmul.f32 %v9235_v30, %v2845_v31 }
0x113a   :  { %v2805_v15 = vsel %vm2784_vm10, %v2794_v57, 0.0  ;;  %v2753_v60 = vsel %vm2731_vm0, %v9216_v36, 0.0  ;;  %v2973_v36 = vmul.f32 %v9285_v61, %v9139_v2 }
0x113b   :  { %v2815_v18 = vmul.f32 %v9226_v63, %v2805_v15  ;;  %v2875_v15 = vmul.f32 %v9264_v34, %v9139_v2 }
0x113d   :  { %v2888_v17 = vpop.permute.xlu0 %2887  ;;  %v9231_v49 = vpop.permute.xlu1 %2833  ;;  %v2823_v48 = vadd.f32 %v2815_v18, %v2780_v12  ;;  %v2763_v18 = vmul.f32 %v9221_v40, %v2753_v60  ;;  %v2804_v12 = vsel %vm2784_vm10, %v6326_v24, 0.0 }
0x113e   :  { %v2903_v5 = vsel %vm2784_vm10, %v2888_v17, 0.0  ;;  %v9291_v17 = vstv %s9251_s15 }
0x113f   :  { %v2913_v11 = vmul.f32 %v9272_v59, %v2903_v5  ;;  %v2880_v5 = vadd.f32 %v2872_v23, %v2862_v42  ;;  %v2781_v6 = vadd.f32 %v2773_v21, %v2763_v18  ;;  %v2814_v42 = vmul.f32 %v9226_v63, %v2804_v12 }
0x1141   :  { %v9259_v37 = vpop.permute.xlu0 %2744  ;;  %v2890_v44 = vpop.permute.xlu1 %2889  ;;  %v2921_v9 = vadd.f32 %v2913_v11, %v2879_v33  ;;  %v2863_v11 = vadd.f32 %v2855_v10, %v2821_v47  ;;  %v2846_v33 = vsel %vm2731_vm0, %v9231_v49, 0.0  ;;  %v2876_v49 = vmul.f32 %v9264_v34, %v9155_v41 }
0x1142   :  { %v2904_v3 = vsel %vm2784_vm10, %v2890_v44, 0.0 }
0x1143   :  { %v2914_v44 = vmul.f32 %v9272_v59, %v2904_v3  ;;  %v2974_v3 = vmul.f32 %v9285_v61, %v9155_v41 }
0x1145   :  { %v2836_v62 = vpop.permute.xlu0 %2835  ;;  %v2796_v29 = vpop.permute.xlu1 %2795 }
0x1146   :  { %v2847_v57 = vsel %vm2731_vm0, %v2836_v62, 0.0  ;;  %v2806_v50 = vsel %vm2784_vm10, %v2796_v29, 0.0  ;;  %v2922_v29 = vadd.f32 %v2914_v44, %v2880_v5  ;;  %v2881_v44 = vadd.f32 %v2873_v46, %v2863_v11 }
0x1147   :  { %v2857_v16 = vmul.f32 %v9235_v30, %v2847_v57  ;;  %v2816_v2 = vmul.f32 %v9226_v63, %v2806_v50  ;;  %v2761_v57 = vmul.f32 %v9221_v40, %v2751_v7 }
0x1149   :  { %v2865_v4 = vadd.f32 %v2857_v16, %v2823_v48  ;;  %v2930_v39 = vpop.permute.xlu0 %2929  ;;  %v2892_v13 = vpop.permute.xlu1 %2891  ;;  %v2779_v60 = vadd.f32 %v9244_v22, %v2761_v57 }
0x114a   :  { %v2945_v0 = vsel %vm2731_vm0, %v2930_v39, 0.0  ;;  %v2905_v48 = vsel %vm2784_vm10, %v2892_v13, 0.0  ;;  %v2824_v13 = vadd.f32 %v2816_v2, %v2781_v6 }
0x114b   :  { %v2955_v52 = vmul.f32 %v9291_v17, %v2945_v0  ;;  %v9310_v27 = vadd.f32 %v2875_v15, %v2865_v4  ;;  %v2754_v4 = vsel %vm2731_vm0, %v9259_v37, 0.0  ;;  %v2915_v15 = vmul.f32 %v9272_v59, %v2905_v48 }
0x114c   :  { %v2856_v37 = vmul.f32 %v9235_v30, %v2846_v33  ;;  %v2822_v50 = vadd.f32 %v2814_v42, %v2779_v60 }
0x114d   :  { %v2963_v19 = vadd.f32 %v2955_v52, %v2921_v9  ;;  %v2747_v25 = vpop.permute.xlu0 %2746  ;;  %v2932_v58 = vpop.permute.xlu1 %2931  ;;  %v2764_v9 = vmul.f32 %v9221_v40, %v2754_v4  ;;  %v2923_v10 = vadd.f32 %v2915_v15, %v2881_v44  ;;  %v6330_v4 = vunpack.i.l.bf16 %v9203_v28 }
0x114e   :  { %v2946_v62 = vsel %vm2731_vm0, %v2932_v58, 0.0  ;;  %v2864_v58 = vadd.f32 %v2856_v37, %v2822_v50  ;;  %v2976_v37 = vmul.f32 %v9285_v61, %v9175_v32 }
0x114f   :  { %v2956_v55 = vmul.f32 %v9291_v17, %v2946_v62  ;;  %v9329_v26 = vadd.f32 %v2973_v36, %v2963_v19  ;;  %v2774_v36 = vmul.f32 %v9223_v43, %v9115_v38  ;;  %v2975_v38 = vmul.f32 %v9285_v61, %v9165_v45 }
0x1150   :  { %v2949_v44 = vsel %vm2731_vm0, %v6330_v4, 0.0 }
0x1151   :  { %v2964_v16 = vadd.f32 %v2956_v55, %v2922_v29  ;;  %v2838_v24 = vpop.permute.xlu0 %2837  ;;  %v2798_v23 = vpop.permute.xlu1 %2797  ;;  %v2782_v12 = vadd.f32 %v2774_v36, %v2764_v9  ;;  %v2874_v29 = vmul.f32 %v9264_v34, %v9125_v53  ;;  %v2775_v9 = vmul.f32 %v9223_v43, %v9125_v53 }
0x1152   :  { %v2848_v39 = vsel %vm2731_vm0, %v2838_v24, 0.0  ;;  %v2807_v0 = vsel %vm2784_vm10, %v2798_v23, 0.0  ;;  %v2877_v23 = vmul.f32 %v9264_v34, %v9165_v45  ;;  %v9402_v36 = vstv %s6116_s1 }
0x1153   :  { %v2858_v35 = vmul.f32 %v9235_v30, %v2848_v39  ;;  %v9349_v31 = vadd.f32 %v2974_v3, %v2964_v16  ;;  %v2817_v18 = vmul.f32 %v9226_v63, %v2807_v0  ;;  %v2882_v11 = vadd.f32 %v2874_v29, %v2864_v58 }
0x1154   :  { %v2755_v3 = vsel %vm2731_vm0, %v2747_v25, 0.0 }
0x1155   :  { %v2866_v52 = vadd.f32 %v2858_v35, %v2824_v13  ;;  %v2934_v7 = vpop.permute.xlu0 %2933  ;;  %v2894_v14 = vpop.permute.xlu1 %2893  ;;  %v2825_v55 = vadd.f32 %v2817_v18, %v2782_v12  ;;  %v2765_v45 = vmul.f32 %v9221_v40, %v2755_v3  ;;  %v2959_v18 = vmul.f32 %v9291_v17, %v2949_v44 }
0x1156   :  { %v2947_v22 = vsel %vm2731_vm0, %v2934_v7, 0.0  ;;  %v2906_v19 = vsel %vm2784_vm10, %v2894_v14, 0.0  ;;  %v6331_v14 = vunpack.i.h.bf16 %v9203_v28 }
0x1157   :  { %v2957_v41 = vmul.f32 %v9291_v17, %v2947_v22  ;;  %v9364_v5 = vadd.f32 %v2876_v49, %v2866_v52  ;;  %v2916_v57 = vmul.f32 %v9272_v59, %v2906_v19  ;;  %v2783_v22 = vadd.f32 %v2775_v9, %v2765_v45 }
0x1159   :  { %v2965_v47 = vadd.f32 %v2957_v41, %v2923_v10  ;;  %v2840_v21 = vpop.permute.xlu0 %2839  ;;  %v2800_v62 = vpop.permute.xlu1 %2799  ;;  %v2924_v39 = vadd.f32 %v2916_v57, %v2882_v11 }
0x115a   :  { %v2849_v2 = vsel %vm2731_vm0, %v2840_v21, 0.0  ;;  %v2808_v35 = vsel %vm2784_vm10, %v2800_v62, 0.0  ;;  %v6336_v21 = vunpack.i.h.bf16 %v9207_v54  ;;  %v6335_v62 = vunpack.i.l.bf16 %v9207_v54 }
0x115b   :  { %v2859_v46 = vmul.f32 %v9235_v30, %v2849_v2  ;;  %v2983_v48 = vadd.f32 %v2975_v38, %v2965_v47  ;;  %v2818_v52 = vmul.f32 %v9226_v63, %v2808_v35  ;;  %v2977_v38 = vmul.f32 0.0, %v9285_v61 }
0x115d   :  { %v2867_v6 = vadd.f32 %v2859_v46, %v2825_v55  ;;  %v2936_v16 = vpop.permute.xlu0 %2935  ;;  %v2896_v24 = vpop.permute.xlu1 %2895  ;;  %v2826_v19 = vadd.f32 %v2818_v52, %v2783_v22  ;;  %v2878_v46 = vmul.f32 %v9264_v34, %v9175_v32  ;;  %v2951_v34 = vsel %vm2731_vm0, %v6335_v62, 0.0 }
0x115e   :  { %v2948_v42 = vsel %vm2731_vm0, %v2936_v16, 0.0  ;;  %v2907_v33 = vsel %vm2784_vm10, %v2896_v24, 0.0  ;;  %v2961_v45 = vmul.f32 %v9291_v17, %v2951_v34 }
0x115f   :  { %v2958_v13 = vmul.f32 %v9291_v17, %v2948_v42  ;;  %v2885_v15 = vadd.f32 %v2877_v23, %v2867_v6  ;;  %v2917_v25 = vmul.f32 %v9272_v59, %v2907_v33 }
0x1161   :  { %v2966_v60 = vadd.f32 %v2958_v13, %v2924_v39  ;;  %v2992_v0 = vpop.permute.xlu0 %2991  ;;  %v2990_v49 = vpop.permute.xlu1 %2989  ;;  %v2925_v10 = vadd.f32 %v2917_v25, %v9310_v27  ;;  %v2950_v27 = vsel %vm2731_vm0, %v6331_v14, 0.0 }
0x1162   :  { %v3006_v7 = vsel %vm2784_vm10, %v2992_v0, 0.0  ;;  %v3005_v50 = vsel %vm2784_vm10, %v2990_v49, 0.0  ;;  %v2960_v32 = vmul.f32 %v9291_v17, %v2950_v27 }
0x1163   :  { %v2984_v40 = vadd.f32 %v2976_v37, %v2966_v60  ;;  %v3016_v63 = vmul.f32 %v9402_v36, %v3006_v7  ;;  %v3015_v58 = vmul.f32 %v9402_v36, %v3005_v50  ;;  %v2967_v29 = vadd.f32 %v2959_v18, %v2925_v10 }
0x1165   :  { %v2898_v53 = vpop.permute.xlu0 %2897  ;;  %v2842_v43 = vpop.permute.xlu1 %2841  ;;  %v9422_v11 = vadd.f32 %v3016_v63, %v9349_v31  ;;  %v3023_v61 = vadd.f32 %v3015_v58, %v9329_v26  ;;  %v2952_v31 = vsel %vm2731_vm0, %v6336_v21, 0.0  ;;  %v2985_v4 = vadd.f32 %v2977_v38, %v2967_v29 }
0x1166   :  { %v2908_v41 = vsel %vm2784_vm10, %v2898_v53, 0.0  ;;  %v2850_v28 = vsel %vm2731_vm0, %v2842_v43, 0.0 }
0x1167   :  { %v2918_v12 = vmul.f32 %v9272_v59, %v2908_v41  ;;  %v2860_v47 = vmul.f32 %v9235_v30, %v2850_v28  ;;  %v3031_v60 = vadd.f32 %v9422_v11, %v3023_v61 }
0x1169   :  { %v2868_v2 = vadd.f32 %v2860_v47, %v2826_v19  ;;  %v2994_v55 = vpop.permute.xlu0 %2993  ;;  %v2900_v57 = vpop.permute.xlu1 %2899  ;;  %v2926_v30 = vadd.f32 %v2918_v12, %v9364_v5  ;;  %v3009_v5 = vsel %vm2784_vm10, %v9209_v20, 0.0 }
0x116a   :  { %v3007_v6 = vsel %vm2784_vm10, %v2994_v55, 0.0  ;;  %v2909_v54 = vsel %vm2784_vm10, %v2900_v57, 0.0 }
0x116b   :  { %v3017_v16 = vmul.f32 %v9402_v36, %v3007_v6  ;;  %v2919_v24 = vmul.f32 %v9272_v59, %v2909_v54  ;;  %v2886_v23 = vadd.f32 %v2878_v46, %v2868_v2  ;;  %v2968_v39 = vadd.f32 %v2960_v32, %v2926_v30 }
0x116d   :  { %v3025_v3 = vadd.f32 %v3017_v16, %v2983_v48  ;;  %v2927_v42 = vadd.f32 %v2919_v24, %v2885_v15  ;;  %v2996_v26 = vpop.permute.xlu0 %2995  ;;  %v2902_v33 = vpop.permute.xlu1 %2901  ;;  %v2962_v48 = vmul.f32 %v9291_v17, %v2952_v31  ;;  %v3019_v15 = vmul.f32 %v9402_v36, %v3009_v5 }
0x116e   :  { %v3008_v13 = vsel %vm2784_vm10, %v2996_v26, 0.0  ;;  %v2910_v35 = vsel %vm2784_vm10, %v2902_v33, 0.0  ;;  %v2986_v7 = vadd.f32 %v2977_v38, %v2968_v39 }
0x116f   :  { %v3018_v25 = vmul.f32 %v9402_v36, %v3008_v13  ;;  %v2920_v20 = vmul.f32 %v9272_v59, %v2910_v35  ;;  %v3032_v0 = vadd.f32 %v3031_v60, %v3025_v3  ;;  %v2969_v49 = vadd.f32 %v2961_v45, %v2927_v42 }
0x1170   :  { %v3027_v50 = vadd.f32 %v3019_v15, %v2985_v4 }
0x1171   :  { %v3026_v37 = vadd.f32 %v3018_v25, %v2984_v40  ;;  %v2928_v9 = vadd.f32 %v2920_v20, %v2886_v23  ;;  %v3000_v44 = vpop.permute.xlu0 %2999  ;;  %v3002_v52 = vpop.permute.xlu1 %3001  ;;  %v2987_v40 = vadd.f32 %v2977_v38, %v2969_v49 }
0x1172   :  { %v3010_v14 = vsel %vm2784_vm10, %v3000_v44, 0.0  ;;  %v3011_v22 = vsel %vm2784_vm10, %v3002_v52, 0.0 }
0x1173   :  { %v3033_v10 = vadd.f32 %v3032_v0, %v3026_v37  ;;  %v2970_v59 = vadd.f32 %v2962_v48, %v2928_v9  ;;  %v3020_v17 = vmul.f32 %v9402_v36, %v3010_v14  ;;  %v3021_v53 = vmul.f32 %v9402_v36, %v3011_v22 }
0x1174   :  { %v3098_v14 = vstv %s6118_s0 }
0x1175   :  { %v3028_v43 = vadd.f32 %v3020_v17, %v2986_v7  ;;  %v3034_v18 = vadd.f32 %v3033_v10, %v3027_v50  ;;  %v3004_v63 = vpop.permute.xlu0 %3003  ;;  %v3029_v19 = vadd.f32 %v3021_v53, %v2987_v40  ;;  %v2988_v58 = vadd.f32 %v2977_v38, %v2970_v59 }
0x1176   :  { %v3012_v41 = vsel %vm2784_vm10, %v3004_v63, 0.0 }
0x1177   :  { %v3035_v28 = vadd.f32 %v3034_v18, %v3028_v43  ;;  %v3022_v12 = vmul.f32 %v9402_v36, %v3012_v41 }
0x1179   :  { %v3030_v47 = vadd.f32 %v3022_v12, %v2988_v58  ;;  %v3036_v27 = vadd.f32 %v3035_v28, %v3029_v19 }
0x117b   :  { %v3037_v21 = vadd.f32 %v3036_v27, %v3030_v47 }
0x117d   :  { %3038 = vadd.xlane.f32.xlu1 %v3037_v21 }
0x118e   :  { %6343 = vrot.lane.b32.xlu1 %v6431_v1, %s6436_s18 }
0x1192   :  { %6348 = vrot.lane.b32.xlu1 %v6431_v1, %s6437_s5 }
0x1196   :  { %6358 = vrot.lane.b32.xlu1 %v6431_v1, %s6436_s18 }
0x119a   :  { %3395 = vrot.lane.b32.xlu1 %v6431_v1, %s6437_s5 }
0x120a   :  { %v3039_v62 = vpop.xlane.xlu1 %3038 }
0x120b   :  { %v3040_v29 = vrot.slane %v3039_v62, 4 }
0x120d   :  { %v3041_v2 = vadd.f32 %v3040_v29, %v3039_v62 }
0x120f   :  { %v3042_v55 = vrot.slane %v3041_v2, 2 }
0x1211   :  { %v3043_v57 = vadd.f32 %v3042_v55, %v3041_v2 }
0x1213   :  { %v3044_v46 = vrot.slane %v3043_v57, 1 }
0x1215   :  { %v3045_v30 = vadd.f32 %v3044_v46, %v3043_v57 }
0x1217   :  { %6226 = vpush %v3045_v30  ;;  %v9580_v30 = vpop.permute.xlu1 %6343 }
0x1248   :  { %s6227_s16 = spop %6226 }
0x1249   :  { %s3047_s17 = smul.f32 0.00012207031, %s6227_s16 }
0x124b   :  { %v3048_v6 = vstv %s3047_s17 }
0x124c   :  { %v3049_v54 = vsub.f32 %v3023_v61, %v3048_v6  ;;  %v3050_v38 = vsub.f32 %v9422_v11, %v3048_v6  ;;  %v3051_v16 = vsub.f32 %v3025_v3, %v3048_v6  ;;  %v3052_v36 = vsub.f32 %v3026_v37, %v3048_v6 }
0x124d   :  { %v9460_v32 = vsub.f32 %v3027_v50, %v3048_v6  ;;  %v9462_v5 = vsub.f32 %v3028_v43, %v3048_v6  ;;  %v9464_v33 = vsub.f32 %v3029_v19, %v3048_v6  ;;  %v9468_v39 = vsub.f32 %v3030_v47, %v3048_v6  ;;  %v6349_v6 = vpop.permute.xlu1 %6348 }
0x124e   :  { %v3057_v24 = vmul.f32 %v3049_v54, %v3049_v54  ;;  %v3058_v23 = vmul.f32 %v3050_v38, %v3050_v38  ;;  %v3059_v34 = vmul.f32 %v3051_v16, %v3051_v16  ;;  %v3060_v42 = vmul.f32 %v3052_v36, %v3052_v36 }
0x124f   :  { %v3061_v4 = vmul.f32 %v9460_v32, %v9460_v32  ;;  %v3062_v11 = vmul.f32 %v9462_v5, %v9462_v5  ;;  %v3063_v13 = vmul.f32 %v9464_v33, %v9464_v33  ;;  %v3064_v45 = vmul.f32 %v9468_v39, %v9468_v39 }
0x1250   :  { %v3065_v31 = vadd.f32 %v3058_v23, %v3057_v24 }
0x1252   :  { %v3066_v26 = vadd.f32 %v3065_v31, %v3059_v34 }
0x1254   :  { %v3067_v61 = vadd.f32 %v3066_v26, %v3060_v42 }
0x1256   :  { %v3068_v3 = vadd.f32 %v3067_v61, %v3061_v4 }
0x1258   :  { %v3069_v35 = vadd.f32 %v3068_v3, %v3062_v11 }
0x125a   :  { %v3070_v60 = vadd.f32 %v3069_v35, %v3063_v13  ;;  %v6351_v13 = vunpack.i.h.bf16 %v6349_v6  ;;  %v9603_v35 = vstv %s6120_s6  ;;  %s6133_s6 = sld [smem:[#allocation2 + $0x57]] }
0x125c   :  { %v3071_v25 = vadd.f32 %v3070_v60, %v3064_v45  ;;  %v9612_v60 = vmul.f32 0.0, %v9603_v35 }
0x125e   :  { %3072 = vadd.xlane.f32.xlu0 %v3071_v25  ;;  %v6345_v25 = vunpack.i.l.bf16 %v9580_v30 }
0x1274   :  { %6338 = vrot.lane.b32.xlu0 %v6431_v1, %s6436_s18 }
0x1278   :  { %6353 = vrot.lane.b32.xlu0 %v6431_v1, %s6437_s5 }
0x127c   :  { %6363 = vrot.lane.b32.xlu0 %v6431_v1, %s6436_s18 }
0x12eb   :  { %v3073_v20 = vpop.xlane.xlu0 %3072 }
0x12ec   :  { %v3074_v48 = vrot.slane %v3073_v20, 4 }
0x12ee   :  { %v3075_v15 = vadd.f32 %v3074_v48, %v3073_v20  ;;  %v9615_v20 = vstv %s6121_s7  ;;  %s6136_s7 = sld [smem:[#allocation2 + $0x5a]] }
0x12f0   :  { %v3076_v0 = vrot.slane %v3075_v15, 2 }
0x12f2   :  { %v3077_v49 = vadd.f32 %v3076_v0, %v3075_v15 }
0x12f4   :  { %v3078_v37 = vrot.slane %v3077_v49, 1 }
0x12f6   :  { %v3079_v9 = vadd.f32 %v3078_v37, %v3077_v49 }
0x12f8   :  { %6228 = vpush %v3079_v9 }
0x1329   :  { %s6229_s21 = spop %6228 }
0x132a   :  { %s3081_s26 = smul.f32 0.00012207031, %s6229_s21 }
0x132c   :  { %s3083_s27 = sadd.f32 1e-05, %s3081_s26  ;;  %s6128_s26 = sld [smem:[#allocation2 + $0x52]] }
0x132e   :  { %v3084_v44 = vstv %s3083_s27  ;;  %s6129_s27 = sld [smem:[#allocation2 + $0x53]] }
0x132f   :  { %6392 = vrsqrt.f32 %v3084_v44 }
0x1339   :  { %v6393_v52 = vpop.eup %6392 }
0x133a   :  { %6230 = vpush %v6393_v52  ;;  %v3200_v52 = vsel %vm2784_vm10, %v6351_v13, 0.0 }
0x136b   :  { %s6231_s3 = spop %6230 }
0x136c   :  { %s3087_s4 = smul.f32 %s6231_s3, %s6117_s30  ;;  %s6131_s3 = sld [smem:[#allocation2 + $0x55]] }
0x136e   :  { %v3088_v7 = vstv %s3087_s4  ;;  %s6132_s4 = sld [smem:[#allocation2 + $0x56]] }
0x136f   :  { %v3089_v50 = vmul.f32 %v3088_v7, %v3049_v54  ;;  %v3090_v22 = vmul.f32 %v3088_v7, %v3050_v38  ;;  %v3091_v10 = vmul.f32 %v3088_v7, %v3051_v16  ;;  %v3092_v40 = vmul.f32 %v3088_v7, %v3052_v36  ;;  %v6339_v54 = vpop.permute.xlu0 %6338  ;;  %v9582_v38 = vpop.permute.xlu1 %6358 }
0x1370   :  { %v3093_v28 = vmul.f32 %v3088_v7, %v9460_v32  ;;  %v3094_v12 = vmul.f32 %v3088_v7, %v9462_v5  ;;  %v3095_v21 = vmul.f32 %v3088_v7, %v9464_v33  ;;  %v3096_v2 = vmul.f32 %v3088_v7, %v9468_v39 }
0x1371   :  { %v3100_v59 = vadd.f32 %v3098_v14, %v3090_v22  ;;  %v3099_v17 = vadd.f32 %v3098_v14, %v3089_v50  ;;  %v3101_v18 = vadd.f32 %v3098_v14, %v3091_v10  ;;  %v3102_v41 = vadd.f32 %v3098_v14, %v3092_v40 }
0x1372   :  { %v3103_v58 = vadd.f32 %v3098_v14, %v3093_v28  ;;  %v3104_v27 = vadd.f32 %v3098_v14, %v3094_v12  ;;  %v3105_v29 = vadd.f32 %v3098_v14, %v3095_v21  ;;  %v3106_v57 = vadd.f32 %v3098_v14, %v3096_v2 }
0x1373   :  { %v9490_v53 = vmax.f32 %v3100_v59, 0.0  ;;  %v9492_v43 = vmax.f32 %v3099_v17, 0.0  ;;  %v9498_v63 = vmax.f32 %v3101_v18, 0.0  ;;  %v9509_v19 = vmax.f32 %v3102_v41, 0.0  ;;  %v9584_v16 = vpop.permute.xlu0 %6353  ;;  %v9588_v24 = vpop.permute.xlu1 %3395 }
0x1374   :  { %v9520_v47 = vmax.f32 %v3103_v58, 0.0  ;;  %v9531_v62 = vmax.f32 %v3104_v27, 0.0  ;;  %v9542_v55 = vmax.f32 %v3105_v29, 0.0  ;;  %v9552_v46 = vmax.f32 %v3106_v57, 0.0 }
0x1375   :  { %3227 = vrot.lane.b32.xlu0 %v9490_v53, %s6436_s18  ;;  %3225 = vrot.lane.b32.xlu1 %v9492_v43, %s6436_s18  ;;  %v6340_v34 = vunpack.i.l.bf16 %v6339_v54  ;;  %v6341_v42 = vunpack.i.h.bf16 %v6339_v54  ;;  %v6350_v33 = vunpack.i.l.bf16 %v6349_v6  ;;  %v3149_v50 = vsel %vm2731_vm0, %v6345_v25, 0.0 }
0x1376   :  { %v6355_v22 = vunpack.i.l.bf16 %v9584_v16  ;;  %v6346_v41 = vunpack.i.h.bf16 %v9580_v30  ;;  %v3210_v28 = vmul.f32 %v9615_v20, %v3200_v52  ;;  %v3171_v27 = vmul.f32 %v9603_v35, %v9492_v43 }
0x1377   :  { %v9586_v36 = vpop.permute.xlu0 %6363  ;;  %v3147_v26 = vsel %vm2731_vm0, %v6340_v34, 0.0  ;;  %v3148_v11 = vsel %vm2731_vm0, %v6341_v42, 0.0  ;;  %v3199_v45 = vsel %vm2784_vm10, %v6350_v33, 0.0  ;;  %v9650_v29 = vstv %s9601_s8  ;;  %s10089_s8 = sld [smem:[#allocation2 + $0x5c]] }
0x1378   :  { %v3209_v7 = vmul.f32 %v9615_v20, %v3199_v45  ;;  %v9654_v57 = vstv %s9607_s9  ;;  %v9659_v6 = vstv %s9609_s10  ;;  %v3201_v54 = vsel %vm2784_vm10, %v6355_v22, 0.0 }
0x1379   :  { %3229 = vrot.lane.b32.xlu0 %v9498_v63, %s6436_s18  ;;  %3139 = vrot.lane.b32.xlu1 %v9492_v43, %s6436_s18  ;;  %v6356_v33 = vunpack.i.h.bf16 %v9584_v16  ;;  %v3269_v13 = vmul.f32 %v9650_v29, %v9492_v43 }
0x137d   :  { %3191 = vrot.lane.b32.xlu0 %v9492_v43, %s6437_s5  ;;  %3141 = vrot.lane.b32.xlu1 %v9490_v53, %s6436_s18 }
0x1381   :  { %3285 = vrot.lane.b32.xlu0 %v9492_v43, %s6437_s5  ;;  %3231 = vrot.lane.b32.xlu1 %v9509_v19, %s6436_s18  ;;  %v3273_v43 = vmul.f32 %v9650_v29, %v9520_v47 }
0x1385   :  { %3143 = vrot.lane.b32.xlu0 %v9498_v63, %s6436_s18  ;;  %3287 = vrot.lane.b32.xlu1 %v9490_v53, %s6437_s5 }
0x1389   :  { %3233 = vrot.lane.b32.xlu0 %v9520_v47, %s6436_s18  ;;  %3193 = vrot.lane.b32.xlu1 %v9490_v53, %s6437_s5 }
0x138d   :  { %3327 = vrot.lane.b32.xlu0 %v9520_v47, %s6436_s18  ;;  %3289 = vrot.lane.b32.xlu1 %v9498_v63, %s6437_s5 }
0x1391   :  { %3145 = vrot.lane.b32.xlu0 %v9509_v19, %s6436_s18  ;;  %3329 = vrot.lane.b32.xlu1 %v9531_v62, %s6436_s18 }
0x1395   :  { %3235 = vrot.lane.b32.xlu0 %v9531_v62, %s6436_s18  ;;  %3195 = vrot.lane.b32.xlu1 %v9498_v63, %s6437_s5 }
0x1399   :  { %3331 = vrot.lane.b32.xlu0 %v9542_v55, %s6436_s18  ;;  %3291 = vrot.lane.b32.xlu1 %v9509_v19, %s6437_s5 }
0x139d   :  { %3237 = vrot.lane.b32.xlu0 %v9542_v55, %s6436_s18  ;;  %3197 = vrot.lane.b32.xlu1 %v9509_v19, %s6437_s5 }
0x13a1   :  { %3333 = vrot.lane.b32.xlu0 %v9552_v46, %s6436_s18  ;;  %3293 = vrot.lane.b32.xlu1 %v9520_v47, %s6437_s5 }
0x13a5   :  { %3389 = vrot.lane.b32.xlu0 %v9531_v62, %s6437_s5  ;;  %3387 = vrot.lane.b32.xlu1 %v9520_v47, %s6437_s5 }
0x13a9   :  { %3295 = vrot.lane.b32.xlu0 %v9531_v62, %s6437_s5  ;;  %3239 = vrot.lane.b32.xlu1 %v9552_v46, %s6436_s18  ;;  %s6119_s18 = sld [smem:[#allocation2 + $0x48]] }
0x13ad   :  { %3391 = vrot.lane.b32.xlu0 %v9542_v55, %s6437_s5  ;;  %3297 = vrot.lane.b32.xlu1 %v9542_v55, %s6437_s5 }
0x13af   :  { %v9596_v39 = vstv %s6119_s18  ;;  %s6134_s18 = sld [smem:[#allocation2 + $0x58]] }
0x13b0   :  { %v3157_v3 = vmul.f32 %v9596_v39, %v3147_v26  ;;  %v3158_v0 = vmul.f32 %v9596_v39, %v3148_v11  ;;  %v3159_v2 = vmul.f32 %v9596_v39, %v3149_v50  ;;  %v3150_v26 = vsel %vm2731_vm0, %v6346_v41, 0.0 }
0x13b1   :  { %3393 = vrot.lane.b32.xlu0 %v9552_v46, %s6437_s5  ;;  %3299 = vrot.lane.b32.xlu1 %v9552_v46, %s6437_s5 }
0x13b2   :  { %v3175_v44 = vadd.f32 %v9612_v60, %v3157_v3  ;;  %v3176_v40 = vadd.f32 %v9612_v60, %v3158_v0  ;;  %v3211_v0 = vmul.f32 %v9615_v20, %v3201_v54 }
0x13b4   :  { %v3217_v12 = vadd.f32 %v3209_v7, %v3175_v44 }
0x13b5   :  { %3397 = vrot.lane.b32.xlu0 %v6431_v1, %s6437_s5  ;;  %3399 = vrot.lane.b32.xlu1 %v6431_v1, %s6437_s5 }
0x13b9   :  { %3401 = vrot.lane.b32.xlu0 %v6431_v1, %s6437_s5  ;;  %s6122_s5 = sld [smem:[#allocation2 + $0x4b]] }
0x13bf   :  { %v9620_v49 = vstv %s6122_s5  ;;  %s6137_s5 = sld [smem:[#allocation2 + $0x5b]] }
0x13e7   :  { %v3228_v23 = vpop.permute.xlu0 %3227  ;;  %v3226_v32 = vpop.permute.xlu1 %3225 }
0x13e8   :  { %v3241_v37 = vsel %vm2731_vm0, %v3226_v32, 0.0  ;;  %v3242_v58 = vsel %vm2731_vm0, %v3228_v23, 0.0 }
0x13e9   :  { %v3251_v10 = vmul.f32 %v9620_v49, %v3241_v37  ;;  %v3252_v23 = vmul.f32 %v9620_v49, %v3242_v58  ;;  %v9676_v37 = vstv %s9630_s11  ;;  %v3160_v58 = vmul.f32 %v9596_v39, %v3150_v26 }
0x13eb   :  { %v9590_v31 = vpop.permute.xlu0 %3229  ;;  %v3140_v5 = vpop.permute.xlu1 %3139  ;;  %v3259_v32 = vadd.f32 %v3251_v10, %v3217_v12  ;;  %v3270_v10 = vmul.f32 %v9650_v29, %v9490_v53  ;;  %v3371_v12 = vmul.f32 %v9659_v6, %v9520_v47 }
0x13ec   :  { %v3151_v9 = vsel %vm2731_vm0, %v3140_v5, 0.0  ;;  %v3243_v50 = vsel %vm2731_vm0, %v9590_v31, 0.0  ;;  %v3202_v31 = vsel %vm2784_vm10, %v6356_v33, 0.0 }
0x13ed   :  { %v3161_v59 = vmul.f32 %v9596_v39, %v3151_v9  ;;  %v3277_v44 = vadd.f32 %v3269_v13, %v3259_v32 }
0x13ef   :  { %v3192_v4 = vpop.permute.xlu0 %3191  ;;  %v9594_v61 = vpop.permute.xlu1 %3141  ;;  %v3179_v34 = vadd.f32 %v3171_v27, %v3161_v59  ;;  %v3253_v27 = vmul.f32 %v9620_v49, %v3243_v50  ;;  %v3274_v50 = vmul.f32 %v9650_v29, %v9531_v62 }
0x13f0   :  { %v3203_v14 = vsel %vm2784_vm10, %v3192_v4, 0.0  ;;  %v3218_v4 = vadd.f32 %v3210_v28, %v3176_v40  ;;  %v3152_v22 = vsel %vm2731_vm0, %v9594_v61, 0.0 }
0x13f1   :  { %v3213_v21 = vmul.f32 %v9615_v20, %v3203_v14 }
0x13f2   :  { %v3260_v9 = vadd.f32 %v3252_v23, %v3218_v4  ;;  %v3178_v4 = vadd.f32 %v9612_v60, %v3160_v58  ;;  %v3173_v58 = vmul.f32 %v9603_v35, %v9498_v63 }
0x13f3   :  { %v3286_v48 = vpop.permute.xlu0 %3285  ;;  %v9617_v15 = vpop.permute.xlu1 %3231  ;;  %v3221_v3 = vadd.f32 %v3213_v21, %v3179_v34  ;;  %v3162_v21 = vmul.f32 %v9596_v39, %v3152_v22  ;;  %v3172_v34 = vmul.f32 %v9603_v35, %v9490_v53 }
0x13f4   :  { %v3301_v30 = vsel %vm2784_vm10, %v3286_v48, 0.0  ;;  %v3177_v48 = vadd.f32 %v9612_v60, %v3159_v2  ;;  %v3278_v2 = vadd.f32 %v3270_v10, %v3260_v9  ;;  %v3271_v9 = vmul.f32 %v9650_v29, %v9498_v63 }
0x13f5   :  { %v3311_v45 = vmul.f32 %v9654_v57, %v3301_v30  ;;  %v3373_v63 = vmul.f32 %v9659_v6, %v9542_v55 }
0x13f6   :  { %v3219_v32 = vadd.f32 %v3211_v0, %v3177_v48  ;;  %v3372_v0 = vmul.f32 %v9659_v6, %v9531_v62 }
0x13f7   :  { %v9639_v17 = vpop.permute.xlu0 %3143  ;;  %v3288_v18 = vpop.permute.xlu1 %3287 }
0x13f8   :  { %v3302_v16 = vsel %vm2784_vm10, %v3288_v18, 0.0  ;;  %v3319_v18 = vadd.f32 %v3311_v45, %v3277_v44  ;;  %v3261_v13 = vadd.f32 %v3253_v27, %v3219_v32  ;;  %v3180_v45 = vadd.f32 %v3172_v34, %v3162_v21 }
0x13f9   :  { %v3312_v40 = vmul.f32 %v9654_v57, %v3302_v16  ;;  %v3244_v16 = vsel %vm2731_vm0, %v9617_v15, 0.0  ;;  %v3153_v60 = vsel %vm2731_vm0, %v9639_v17, 0.0 }
0x13fa   :  { %v3254_v17 = vmul.f32 %v9620_v49, %v3244_v16  ;;  %v3163_v22 = vmul.f32 %v9596_v39, %v3153_v60  ;;  %v3279_v10 = vadd.f32 %v3271_v9, %v3261_v13 }
0x13fb   :  { %v3234_v5 = vpop.permute.xlu0 %3233  ;;  %v3194_v42 = vpop.permute.xlu1 %3193  ;;  %v3320_v26 = vadd.f32 %v3312_v40, %v3278_v2 }
0x13fc   :  { %v3245_v11 = vsel %vm2731_vm0, %v3234_v5, 0.0  ;;  %v3204_v61 = vsel %vm2784_vm10, %v3194_v42, 0.0 }
0x13fd   :  { %v3255_v25 = vmul.f32 %v9620_v49, %v3245_v11  ;;  %v3214_v42 = vmul.f32 %v9615_v20, %v3204_v61  ;;  %v3212_v11 = vmul.f32 %v9615_v20, %v3202_v31 }
0x13ff   :  { %v3263_v52 = vadd.f32 %v3255_v25, %v3221_v3  ;;  %v3328_v7 = vpop.permute.xlu0 %3327  ;;  %v3290_v14 = vpop.permute.xlu1 %3289 }
0x1400   :  { %v3343_v59 = vsel %vm2731_vm0, %v3328_v7, 0.0  ;;  %v3303_v3 = vsel %vm2784_vm10, %v3290_v14, 0.0 }
0x1401   :  { %v3353_v41 = vmul.f32 %v9676_v37, %v3343_v59  ;;  %v9694_v28 = vadd.f32 %v3273_v43, %v3263_v52  ;;  %v3222_v52 = vadd.f32 %v3214_v42, %v3180_v45  ;;  %v3313_v7 = vmul.f32 %v9654_v57, %v3303_v3 }
0x1403   :  { %v3361_v30 = vadd.f32 %v3353_v41, %v3319_v18  ;;  %v3146_v54 = vpop.permute.xlu0 %3145  ;;  %v3330_v23 = vpop.permute.xlu1 %3329  ;;  %v3220_v41 = vadd.f32 %v3212_v11, %v3178_v4  ;;  %v3321_v61 = vadd.f32 %v3313_v7, %v3279_v10  ;;  %v3174_v10 = vmul.f32 %v9603_v35, %v9509_v19 }
0x1404   :  { %v3344_v5 = vsel %vm2731_vm0, %v3330_v23, 0.0 }
0x1405   :  { %v3354_v47 = vmul.f32 %v9676_v37, %v3344_v5  ;;  %v9711_v33 = vadd.f32 %v3371_v12, %v3361_v30  ;;  %v3262_v2 = vadd.f32 %v3254_v17, %v3220_v41  ;;  %v3181_v30 = vadd.f32 %v3173_v58, %v3163_v22 }
0x1406   :  { %v3272_v5 = vmul.f32 %v9650_v29, %v9509_v19  ;;  %v3374_v17 = vmul.f32 %v9659_v6, %v9552_v46  ;;  %v9783_v58 = vstv %s6127_s14 }
0x1407   :  { %v3362_v53 = vadd.f32 %v3354_v47, %v3320_v26  ;;  %v3236_v25 = vpop.permute.xlu0 %3235  ;;  %v3196_v48 = vpop.permute.xlu1 %3195 }
0x1408   :  { %v3246_v44 = vsel %vm2731_vm0, %v3236_v25, 0.0  ;;  %v3205_v15 = vsel %vm2784_vm10, %v3196_v48, 0.0  ;;  %v3280_v3 = vadd.f32 %v3272_v5, %v3262_v2  ;;  %v3275_v25 = vmul.f32 %v9650_v29, %v9542_v55 }
0x1409   :  { %v3256_v14 = vmul.f32 %v9620_v49, %v3246_v44  ;;  %v9731_v43 = vadd.f32 %v3372_v0, %v3362_v53  ;;  %v3215_v12 = vmul.f32 %v9615_v20, %v3205_v15  ;;  %v6360_v48 = vunpack.i.l.bf16 %v9582_v38 }
0x140a   :  { %v3154_v0 = vsel %vm2731_vm0, %v3146_v54, 0.0 }
0x140b   :  { %v3264_v59 = vadd.f32 %v3256_v14, %v3222_v52  ;;  %v3332_v18 = vpop.permute.xlu0 %3331  ;;  %v3292_v40 = vpop.permute.xlu1 %3291  ;;  %v3223_v42 = vadd.f32 %v3215_v12, %v3181_v30  ;;  %v3164_v55 = vmul.f32 %v9596_v39, %v3154_v0  ;;  %v3347_v22 = vsel %vm2731_vm0, %v6360_v48, 0.0 }
0x140c   :  { %v3345_v31 = vsel %vm2731_vm0, %v3332_v18, 0.0  ;;  %v3304_v21 = vsel %vm2784_vm10, %v3292_v40, 0.0  ;;  %v6361_v40 = vunpack.i.h.bf16 %v9582_v38  ;;  %v3357_v19 = vmul.f32 %v9676_v37, %v3347_v22 }
0x140d   :  { %v3355_v62 = vmul.f32 %v9676_v37, %v3345_v31  ;;  %v9745_v27 = vadd.f32 %v3274_v50, %v3264_v59  ;;  %v3314_v47 = vmul.f32 %v9654_v57, %v3304_v21  ;;  %v3182_v31 = vadd.f32 %v3174_v10, %v3164_v55 }
0x140f   :  { %v3363_v23 = vadd.f32 %v3355_v62, %v3321_v61  ;;  %v3238_v32 = vpop.permute.xlu0 %3237  ;;  %v3198_v34 = vpop.permute.xlu1 %3197  ;;  %v3322_v9 = vadd.f32 %v3314_v47, %v3280_v3 }
0x1410   :  { %v3247_v26 = vsel %vm2731_vm0, %v3238_v32, 0.0  ;;  %v3206_v7 = vsel %vm2784_vm10, %v3198_v34, 0.0  ;;  %v6366_v32 = vunpack.i.h.bf16 %v9586_v36  ;;  %v6365_v34 = vunpack.i.l.bf16 %v9586_v36 }
0x1411   :  { %v3257_v4 = vmul.f32 %v9620_v49, %v3247_v26  ;;  %v3381_v11 = vadd.f32 %v3373_v63, %v3363_v23  ;;  %v3216_v59 = vmul.f32 %v9615_v20, %v3206_v7  ;;  %v3375_v63 = vmul.f32 0.0, %v9659_v6 }
0x1413   :  { %v3265_v13 = vadd.f32 %v3257_v4, %v3223_v42  ;;  %v3334_v45 = vpop.permute.xlu0 %3333  ;;  %v3294_v53 = vpop.permute.xlu1 %3293  ;;  %v3224_v21 = vadd.f32 %v3216_v59, %v3182_v31  ;;  %v3276_v4 = vmul.f32 %v9650_v29, %v9552_v46  ;;  %v3349_v29 = vsel %vm2731_vm0, %v6365_v34, 0.0 }
0x1414   :  { %v3346_v16 = vsel %vm2731_vm0, %v3334_v45, 0.0  ;;  %v3305_v60 = vsel %vm2784_vm10, %v3294_v53, 0.0  ;;  %v3359_v55 = vmul.f32 %v9676_v37, %v3349_v29 }
0x1415   :  { %v3356_v44 = vmul.f32 %v9676_v37, %v3346_v16  ;;  %v3283_v52 = vadd.f32 %v3275_v25, %v3265_v13  ;;  %v3315_v15 = vmul.f32 %v9654_v57, %v3305_v60 }
0x1417   :  { %v3364_v14 = vadd.f32 %v3356_v44, %v3322_v9  ;;  %v3390_v50 = vpop.permute.xlu0 %3389  ;;  %v3388_v54 = vpop.permute.xlu1 %3387  ;;  %v3323_v61 = vadd.f32 %v3315_v15, %v9694_v28  ;;  %v3348_v28 = vsel %vm2731_vm0, %v6361_v40, 0.0 }
0x1418   :  { %v3404_v18 = vsel %vm2784_vm10, %v3390_v50, 0.0  ;;  %v3403_v41 = vsel %vm2784_vm10, %v3388_v54, 0.0  ;;  %v3358_v46 = vmul.f32 %v9676_v37, %v3348_v28 }
0x1419   :  { %v3382_v39 = vadd.f32 %v3374_v17, %v3364_v14  ;;  %v3414_v35 = vmul.f32 %v9783_v58, %v3404_v18  ;;  %v3413_v2 = vmul.f32 %v9783_v58, %v3403_v41  ;;  %v3365_v5 = vadd.f32 %v3357_v19, %v3323_v61 }
0x141b   :  { %v3296_v12 = vpop.permute.xlu0 %3295  ;;  %v3240_v62 = vpop.permute.xlu1 %3239  ;;  %v9803_v3 = vadd.f32 %v3414_v35, %v9731_v43  ;;  %v3421_v6 = vadd.f32 %v3413_v2, %v9711_v33  ;;  %v3350_v43 = vsel %vm2731_vm0, %v6366_v32, 0.0  ;;  %v3383_v60 = vadd.f32 %v3375_v63, %v3365_v5 }
0x141c   :  { %v3306_v20 = vsel %vm2784_vm10, %v3296_v12, 0.0  ;;  %v3248_v38 = vsel %vm2731_vm0, %v3240_v62, 0.0 }
0x141d   :  { %v3316_v30 = vmul.f32 %v9654_v57, %v3306_v20  ;;  %v3258_v23 = vmul.f32 %v9620_v49, %v3248_v38  ;;  %v3429_v14 = vadd.f32 %v9803_v3, %v3421_v6 }
0x141f   :  { %v3266_v26 = vadd.f32 %v3258_v23, %v3224_v21  ;;  %v3392_v42 = vpop.permute.xlu0 %3391  ;;  %v3298_v47 = vpop.permute.xlu1 %3297  ;;  %v3324_v49 = vadd.f32 %v3316_v30, %v9745_v27  ;;  %v3407_v27 = vsel %vm2784_vm10, %v9588_v24, 0.0 }
0x1420   :  { %v3405_v13 = vsel %vm2784_vm10, %v3392_v42, 0.0  ;;  %v3307_v36 = vsel %vm2784_vm10, %v3298_v47, 0.0 }
0x1421   :  { %v3415_v45 = vmul.f32 %v9783_v58, %v3405_v13  ;;  %v3317_v53 = vmul.f32 %v9654_v57, %v3307_v36  ;;  %v3284_v25 = vadd.f32 %v3276_v4, %v3266_v26  ;;  %v3366_v9 = vadd.f32 %v3358_v46, %v3324_v49 }
0x1423   :  { %v3423_v48 = vadd.f32 %v3415_v45, %v3381_v11  ;;  %v3325_v0 = vadd.f32 %v3317_v53, %v3283_v52  ;;  %v3394_v33 = vpop.permute.xlu0 %3393  ;;  %v3300_v16 = vpop.permute.xlu1 %3299  ;;  %v3360_v11 = vmul.f32 %v9676_v37, %v3350_v43  ;;  %v3417_v52 = vmul.f32 %v9783_v58, %v3407_v27 }
0x1424   :  { %v3406_v44 = vsel %vm2784_vm10, %v3394_v33, 0.0  ;;  %v3308_v7 = vsel %vm2784_vm10, %v3300_v16, 0.0  ;;  %v3384_v18 = vadd.f32 %v3375_v63, %v3366_v9 }
0x1425   :  { %v3416_v15 = vmul.f32 %v9783_v58, %v3406_v44  ;;  %v3318_v24 = vmul.f32 %v9654_v57, %v3308_v7  ;;  %v3430_v50 = vadd.f32 %v3429_v14, %v3423_v48  ;;  %v3367_v54 = vadd.f32 %v3359_v55, %v3325_v0 }
0x1426   :  { %v3425_v41 = vadd.f32 %v3417_v52, %v3383_v60 }
0x1427   :  { %v3424_v17 = vadd.f32 %v3416_v15, %v3382_v39  ;;  %v3326_v22 = vadd.f32 %v3318_v24, %v3284_v25  ;;  %v3398_v10 = vpop.permute.xlu0 %3397  ;;  %v3400_v59 = vpop.permute.xlu1 %3399  ;;  %v3385_v39 = vadd.f32 %v3375_v63, %v3367_v54 }
0x1428   :  { %v3408_v40 = vsel %vm2784_vm10, %v3398_v10, 0.0  ;;  %v3409_v31 = vsel %vm2784_vm10, %v3400_v59, 0.0 }
0x1429   :  { %v3431_v61 = vadd.f32 %v3430_v50, %v3424_v17  ;;  %v3368_v57 = vadd.f32 %v3360_v11, %v3326_v22  ;;  %v3418_v37 = vmul.f32 %v9783_v58, %v3408_v40  ;;  %v3419_v12 = vmul.f32 %v9783_v58, %v3409_v31 }
0x142a   :  { %v3496_v40 = vstv %s6129_s27  ;;  %s6142_s27 = sld [smem:[#allocation2 + $0x61]] }
0x142b   :  { %v3426_v62 = vadd.f32 %v3418_v37, %v3384_v18  ;;  %v3432_v19 = vadd.f32 %v3431_v61, %v3425_v41  ;;  %v3402_v35 = vpop.permute.xlu0 %3401  ;;  %v3427_v21 = vadd.f32 %v3419_v12, %v3385_v39  ;;  %v3386_v2 = vadd.f32 %v3375_v63, %v3368_v57 }
0x142c   :  { %v3410_v20 = vsel %vm2784_vm10, %v3402_v35, 0.0 }
0x142d   :  { %v3433_v38 = vadd.f32 %v3432_v19, %v3426_v62  ;;  %v3420_v30 = vmul.f32 %v9783_v58, %v3410_v20 }
0x142f   :  { %v3428_v23 = vadd.f32 %v3420_v30, %v3386_v2  ;;  %v3434_v28 = vadd.f32 %v3433_v38, %v3427_v21 }
0x1431   :  { %v3435_v32 = vadd.f32 %v3434_v28, %v3428_v23 }
0x1433   :  { %3436 = vadd.xlane.f32.xlu1 %v3435_v32 }
0x1444   :  { %6373 = vrot.lane.b32.xlu1 %v6431_v1, %s6435_s25 }
0x1448   :  { %6378 = vrot.lane.b32.xlu1 %v6431_v1, %s6434_s22 }
0x14c0   :  { %v3437_v34 = vpop.xlane.xlu1 %3436 }
0x14c1   :  { %v3438_v5 = vrot.slane %v3437_v34, 4 }
0x14c3   :  { %v3439_v26 = vadd.f32 %v3438_v5, %v3437_v34 }
0x14c5   :  { %v3440_v42 = vrot.slane %v3439_v26, 2 }
0x14c7   :  { %v3441_v47 = vadd.f32 %v3440_v42, %v3439_v26 }
0x14c9   :  { %v3442_v4 = vrot.slane %v3441_v47, 1 }
0x14cb   :  { %v3443_v49 = vadd.f32 %v3442_v4, %v3441_v47 }
0x14cd   :  { %6232 = vpush %v3443_v49  ;;  %v6374_v49 = vpop.permute.xlu1 %6373 }
0x14fe   :  { %s6233_s15 = spop %6232 }
0x14ff   :  { %s3445_s1 = smul.f32 0.00012207031, %s6233_s15 }
0x1501   :  { %v3446_v13 = vstv %s3445_s1  ;;  %s6139_s1 = sld [smem:[#allocation2 + $0x5e]] }
0x1502   :  { %v3447_v36 = vsub.f32 %v3421_v6, %v3446_v13  ;;  %v3448_v63 = vsub.f32 %v9803_v3, %v3446_v13  ;;  %v3449_v45 = vsub.f32 %v3423_v48, %v3446_v13  ;;  %v3450_v58 = vsub.f32 %v3424_v17, %v3446_v13 }
0x1503   :  { %v3451_v46 = vsub.f32 %v3425_v41, %v3446_v13  ;;  %v9841_v27 = vsub.f32 %v3426_v62, %v3446_v13  ;;  %v9843_v16 = vsub.f32 %v3427_v21, %v3446_v13  ;;  %v9845_v44 = vsub.f32 %v3428_v23, %v3446_v13  ;;  %v9962_v13 = vpop.permute.xlu1 %6378 }
0x1504   :  { %v3455_v53 = vmul.f32 %v3447_v36, %v3447_v36  ;;  %v3456_v25 = vmul.f32 %v3448_v63, %v3448_v63  ;;  %v3457_v29 = vmul.f32 %v3449_v45, %v3449_v45  ;;  %v3458_v0 = vmul.f32 %v3450_v58, %v3450_v58 }
0x1505   :  { %v3459_v60 = vmul.f32 %v3451_v46, %v3451_v46  ;;  %v3460_v3 = vmul.f32 %v9841_v27, %v9841_v27  ;;  %v3461_v48 = vmul.f32 %v9843_v16, %v9843_v16  ;;  %v3462_v55 = vmul.f32 %v9845_v44, %v9845_v44 }
0x1506   :  { %v3463_v43 = vadd.f32 %v3456_v25, %v3455_v53 }
0x1508   :  { %v3464_v33 = vadd.f32 %v3463_v43, %v3457_v29  ;;  %v9968_v29 = vstv %s6131_s3  ;;  %s6148_s3 = sld [smem:[#allocation2 + $0x67]] }
0x150a   :  { %v3465_v9 = vadd.f32 %v3464_v33, %v3458_v0 }
0x150c   :  { %v3466_v6 = vadd.f32 %v3465_v9, %v3459_v60 }
0x150e   :  { %v3467_v7 = vadd.f32 %v3466_v6, %v3460_v3 }
0x1510   :  { %v3468_v14 = vadd.f32 %v3467_v7, %v3461_v48  ;;  %v9978_v7 = vstv %s6134_s18 }
0x1512   :  { %v3469_v15 = vadd.f32 %v3468_v14, %v3462_v55 }
0x1514   :  { %3470 = vadd.xlane.f32.xlu0 %v3469_v15  ;;  %v9982_v15 = vstv %s6133_s6 }
0x152a   :  { %6368 = vrot.lane.b32.xlu0 %v6431_v1, %s6434_s22 }
0x15a1   :  { %v3471_v24 = vpop.xlane.xlu0 %3470 }
0x15a2   :  { %v3472_v11 = vrot.slane %v3471_v24, 4 }
0x15a4   :  { %v3473_v52 = vadd.f32 %v3472_v11, %v3471_v24 }
0x15a6   :  { %v3474_v50 = vrot.slane %v3473_v52, 2 }
0x15a8   :  { %v3475_v54 = vadd.f32 %v3474_v50, %v3473_v52 }
0x15aa   :  { %v3476_v17 = vrot.slane %v3475_v54, 1 }
0x15ac   :  { %v3477_v22 = vadd.f32 %v3476_v17, %v3475_v54  ;;  %v6375_v54 = vunpack.i.l.bf16 %v6374_v49 }
0x15ae   :  { %6234 = vpush %v3477_v22  ;;  %v6376_v22 = vunpack.i.h.bf16 %v6374_v49 }
0x15df   :  { %s6235_s16 = spop %6234 }
0x15e0   :  { %s3479_s17 = smul.f32 0.00012207031, %s6235_s16  ;;  %s6140_s16 = sld [smem:[#allocation2 + $0x5f]] }
0x15e2   :  { %s3481_s21 = sadd.f32 1e-05, %s3479_s17 }
0x15e4   :  { %v3482_v10 = vstv %s3481_s21 }
0x15e5   :  { %6394 = vrsqrt.f32 %v3482_v10 }
0x15ef   :  { %v6395_v59 = vpop.eup %6394 }
0x15f0   :  { %6236 = vpush %v6395_v59 }
0x1621   :  { %s6237_s30 = spop %6236 }
0x1622   :  { %s3485_s0 = smul.f32 %s6237_s30, %s6128_s26  ;;  %s6141_s26 = sld [smem:[#allocation2 + $0x60]] }
0x1623   :  { %s6144_s30 = sld [smem:[#allocation2 + $0x63]] }
0x1624   :  { %v3486_v18 = vstv %s3485_s0  ;;  %s6145_s0 = sld [smem:[#allocation2 + $0x64]] }
0x1625   :  { %v3487_v41 = vmul.f32 %v3486_v18, %v3447_v36  ;;  %v3488_v31 = vmul.f32 %v3486_v18, %v3448_v63  ;;  %v3489_v37 = vmul.f32 %v3486_v18, %v3449_v45  ;;  %v3490_v39 = vmul.f32 %v3486_v18, %v3450_v58  ;;  %v6369_v36 = vpop.permute.xlu0 %6368 }
0x1626   :  { %v3491_v38 = vmul.f32 %v3486_v18, %v3451_v46  ;;  %v3492_v23 = vmul.f32 %v3486_v18, %v9841_v27  ;;  %v3493_v34 = vmul.f32 %v3486_v18, %v9843_v16  ;;  %v3494_v42 = vmul.f32 %v3486_v18, %v9845_v44 }
0x1627   :  { %v3498_v61 = vadd.f32 %v3496_v40, %v3488_v31  ;;  %v3497_v57 = vadd.f32 %v3496_v40, %v3487_v41  ;;  %v3499_v19 = vadd.f32 %v3496_v40, %v3489_v37  ;;  %v3500_v20 = vadd.f32 %v3496_v40, %v3490_v39 }
0x1628   :  { %v3501_v2 = vadd.f32 %v3496_v40, %v3491_v38  ;;  %v3502_v28 = vadd.f32 %v3496_v40, %v3492_v23  ;;  %v3503_v5 = vadd.f32 %v3496_v40, %v3493_v34  ;;  %v3504_v47 = vadd.f32 %v3496_v40, %v3494_v42 }
0x1629   :  { %v9859_v12 = vmax.f32 %v3498_v61, 0.0  ;;  %v9861_v62 = vmax.f32 %v3497_v57, 0.0  ;;  %v9871_v35 = vmax.f32 %v3499_v19, 0.0  ;;  %v9881_v21 = vmax.f32 %v3500_v20, 0.0 }
0x162a   :  { %v9891_v30 = vmax.f32 %v3501_v2, 0.0  ;;  %v9906_v32 = vmax.f32 %v3502_v28, 0.0  ;;  %v9921_v26 = vmax.f32 %v3503_v5, 0.0  ;;  %v9936_v4 = vmax.f32 %v3504_v47, 0.0 }
0x162b   :  { %3535 = vrot.lane.b32.xlu0 %v9859_v12, %s6434_s22  ;;  %3533 = vrot.lane.b32.xlu1 %v9861_v62, %s6434_s22  ;;  %v9973_v16 = vstv %s6132_s4  ;;  %v3567_v60 = vmul.f32 %v9968_v29, %v9861_v62  ;;  %v6370_v44 = vunpack.i.l.bf16 %v6369_v36  ;;  %v6371_v55 = vunpack.i.h.bf16 %v6369_v36  ;;  %s6149_s4 = sld [smem:[#allocation2 + $0x68]] }
0x162c   :  { %v3669_v41 = vmul.f32 %v9978_v7, %v9871_v35  ;;  %v3565_v31 = vmul.f32 0.0, %v9968_v29  ;;  %v3568_v37 = vmul.f32 %v9968_v29, %v9859_v12  ;;  %v3597_v20 = vsel %vm2286_vm4, %v6375_v54, 0.0 }
0x162d   :  { %v3545_v50 = vsel %vm2233_vm2, %v6370_v44, 0.0  ;;  %v3546_v61 = vsel %vm2233_vm2, %v6371_v55, 0.0  ;;  %v3598_v38 = vsel %vm2286_vm4, %v6376_v22, 0.0  ;;  %v3607_v36 = vmul.f32 %v9973_v16, %v3597_v20 }
0x162e   :  { %v3608_v44 = vmul.f32 %v9973_v16, %v3598_v38 }
0x162f   :  { %3623 = vrot.lane.b32.xlu0 %v9861_v62, %s6434_s22  ;;  %3585 = vrot.lane.b32.xlu1 %v9861_v62, %s6435_s25 }
0x1633   :  { %3537 = vrot.lane.b32.xlu0 %v9871_v35, %s6434_s22  ;;  %3625 = vrot.lane.b32.xlu1 %v9859_v12, %s6434_s22 }
0x1637   :  { %3627 = vrot.lane.b32.xlu0 %v9871_v35, %s6434_s22  ;;  %3587 = vrot.lane.b32.xlu1 %v9859_v12, %s6435_s25 }
0x163b   :  { %3589 = vrot.lane.b32.xlu0 %v9871_v35, %s6435_s25  ;;  %3539 = vrot.lane.b32.xlu1 %v9881_v21, %s6434_s22 }
0x163f   :  { %3683 = vrot.lane.b32.xlu0 %v9861_v62, %s6435_s25  ;;  %3629 = vrot.lane.b32.xlu1 %v9881_v21, %s6434_s22 }
0x1643   :  { %3541 = vrot.lane.b32.xlu0 %v9891_v30, %s6434_s22  ;;  %3685 = vrot.lane.b32.xlu1 %v9859_v12, %s6435_s25 }
0x1647   :  { %3631 = vrot.lane.b32.xlu0 %v9891_v30, %s6434_s22  ;;  %3591 = vrot.lane.b32.xlu1 %v9881_v21, %s6435_s25 }
0x164b   :  { %3725 = vrot.lane.b32.xlu0 %v9871_v35, %s6434_s22  ;;  %3687 = vrot.lane.b32.xlu1 %v9871_v35, %s6435_s25 }
0x164f   :  { %3543 = vrot.lane.b32.xlu0 %v9906_v32, %s6434_s22  ;;  %3727 = vrot.lane.b32.xlu1 %v9881_v21, %s6434_s22 }
0x1653   :  { %3633 = vrot.lane.b32.xlu0 %v9906_v32, %s6434_s22  ;;  %3593 = vrot.lane.b32.xlu1 %v9891_v30, %s6435_s25 }
0x1657   :  { %3729 = vrot.lane.b32.xlu0 %v9891_v30, %s6434_s22  ;;  %3689 = vrot.lane.b32.xlu1 %v9881_v21, %s6435_s25 }
0x165b   :  { %3635 = vrot.lane.b32.xlu0 %v9921_v26, %s6434_s22  ;;  %3595 = vrot.lane.b32.xlu1 %v9906_v32, %s6435_s25 }
0x165f   :  { %3731 = vrot.lane.b32.xlu0 %v9906_v32, %s6434_s22  ;;  %3691 = vrot.lane.b32.xlu1 %v9891_v30, %s6435_s25 }
0x1663   :  { %3787 = vrot.lane.b32.xlu0 %v9881_v21, %s6435_s25  ;;  %3785 = vrot.lane.b32.xlu1 %v9871_v35, %s6435_s25 }
0x1667   :  { %3693 = vrot.lane.b32.xlu0 %v9906_v32, %s6435_s25  ;;  %3637 = vrot.lane.b32.xlu1 %v9936_v4, %s6434_s22 }
0x166b   :  { %3789 = vrot.lane.b32.xlu0 %v9891_v30, %s6435_s25  ;;  %3733 = vrot.lane.b32.xlu1 %v9921_v26, %s6434_s22 }
0x166f   :  { %3735 = vrot.lane.b32.xlu0 %v9936_v4, %s6434_s22  ;;  %3695 = vrot.lane.b32.xlu1 %v9921_v26, %s6435_s25  ;;  %s6130_s22 = sld [smem:[#allocation2 + $0x54]] }
0x1673   :  { %3697 = vrot.lane.b32.xlu0 %v9936_v4, %s6435_s25  ;;  %3791 = vrot.lane.b32.xlu1 %v9906_v32, %s6435_s25 }
0x1675   :  { %v9966_v46 = vstv %s6130_s22  ;;  %s6147_s22 = sld [smem:[#allocation2 + $0x66]] }
0x1676   :  { %v3555_v57 = vmul.f32 %v9966_v46, %v3545_v50  ;;  %v3556_v34 = vmul.f32 %v9966_v46, %v3546_v61 }
0x1677   :  { %3793 = vrot.lane.b32.xlu0 %v9921_v26, %s6435_s25  ;;  %3795 = vrot.lane.b32.xlu1 %v9936_v4, %s6435_s25 }
0x1678   :  { %v3573_v49 = vadd.f32 %v3565_v31, %v3555_v57 }
0x167b   :  { %3797 = vrot.lane.b32.xlu0 %v6431_v1, %s6435_s25  ;;  %3799 = vrot.lane.b32.xlu1 %v6431_v1, %s6435_s25  ;;  %s6135_s25 = sld [smem:[#allocation2 + $0x59]] }
0x169d   :  { %v3536_v63 = vpop.permute.xlu0 %3535  ;;  %v3534_v45 = vpop.permute.xlu1 %3533 }
0x169e   :  { %v3547_v25 = vsel %vm2233_vm2, %v3534_v45, 0.0  ;;  %v3548_v14 = vsel %vm2233_vm2, %v3536_v63, 0.0 }
0x169f   :  { %v3557_v27 = vmul.f32 %v9966_v46, %v3547_v25  ;;  %v3558_v10 = vmul.f32 %v9966_v46, %v3548_v14 }
0x16a1   :  { %v3624_v58 = vpop.permute.xlu0 %3623  ;;  %v3586_v53 = vpop.permute.xlu1 %3585  ;;  %v3575_v3 = vadd.f32 %v3567_v60, %v3557_v27  ;;  %v3576_v2 = vadd.f32 %v3568_v37, %v3558_v10  ;;  %v3670_v60 = vmul.f32 %v9978_v7, %v9881_v21 }
0x16a2   :  { %v3599_v43 = vsel %vm2286_vm4, %v3586_v53, 0.0  ;;  %v3639_v5 = vsel %vm2233_vm2, %v3624_v58, 0.0 }
0x16a3   :  { %v3609_v9 = vmul.f32 %v9973_v16, %v3599_v43  ;;  %v3649_v25 = vmul.f32 %v9982_v15, %v3639_v5 }
0x16a5   :  { %v3538_v0 = vpop.permute.xlu0 %3537  ;;  %v3626_v33 = vpop.permute.xlu1 %3625  ;;  %v3617_v11 = vadd.f32 %v3609_v9, %v3575_v3  ;;  %v3574_v9 = vadd.f32 %v3565_v31, %v3556_v34  ;;  %v10055_v34 = vstv %s6137_s5 }
0x16a6   :  { %v3549_v42 = vsel %vm2233_vm2, %v3538_v0, 0.0  ;;  %v3640_v3 = vsel %vm2233_vm2, %v3626_v33, 0.0 }
0x16a7   :  { %v3559_v43 = vmul.f32 %v9966_v46, %v3549_v42  ;;  %v3650_v54 = vmul.f32 %v9982_v15, %v3640_v3  ;;  %v3616_v22 = vadd.f32 %v3608_v44, %v3574_v9 }
0x16a9   :  { %v3628_v6 = vpop.permute.xlu0 %3627  ;;  %v3588_v48 = vpop.permute.xlu1 %3587  ;;  %v3658_v57 = vadd.f32 %v3650_v54, %v3616_v22 }
0x16aa   :  { %v3641_v24 = vsel %vm2233_vm2, %v3628_v6, 0.0  ;;  %v3600_v17 = vsel %vm2286_vm4, %v3588_v48, 0.0  ;;  %v3615_v6 = vadd.f32 %v3607_v36, %v3573_v49  ;;  %v3569_v48 = vmul.f32 %v9968_v29, %v9871_v35 }
0x16ab   :  { %v3651_v52 = vmul.f32 %v9982_v15, %v3641_v24  ;;  %v3610_v19 = vmul.f32 %v9973_v16, %v3600_v17  ;;  %v10034_v24 = vstv %s6135_s25 }
0x16ac   :  { %v3577_v50 = vadd.f32 %v3569_v48, %v3559_v43 }
0x16ad   :  { %v3659_v59 = vadd.f32 %v3651_v52, %v3617_v11  ;;  %v3590_v18 = vpop.permute.xlu0 %3589  ;;  %v9992_v40 = vpop.permute.xlu1 %3539  ;;  %v3618_v63 = vadd.f32 %v3610_v19, %v3576_v2  ;;  %v3657_v52 = vadd.f32 %v3649_v25, %v3615_v6  ;;  %v3671_v2 = vmul.f32 %v9978_v7, %v9891_v30 }
0x16ae   :  { %v3601_v53 = vsel %vm2286_vm4, %v3590_v18, 0.0  ;;  %v3667_v18 = vmul.f32 %v9978_v7, %v9861_v62  ;;  %v3668_v62 = vmul.f32 %v9978_v7, %v9859_v12  ;;  %v3769_v25 = vmul.f32 %v10055_v34, %v9871_v35 }
0x16af   :  { %v10003_v39 = vadd.f32 %v3669_v41, %v3659_v59  ;;  %v3611_v55 = vmul.f32 %v9973_v16, %v3601_v53  ;;  %v3770_v6 = vmul.f32 %v10055_v34, %v9881_v21 }
0x16b0   :  { %v3675_v37 = vadd.f32 %v3667_v18, %v3657_v52  ;;  %v3676_v36 = vadd.f32 %v3668_v62, %v3658_v57  ;;  %v6381_v57 = vunpack.i.h.bf16 %v9962_v13 }
0x16b1   :  { %v3684_v23 = vpop.permute.xlu0 %3683  ;;  %v3630_v28 = vpop.permute.xlu1 %3629  ;;  %v3619_v59 = vadd.f32 %v3611_v55, %v3577_v50 }
0x16b2   :  { %v3642_v47 = vsel %vm2233_vm2, %v3630_v28, 0.0  ;;  %v3699_v11 = vsel %vm2286_vm4, %v3684_v23, 0.0  ;;  %v10049_v23 = vstv %s6136_s7 }
0x16b3   :  { %v3652_v45 = vmul.f32 %v9982_v15, %v3642_v47  ;;  %v3709_v41 = vmul.f32 %v10034_v24, %v3699_v11 }
0x16b5   :  { %v3660_v58 = vadd.f32 %v3652_v45, %v3618_v63  ;;  %v10022_v27 = vpop.permute.xlu0 %3541  ;;  %v3686_v0 = vpop.permute.xlu1 %3685  ;;  %v3717_v5 = vadd.f32 %v3709_v41, %v3675_v37 }
0x16b6   :  { %v3700_v61 = vsel %vm2286_vm4, %v3686_v0, 0.0 }
0x16b7   :  { %v10032_v14 = vadd.f32 %v3670_v60, %v3660_v58  ;;  %v3710_v42 = vmul.f32 %v10034_v24, %v3700_v61  ;;  %v3550_v61 = vsel %vm2233_vm2, %v9992_v40, 0.0 }
0x16b8   :  { %v3560_v37 = vmul.f32 %v9966_v46, %v3550_v61 }
0x16b9   :  { %v3632_v17 = vpop.permute.xlu0 %3631  ;;  %v3592_v33 = vpop.permute.xlu1 %3591  ;;  %v3718_v43 = vadd.f32 %v3710_v42, %v3676_v36 }
0x16ba   :  { %v3643_v10 = vsel %vm2233_vm2, %v3632_v17, 0.0 }
0x16bb   :  { %v3653_v31 = vmul.f32 %v9982_v15, %v3643_v10 }
0x16bd   :  { %v3661_v19 = vadd.f32 %v3653_v31, %v3619_v59  ;;  %v3726_v20 = vpop.permute.xlu0 %3725  ;;  %v3688_v38 = vpop.permute.xlu1 %3687  ;;  %v3771_v59 = vmul.f32 %v10055_v34, %v9891_v30 }
0x16be   :  { %v3741_v28 = vsel %vm2233_vm2, %v3726_v20, 0.0  ;;  %v3701_v60 = vsel %vm2286_vm4, %v3688_v38, 0.0 }
0x16bf   :  { %v3751_v47 = vmul.f32 %v10049_v23, %v3741_v28  ;;  %v10059_v49 = vadd.f32 %v3671_v2, %v3661_v19  ;;  %v3711_v48 = vmul.f32 %v10034_v24, %v3701_v60  ;;  %v3602_v19 = vsel %vm2286_vm4, %v3592_v33, 0.0 }
0x16c0   :  { %v6380_v28 = vunpack.i.l.bf16 %v9962_v13  ;;  %v3571_v33 = vmul.f32 %v9968_v29, %v9891_v30  ;;  %v3612_v42 = vmul.f32 %v9973_v16, %v3602_v19  ;;  %v3572_v60 = vmul.f32 %v9968_v29, %v9906_v32 }
0x16c1   :  { %v3759_v63 = vadd.f32 %v3751_v47, %v3717_v5  ;;  %v3544_v45 = vpop.permute.xlu0 %3543  ;;  %v3728_v53 = vpop.permute.xlu1 %3727  ;;  %v3719_v50 = vadd.f32 %v3711_v48, %v10003_v39  ;;  %v3551_v39 = vsel %vm2233_vm2, %v10022_v27, 0.0  ;;  %v3570_v5 = vmul.f32 %v9968_v29, %v9881_v21 }
0x16c2   :  { %v3742_v12 = vsel %vm2233_vm2, %v3728_v53, 0.0  ;;  %v3561_v2 = vmul.f32 %v9966_v46, %v3551_v39  ;;  %v3552_v40 = vsel %vm2233_vm2, %v3544_v45, 0.0 }
0x16c3   :  { %v3752_v58 = vmul.f32 %v10049_v23, %v3742_v12  ;;  %v10066_v0 = vadd.f32 %v3769_v25, %v3759_v63  ;;  %v3562_v45 = vmul.f32 %v9966_v46, %v3552_v40  ;;  %v3748_v12 = vsel %vm2233_vm2, %v6381_v57, 0.0 }
0x16c5   :  { %v3760_v9 = vadd.f32 %v3752_v58, %v3718_v43  ;;  %v3634_v44 = vpop.permute.xlu0 %3633  ;;  %v3594_v3 = vpop.permute.xlu1 %3593  ;;  %v3578_v43 = vadd.f32 %v3570_v5, %v3560_v37  ;;  %v3579_v58 = vadd.f32 %v3571_v33, %v3561_v2 }
0x16c6   :  { %v3603_v62 = vsel %vm2286_vm4, %v3594_v3, 0.0  ;;  %v3644_v47 = vsel %vm2233_vm2, %v3634_v44, 0.0 }
0x16c7   :  { %v10073_v35 = vadd.f32 %v3770_v6, %v3760_v9  ;;  %v3613_v13 = vmul.f32 %v9973_v16, %v3603_v62  ;;  %v3654_v46 = vmul.f32 %v9982_v15, %v3644_v47  ;;  %v3747_v6 = vsel %vm2233_vm2, %v6380_v28, 0.0 }
0x16c8   :  { %v3620_v48 = vadd.f32 %v3612_v42, %v3578_v43  ;;  %v3673_v62 = vmul.f32 %v9978_v7, %v9921_v26  ;;  %v3772_v42 = vmul.f32 %v10055_v34, %v9906_v32 }
0x16c9   :  { %v3730_v55 = vpop.permute.xlu0 %3729  ;;  %v3690_v11 = vpop.permute.xlu1 %3689 }
0x16ca   :  { %v3743_v52 = vsel %vm2233_vm2, %v3730_v55, 0.0  ;;  %v3702_v27 = vsel %vm2286_vm4, %v3690_v11, 0.0  ;;  %v10132_v11 = vstv %s10089_s8  ;;  %v3662_v61 = vadd.f32 %v3654_v46, %v3620_v48  ;;  %s6150_s8 = sld [smem:[#allocation2 + $0x6a]] }
0x16cb   :  { %v3753_v54 = vmul.f32 %v10049_v23, %v3743_v52  ;;  %v3712_v21 = vmul.f32 %v10034_v24, %v3702_v27  ;;  %v3580_v52 = vadd.f32 %v3572_v60, %v3562_v45 }
0x16cd   :  { %v3761_v17 = vadd.f32 %v3753_v54, %v3719_v50  ;;  %v3636_v22 = vpop.permute.xlu0 %3635  ;;  %v3596_v10 = vpop.permute.xlu1 %3595  ;;  %v3621_v50 = vadd.f32 %v3613_v13, %v3579_v58  ;;  %v3720_v29 = vadd.f32 %v3712_v21, %v10032_v14  ;;  %v3672_v14 = vmul.f32 %v9978_v7, %v9906_v32 }
0x16ce   :  { %v3645_v36 = vsel %vm2233_vm2, %v3636_v22, 0.0  ;;  %v3604_v63 = vsel %vm2286_vm4, %v3596_v10, 0.0 }
0x16cf   :  { %v10081_v18 = vadd.f32 %v3771_v59, %v3761_v17  ;;  %v3655_v9 = vmul.f32 %v9982_v15, %v3645_v36  ;;  %v3614_v44 = vmul.f32 %v9973_v16, %v3604_v63  ;;  %v3680_v47 = vadd.f32 %v3672_v14, %v3662_v61 }
0x16d1   :  { %v3732_v41 = vpop.permute.xlu0 %3731  ;;  %v3692_v31 = vpop.permute.xlu1 %3691  ;;  %v3663_v39 = vadd.f32 %v3655_v9, %v3621_v50  ;;  %v3622_v57 = vadd.f32 %v3614_v44, %v3580_v52  ;;  %v3757_v52 = vmul.f32 %v10049_v23, %v3747_v6  ;;  %v3773_v50 = vmul.f32 %v10055_v34, %v9921_v26 }
0x16d2   :  { %v3744_v30 = vsel %vm2233_vm2, %v3732_v41, 0.0  ;;  %v3703_v54 = vsel %vm2286_vm4, %v3692_v31, 0.0  ;;  %v3775_v26 = vmul.f32 0.0, %v10055_v34 }
0x16d3   :  { %v3754_v55 = vmul.f32 %v10049_v23, %v3744_v30  ;;  %v3713_v37 = vmul.f32 %v10034_v24, %v3703_v54  ;;  %v3681_v21 = vadd.f32 %v3673_v62, %v3663_v39  ;;  %v3674_v30 = vmul.f32 %v9978_v7, %v9936_v4 }
0x16d5   :  { %v3788_v20 = vpop.permute.xlu0 %3787  ;;  %v3786_v38 = vpop.permute.xlu1 %3785  ;;  %v3762_v31 = vadd.f32 %v3754_v55, %v3720_v29  ;;  %v3721_v13 = vadd.f32 %v3713_v37, %v10059_v49  ;;  %v3758_v55 = vmul.f32 %v10049_v23, %v3748_v12  ;;  %v3774_v29 = vmul.f32 %v10055_v34, %v9936_v4 }
0x16d6   :  { %v3802_v22 = vsel %vm2286_vm4, %v3788_v20, 0.0  ;;  %v3801_v10 = vsel %vm2286_vm4, %v3786_v38, 0.0 }
0x16d7   :  { %v3812_v38 = vmul.f32 %v10132_v11, %v3802_v22  ;;  %v3811_v2 = vmul.f32 %v10132_v11, %v3801_v10 }
0x16d9   :  { %v3694_v53 = vpop.permute.xlu0 %3693  ;;  %v3638_v25 = vpop.permute.xlu1 %3637  ;;  %v10172_v43 = vadd.f32 %v3811_v2, %v10066_v0 }
0x16da   :  { %v3646_v3 = vsel %vm2233_vm2, %v3638_v25, 0.0  ;;  %v3704_v59 = vsel %vm2286_vm4, %v3694_v53, 0.0  ;;  %v3780_v53 = vadd.f32 %v3772_v42, %v3762_v31  ;;  %v10169_v25 = vadd.f32 %v3812_v38, %v10073_v35 }
0x16db   :  { %v3656_v41 = vmul.f32 %v9982_v15, %v3646_v3  ;;  %v3714_v15 = vmul.f32 %v10034_v24, %v3704_v59 }
0x16dc   :  { %v3827_v54 = vadd.f32 %v10169_v25, %v10172_v43 }
0x16dd   :  { %v3790_v17 = vpop.permute.xlu0 %3789  ;;  %v3734_v16 = vpop.permute.xlu1 %3733  ;;  %v3664_v28 = vadd.f32 %v3656_v41, %v3622_v57  ;;  %v3722_v32 = vadd.f32 %v3714_v15, %v3680_v47 }
0x16de   :  { %v3803_v19 = vsel %vm2286_vm4, %v3790_v17, 0.0  ;;  %v3745_v20 = vsel %vm2233_vm2, %v3734_v16, 0.0 }
0x16df   :  { %v3813_v36 = vmul.f32 %v10132_v11, %v3803_v19  ;;  %v3755_v63 = vmul.f32 %v10049_v23, %v3745_v20  ;;  %v3682_v44 = vadd.f32 %v3674_v30, %v3664_v28 }
0x16e1   :  { %v3736_v40 = vpop.permute.xlu0 %3735  ;;  %v3696_v27 = vpop.permute.xlu1 %3695  ;;  %v3821_v3 = vadd.f32 %v3813_v36, %v10081_v18  ;;  %v3763_v35 = vadd.f32 %v3755_v63, %v3721_v13 }
0x16e2   :  { %v3746_v5 = vsel %vm2233_vm2, %v3736_v40, 0.0  ;;  %v3705_v33 = vsel %vm2286_vm4, %v3696_v27, 0.0 }
0x16e3   :  { %v3715_v45 = vmul.f32 %v10034_v24, %v3705_v33  ;;  %v3756_v58 = vmul.f32 %v10049_v23, %v3746_v5  ;;  %v3828_v6 = vadd.f32 %v3827_v54, %v3821_v3  ;;  %v3781_v59 = vadd.f32 %v3773_v50, %v3763_v35 }
0x16e5   :  { %v3698_v60 = vpop.permute.xlu0 %3697  ;;  %v3792_v46 = vpop.permute.xlu1 %3791  ;;  %v3723_v9 = vadd.f32 %v3715_v45, %v3681_v21  ;;  %v3764_v17 = vadd.f32 %v3756_v58, %v3722_v32 }
0x16e6   :  { %v3706_v49 = vsel %vm2286_vm4, %v3698_v60, 0.0  ;;  %v3804_v7 = vsel %vm2286_vm4, %v3792_v46, 0.0 }
0x16e7   :  { %v3716_v48 = vmul.f32 %v10034_v24, %v3706_v49  ;;  %v3814_v0 = vmul.f32 %v10132_v11, %v3804_v7  ;;  %v3765_v10 = vadd.f32 %v3757_v52, %v3723_v9  ;;  %v3782_v14 = vadd.f32 %v3774_v29, %v3764_v17 }
0x16e9   :  { %v3724_v18 = vadd.f32 %v3716_v48, %v3682_v44  ;;  %v3822_v16 = vadd.f32 %v3814_v0, %v3780_v53  ;;  %v3794_v22 = vpop.permute.xlu0 %3793  ;;  %v3796_v24 = vpop.permute.xlu1 %3795  ;;  %v3783_v19 = vadd.f32 %v3775_v26, %v3765_v10 }
0x16ea   :  { %v3805_v12 = vsel %vm2286_vm4, %v3794_v22, 0.0  ;;  %v3806_v23 = vsel %vm2286_vm4, %v3796_v24, 0.0 }
0x16eb   :  { %v3815_v4 = vmul.f32 %v10132_v11, %v3805_v12  ;;  %v3816_v41 = vmul.f32 %v10132_v11, %v3806_v23  ;;  %v3766_v61 = vadd.f32 %v3758_v55, %v3724_v18  ;;  %v3829_v39 = vadd.f32 %v3828_v6, %v3822_v16 }
0x16ed   :  { %v3823_v57 = vadd.f32 %v3815_v4, %v3781_v59  ;;  %v3798_v31 = vpop.permute.xlu0 %3797  ;;  %v3800_v37 = vpop.permute.xlu1 %3799  ;;  %v3824_v2 = vadd.f32 %v3816_v41, %v3782_v14  ;;  %v3784_v28 = vadd.f32 %v3775_v26, %v3766_v61  ;;  %v3894_v61 = vstv %s6140_s16  ;;  %s6157_s16 = sld [smem:[#allocation2 + $0x71]] }
0x16ee   :  { %v3807_v20 = vsel %vm2286_vm4, %v3798_v31, 0.0  ;;  %v3808_v38 = vsel %vm2286_vm4, %v3800_v37, 0.0 }
0x16ef   :  { %v3830_v34 = vadd.f32 %v3829_v39, %v3823_v57  ;;  %v3817_v15 = vmul.f32 %v10132_v11, %v3807_v20  ;;  %v3818_v40 = vmul.f32 %v10132_v11, %v3808_v38 }
0x16f1   :  { %v3831_v62 = vadd.f32 %v3830_v34, %v3824_v2  ;;  %v3825_v27 = vadd.f32 %v3817_v15, %v3783_v19  ;;  %v3826_v5 = vadd.f32 %v3818_v40, %v3784_v28 }
0x16f3   :  { %v3832_v33 = vadd.f32 %v3831_v62, %v3825_v27 }
0x16f5   :  { %v3833_v42 = vadd.f32 %v3832_v33, %v3826_v5 }
0x16f7   :  { %3834 = vadd.xlane.f32.xlu0 %v3833_v42 }
0x170d   :  { %3927 = vrot.lane.b32.xlu0 %v6431_v1, %s6432_s28 }
0x1711   :  { %4137 = vrot.lane.b32.xlu0 %v6431_v1, %s6432_s28 }
0x1784   :  { %v3835_v47 = vpop.xlane.xlu0 %3834 }
0x1785   :  { %v3836_v36 = vrot.slane %v3835_v47, 4 }
0x1787   :  { %v3837_v63 = vadd.f32 %v3836_v36, %v3835_v47 }
0x1789   :  { %v3838_v45 = vrot.slane %v3837_v63, 2 }
0x178b   :  { %v3839_v13 = vadd.f32 %v3838_v45, %v3837_v63 }
0x178d   :  { %v3840_v21 = vrot.slane %v3839_v13, 1 }
0x178f   :  { %v3841_v11 = vadd.f32 %v3840_v21, %v3839_v13 }
0x1791   :  { %6238 = vpush %v3841_v11  ;;  %v3928_v11 = vpop.permute.xlu0 %3927 }
0x17c2   :  { %s6239_s9 = spop %6238 }
0x17c3   :  { %s3843_s10 = smul.f32 0.00012207031, %s6239_s9  ;;  %s6151_s9 = sld [smem:[#allocation2 + $0x6b]] }
0x17c5   :  { %v3844_v30 = vstv %s3843_s10 }
0x17c6   :  { %v3845_v53 = vsub.f32 %v10172_v43, %v3844_v30  ;;  %v3846_v32 = vsub.f32 %v10169_v25, %v3844_v30  ;;  %v3847_v58 = vsub.f32 %v3821_v3, %v3844_v30  ;;  %v3848_v60 = vsub.f32 %v3822_v16, %v3844_v30 }
0x17c7   :  { %v3849_v44 = vsub.f32 %v3823_v57, %v3844_v30  ;;  %v10209_v35 = vsub.f32 %v3824_v2, %v3844_v30  ;;  %v10211_v55 = vsub.f32 %v3825_v27, %v3844_v30  ;;  %v3852_v29 = vsub.f32 %v3826_v5, %v3844_v30 }
0x17c8   :  { %v3853_v46 = vmul.f32 %v3845_v53, %v3845_v53  ;;  %v3854_v9 = vmul.f32 %v3846_v32, %v3846_v32  ;;  %v3855_v49 = vmul.f32 %v3847_v58, %v3847_v58  ;;  %v3856_v48 = vmul.f32 %v3848_v60, %v3848_v60 }
0x17c9   :  { %v3857_v52 = vmul.f32 %v3849_v44, %v3849_v44  ;;  %v3858_v43 = vmul.f32 %v10209_v35, %v10209_v35  ;;  %v3859_v3 = vmul.f32 %v10211_v55, %v10211_v55  ;;  %v3860_v17 = vmul.f32 %v3852_v29, %v3852_v29 }
0x17ca   :  { %v3861_v7 = vadd.f32 %v3854_v9, %v3853_v46 }
0x17cc   :  { %v3862_v0 = vadd.f32 %v3861_v7, %v3855_v49 }
0x17ce   :  { %v3863_v50 = vadd.f32 %v3862_v0, %v3856_v48 }
0x17d0   :  { %v3864_v25 = vadd.f32 %v3863_v50, %v3857_v52 }
0x17d2   :  { %v3865_v54 = vadd.f32 %v3864_v25, %v3858_v43 }
0x17d4   :  { %v3866_v18 = vadd.f32 %v3865_v54, %v3859_v3 }
0x17d6   :  { %v3867_v16 = vadd.f32 %v3866_v18, %v3860_v17  ;;  %v10352_v17 = vstv %s6144_s30 }
0x17d8   :  { %3868 = vadd.xlane.f32.xlu1 %v3867_v16  ;;  %v10356_v16 = vstv %s6145_s0 }
0x17e9   :  { %3979 = vrot.lane.b32.xlu1 %v6431_v1, %s6433_s29 }
0x1865   :  { %v3869_v22 = vpop.xlane.xlu1 %3868 }
0x1866   :  { %v3870_v24 = vrot.slane %v3869_v22, 4 }
0x1868   :  { %v3871_v10 = vadd.f32 %v3870_v24, %v3869_v22 }
0x1869   :  { %v3980_v30 = vpop.permute.xlu1 %3979 }
0x186a   :  { %v3872_v12 = vrot.slane %v3871_v10, 2 }
0x186c   :  { %v3873_v23 = vadd.f32 %v3872_v12, %v3871_v10 }
0x186e   :  { %v3874_v26 = vrot.slane %v3873_v23, 1 }
0x1870   :  { %v3875_v6 = vadd.f32 %v3874_v26, %v3873_v23 }
0x1872   :  { %6240 = vpush %v3875_v6 }
0x18a3   :  { %s6241_s11 = spop %6240 }
0x18a4   :  { %s3877_s14 = smul.f32 0.00012207031, %s6241_s11 }
0x18a6   :  { %s3879_s15 = sadd.f32 1e-05, %s3877_s14  ;;  %s6154_s14 = sld [smem:[#allocation2 + $0x6e]] }
0x18a8   :  { %v3880_v59 = vstv %s3879_s15  ;;  %s6155_s15 = sld [smem:[#allocation2 + $0x6f]] }
0x18a9   :  { %6396 = vrsqrt.f32 %v3880_v59 }
0x18b3   :  { %v6397_v4 = vpop.eup %6396 }
0x18b4   :  { %6242 = vpush %v6397_v4 }
0x18e5   :  { %s6243_s17 = spop %6242 }
0x18e6   :  { %s3883_s21 = smul.f32 %s6243_s17, %s6139_s1  ;;  %s6156_s1 = sld [smem:[#allocation2 + $0x70]] }
0x18e7   :  { %s6159_s17 = sld [smem:[#allocation2 + $0x73]] }
0x18e8   :  { %v3884_v41 = vstv %s3883_s21  ;;  %s6158_s21 = sld [smem:[#allocation2 + $0x72]] }
0x18e9   :  { %v3885_v39 = vmul.f32 %v3884_v41, %v3845_v53  ;;  %v3886_v57 = vmul.f32 %v3884_v41, %v3846_v32  ;;  %v3887_v14 = vmul.f32 %v3884_v41, %v3847_v58  ;;  %v3892_v31 = vmul.f32 %v3884_v41, %v3852_v29  ;;  %v10327_v53 = vpop.permute.xlu0 %4137 }
0x18ea   :  { %v3888_v15 = vmul.f32 %v3884_v41, %v3848_v60  ;;  %v3889_v27 = vmul.f32 %v3884_v41, %v3849_v44  ;;  %v3890_v33 = vmul.f32 %v3884_v41, %v10209_v35  ;;  %v3891_v63 = vmul.f32 %v3884_v41, %v10211_v55 }
0x18eb   :  { %v3896_v37 = vadd.f32 %v3894_v61, %v3886_v57  ;;  %v3895_v19 = vadd.f32 %v3894_v61, %v3885_v39  ;;  %v3902_v20 = vadd.f32 %v3894_v61, %v3892_v31  ;;  %v3897_v38 = vadd.f32 %v3894_v61, %v3887_v14 }
0x18ec   :  { %v3898_v62 = vadd.f32 %v3894_v61, %v3888_v15  ;;  %v3899_v5 = vadd.f32 %v3894_v61, %v3889_v27  ;;  %v3900_v47 = vadd.f32 %v3894_v61, %v3890_v33  ;;  %v3901_v45 = vadd.f32 %v3894_v61, %v3891_v63 }
0x18ed   :  { %v10219_v34 = vmax.f32 %v3896_v37, 0.0  ;;  %v10221_v2 = vmax.f32 %v3895_v19, 0.0  ;;  %v10227_v40 = vmax.f32 %v3897_v38, 0.0  ;;  %v10299_v21 = vmax.f32 %v3902_v20, 0.0 }
0x18ee   :  { %v10237_v28 = vmax.f32 %v3898_v62, 0.0  ;;  %v10248_v42 = vmax.f32 %v3899_v5, 0.0  ;;  %v10258_v36 = vmax.f32 %v3900_v47, 0.0  ;;  %v10273_v13 = vmax.f32 %v3901_v45, 0.0 }
0x18ef   :  { %3931 = vrot.lane.b32.xlu0 %v10219_v34, %s6432_s28  ;;  %3929 = vrot.lane.b32.xlu1 %v10221_v2, %s6432_s28  ;;  %v10333_v44 = vstv %s6141_s26  ;;  %v4066_v4 = vmul.f32 %v10356_v16, %v10219_v34  ;;  %v3943_v14 = vsel %vm1735_vm1, %v3928_v11, 0.0  ;;  %v4067_v20 = vmul.f32 %v10356_v16, %v10227_v40  ;;  %s10863_s26 = sld [smem:[#allocation2 + $0x74]] }
0x18f0   :  { %v3953_v15 = vmul.f32 %v10333_v44, %v3943_v14  ;;  %v3995_v27 = vsel %vm1788_vm3, %v3980_v30, 0.0 }
0x18f3   :  { %3981 = vrot.lane.b32.xlu0 %v10221_v2, %s6433_s29  ;;  %3933 = vrot.lane.b32.xlu1 %v10227_v40, %s6432_s28 }
0x18f7   :  { %3983 = vrot.lane.b32.xlu0 %v10219_v34, %s6433_s29  ;;  %4021 = vrot.lane.b32.xlu1 %v10221_v2, %s6432_s28 }
0x18fb   :  { %4023 = vrot.lane.b32.xlu0 %v10219_v34, %s6432_s28  ;;  %3935 = vrot.lane.b32.xlu1 %v10237_v28, %s6432_s28 }
0x18ff   :  { %3985 = vrot.lane.b32.xlu0 %v10227_v40, %s6433_s29  ;;  %4025 = vrot.lane.b32.xlu1 %v10227_v40, %s6432_s28 }
0x1903   :  { %3937 = vrot.lane.b32.xlu0 %v10248_v42, %s6432_s28  ;;  %3987 = vrot.lane.b32.xlu1 %v10237_v28, %s6433_s29 }
0x1907   :  { %4027 = vrot.lane.b32.xlu0 %v10237_v28, %s6432_s28  ;;  %4081 = vrot.lane.b32.xlu1 %v10221_v2, %s6433_s29 }
0x190b   :  { %4083 = vrot.lane.b32.xlu0 %v10219_v34, %s6433_s29  ;;  %3939 = vrot.lane.b32.xlu1 %v10258_v36, %s6432_s28 }
0x190f   :  { %3989 = vrot.lane.b32.xlu0 %v10248_v42, %s6433_s29  ;;  %4029 = vrot.lane.b32.xlu1 %v10248_v42, %s6432_s28 }
0x1913   :  { %4085 = vrot.lane.b32.xlu0 %v10227_v40, %s6433_s29  ;;  %4123 = vrot.lane.b32.xlu1 %v10219_v34, %s6432_s28 }
0x1917   :  { %4125 = vrot.lane.b32.xlu0 %v10227_v40, %s6432_s28  ;;  %3941 = vrot.lane.b32.xlu1 %v10273_v13, %s6432_s28 }
0x191b   :  { %3991 = vrot.lane.b32.xlu0 %v10258_v36, %s6433_s29  ;;  %4031 = vrot.lane.b32.xlu1 %v10258_v36, %s6432_s28 }
0x191f   :  { %4087 = vrot.lane.b32.xlu0 %v10237_v28, %s6433_s29  ;;  %4127 = vrot.lane.b32.xlu1 %v10237_v28, %s6432_s28 }
0x1923   :  { %3993 = vrot.lane.b32.xlu0 %v10273_v13, %s6433_s29  ;;  %4033 = vrot.lane.b32.xlu1 %v10273_v13, %s6432_s28 }
0x1927   :  { %4089 = vrot.lane.b32.xlu0 %v10248_v42, %s6433_s29  ;;  %4129 = vrot.lane.b32.xlu1 %v10248_v42, %s6432_s28 }
0x192b   :  { %4183 = vrot.lane.b32.xlu0 %v10219_v34, %s6433_s29  ;;  %4185 = vrot.lane.b32.xlu1 %v10227_v40, %s6433_s29 }
0x192f   :  { %4035 = vrot.lane.b32.xlu0 %v10299_v21, %s6432_s28  ;;  %4091 = vrot.lane.b32.xlu1 %v10258_v36, %s6433_s29 }
0x1933   :  { %4131 = vrot.lane.b32.xlu0 %v10258_v36, %s6432_s28  ;;  %4187 = vrot.lane.b32.xlu1 %v10237_v28, %s6433_s29 }
0x1937   :  { %4093 = vrot.lane.b32.xlu0 %v10273_v13, %s6433_s29  ;;  %4133 = vrot.lane.b32.xlu1 %v10273_v13, %s6432_s28 }
0x193b   :  { %4189 = vrot.lane.b32.xlu0 %v10248_v42, %s6433_s29  ;;  %4095 = vrot.lane.b32.xlu1 %v10299_v21, %s6433_s29 }
0x193f   :  { %4135 = vrot.lane.b32.xlu0 %v10299_v21, %s6432_s28  ;;  %4191 = vrot.lane.b32.xlu1 %v10258_v36, %s6433_s29  ;;  %s6143_s28 = sld [smem:[#allocation2 + $0x62]] }
0x1943   :  { %4195 = vrot.lane.b32.xlu0 %v10299_v21, %s6433_s29  ;;  %4193 = vrot.lane.b32.xlu1 %v10273_v13, %s6433_s29 }
0x1945   :  { %v10340_v0 = vstv %s6143_s28 }
0x1946   :  { %v4005_v45 = vmul.f32 %v10340_v0, %v3995_v27 }
0x1947   :  { %4197 = vrot.lane.b32.xlu1 %v6431_v1, %s6433_s29  ;;  %v10335_v1 = vstv %s6142_s27  ;;  %s6146_s29 = sld [smem:[#allocation2 + $0x65]] }
0x1948   :  { %v3964_v52 = vmul.f32 %v10335_v1, %v10221_v2  ;;  %v3965_v22 = vmul.f32 %v10335_v1, %v10219_v34  ;;  %v3963_v38 = vmul.f32 0.0, %v10335_v1 }
0x194a   :  { %v3971_v63 = vadd.f32 %v3963_v38, %v3953_v15 }
0x1961   :  { %v3930_v32 = vpop.permute.xlu1 %3929  ;;  %v3932_v58 = vpop.permute.xlu0 %3931 }
0x1962   :  { %v3944_v9 = vsel %vm1735_vm1, %v3930_v32, 0.0  ;;  %v3945_v55 = vsel %vm1735_vm1, %v3932_v58, 0.0 }
0x1963   :  { %v3954_v7 = vmul.f32 %v10333_v44, %v3944_v9  ;;  %v3955_v25 = vmul.f32 %v10333_v44, %v3945_v55  ;;  %v10383_v9 = vstv %s6146_s29 }
0x1965   :  { %v10329_v60 = vpop.permute.xlu1 %3933  ;;  %v3982_v46 = vpop.permute.xlu0 %3981  ;;  %v3972_v43 = vadd.f32 %v3964_v52, %v3954_v7  ;;  %v3973_v23 = vadd.f32 %v3965_v22, %v3955_v25  ;;  %v10394_v25 = vstv %s6147_s22  ;;  %s6161_s22 = sld [smem:[#allocation2 + $0x76]] }
0x1966   :  { %v3996_v49 = vsel %vm1788_vm3, %v3982_v46, 0.0  ;;  %v4013_v46 = vadd.f32 %v4005_v45, %v3971_v63 }
0x1967   :  { %v4006_v50 = vmul.f32 %v10340_v0, %v3996_v49 }
0x1969   :  { %v4022_v35 = vpop.permute.xlu1 %4021  ;;  %v3984_v48 = vpop.permute.xlu0 %3983  ;;  %v4014_v24 = vadd.f32 %v4006_v50, %v3972_v43 }
0x196a   :  { %v3997_v29 = vsel %vm1788_vm3, %v3984_v48, 0.0  ;;  %v4037_v47 = vsel %vm1735_vm1, %v4022_v35, 0.0  ;;  %v4065_v35 = vmul.f32 %v10356_v16, %v10221_v2 }
0x196b   :  { %v4007_v10 = vmul.f32 %v10340_v0, %v3997_v29  ;;  %v4047_v11 = vmul.f32 %v10352_v17, %v4037_v47 }
0x196d   :  { %v10350_v3 = vpop.permute.xlu1 %3935  ;;  %v4024_v54 = vpop.permute.xlu0 %4023  ;;  %v4015_v61 = vadd.f32 %v4007_v10, %v3973_v23  ;;  %v4055_v49 = vadd.f32 %v4047_v11, %v4013_v46 }
0x196e   :  { %v4038_v18 = vsel %vm1735_vm1, %v4024_v54, 0.0 }
0x196f   :  { %v4048_v12 = vmul.f32 %v10352_v17, %v4038_v18  ;;  %v4073_v50 = vadd.f32 %v4065_v35, %v4055_v49  ;;  %v10398_v18 = vstv %s6148_s3  ;;  %s6162_s3 = sld [smem:[#allocation2 + $0x77]] }
0x1971   :  { %v4056_v26 = vadd.f32 %v4048_v12, %v4014_v24  ;;  %v4026_v6 = vpop.permute.xlu1 %4025  ;;  %v3986_v59 = vpop.permute.xlu0 %3985 }
0x1972   :  { %v4039_v41 = vsel %vm1735_vm1, %v4026_v6, 0.0 }
0x1973   :  { %v4049_v39 = vmul.f32 %v10352_v17, %v4039_v41  ;;  %v4074_v57 = vadd.f32 %v4066_v4, %v4056_v26  ;;  %v4167_v26 = vmul.f32 %v10398_v18, %v10219_v34  ;;  %v3946_v34 = vsel %vm1735_vm1, %v10329_v60, 0.0 }
0x1974   :  { %v3956_v47 = vmul.f32 %v10333_v44, %v3946_v34  ;;  %v3966_v60 = vmul.f32 %v10335_v1, %v10227_v40  ;;  %v10469_v34 = vmul.f32 %v10356_v16, %v10273_v13 }
0x1975   :  { %v4057_v31 = vadd.f32 %v4049_v39, %v4015_v61  ;;  %v3988_v37 = vpop.permute.xlu1 %3987  ;;  %v10369_v19 = vpop.permute.xlu0 %3937 }
0x1976   :  { %v3974_v49 = vadd.f32 %v3966_v60, %v3956_v47  ;;  %v10486_v60 = vstv %s6149_s4 }
0x1977   :  { %v10375_v62 = vadd.f32 %v4067_v20, %v4057_v31  ;;  %v4168_v20 = vmul.f32 %v10398_v18, %v10227_v40 }
0x1979   :  { %v4082_v5 = vpop.permute.xlu1 %4081  ;;  %v4028_v33 = vpop.permute.xlu0 %4027 }
0x197a   :  { %v4097_v30 = vsel %vm1788_vm3, %v4082_v5, 0.0  ;;  %v3998_v5 = vsel %vm1788_vm3, %v3986_v59, 0.0  ;;  %v4040_v46 = vsel %vm1735_vm1, %v4028_v33, 0.0  ;;  %v3967_v59 = vmul.f32 %v10335_v1, %v10237_v28 }
0x197b   :  { %v4107_v55 = vmul.f32 %v10383_v9, %v4097_v30  ;;  %v4050_v33 = vmul.f32 %v10352_v17, %v4040_v46 }
0x197d   :  { %v3940_v32 = vpop.permute.xlu1 %3939  ;;  %v4084_v58 = vpop.permute.xlu0 %4083  ;;  %v4115_v22 = vadd.f32 %v4107_v55, %v4073_v50 }
0x197e   :  { %v4098_v52 = vsel %vm1788_vm3, %v4084_v58, 0.0  ;;  %v3999_v58 = vsel %vm1788_vm3, %v3988_v37, 0.0  ;;  %v3948_v37 = vsel %vm1735_vm1, %v10369_v19, 0.0 }
0x197f   :  { %v4108_v24 = vmul.f32 %v10383_v9, %v4098_v52  ;;  %v4009_v35 = vmul.f32 %v10340_v0, %v3999_v58  ;;  %v3958_v19 = vmul.f32 %v10333_v44, %v3948_v37 }
0x1981   :  { %v4030_v7 = vpop.permute.xlu1 %4029  ;;  %v3990_v48 = vpop.permute.xlu0 %3989  ;;  %v4116_v4 = vadd.f32 %v4108_v24, %v4074_v57  ;;  %v3947_v57 = vsel %vm1735_vm1, %v10350_v3, 0.0  ;;  %v4008_v3 = vmul.f32 %v10340_v0, %v3998_v5  ;;  %v3969_v24 = vmul.f32 %v10335_v1, %v10258_v36 }
0x1982   :  { %v3957_v11 = vmul.f32 %v10333_v44, %v3947_v57  ;;  %v4041_v30 = vsel %vm1735_vm1, %v4030_v7, 0.0  ;;  %v4000_v7 = vsel %vm1788_vm3, %v3990_v48, 0.0  ;;  %v10473_v57 = vmul.f32 %v10356_v16, %v10299_v21 }
0x1983   :  { %v4016_v50 = vadd.f32 %v4008_v3, %v3974_v49 }
0x1984   :  { %v3975_v40 = vadd.f32 %v3967_v59, %v3957_v11  ;;  %v10490_v59 = vmul.f32 %v10398_v18, %v10258_v36 }
0x1985   :  { %v4124_v29 = vpop.permute.xlu1 %4123  ;;  %v10392_v43 = vpop.permute.xlu0 %4085 }
0x1986   :  { %v4139_v54 = vsel %vm1735_vm1, %v4124_v29, 0.0  ;;  %v3949_v29 = vsel %vm1735_vm1, %v3940_v32, 0.0  ;;  %v4068_v32 = vmul.f32 %v10356_v16, %v10237_v28  ;;  %v4099_v47 = vsel %vm1788_vm3, %v10392_v43, 0.0 }
0x1987   :  { %v4149_v2 = vmul.f32 %v10394_v25, %v4139_v54  ;;  %v4051_v54 = vmul.f32 %v10352_v17, %v4041_v30  ;;  %v3959_v48 = vmul.f32 %v10333_v44, %v3949_v29  ;;  %v4109_v49 = vmul.f32 %v10383_v9, %v4099_v47 }
0x1989   :  { %v4157_v10 = vadd.f32 %v4149_v2, %v4115_v22  ;;  %v3942_v12 = vpop.permute.xlu1 %3941  ;;  %v4126_v23 = vpop.permute.xlu0 %4125  ;;  %v3968_v22 = vmul.f32 %v10335_v1, %v10248_v42  ;;  %v4017_v2 = vadd.f32 %v4009_v35, %v3975_v40  ;;  %v3977_v43 = vadd.f32 %v3969_v24, %v3959_v48 }
0x198a   :  { %v4140_v6 = vsel %vm1735_vm1, %v4126_v23, 0.0  ;;  %v3970_v23 = vmul.f32 %v10335_v1, %v10273_v13  ;;  %v10465_v1 = vmul.f32 %v10398_v18, %v10237_v28  ;;  %v3950_v11 = vsel %vm1735_vm1, %v3942_v12, 0.0 }
0x198b   :  { %v4150_v41 = vmul.f32 %v10394_v25, %v4140_v6  ;;  %v10407_v61 = vadd.f32 %v4167_v26, %v4157_v10  ;;  %v4058_v10 = vadd.f32 %v4050_v33, %v4016_v50  ;;  %v3976_v5 = vadd.f32 %v3968_v22, %v3958_v19 }
0x198c   :  { %v10482_v28 = vmul.f32 %v10398_v18, %v10248_v42  ;;  %v4117_v22 = vadd.f32 %v4109_v49, %v10375_v62 }
0x198d   :  { %v4158_v39 = vadd.f32 %v4150_v41, %v4116_v4  ;;  %v4032_v14 = vpop.permute.xlu1 %4031  ;;  %v3992_v31 = vpop.permute.xlu0 %3991  ;;  %v4010_v4 = vmul.f32 %v10340_v0, %v4000_v7  ;;  %v4069_v41 = vmul.f32 %v10356_v16, %v10248_v42  ;;  %v4076_v46 = vadd.f32 %v4068_v32, %v4058_v10 }
0x198e   :  { %v4001_v58 = vsel %vm1788_vm3, %v3992_v31, 0.0  ;;  %v4042_v12 = vsel %vm1735_vm1, %v4032_v14, 0.0  ;;  %v3960_v31 = vmul.f32 %v10333_v44, %v3950_v11 }
0x198f   :  { %v10411_v38 = vadd.f32 %v4168_v20, %v4158_v39  ;;  %v10461_v39 = vmul.f32 %v10356_v16, %v10258_v36  ;;  %v4059_v20 = vadd.f32 %v4051_v54, %v4017_v2  ;;  %v4018_v30 = vadd.f32 %v4010_v4, %v3976_v5 }
0x1990   :  { %v4011_v33 = vmul.f32 %v10340_v0, %v4001_v58  ;;  %v4052_v40 = vmul.f32 %v10352_v17, %v4042_v12  ;;  %v3978_v2 = vadd.f32 %v3970_v23, %v3960_v31 }
0x1991   :  { %v10413_v15 = vpop.permute.xlu1 %4127  ;;  %v4088_v27 = vpop.permute.xlu0 %4087  ;;  %v4077_v37 = vadd.f32 %v4069_v41, %v4059_v20 }
0x1992   :  { %v4100_v42 = vsel %vm1788_vm3, %v4088_v27, 0.0  ;;  %v4141_v36 = vsel %vm1735_vm1, %v10413_v15, 0.0  ;;  %v4019_v10 = vadd.f32 %v4011_v33, %v3977_v43  ;;  %v4060_v20 = vadd.f32 %v4052_v40, %v4018_v30 }
0x1993   :  { %v4110_v44 = vmul.f32 %v10383_v9, %v4100_v42 }
0x1994   :  { %v4078_v33 = vadd.f32 %v10461_v39, %v4060_v20  ;;  %v4146_v39 = vsel %vm1735_vm1, %v10327_v53, 0.0 }
0x1995   :  { %v4034_v63 = vpop.permute.xlu1 %4033  ;;  %v3994_v45 = vpop.permute.xlu0 %3993  ;;  %v4118_v5 = vadd.f32 %v4110_v44, %v4076_v46 }
0x1996   :  { %v4002_v35 = vsel %vm1788_vm3, %v3994_v45, 0.0  ;;  %v4043_v14 = vsel %vm1735_vm1, %v4034_v63, 0.0 }
0x1997   :  { %v4012_v15 = vmul.f32 %v10340_v0, %v4002_v35  ;;  %v4053_v19 = vmul.f32 %v10352_v17, %v4043_v14 }
0x1999   :  { %v4130_v55 = vpop.permute.xlu1 %4129  ;;  %v4090_v52 = vpop.permute.xlu0 %4089  ;;  %v4020_v47 = vadd.f32 %v4012_v15, %v3978_v2  ;;  %v4061_v58 = vadd.f32 %v4053_v19, %v4019_v10  ;;  %v4173_v2 = vmul.f32 %v10398_v18, %v10299_v21 }
0x199a   :  { %v4101_v27 = vsel %vm1788_vm3, %v4090_v52, 0.0  ;;  %v4142_v45 = vsel %vm1735_vm1, %v4130_v55, 0.0  ;;  %v4151_v55 = vmul.f32 %v10394_v25, %v4141_v36 }
0x199b   :  { %v4111_v24 = vmul.f32 %v10383_v9, %v4101_v27  ;;  %v4152_v0 = vmul.f32 %v10394_v25, %v4142_v45 }
0x199c   :  { %v4159_v11 = vadd.f32 %v4151_v55, %v4117_v22 }
0x199d   :  { %v4186_v26 = vpop.permute.xlu1 %4185  ;;  %v4184_v6 = vpop.permute.xlu0 %4183  ;;  %v4160_v43 = vadd.f32 %v4152_v0, %v4118_v5 }
0x199e   :  { %v4200_v63 = vsel %vm1788_vm3, %v4186_v26, 0.0  ;;  %v4199_v52 = vsel %vm1788_vm3, %v4184_v6, 0.0 }
0x199f   :  { %v4210_v26 = vmul.f32 %v10486_v60, %v4200_v63  ;;  %v4209_v6 = vmul.f32 %v10486_v60, %v4199_v52 }
0x19a1   :  { %v4092_v16 = vpop.permute.xlu1 %4091  ;;  %v4036_v3 = vpop.permute.xlu0 %4035  ;;  %v10540_v30 = vadd.f32 %v4210_v26, %v10411_v38  ;;  %v10543_v46 = vadd.f32 %v4209_v6, %v10407_v61  ;;  %v4177_v38 = vadd.f32 %v10465_v1, %v4159_v11  ;;  %v4178_v1 = vadd.f32 %v10482_v28, %v4160_v43 }
0x19a2   :  { %v4044_v50 = vsel %vm1735_vm1, %v4036_v3, 0.0  ;;  %v4102_v48 = vsel %vm1788_vm3, %v4092_v16, 0.0  ;;  %v4156_v28 = vmul.f32 %v10394_v25, %v4146_v39 }
0x19a3   :  { %v4054_v32 = vmul.f32 %v10352_v17, %v4044_v50  ;;  %v4119_v17 = vadd.f32 %v4111_v24, %v4077_v37  ;;  %v4112_v12 = vmul.f32 %v10383_v9, %v4102_v48  ;;  %v4079_v50 = vadd.f32 %v10469_v34, %v4061_v58 }
0x19a4   :  { %v4174_v48 = vmul.f32 0.0, %v10398_v18 }
0x19a5   :  { %v4188_v29 = vpop.permute.xlu1 %4187  ;;  %v4132_v54 = vpop.permute.xlu0 %4131  ;;  %v4062_v16 = vadd.f32 %v4054_v32, %v4020_v47  ;;  %v4120_v45 = vadd.f32 %v4112_v12, %v4078_v33 }
0x19a6   :  { %v4143_v7 = vsel %vm1735_vm1, %v4132_v54, 0.0  ;;  %v4201_v23 = vsel %vm1788_vm3, %v4188_v29, 0.0  ;;  %v4225_v54 = vadd.f32 %v10540_v30, %v10543_v46 }
0x19a7   :  { %v4153_v62 = vmul.f32 %v10394_v25, %v4143_v7  ;;  %v4211_v49 = vmul.f32 %v10486_v60, %v4201_v23  ;;  %v4080_v29 = vadd.f32 %v10473_v57, %v4062_v16 }
0x19a9   :  { %v4134_v4 = vpop.permute.xlu1 %4133  ;;  %v4094_v41 = vpop.permute.xlu0 %4093  ;;  %v4161_v31 = vadd.f32 %v4153_v62, %v4119_v17  ;;  %v4219_v15 = vadd.f32 %v4211_v49, %v4177_v38 }
0x19aa   :  { %v4144_v3 = vsel %vm1735_vm1, %v4134_v4, 0.0  ;;  %v4103_v42 = vsel %vm1788_vm3, %v4094_v41, 0.0 }
0x19ab   :  { %v4154_v36 = vmul.f32 %v10394_v25, %v4144_v3  ;;  %v4113_v61 = vmul.f32 %v10383_v9, %v4103_v42  ;;  %v4226_v10 = vadd.f32 %v4225_v54, %v4219_v15 }
0x19ad   :  { %v4096_v35 = vpop.permute.xlu1 %4095  ;;  %v4190_v37 = vpop.permute.xlu0 %4189  ;;  %v4162_v7 = vadd.f32 %v4154_v36, %v4120_v45  ;;  %v4121_v55 = vadd.f32 %v4113_v61, %v4079_v50 }
0x19ae   :  { %v4104_v14 = vsel %vm1788_vm3, %v4096_v35, 0.0  ;;  %v4202_v27 = vsel %vm1788_vm3, %v4190_v37, 0.0 }
0x19af   :  { %v4114_v40 = vmul.f32 %v10383_v9, %v4104_v14  ;;  %v4212_v44 = vmul.f32 %v10486_v60, %v4202_v27  ;;  %v4179_v9 = vadd.f32 %v10490_v59, %v4161_v31  ;;  %v4172_v59 = vmul.f32 %v10398_v18, %v10273_v13 }
0x19b1   :  { %v4192_v63 = vpop.permute.xlu1 %4191  ;;  %v4136_v52 = vpop.permute.xlu0 %4135  ;;  %v4122_v22 = vadd.f32 %v4114_v40, %v4080_v29  ;;  %v4220_v57 = vadd.f32 %v4212_v44, %v4178_v1  ;;  %v4180_v4 = vadd.f32 %v4172_v59, %v4162_v7 }
0x19b2   :  { %v4203_v53 = vsel %vm1788_vm3, %v4192_v63, 0.0  ;;  %v4145_v34 = vsel %vm1735_vm1, %v4136_v52, 0.0 }
0x19b3   :  { %v4213_v19 = vmul.f32 %v10486_v60, %v4203_v53  ;;  %v4155_v24 = vmul.f32 %v10394_v25, %v4145_v34  ;;  %v4164_v62 = vadd.f32 %v4156_v28, %v4122_v22  ;;  %v4227_v20 = vadd.f32 %v4226_v10, %v4220_v57 }
0x19b5   :  { %v4221_v0 = vadd.f32 %v4213_v19, %v4179_v9  ;;  %v4163_v32 = vadd.f32 %v4155_v24, %v4121_v55  ;;  %v4194_v26 = vpop.permute.xlu1 %4193  ;;  %v4196_v6 = vpop.permute.xlu0 %4195  ;;  %v4182_v3 = vadd.f32 %v4174_v48, %v4164_v62  ;;  %v4292_v48 = vstv %s6151_s9  ;;  %s6169_s9 = sld [smem:[#allocation2 + $0x7e]] }
0x19b6   :  { %v4204_v41 = vsel %vm1788_vm3, %v4194_v26, 0.0  ;;  %v4205_v25 = vsel %vm1788_vm3, %v4196_v6, 0.0 }
0x19b7   :  { %v4214_v13 = vmul.f32 %v10486_v60, %v4204_v41  ;;  %v4181_v5 = vadd.f32 %v4173_v2, %v4163_v32  ;;  %v4215_v21 = vmul.f32 %v10486_v60, %v4205_v25  ;;  %v4228_v47 = vadd.f32 %v4227_v20, %v4221_v0 }
0x19b9   :  { %v4222_v23 = vadd.f32 %v4214_v13, %v4180_v4  ;;  %v4198_v11 = vpop.permute.xlu1 %4197  ;;  %v4223_v17 = vadd.f32 %v4215_v21, %v4181_v5 }
0x19ba   :  { %v4206_v18 = vsel %vm1788_vm3, %v4198_v11, 0.0 }
0x19bb   :  { %v4229_v58 = vadd.f32 %v4228_v47, %v4222_v23  ;;  %v4216_v43 = vmul.f32 %v10486_v60, %v4206_v18 }
0x19bd   :  { %v4224_v12 = vadd.f32 %v4216_v43, %v4182_v3  ;;  %v4230_v16 = vadd.f32 %v4229_v58, %v4223_v17 }
0x19bf   :  { %v4231_v42 = vadd.f32 %v4230_v16, %v4224_v12 }
0x19c1   :  { %4232 = vadd.xlane.f32.xlu0 %v4231_v42 }
0x1a4e   :  { %v4233_v49 = vpop.xlane.xlu0 %4232 }
0x1a4f   :  { %v4234_v31 = vrot.slane %v4233_v49, 4 }
0x1a51   :  { %v4235_v35 = vadd.f32 %v4234_v31, %v4233_v49 }
0x1a53   :  { %v4236_v37 = vrot.slane %v4235_v35, 2 }
0x1a55   :  { %v4237_v33 = vadd.f32 %v4236_v37, %v4235_v35 }
0x1a57   :  { %v4238_v36 = vrot.slane %v4237_v33, 1 }
0x1a59   :  { %v4239_v14 = vadd.f32 %v4238_v36, %v4237_v33 }
0x1a5b   :  { %6244 = vpush %v4239_v14 }
0x1a8c   :  { %s6245_s18 = spop %6244 }
0x1a8d   :  { %s4241_s6 = smul.f32 0.00012207031, %s6245_s18 }
0x1a8f   :  { %v4242_v27 = vstv %s4241_s6  ;;  %s6165_s6 = sld [smem:[#allocation2 + $0x7a]] }
0x1a90   :  { %v4243_v38 = vsub.f32 %v10543_v46, %v4242_v27  ;;  %v4244_v61 = vsub.f32 %v10540_v30, %v4242_v27  ;;  %v4245_v60 = vsub.f32 %v4219_v15, %v4242_v27  ;;  %v4246_v40 = vsub.f32 %v4220_v57, %v4242_v27 }
0x1a91   :  { %v4247_v45 = vsub.f32 %v4221_v0, %v4242_v27  ;;  %v4248_v54 = vsub.f32 %v4222_v23, %v4242_v27  ;;  %v4249_v9 = vsub.f32 %v4223_v17, %v4242_v27  ;;  %v4250_v22 = vsub.f32 %v4224_v12, %v4242_v27 }
0x1a92   :  { %v4251_v44 = vmul.f32 %v4243_v38, %v4243_v38  ;;  %v4252_v39 = vmul.f32 %v4244_v61, %v4244_v61  ;;  %v4253_v50 = vmul.f32 %v4245_v60, %v4245_v60  ;;  %v4254_v1 = vmul.f32 %v4246_v40, %v4246_v40 }
0x1a93   :  { %v4255_v52 = vmul.f32 %v4247_v45, %v4247_v45  ;;  %v4256_v53 = vmul.f32 %v4248_v54, %v4248_v54  ;;  %v4257_v55 = vmul.f32 %v4249_v9, %v4249_v9  ;;  %v4258_v19 = vmul.f32 %v4250_v22, %v4250_v22 }
0x1a94   :  { %v4259_v29 = vadd.f32 %v4252_v39, %v4251_v44 }
0x1a96   :  { %v4260_v63 = vadd.f32 %v4259_v29, %v4253_v50 }
0x1a98   :  { %v4261_v7 = vadd.f32 %v4260_v63, %v4254_v1 }
0x1a9a   :  { %v4262_v34 = vadd.f32 %v4261_v7, %v4255_v52 }
0x1a9c   :  { %v4263_v46 = vadd.f32 %v4262_v34, %v4256_v53 }
0x1a9e   :  { %v4264_v30 = vadd.f32 %v4263_v46, %v4257_v55 }
0x1aa0   :  { %v4265_v15 = vadd.f32 %v4264_v30, %v4258_v19 }
0x1aa2   :  { %4266 = vadd.xlane.f32.xlu1 %v4265_v15 }
0x1b2f   :  { %v4267_v57 = vpop.xlane.xlu1 %4266 }
0x1b30   :  { %v4268_v24 = vrot.slane %v4267_v57, 4 }
0x1b32   :  { %v4269_v28 = vadd.f32 %v4268_v24, %v4267_v57 }
0x1b34   :  { %v4270_v59 = vrot.slane %v4269_v28, 2 }
0x1b36   :  { %v4271_v2 = vadd.f32 %v4270_v59, %v4269_v28 }
0x1b38   :  { %v4272_v10 = vrot.slane %v4271_v2, 1 }
0x1b3a   :  { %v4273_v0 = vadd.f32 %v4272_v10, %v4271_v2 }
0x1b3c   :  { %6246 = vpush %v4273_v0 }
0x1b6d   :  { %s6247_s25 = spop %6246 }
0x1b6e   :  { %s4275_s7 = smul.f32 0.00012207031, %s6247_s25  ;;  %s6166_s25 = sld [smem:[#allocation2 + $0x7b]] }
0x1b70   :  { %s4277_s5 = sadd.f32 1e-05, %s4275_s7  ;;  %s6167_s7 = sld [smem:[#allocation2 + $0x7c]] }
0x1b72   :  { %v4278_v32 = vstv %s4277_s5  ;;  %s6168_s5 = sld [smem:[#allocation2 + $0x7d]] }
0x1b73   :  { %6398 = vrsqrt.f32 %v4278_v32 }
0x1b7d   :  { %v6399_v26 = vpop.eup %6398 }
0x1b7e   :  { %6248 = vpush %v6399_v26 }
0x1baf   :  { %s6249_s10 = spop %6248 }
0x1bb0   :  { %s4281_s11 = smul.f32 %s6249_s10, %s6150_s8  ;;  %s6170_s8 = sld [smem:[#allocation2 + $0x7f]] }
0x1bb1   :  { %s6171_s10 = sld [smem:[#allocation2 + $0x80]] }
0x1bb2   :  { %v4282_v6 = vstv %s4281_s11 }
0x1bb3   :  { %v4284_v62 = vmul.f32 %v4282_v6, %v4244_v61  ;;  %v4283_v4 = vmul.f32 %v4282_v6, %v4243_v38  ;;  %v4286_v41 = vmul.f32 %v4282_v6, %v4246_v40  ;;  %v4285_v25 = vmul.f32 %v4282_v6, %v4245_v60 }
0x1bb4   :  { %v4287_v58 = vmul.f32 %v4282_v6, %v4247_v45  ;;  %v4288_v3 = vmul.f32 %v4282_v6, %v4248_v54  ;;  %v4289_v16 = vmul.f32 %v4282_v6, %v4249_v9  ;;  %v4290_v31 = vmul.f32 %v4282_v6, %v4250_v22 }
0x1bb5   :  { %v4294_v20 = vadd.f32 %v4292_v48, %v4284_v62  ;;  %v4293_v13 = vadd.f32 %v4292_v48, %v4283_v4  ;;  %v4296_v47 = vadd.f32 %v4292_v48, %v4286_v41  ;;  %v4295_v23 = vadd.f32 %v4292_v48, %v4285_v25 }
0x1bb6   :  { %v4297_v17 = vadd.f32 %v4292_v48, %v4287_v58  ;;  %v4298_v12 = vadd.f32 %v4292_v48, %v4288_v3  ;;  %v4299_v49 = vadd.f32 %v4292_v48, %v4289_v16  ;;  %v4300_v37 = vadd.f32 %v4292_v48, %v4290_v31 }
0x1bb7   :  { %v10588_v5 = vmax.f32 %v4294_v20, 0.0  ;;  %v10590_v21 = vmax.f32 %v4293_v13, 0.0  ;;  %v10596_v11 = vmax.f32 %v4296_v47, 0.0  ;;  %v10598_v18 = vmax.f32 %v4295_v23, 0.0 }
0x1bb8   :  { %v10608_v43 = vmax.f32 %v4297_v17, 0.0  ;;  %v10614_v42 = vmax.f32 %v4298_v12, 0.0  ;;  %v10620_v35 = vmax.f32 %v4299_v49, 0.0  ;;  %v10626_v33 = vmax.f32 %v4300_v37, 0.0 }
0x1bb9   :  { %4437 = vrot.lane.b32.xlu0 %v10588_v5, %s6429_s12  ;;  %4435 = vrot.lane.b32.xlu1 %v10590_v21, %s6429_s12  ;;  %v4310_v36 = vrot.slane %v10588_v5, 4  ;;  %v4311_v14 = vrot.slane %v10598_v18, 4  ;;  %v4309_v27 = vrot.slane %v10590_v21, 4  ;;  %v4312_v60 = vrot.slane %v10596_v11, 4 }
0x1bba   :  { %v4313_v44 = vrot.slane %v10608_v43, 4  ;;  %v4314_v45 = vrot.slane %v10614_v42, 4  ;;  %v4315_v50 = vrot.slane %v10620_v35, 4  ;;  %v4316_v1 = vrot.slane %v10626_v33, 4 }
0x1bbb   :  { %v10637_v38 = vsel %vm1188_vm13, %v4310_v36, %v4311_v14  ;;  %v10641_v61 = vsel %vm1188_vm13, %v4309_v27, %v4310_v36  ;;  %v10650_v40 = vsel %vm1188_vm13, %v4311_v14, %v4312_v60  ;;  %v10777_v41 = vstv %s6154_s14 }
0x1bbc   :  { %v10659_v39 = vsel %vm1188_vm13, %v4312_v60, %v4313_v44  ;;  %v10673_v29 = vsel %vm1188_vm13, %v4313_v44, %v4314_v45  ;;  %v10677_v54 = vsel %vm1188_vm13, %v4314_v45, %v4315_v50  ;;  %v10690_v63 = vsel %vm1188_vm13, %v4315_v50, %v4316_v1 }
0x1bbd   :  { %4441 = vrot.lane.b32.xlu0 %v10596_v11, %s6429_s12  ;;  %4439 = vrot.lane.b32.xlu1 %v10598_v18, %s6429_s12  ;;  %v4324_v9 = vsel %vm1188_vm13, %v4316_v1, %v4309_v27  ;;  %v10781_v47 = vstv %s6155_s15  ;;  %v10789_v16 = vstv %s6156_s1  ;;  %s6172_s1 = sld [smem:[#allocation2 + $0x82]] }
0x1bbe   :  { %v10712_v52 = vsel %vm1172_vm11, %v4324_v9, 0.0  ;;  %v10736_v7 = vsel %vm1212_vm14, %v4324_v9, 0.0  ;;  %v4480_v1 = vmul.f32 %v10789_v16, %v10588_v5 }
0x1bc1   :  { %4497 = vrot.lane.b32.xlu0 %v10588_v5, %s6430_s13  ;;  %4495 = vrot.lane.b32.xlu1 %v10590_v21, %s6430_s13 }
0x1bc5   :  { %4499 = vrot.lane.b32.xlu0 %v10598_v18, %s6430_s13  ;;  %4443 = vrot.lane.b32.xlu1 %v10608_v43, %s6429_s12 }
0x1bc9   :  { %4501 = vrot.lane.b32.xlu0 %v10596_v11, %s6430_s13  ;;  %4445 = vrot.lane.b32.xlu1 %v10614_v42, %s6429_s12 }
0x1bcd   :  { %4503 = vrot.lane.b32.xlu0 %v10608_v43, %s6430_s13  ;;  %4447 = vrot.lane.b32.xlu1 %v10620_v35, %s6429_s12 }
0x1bd1   :  { %4449 = vrot.lane.b32.xlu0 %v10626_v33, %s6429_s12  ;;  %4505 = vrot.lane.b32.xlu1 %v10614_v42, %s6430_s13 }
0x1bd5   :  { %4345 = vrot.lane.b32.xlu0 %v10637_v38, %s6429_s12  ;;  %4343 = vrot.lane.b32.xlu1 %v10641_v61, %s6429_s12 }
0x1bd9   :  { %4395 = vrot.lane.b32.xlu0 %v10641_v61, %s6430_s13  ;;  %4347 = vrot.lane.b32.xlu1 %v10650_v40, %s6429_s12 }
0x1bdd   :  { %4397 = vrot.lane.b32.xlu0 %v10637_v38, %s6430_s13  ;;  %4349 = vrot.lane.b32.xlu1 %v10659_v39, %s6429_s12 }
0x1be1   :  { %4399 = vrot.lane.b32.xlu0 %v10650_v40, %s6430_s13  ;;  %4401 = vrot.lane.b32.xlu1 %v10659_v39, %s6430_s13 }
0x1be5   :  { %4351 = vrot.lane.b32.xlu0 %v10673_v29, %s6429_s12  ;;  %4353 = vrot.lane.b32.xlu1 %v10677_v54, %s6429_s12 }
0x1be9   :  { %4403 = vrot.lane.b32.xlu0 %v10673_v29, %s6430_s13  ;;  %4537 = vrot.lane.b32.xlu1 %v10641_v61, %s6429_s12 }
0x1bed   :  { %4539 = vrot.lane.b32.xlu0 %v10637_v38, %s6429_s12  ;;  %4355 = vrot.lane.b32.xlu1 %v10690_v63, %s6429_s12 }
0x1bf1   :  { %4405 = vrot.lane.b32.xlu0 %v10677_v54, %s6430_s13  ;;  %4541 = vrot.lane.b32.xlu1 %v10650_v40, %s6429_s12 }
0x1bf5   :  { %4407 = vrot.lane.b32.xlu0 %v10690_v63, %s6430_s13  ;;  %4543 = vrot.lane.b32.xlu1 %v10659_v39, %s6429_s12 }
0x1bf9   :  { %4597 = vrot.lane.b32.xlu0 %v10641_v61, %s6430_s13  ;;  %4599 = vrot.lane.b32.xlu1 %v10637_v38, %s6430_s13 }
0x1bfd   :  { %4341 = vrot.lane.b32.xlu0 %v10712_v52, %s6429_s12  ;;  %4393 = vrot.lane.b32.xlu1 %v10712_v52, %s6430_s13 }
0x1c01   :  { %4545 = vrot.lane.b32.xlu0 %v10673_v29, %s6429_s12  ;;  %4601 = vrot.lane.b32.xlu1 %v10650_v40, %s6430_s13 }
0x1c05   :  { %4507 = vrot.lane.b32.xlu0 %v10620_v35, %s6430_s13  ;;  %4547 = vrot.lane.b32.xlu1 %v10677_v54, %s6429_s12 }
0x1c09   :  { %4603 = vrot.lane.b32.xlu0 %v10659_v39, %s6430_s13  ;;  %4509 = vrot.lane.b32.xlu1 %v10626_v33, %s6430_s13 }
0x1c0d   :  { %4549 = vrot.lane.b32.xlu0 %v10690_v63, %s6429_s12  ;;  %4605 = vrot.lane.b32.xlu1 %v10673_v29, %s6430_s13 }
0x1c11   :  { %4551 = vrot.lane.b32.xlu0 %v10736_v7, %s6429_s12  ;;  %4607 = vrot.lane.b32.xlu1 %v10677_v54, %s6430_s13  ;;  %s6152_s12 = sld [smem:[#allocation2 + $0x6c]] }
0x1c15   :  { %4609 = vrot.lane.b32.xlu0 %v10690_v63, %s6430_s13  ;;  %4611 = vrot.lane.b32.xlu1 %v10736_v7, %s6430_s13  ;;  %s6153_s13 = sld [smem:[#allocation2 + $0x6d]] }
0x1c17   :  { %v10768_v0 = vstv %s6152_s12 }
0x1c1b   :  { %v10770_v6 = vstv %s6153_s13 }
0x1c1c   :  { %v4378_v25 = vmul.f32 %v10770_v6, %v10641_v61  ;;  %v4379_v31 = vmul.f32 %v10770_v6, %v10637_v38 }
0x1c2b   :  { %v4438_v22 = vpop.permute.xlu0 %4437  ;;  %v10746_v53 = vpop.permute.xlu1 %4435 }
0x1c2c   :  { %v4452_v23 = vsel %vm1221_vm12, %v4438_v22, 0.0 }
0x1c2d   :  { %v4462_v49 = vmul.f32 %v10781_v47, %v4452_v23 }
0x1c2f   :  { %v10748_v34 = vpop.permute.xlu0 %4441  ;;  %v4440_v55 = vpop.permute.xlu1 %4439 }
0x1c30   :  { %v4453_v27 = vsel %vm1221_vm12, %v4440_v55, 0.0  ;;  %v4481_v55 = vmul.f32 %v10789_v16, %v10598_v18  ;;  %v10817_v18 = vstv %s6159_s17 }
0x1c31   :  { %v4463_v9 = vmul.f32 %v10781_v47, %v4453_v27 }
0x1c33   :  { %v4498_v46 = vpop.permute.xlu0 %4497  ;;  %v10750_v19 = vpop.permute.xlu1 %4495 }
0x1c37   :  { %v10752_v30 = vpop.permute.xlu0 %4499  ;;  %v10754_v15 = vpop.permute.xlu1 %4443 }
0x1c3b   :  { %v10756_v57 = vpop.permute.xlu0 %4501  ;;  %v10758_v24 = vpop.permute.xlu1 %4445 }
0x1c3f   :  { %v10760_v28 = vpop.permute.xlu0 %4503  ;;  %v10762_v59 = vpop.permute.xlu1 %4447 }
0x1c43   :  { %v10764_v2 = vpop.permute.xlu0 %4449  ;;  %v10766_v10 = vpop.permute.xlu1 %4505 }
0x1c47   :  { %v4346_v32 = vpop.permute.xlu0 %4345  ;;  %v4344_v26 = vpop.permute.xlu1 %4343 }
0x1c48   :  { %v4358_v48 = vsel %vm1221_vm12, %v4344_v26, 0.0  ;;  %v4359_v4 = vsel %vm1221_vm12, %v4346_v32, 0.0 }
0x1c49   :  { %v4368_v62 = vmul.f32 %v10768_v0, %v4358_v48  ;;  %v4369_v17 = vmul.f32 %v10768_v0, %v4359_v4 }
0x1c4b   :  { %v4396_v20 = vpop.permute.xlu0 %4395  ;;  %v4348_v13 = vpop.permute.xlu1 %4347  ;;  %v4386_v3 = vadd.f32 %v4378_v25, %v4368_v62  ;;  %v4387_v44 = vadd.f32 %v4379_v31, %v4369_v17  ;;  %v4512_v17 = vsel %vm1274_vm5, %v4498_v46, 0.0  ;;  %v10819_v31 = vstv %s6158_s21 }
0x1c4c   :  { %v4410_v58 = vsel %vm1274_vm5, %v4396_v20, 0.0  ;;  %v4380_v46 = vmul.f32 %v10770_v6, %v10650_v40 }
0x1c4d   :  { %v4420_v12 = vmul.f32 %v10777_v41, %v4410_v58  ;;  %v10810_v58 = vstv %s6157_s16  ;;  %s6173_s16 = sld [smem:[#allocation2 + $0x83]] }
0x1c4f   :  { %v4428_v37 = vadd.f32 %v4420_v12, %v4386_v3  ;;  %v4398_v36 = vpop.permute.xlu0 %4397  ;;  %v4350_v14 = vpop.permute.xlu1 %4349  ;;  %v4522_v3 = vmul.f32 %v10810_v58, %v4512_v17 }
0x1c50   :  { %v4411_v60 = vsel %vm1274_vm5, %v4398_v36, 0.0 }
0x1c51   :  { %v4470_v45 = vadd.f32 %v4462_v49, %v4428_v37  ;;  %v4421_v50 = vmul.f32 %v10777_v41, %v4411_v60  ;;  %v10826_v60 = vmul.f32 %v10770_v6, %v10712_v52 }
0x1c53   :  { %v4429_v22 = vadd.f32 %v4421_v50, %v4387_v44  ;;  %v4400_v32 = vpop.permute.xlu0 %4399  ;;  %v4402_v26 = vpop.permute.xlu1 %4401  ;;  %v4488_v48 = vadd.f32 %v4480_v1, %v4470_v45  ;;  %v4360_v44 = vsel %vm1221_vm12, %v4348_v13, 0.0  ;;  %v4381_v45 = vmul.f32 %v10770_v6, %v10659_v39 }
0x1c54   :  { %v4361_v50 = vsel %vm1221_vm12, %v4350_v14, 0.0  ;;  %v4382_v1 = vmul.f32 %v10770_v6, %v10673_v29  ;;  %v4412_v13 = vsel %vm1274_vm5, %v4400_v32, 0.0  ;;  %v10852_v14 = vmul.f32 %v10770_v6, %v10690_v63 }
0x1c55   :  { %v4471_v62 = vadd.f32 %v4463_v9, %v4429_v22  ;;  %v4530_v36 = vadd.f32 %v4522_v3, %v4488_v48  ;;  %v4582_v48 = vmul.f32 %v10817_v18, %v10637_v38  ;;  %v4370_v17 = vmul.f32 %v10768_v0, %v4360_v44 }
0x1c56   :  { %v4413_v38 = vsel %vm1274_vm5, %v4402_v26, 0.0  ;;  %v10878_v26 = vmul.f32 %v10817_v18, %v10650_v40 }
0x1c57   :  { %v4352_v4 = vpop.permute.xlu0 %4351  ;;  %v10804_v25 = vpop.permute.xlu1 %4353  ;;  %v10806_v20 = vadd.f32 %v4481_v55, %v4471_v62  ;;  %v10848_v62 = vmul.f32 %v10770_v6, %v10677_v54  ;;  %v10856_v55 = vmul.f32 %v10789_v16, %v10596_v11  ;;  %v10870_v6 = vmul.f32 %v10789_v16, %v10590_v21 }
0x1c58   :  { %v4362_v32 = vsel %vm1221_vm12, %v4352_v4, 0.0  ;;  %v10874_v11 = vmul.f32 %v10789_v16, %v10608_v43  ;;  %v4422_v4 = vmul.f32 %v10777_v41, %v4412_v13  ;;  %v10887_v21 = vmul.f32 %v10817_v18, %v10641_v61 }
0x1c59   :  { %v10891_v43 = vmul.f32 %v10789_v16, %v10620_v35  ;;  %v4423_v44 = vmul.f32 %v10777_v41, %v4413_v38  ;;  %v4372_v40 = vmul.f32 %v10768_v0, %v4362_v32  ;;  %v10905_v61 = vmul.f32 %v10789_v16, %v10626_v33 }
0x1c5a   :  { %v10909_v35 = vmul.f32 %v10817_v18, %v10673_v29  ;;  %v4511_v29 = vsel %vm1274_vm5, %v10750_v19, 0.0  ;;  %v4456_v19 = vsel %vm1221_vm12, %v10758_v24, 0.0 }
0x1c5b   :  { %v4404_v23 = vpop.permute.xlu0 %4403  ;;  %v10808_v5 = vpop.permute.xlu1 %4537  ;;  %v4390_v38 = vadd.f32 %v4382_v1, %v4372_v40  ;;  %v4466_v1 = vmul.f32 %v10781_v47, %v4456_v19  ;;  %v4457_v19 = vsel %vm1221_vm12, %v10762_v59, 0.0 }
0x1c5f   :  { %v4540_v12 = vpop.permute.xlu0 %4539  ;;  %v10815_v49 = vpop.permute.xlu1 %4355 }
0x1c60   :  { %v4554_v37 = vsel %vm1221_vm12, %v4540_v12, 0.0  ;;  %v4371_v12 = vmul.f32 %v10768_v0, %v4361_v50  ;;  %v10897_v50 = vmul.f32 %v10789_v16, %v10614_v42  ;;  %v4451_v42 = vsel %vm1221_vm12, %v10746_v53, 0.0 }
0x1c61   :  { %v4564_v27 = vmul.f32 %v10819_v31, %v4554_v37  ;;  %v4414_v37 = vsel %vm1274_vm5, %v4404_v23, 0.0  ;;  %v10901_v23 = vmul.f32 %v10817_v18, %v10659_v39  ;;  %v4454_v39 = vsel %vm1221_vm12, %v10748_v34, 0.0 }
0x1c62   :  { %v4424_v33 = vmul.f32 %v10777_v41, %v4414_v37  ;;  %v4455_v53 = vsel %vm1221_vm12, %v10754_v15, 0.0  ;;  %v4464_v32 = vmul.f32 %v10781_v47, %v4454_v39  ;;  %v4363_v15 = vsel %vm1221_vm12, %v10804_v25, 0.0 }
0x1c63   :  { %v4572_v9 = vadd.f32 %v4564_v27, %v4530_v36  ;;  %v10838_v22 = vpop.permute.xlu0 %4405  ;;  %v10840_v52 = vpop.permute.xlu1 %4541  ;;  %v4465_v37 = vmul.f32 %v10781_v47, %v4455_v53 }
0x1c64   :  { %v4555_v53 = vsel %vm1221_vm12, %v10840_v52, 0.0 }
0x1c65   :  { %v10865_v3 = vadd.f32 %v4582_v48, %v4572_v9  ;;  %v4388_v9 = vadd.f32 %v4380_v46, %v4370_v17  ;;  %v10913_v48 = vmul.f32 %v10817_v18, %v10677_v54  ;;  %v4389_v46 = vadd.f32 %v4381_v45, %v4371_v12 }
0x1c66   :  { %v4513_v54 = vsel %vm1274_vm5, %v10752_v30, 0.0  ;;  %v4514_v45 = vsel %vm1274_vm5, %v10756_v57, 0.0  ;;  %v4461_v30 = vmul.f32 %v10781_v47, %v4451_v42  ;;  %v10947_v12 = vstv %s10863_s26  ;;  %s6174_s26 = sld [smem:[#allocation2 + $0x84]] }
0x1c67   :  { %v4408_v36 = vpop.permute.xlu0 %4407  ;;  %v10883_v27 = vpop.permute.xlu1 %4543  ;;  %v4430_v16 = vadd.f32 %v4422_v4, %v4388_v9  ;;  %v4431_v17 = vadd.f32 %v4423_v44, %v4389_v46  ;;  %v4521_v4 = vmul.f32 %v10810_v58, %v4511_v29  ;;  %v4523_v57 = vmul.f32 %v10810_v58, %v4513_v54 }
0x1c68   :  { %v4432_v9 = vadd.f32 %v4424_v33, %v4390_v38  ;;  %v4524_v24 = vmul.f32 %v10810_v58, %v4514_v45  ;;  %v4515_v44 = vsel %vm1274_vm5, %v10760_v28, 0.0  ;;  %v4373_v46 = vmul.f32 %v10768_v0, %v4363_v15 }
0x1c69   :  { %v4472_v40 = vadd.f32 %v4464_v32, %v4430_v16  ;;  %v4473_v39 = vadd.f32 %v4465_v37, %v4431_v17  ;;  %v4364_v54 = vsel %vm1221_vm12, %v10815_v49, 0.0  ;;  %v4415_v28 = vsel %vm1274_vm5, %v10838_v22, 0.0 }
0x1c6a   :  { %v4525_v45 = vmul.f32 %v10810_v58, %v4515_v44  ;;  %v4458_v49 = vsel %vm1221_vm12, %v10764_v2, 0.0  ;;  %v4474_v17 = vadd.f32 %v4466_v1, %v4432_v9  ;;  %v4516_v22 = vsel %vm1274_vm5, %v10766_v10, 0.0 }
0x1c6b   :  { %v10931_v13 = vpop.permute.xlu0 %4597  ;;  %v10933_v34 = vpop.permute.xlu1 %4599  ;;  %v4416_v52 = vsel %vm1274_vm5, %v4408_v36, 0.0  ;;  %v4374_v59 = vmul.f32 %v10768_v0, %v4364_v54  ;;  %v4425_v44 = vmul.f32 %v10777_v41, %v4415_v28  ;;  %v4531_v2 = vadd.f32 %v4523_v57, %v10806_v20 }
0x1c6c   :  { %v4565_v9 = vmul.f32 %v10819_v31, %v4555_v53  ;;  %v4391_v1 = vadd.f32 %v10848_v62, %v4373_v46  ;;  %v4490_v10 = vadd.f32 %v10856_v55, %v4472_v40  ;;  %v4491_v36 = vadd.f32 %v10874_v11, %v4473_v39 }
0x1c6d   :  { %v4492_v20 = vadd.f32 %v10897_v50, %v4474_v17  ;;  %v4467_v57 = vmul.f32 %v10781_v47, %v4457_v19  ;;  %v4468_v62 = vmul.f32 %v10781_v47, %v4458_v49  ;;  %v4526_v55 = vmul.f32 %v10810_v58, %v4516_v22 }
0x1c6e   :  { %v4392_v46 = vadd.f32 %v10852_v14, %v4374_v59  ;;  %v4533_v28 = vadd.f32 %v4525_v45, %v4491_v36 }
0x1c6f   :  { %v4342_v42 = vpop.permute.xlu0 %4341  ;;  %v4394_v25 = vpop.permute.xlu1 %4393  ;;  %v4534_v53 = vadd.f32 %v4526_v55, %v4492_v20 }
0x1c70   :  { %v4357_v29 = vsel %vm1221_vm12, %v4342_v42, 0.0  ;;  %v4409_v33 = vsel %vm1274_vm5, %v4394_v25, 0.0  ;;  %v4426_v25 = vmul.f32 %v10777_v41, %v4416_v52 }
0x1c71   :  { %v4367_v16 = vmul.f32 %v10768_v0, %v4357_v29  ;;  %v4419_v32 = vmul.f32 %v10777_v41, %v4409_v33  ;;  %v4556_v0 = vsel %vm1221_vm12, %v10883_v27, 0.0  ;;  %v4573_v29 = vadd.f32 %v4565_v9, %v4531_v2 }
0x1c72   :  { %v4532_v33 = vadd.f32 %v4524_v24, %v4490_v10  ;;  %v4566_v50 = vmul.f32 %v10819_v31, %v4556_v0  ;;  %v4434_v47 = vadd.f32 %v4426_v25, %v4392_v46 }
0x1c73   :  { %v4385_v38 = vadd.f32 %v10826_v60, %v4367_v16  ;;  %v4546_v15 = vpop.permute.xlu0 %4545  ;;  %v4602_v37 = vpop.permute.xlu1 %4601  ;;  %v4553_v60 = vsel %vm1221_vm12, %v10808_v5, 0.0  ;;  %v4433_v5 = vadd.f32 %v4425_v44, %v4391_v1 }
0x1c74   :  { %v4557_v41 = vsel %vm1221_vm12, %v4546_v15, 0.0  ;;  %v4563_v27 = vmul.f32 %v10819_v31, %v4553_v60  ;;  %v4574_v45 = vadd.f32 %v4566_v50, %v4532_v33  ;;  %v4476_v15 = vadd.f32 %v4468_v62, %v4434_v47 }
0x1c75   :  { %v4427_v42 = vadd.f32 %v4419_v32, %v4385_v38  ;;  %v4567_v16 = vmul.f32 %v10819_v31, %v4557_v41  ;;  %v4475_v22 = vadd.f32 %v4467_v57, %v4433_v5  ;;  %v4587_v47 = vmul.f32 %v10817_v18, %v10690_v63 }
0x1c77   :  { %v4469_v40 = vadd.f32 %v4461_v30, %v4427_v42  ;;  %v4508_v11 = vpop.permute.xlu0 %4507  ;;  %v4548_v39 = vpop.permute.xlu1 %4547  ;;  %v4614_v30 = vsel %vm1274_vm5, %v10933_v34, 0.0  ;;  %v4591_v34 = vadd.f32 %v10878_v26, %v4573_v29  ;;  %v4575_v2 = vadd.f32 %v4567_v16, %v4533_v28 }
0x1c78   :  { %v4517_v19 = vsel %vm1274_vm5, %v4508_v11, 0.0  ;;  %v4558_v24 = vsel %vm1221_vm12, %v4548_v39, 0.0  ;;  %v4624_v52 = vmul.f32 %v10947_v12, %v4614_v30  ;;  %v4493_v42 = vadd.f32 %v10891_v43, %v4475_v22 }
0x1c79   :  { %v4487_v54 = vadd.f32 %v10870_v6, %v4469_v40  ;;  %v4613_v6 = vsel %vm1274_vm5, %v10931_v13, 0.0  ;;  %v4527_v59 = vmul.f32 %v10810_v58, %v4517_v19  ;;  %v4568_v44 = vmul.f32 %v10819_v31, %v4558_v24 }
0x1c7a   :  { %v4623_v26 = vmul.f32 %v10947_v12, %v4613_v6  ;;  %v4632_v0 = vadd.f32 %v4624_v52, %v10865_v3  ;;  %v4592_v40 = vadd.f32 %v10901_v23, %v4574_v45  ;;  %v4494_v43 = vadd.f32 %v10905_v61, %v4476_v15 }
0x1c7b   :  { %v4529_v14 = vadd.f32 %v4521_v4, %v4487_v54  ;;  %v4604_v49 = vpop.permute.xlu0 %4603  ;;  %v4510_v17 = vpop.permute.xlu1 %4509  ;;  %v4615_v4 = vsel %vm1274_vm5, %v4602_v37, 0.0  ;;  %v4535_v62 = vadd.f32 %v4527_v59, %v4493_v42  ;;  %v4576_v55 = vadd.f32 %v4568_v44, %v4534_v53 }
0x1c7c   :  { %v4616_v32 = vsel %vm1274_vm5, %v4604_v49, 0.0  ;;  %v4518_v13 = vsel %vm1274_vm5, %v4510_v17, 0.0  ;;  %v4625_v9 = vmul.f32 %v10947_v12, %v4615_v4  ;;  %v4593_v46 = vadd.f32 %v10909_v35, %v4575_v2 }
0x1c7d   :  { %v4571_v38 = vadd.f32 %v4563_v27, %v4529_v14  ;;  %v4626_v36 = vmul.f32 %v10947_v12, %v4616_v32  ;;  %v4528_v57 = vmul.f32 %v10810_v58, %v4518_v13  ;;  %v4594_v35 = vadd.f32 %v10913_v48, %v4576_v55 }
0x1c7e   :  { %v4633_v11 = vadd.f32 %v4625_v9, %v4591_v34  ;;  %v4588_v30 = vmul.f32 %v10817_v18, %v10736_v7 }
0x1c7f   :  { %v4589_v37 = vadd.f32 %v10887_v21, %v4571_v38  ;;  %v4550_v1 = vpop.permute.xlu0 %4549  ;;  %v4606_v10 = vpop.permute.xlu1 %4605  ;;  %v4634_v3 = vadd.f32 %v4626_v36, %v4592_v40  ;;  %v4536_v23 = vadd.f32 %v4528_v57, %v4494_v43 }
0x1c80   :  { %v4559_v60 = vsel %vm1221_vm12, %v4550_v1, 0.0  ;;  %v4617_v25 = vsel %vm1274_vm5, %v4606_v10, 0.0 }
0x1c81   :  { %v4631_v20 = vadd.f32 %v4623_v26, %v4589_v37  ;;  %v4569_v21 = vmul.f32 %v10819_v31, %v4559_v60  ;;  %v4627_v5 = vmul.f32 %v10947_v12, %v4617_v25 }
0x1c83   :  { %v4639_v39 = vadd.f32 %v4632_v0, %v4631_v20  ;;  %v4552_v29 = vpop.permute.xlu0 %4551  ;;  %v4608_v41 = vpop.permute.xlu1 %4607  ;;  %v4577_v27 = vadd.f32 %v4569_v21, %v4535_v62  ;;  %v4635_v53 = vadd.f32 %v4627_v5, %v4593_v46 }
0x1c84   :  { %v4560_v58 = vsel %vm1221_vm12, %v4552_v29, 0.0  ;;  %v4618_v33 = vsel %vm1274_vm5, %v4608_v41, 0.0 }
0x1c85   :  { %v4640_v50 = vadd.f32 %v4639_v39, %v4633_v11  ;;  %v4570_v61 = vmul.f32 %v10819_v31, %v4560_v58  ;;  %v4628_v54 = vmul.f32 %v10947_v12, %v4618_v33  ;;  %v4595_v49 = vadd.f32 %v4587_v47, %v4577_v27 }
0x1c86   :  { %v4706_v47 = vstv %s6162_s3  ;;  %s6180_s3 = sld [smem:[#allocation2 + $0x8a]] }
0x1c87   :  { %v4641_v28 = vadd.f32 %v4640_v50, %v4634_v3  ;;  %v4578_v14 = vadd.f32 %v4570_v61, %v4536_v23  ;;  %v4610_v16 = vpop.permute.xlu0 %4609  ;;  %v4612_v19 = vpop.permute.xlu1 %4611  ;;  %v4636_v24 = vadd.f32 %v4628_v54, %v4594_v35 }
0x1c88   :  { %v4619_v31 = vsel %vm1274_vm5, %v4610_v16, 0.0  ;;  %v4620_v17 = vsel %vm1274_vm5, %v4612_v19, 0.0  ;;  %vm12562_vm5 = vcmp.lt.s32.totalorder %v6691_v56, 62 }
0x1c89   :  { %v4642_v48 = vadd.f32 %v4641_v28, %v4635_v53  ;;  %v4629_v22 = vmul.f32 %v10947_v12, %v4619_v31  ;;  %v4596_v63 = vadd.f32 %v4588_v30, %v4578_v14  ;;  %v4630_v6 = vmul.f32 %v10947_v12, %v4620_v17  ;;  %vm12567_vm10 = vmmov %vm12562_vm5 }
0x1c8a   :  { %vm12568_vm13 = vmmov %vm12562_vm5 }
0x1c8b   :  { %v4643_v7 = vadd.f32 %v4642_v48, %v4636_v24  ;;  %v4637_v18 = vadd.f32 %v4629_v22, %v4595_v49  ;;  %v4638_v34 = vadd.f32 %v4630_v6, %v4596_v63  ;;  %vm12569_vm11 = vmmov %vm12562_vm5 }
0x1c8c   :  { %vm12570_vm14 = vmmov %vm12562_vm5 }
0x1c8d   :  { %v4644_v4 = vadd.f32 %v4643_v7, %v4637_v18  ;;  %vm12571_vm12 = vmmov %vm12562_vm5 }
0x1c8e   :  { %vm12572_vm1 = vmmov %vm12562_vm5 }
0x1c8f   :  { %v4645_v45 = vadd.f32 %v4644_v4, %v4638_v34  ;;  %vm12573_vm3 = vmmov %vm12572_vm1 }
0x1c90   :  { %vm12574_vm2 = vmmov %vm12572_vm1 }
0x1c91   :  { %4646 = vadd.xlane.f32.xlu0 %v4645_v45  ;;  %vm12575_vm4 = vmmov %vm12572_vm1 }
0x1c92   :  { %vm12576_vm0 = vmmov %vm12572_vm1 }
0x1d1e   :  { %v4647_v52 = vpop.xlane.xlu0 %4646 }
0x1d1f   :  { %v4648_v38 = vrot.slane %v4647_v52, 4 }
0x1d21   :  { %v4649_v32 = vadd.f32 %v4648_v38, %v4647_v52 }
0x1d23   :  { %v4650_v15 = vrot.slane %v4649_v32, 2 }
0x1d25   :  { %v4651_v59 = vadd.f32 %v4650_v15, %v4649_v32 }
0x1d27   :  { %v4652_v44 = vrot.slane %v4651_v59, 1 }
0x1d29   :  { %v4653_v13 = vadd.f32 %v4652_v44, %v4651_v59 }
0x1d2b   :  { %6250 = vpush %v4653_v13 }
0x1d5c   :  { %s6251_s27 = spop %6250 }
0x1d5d   :  { %s4655_s28 = smul.f32 0.00012207031, %s6251_s27  ;;  %s6175_s27 = sld [smem:[#allocation2 + $0x85]] }
0x1d5f   :  { %v4656_v26 = vstv %s4655_s28  ;;  %s6176_s28 = sld [smem:[#allocation2 + $0x86]] }
0x1d60   :  { %v4657_v2 = vsub.f32 %v4631_v20, %v4656_v26  ;;  %v4658_v37 = vsub.f32 %v4632_v0, %v4656_v26  ;;  %v4659_v12 = vsub.f32 %v4633_v11, %v4656_v26  ;;  %v4660_v9 = vsub.f32 %v4634_v3, %v4656_v26 }
0x1d61   :  { %v4661_v42 = vsub.f32 %v4635_v53, %v4656_v26  ;;  %v4662_v25 = vsub.f32 %v4636_v24, %v4656_v26  ;;  %v4663_v62 = vsub.f32 %v4637_v18, %v4656_v26  ;;  %v4664_v43 = vsub.f32 %v4638_v34, %v4656_v26 }
0x1d62   :  { %v4665_v1 = vmul.f32 %v4657_v2, %v4657_v2  ;;  %v4666_v10 = vmul.f32 %v4658_v37, %v4658_v37  ;;  %v4667_v36 = vmul.f32 %v4659_v12, %v4659_v12  ;;  %v4668_v57 = vmul.f32 %v4660_v9, %v4660_v9 }
0x1d63   :  { %v4669_v55 = vmul.f32 %v4661_v42, %v4661_v42  ;;  %v4670_v39 = vmul.f32 %v4662_v25, %v4662_v25  ;;  %v4671_v5 = vmul.f32 %v4663_v62, %v4663_v62  ;;  %v4672_v20 = vmul.f32 %v4664_v43, %v4664_v43 }
0x1d64   :  { %v4673_v60 = vadd.f32 %v4666_v10, %v4665_v1 }
0x1d66   :  { %v4674_v21 = vadd.f32 %v4673_v60, %v4667_v36 }
0x1d68   :  { %v4675_v40 = vadd.f32 %v4674_v21, %v4668_v57 }
0x1d6a   :  { %v4676_v46 = vadd.f32 %v4675_v40, %v4669_v55 }
0x1d6c   :  { %v4677_v29 = vadd.f32 %v4676_v46, %v4670_v39 }
0x1d6e   :  { %v4678_v0 = vadd.f32 %v4677_v29, %v4671_v5 }
0x1d70   :  { %v4679_v11 = vadd.f32 %v4678_v0, %v4672_v20 }
0x1d72   :  { %4680 = vadd.xlane.f32.xlu1 %v4679_v11 }
0x1dff   :  { %v4681_v41 = vpop.xlane.xlu1 %4680 }
0x1e00   :  { %v4682_v3 = vrot.slane %v4681_v41, 4 }
0x1e02   :  { %v4683_v27 = vadd.f32 %v4682_v3, %v4681_v41 }
0x1e04   :  { %v4684_v58 = vrot.slane %v4683_v27, 2 }
0x1e06   :  { %v4685_v33 = vadd.f32 %v4684_v58, %v4683_v27 }
0x1e08   :  { %v4686_v50 = vrot.slane %v4685_v33, 1 }
0x1e0a   :  { %v4687_v23 = vadd.f32 %v4686_v50, %v4685_v33 }
0x1e0c   :  { %6252 = vpush %v4687_v23 }
0x1e3d   :  { %s6253_s30 = spop %6252 }
0x1e3e   :  { %s4689_s0 = smul.f32 0.00012207031, %s6253_s30  ;;  %s6177_s30 = sld [smem:[#allocation2 + $0x87]] }
0x1e40   :  { %s4691_s29 = sadd.f32 1e-05, %s4689_s0  ;;  %s6178_s0 = sld [smem:[#allocation2 + $0x88]] }
0x1e42   :  { %v4692_v61 = vstv %s4691_s29  ;;  %s6179_s29 = sld [smem:[#allocation2 + $0x89]] }
0x1e43   :  { %6400 = vrsqrt.f32 %v4692_v61 }
0x1e4d   :  { %v6401_v54 = vpop.eup %6400 }
0x1e4e   :  { %6254 = vpush %v6401_v54 }
0x1e7f   :  { %s6255_s4 = spop %6254 }
0x1e80   :  { %s4695_s18 = smul.f32 %s6255_s4, %s6161_s22  ;;  %s6181_s22 = sld [smem:[#allocation2 + $0x8b]] }
0x1e81   :  { %s6182_s4 = sld [smem:[#allocation2 + $0x8c]] }
0x1e82   :  { %v4696_v35 = vstv %s4695_s18 }
0x1e83   :  { %v4698_v30 = vmul.f32 %v4696_v35, %v4658_v37  ;;  %v4697_v28 = vmul.f32 %v4696_v35, %v4657_v2  ;;  %v4700_v53 = vmul.f32 %v4696_v35, %v4660_v9  ;;  %v4699_v14 = vmul.f32 %v4696_v35, %v4659_v12 }
0x1e84   :  { %v4701_v63 = vmul.f32 %v4696_v35, %v4661_v42  ;;  %v4702_v7 = vmul.f32 %v4696_v35, %v4662_v25  ;;  %v4703_v4 = vmul.f32 %v4696_v35, %v4663_v62  ;;  %v4704_v38 = vmul.f32 %v4696_v35, %v4664_v43 }
0x1e85   :  { %v4708_v16 = vadd.f32 %v4706_v47, %v4698_v30  ;;  %v4707_v19 = vadd.f32 %v4706_v47, %v4697_v28  ;;  %v4710_v31 = vadd.f32 %v4706_v47, %v4700_v53  ;;  %v4709_v17 = vadd.f32 %v4706_v47, %v4699_v14 }
0x1e86   :  { %v4711_v6 = vadd.f32 %v4706_v47, %v4701_v63  ;;  %v4712_v34 = vadd.f32 %v4706_v47, %v4702_v7  ;;  %v4713_v52 = vadd.f32 %v4706_v47, %v4703_v4  ;;  %v4714_v15 = vadd.f32 %v4706_v47, %v4704_v38 }
0x1e87   :  { %v11064_v24 = vmax.f32 %v4708_v16, 0.0  ;;  %v11066_v49 = vmax.f32 %v4707_v19, 0.0  ;;  %v11072_v48 = vmax.f32 %v4710_v31, 0.0  ;;  %v11074_v22 = vmax.f32 %v4709_v17, 0.0 }
0x1e88   :  { %v11084_v18 = vmax.f32 %v4711_v6, 0.0  ;;  %v11090_v45 = vmax.f32 %v4712_v34, 0.0  ;;  %v11096_v32 = vmax.f32 %v4713_v52, 0.0  ;;  %v11102_v59 = vmax.f32 %v4714_v15, 0.0 }
0x1e89   :  { %4867 = vrot.lane.b32.xlu0 %v11064_v24, %s6427_s19  ;;  %4865 = vrot.lane.b32.xlu1 %v11066_v49, %s6427_s19  ;;  %v4724_v44 = vrot.slane %v11064_v24, 6  ;;  %v4725_v13 = vrot.slane %v11074_v22, 6  ;;  %v4723_v26 = vrot.slane %v11066_v49, 6  ;;  %v4726_v12 = vrot.slane %v11072_v48, 6 }
0x1e8a   :  { %v4727_v1 = vrot.slane %v11084_v18, 6  ;;  %v4728_v42 = vrot.slane %v11090_v45, 6  ;;  %v4729_v36 = vrot.slane %v11096_v32, 6  ;;  %v4747_v57 = vrot.slane %v11066_v49, 2 }
0x1e8b   :  { %v11113_v2 = vsel %vm624_vm15, %v4724_v44, %v4725_v13  ;;  %v11117_v37 = vsel %vm624_vm15, %v4723_v26, %v4724_v44  ;;  %v11126_v9 = vsel %vm624_vm15, %v4725_v13, %v4726_v12  ;;  %v4748_v21 = vrot.slane %v11064_v24, 2 }
0x1e8c   :  { %v11135_v10 = vsel %vm624_vm15, %v4726_v12, %v4727_v1  ;;  %v11149_v60 = vsel %vm624_vm15, %v4727_v1, %v4728_v42  ;;  %v11153_v25 = vsel %vm624_vm15, %v4728_v42, %v4729_v36  ;;  %v4749_v55 = vrot.slane %v11074_v22, 2 }
0x1e8d   :  { %4871 = vrot.lane.b32.xlu0 %v11072_v48, %s6427_s19  ;;  %4869 = vrot.lane.b32.xlu1 %v11074_v22, %s6427_s19  ;;  %v11163_v62 = vsel %vm657_vm6, %v4747_v57, %v4748_v21  ;;  %v4730_v40 = vrot.slane %v11102_v59, 6  ;;  %v4750_v46 = vrot.slane %v11072_v48, 2  ;;  %v4751_v29 = vrot.slane %v11084_v18, 2 }
0x1e8e   :  { %v11173_v43 = vsel %vm657_vm6, %v4748_v21, %v4749_v55  ;;  %v4752_v41 = vrot.slane %v11090_v45, 2  ;;  %v4753_v27 = vrot.slane %v11096_v32, 2  ;;  %v4754_v33 = vrot.slane %v11102_v59, 2 }
0x1e8f   :  { %v11177_v39 = vsel %vm624_vm15, %v4729_v36, %v4730_v40  ;;  %v11186_v5 = vsel %vm657_vm6, %v4749_v55, %v4750_v46  ;;  %v11195_v20 = vsel %vm657_vm6, %v4750_v46, %v4751_v29  ;;  %v4738_v0 = vsel %vm624_vm15, %v4730_v40, %v4723_v26  ;;  %vm12563_vm15 = vmmov %vm12562_vm5 }
0x1e90   :  { %v11209_v11 = vsel %vm608_vm7, %v4738_v0, 0.0  ;;  %v11218_v3 = vsel %vm657_vm6, %v4751_v29, %v4752_v41  ;;  %v11227_v58 = vsel %vm657_vm6, %v4752_v41, %v4753_v27  ;;  %v11240_v50 = vsel %vm657_vm6, %v4753_v27, %v4754_v33  ;;  %vm12565_vm7 = vmmov %vm12562_vm5 }
0x1e91   :  { %4927 = vrot.lane.b32.xlu0 %v11064_v24, %s6428_s20  ;;  %4925 = vrot.lane.b32.xlu1 %v11066_v49, %s6428_s20  ;;  %v4762_v23 = vsel %vm657_vm6, %v4754_v33, %v4747_v57  ;;  %v11289_v26 = vstv %s6165_s6  ;;  %v11293_v36 = vstv %s6166_s25  ;;  %vm12564_vm6 = vmmov %vm12562_vm5 }
0x1e92   :  { %v11250_v61 = vsel %vm648_vm8, %v4762_v23, 0.0  ;;  %v11299_v55 = vstv %s6167_s7  ;;  %vm12566_vm8 = vmmov %vm12562_vm5  ;;  %s6183_s7 = sld [smem:[#allocation2 + $0x8e]] }
0x1e95   :  { %4929 = vrot.lane.b32.xlu0 %v11074_v22, %s6428_s20  ;;  %4873 = vrot.lane.b32.xlu1 %v11084_v18, %s6427_s19 }
0x1e99   :  { %4931 = vrot.lane.b32.xlu0 %v11072_v48, %s6428_s20  ;;  %4875 = vrot.lane.b32.xlu1 %v11090_v45, %s6427_s19 }
0x1e9d   :  { %4933 = vrot.lane.b32.xlu0 %v11084_v18, %s6428_s20  ;;  %4877 = vrot.lane.b32.xlu1 %v11096_v32, %s6427_s19 }
0x1ea1   :  { %4879 = vrot.lane.b32.xlu0 %v11102_v59, %s6427_s19  ;;  %4935 = vrot.lane.b32.xlu1 %v11090_v45, %s6428_s20 }
0x1ea5   :  { %4775 = vrot.lane.b32.xlu0 %v11113_v2, %s6427_s19  ;;  %4773 = vrot.lane.b32.xlu1 %v11117_v37, %s6427_s19 }
0x1ea9   :  { %4825 = vrot.lane.b32.xlu0 %v11117_v37, %s6428_s20  ;;  %4777 = vrot.lane.b32.xlu1 %v11126_v9, %s6427_s19 }
0x1ead   :  { %4827 = vrot.lane.b32.xlu0 %v11113_v2, %s6428_s20  ;;  %4779 = vrot.lane.b32.xlu1 %v11135_v10, %s6427_s19 }
0x1eb1   :  { %4829 = vrot.lane.b32.xlu0 %v11126_v9, %s6428_s20  ;;  %4831 = vrot.lane.b32.xlu1 %v11135_v10, %s6428_s20 }
0x1eb5   :  { %4781 = vrot.lane.b32.xlu0 %v11149_v60, %s6427_s19  ;;  %4783 = vrot.lane.b32.xlu1 %v11153_v25, %s6427_s19 }
0x1eb9   :  { %4833 = vrot.lane.b32.xlu0 %v11149_v60, %s6428_s20  ;;  %4967 = vrot.lane.b32.xlu1 %v11163_v62, %s6427_s19 }
0x1ebd   :  { %4969 = vrot.lane.b32.xlu0 %v11173_v43, %s6427_s19  ;;  %4785 = vrot.lane.b32.xlu1 %v11177_v39, %s6427_s19 }
0x1ec1   :  { %4835 = vrot.lane.b32.xlu0 %v11153_v25, %s6428_s20  ;;  %4971 = vrot.lane.b32.xlu1 %v11186_v5, %s6427_s19 }
0x1ec5   :  { %4837 = vrot.lane.b32.xlu0 %v11177_v39, %s6428_s20  ;;  %4973 = vrot.lane.b32.xlu1 %v11195_v20, %s6427_s19 }
0x1ec9   :  { %5027 = vrot.lane.b32.xlu0 %v11163_v62, %s6428_s20  ;;  %5029 = vrot.lane.b32.xlu1 %v11173_v43, %s6428_s20 }
0x1ecd   :  { %4771 = vrot.lane.b32.xlu0 %v11209_v11, %s6427_s19  ;;  %4823 = vrot.lane.b32.xlu1 %v11209_v11, %s6428_s20 }
0x1ed1   :  { %4975 = vrot.lane.b32.xlu0 %v11218_v3, %s6427_s19  ;;  %5031 = vrot.lane.b32.xlu1 %v11186_v5, %s6428_s20 }
0x1ed5   :  { %4937 = vrot.lane.b32.xlu0 %v11096_v32, %s6428_s20  ;;  %4977 = vrot.lane.b32.xlu1 %v11227_v58, %s6427_s19 }
0x1ed9   :  { %5033 = vrot.lane.b32.xlu0 %v11195_v20, %s6428_s20  ;;  %4939 = vrot.lane.b32.xlu1 %v11102_v59, %s6428_s20 }
0x1edd   :  { %4979 = vrot.lane.b32.xlu0 %v11240_v50, %s6427_s19  ;;  %5035 = vrot.lane.b32.xlu1 %v11218_v3, %s6428_s20 }
0x1ee1   :  { %4981 = vrot.lane.b32.xlu0 %v11250_v61, %s6427_s19  ;;  %5037 = vrot.lane.b32.xlu1 %v11227_v58, %s6428_s20  ;;  %s6163_s19 = sld [smem:[#allocation2 + $0x78]] }
0x1ee5   :  { %5039 = vrot.lane.b32.xlu0 %v11240_v50, %s6428_s20  ;;  %5041 = vrot.lane.b32.xlu1 %v11250_v61, %s6428_s20  ;;  %s6164_s20 = sld [smem:[#allocation2 + $0x79]] }
0x1ee7   :  { %v11280_v34 = vstv %s6163_s19 }
0x1eeb   :  { %v11282_v38 = vstv %s6164_s20 }
0x1eec   :  { %v4808_v12 = vmul.f32 %v11282_v38, %v11117_v37  ;;  %v4809_v0 = vmul.f32 %v11282_v38, %v11113_v2 }
0x1efb   :  { %v4868_v54 = vpop.permute.xlu0 %4867  ;;  %v11260_v35 = vpop.permute.xlu1 %4865 }
0x1efc   :  { %v4882_v57 = vsel %vm674_vm9, %v4868_v54, 0.0  ;;  %v4910_v54 = vmul.f32 %v11299_v55, %v11064_v24  ;;  %v4810_v24 = vmul.f32 %v11282_v38, %v11126_v9 }
0x1efd   :  { %v4892_v41 = vmul.f32 %v11293_v36, %v4882_v57 }
0x1eff   :  { %v4872_v47 = vpop.permute.xlu0 %4871  ;;  %v4870_v30 = vpop.permute.xlu1 %4869 }
0x1f00   :  { %v4884_v57 = vsel %vm674_vm9, %v4872_v47, 0.0 }
0x1f03   :  { %v11262_v28 = vpop.permute.xlu0 %4927  ;;  %v11264_v53 = vpop.permute.xlu1 %4925 }
0x1f07   :  { %v11266_v14 = vpop.permute.xlu0 %4929  ;;  %v4874_v16 = vpop.permute.xlu1 %4873 }
0x1f0b   :  { %v11268_v19 = vpop.permute.xlu0 %4931  ;;  %v11270_v31 = vpop.permute.xlu1 %4875 }
0x1f0f   :  { %v11272_v17 = vpop.permute.xlu0 %4933  ;;  %v11274_v63 = vpop.permute.xlu1 %4877 }
0x1f13   :  { %v11276_v6 = vpop.permute.xlu0 %4879  ;;  %v11278_v7 = vpop.permute.xlu1 %4935 }
0x1f17   :  { %v4776_v4 = vpop.permute.xlu0 %4775  ;;  %v4774_v52 = vpop.permute.xlu1 %4773 }
0x1f18   :  { %v4788_v15 = vsel %vm674_vm9, %v4774_v52, 0.0  ;;  %v4789_v13 = vsel %vm674_vm9, %v4776_v4, 0.0  ;;  %v4883_v4 = vsel %vm674_vm9, %v4870_v30, 0.0  ;;  %v4811_v30 = vmul.f32 %v11282_v38, %v11135_v10 }
0x1f19   :  { %v4798_v44 = vmul.f32 %v11280_v34, %v4788_v15  ;;  %v4799_v40 = vmul.f32 %v11280_v34, %v4789_v13 }
0x1f1b   :  { %v4826_v1 = vpop.permute.xlu0 %4825  ;;  %v4778_v42 = vpop.permute.xlu1 %4777  ;;  %v4816_v46 = vadd.f32 %v4808_v12, %v4798_v44  ;;  %v4817_v2 = vadd.f32 %v4809_v0, %v4799_v40  ;;  %v4885_v0 = vsel %vm674_vm9, %v4874_v16, 0.0 }
0x1f1c   :  { %v4840_v21 = vsel %vm12562_vm5, %v4826_v1, 0.0  ;;  %v4790_v37 = vsel %vm674_vm9, %v4778_v42, 0.0  ;;  %v4911_v42 = vmul.f32 %v11299_v55, %v11074_v22  ;;  %vm12577_vm5 = vmmov %vm12576_vm0 }
0x1f1d   :  { %v4850_v29 = vmul.f32 %v11289_v26, %v4840_v21  ;;  %v4800_v52 = vmul.f32 %v11280_v34, %v4790_v37  ;;  %v4893_v21 = vmul.f32 %v11293_v36, %v4883_v4 }
0x1f1f   :  { %v4858_v27 = vadd.f32 %v4850_v29, %v4816_v46  ;;  %v4828_v33 = vpop.permute.xlu0 %4827  ;;  %v4780_v23 = vpop.permute.xlu1 %4779  ;;  %v4818_v9 = vadd.f32 %v4810_v24, %v4800_v52 }
0x1f20   :  { %v4841_v15 = vsel %vm12563_vm15, %v4828_v33, 0.0  ;;  %v4791_v44 = vsel %vm674_vm9, %v4780_v23, 0.0  ;;  %v4894_v23 = vmul.f32 %v11293_v36, %v4884_v57  ;;  %v4812_v57 = vmul.f32 %v11282_v38, %v11149_v60  ;;  %vm12578_vm15 = vmmov %vm12576_vm0 }
0x1f21   :  { %v4900_v13 = vadd.f32 %v4892_v41, %v4858_v27  ;;  %v4851_v12 = vmul.f32 %v11289_v26, %v4841_v15  ;;  %v4801_v1 = vmul.f32 %v11280_v34, %v4791_v44 }
0x1f23   :  { %v4859_v40 = vadd.f32 %v4851_v12, %v4817_v2  ;;  %v4830_v46 = vpop.permute.xlu0 %4829  ;;  %v4832_v29 = vpop.permute.xlu1 %4831  ;;  %v4918_v37 = vadd.f32 %v4910_v54, %v4900_v13  ;;  %v4819_v27 = vadd.f32 %v4811_v30, %v4801_v1  ;;  %v4895_v54 = vmul.f32 %v11293_v36, %v4885_v0 }
0x1f24   :  { %v4842_v10 = vsel %vm12564_vm6, %v4830_v46, 0.0  ;;  %v4843_v22 = vsel %vm12565_vm7, %v4832_v29, 0.0  ;;  %v4912_v13 = vmul.f32 %v11299_v55, %v11072_v48  ;;  %v4913_v30 = vmul.f32 %v11299_v55, %v11084_v18  ;;  %vm12579_vm6 = vmmov %vm12576_vm0 }
0x1f25   :  { %v4901_v41 = vadd.f32 %v4893_v21, %v4859_v40  ;;  %v4852_v47 = vmul.f32 %v11289_v26, %v4842_v10  ;;  %v4853_v33 = vmul.f32 %v11289_v26, %v4843_v22  ;;  %v11353_v29 = vstv %s6168_s5  ;;  %vm12580_vm7 = vmmov %vm12576_vm0  ;;  %s6184_s5 = sld [smem:[#allocation2 + $0x8f]] }
0x1f26   :  { %v4942_v48 = vsel %vm12566_vm8, %v11262_v28, 0.0  ;;  %v4886_v18 = vsel %vm674_vm9, %v11270_v31, 0.0  ;;  %v4943_v28 = vsel %vm12568_vm13, %v11266_v14, 0.0  ;;  %v11371_v31 = vstv %s6169_s9  ;;  %vm12581_vm8 = vmmov %vm12576_vm0 }
0x1f27   :  { %v4860_v4 = vadd.f32 %v4852_v47, %v4818_v9  ;;  %v4861_v15 = vadd.f32 %v4853_v33, %v4819_v27  ;;  %v4782_v16 = vpop.permute.xlu0 %4781  ;;  %v4784_v52 = vpop.permute.xlu1 %4783  ;;  %v4919_v44 = vadd.f32 %v4911_v42, %v4901_v41  ;;  %v4952_v10 = vmul.f32 %v11353_v29, %v4942_v48  ;;  %vm12583_vm13 = vmmov %vm12576_vm0 }
0x1f28   :  { %v4792_v2 = vsel %vm674_vm9, %v4782_v16, 0.0  ;;  %v4896_v22 = vmul.f32 %v11293_v36, %v4886_v18  ;;  %v11366_v33 = vstv %s6170_s8  ;;  %v4914_v16 = vmul.f32 %v11299_v55, %v11090_v45 }
0x1f29   :  { %v4902_v12 = vadd.f32 %v4894_v23, %v4860_v4  ;;  %v4903_v1 = vadd.f32 %v4895_v54, %v4861_v15  ;;  %v4802_v24 = vmul.f32 %v11280_v34, %v4792_v2  ;;  %v4960_v4 = vadd.f32 %v4952_v10, %v4918_v37 }
0x1f2a   :  { %v5012_v2 = vmul.f32 %v11366_v33, %v11173_v43  ;;  %v5013_v45 = vmul.f32 %v11366_v33, %v11186_v5  ;;  %v4813_v10 = vmul.f32 %v11282_v38, %v11153_v25  ;;  %v11404_v5 = vmul.f32 %v11366_v33, %v11195_v20 }
0x1f2b   :  { %v4834_v21 = vpop.permute.xlu0 %4833  ;;  %v11347_v42 = vpop.permute.xlu1 %4967  ;;  %v11349_v40 = vadd.f32 %v4912_v13, %v4902_v12  ;;  %v11351_v46 = vadd.f32 %v4913_v30, %v4903_v1  ;;  %v4820_v0 = vadd.f32 %v4812_v57, %v4802_v24  ;;  %v4953_v13 = vmul.f32 %v11353_v29, %v4943_v28 }
0x1f2c   :  { %v4844_v60 = vsel %vm12567_vm10, %v4834_v21, 0.0  ;;  %v4881_v25 = vsel %vm674_vm9, %v11260_v35, 0.0  ;;  %v11429_v35 = vmul.f32 %v11299_v55, %v11096_v32  ;;  %vm12582_vm10 = vmmov %vm12576_vm0 }
0x1f2d   :  { %v4854_v9 = vmul.f32 %v11289_v26, %v4844_v60  ;;  %v4961_v57 = vadd.f32 %v4953_v13, %v4919_v44  ;;  %v11398_v44 = vmul.f32 %v11366_v33, %v11163_v62  ;;  %v4793_v62 = vsel %vm674_vm9, %v4784_v52, 0.0 }
0x1f2e   :  { %v4803_v32 = vmul.f32 %v11280_v34, %v4793_v62 }
0x1f2f   :  { %v4862_v41 = vadd.f32 %v4854_v9, %v4820_v0  ;;  %v4970_v27 = vpop.permute.xlu0 %4969  ;;  %v4786_v47 = vpop.permute.xlu1 %4785 }
0x1f30   :  { %v4984_v23 = vsel %vm674_vm9, %v4970_v27, 0.0  ;;  %v11410_v27 = vmul.f32 %v11366_v33, %v11218_v3 }
0x1f31   :  { %v4904_v54 = vadd.f32 %v4896_v22, %v4862_v41  ;;  %v4994_v15 = vmul.f32 %v11371_v31, %v4984_v23  ;;  %v4814_v22 = vmul.f32 %v11282_v38, %v11177_v39  ;;  %v4807_v41 = vmul.f32 %v11282_v38, %v11209_v11 }
0x1f32   :  { %v4909_v39 = vmul.f32 %v11299_v55, %v11066_v49  ;;  %v11421_v23 = vmul.f32 %v11366_v33, %v11227_v58  ;;  %v4794_v38 = vsel %vm674_vm9, %v4786_v47, 0.0  ;;  %v11438_v58 = vmul.f32 %v11299_v55, %v11102_v59 }
0x1f33   :  { %v5002_v12 = vadd.f32 %v4994_v15, %v4960_v4  ;;  %v4836_v1 = vpop.permute.xlu0 %4835  ;;  %v4972_v14 = vpop.permute.xlu1 %4971  ;;  %v11381_v24 = vadd.f32 %v4914_v16, %v4904_v54  ;;  %v4891_v54 = vmul.f32 %v11293_v36, %v4881_v25  ;;  %v4941_v4 = vsel %vm12571_vm12, %v11264_v53, 0.0 }
0x1f34   :  { %v4985_v30 = vsel %vm674_vm9, %v4972_v14, 0.0  ;;  %v4845_v49 = vsel %vm12570_vm14, %v4836_v1, 0.0  ;;  %v11445_v15 = vstv %s6171_s10  ;;  %v4944_v47 = vsel %vm12572_vm1, %v11268_v19, 0.0  ;;  %s6187_s10 = sld [smem:[#allocation2 + $0x92]] }
0x1f35   :  { %v4995_v37 = vmul.f32 %v11371_v31, %v4985_v30  ;;  %v11386_v21 = vadd.f32 %v5012_v2, %v5002_v12  ;;  %v4945_v53 = vsel %vm12574_vm2, %v11272_v17, 0.0  ;;  %v4887_v12 = vsel %vm674_vm9, %v11274_v63, 0.0 }
0x1f36   :  { %v4804_v1 = vmul.f32 %v11280_v34, %v4794_v38  ;;  %v4855_v19 = vmul.f32 %v11289_v26, %v4845_v49  ;;  %v4951_v14 = vmul.f32 %v11353_v29, %v4941_v4  ;;  %v4888_v30 = vsel %vm674_vm9, %v11276_v6, 0.0 }
0x1f37   :  { %v5003_v48 = vadd.f32 %v4995_v37, %v4961_v57  ;;  %v4838_v43 = vpop.permute.xlu0 %4837  ;;  %v4974_v18 = vpop.permute.xlu1 %4973  ;;  %v4946_v57 = vsel %vm12575_vm4, %v11278_v7, 0.0  ;;  %v4821_v17 = vadd.f32 %v4813_v10, %v4803_v32  ;;  %v4983_v63 = vsel %vm674_vm9, %v11347_v42, 0.0 }
0x1f38   :  { %v4846_v16 = vsel %vm12573_vm3, %v4838_v43, 0.0  ;;  %v4955_v43 = vmul.f32 %v11353_v29, %v4945_v53  ;;  %v4897_v6 = vmul.f32 %v11293_v36, %v4887_v12  ;;  %v4898_v10 = vmul.f32 %v11293_v36, %v4888_v30 }
0x1f39   :  { %v11390_v60 = vadd.f32 %v5013_v45, %v5003_v48  ;;  %v4986_v45 = vsel %vm674_vm9, %v4974_v18, 0.0  ;;  %v4954_v48 = vmul.f32 %v11353_v29, %v4944_v47  ;;  %v4822_v62 = vadd.f32 %v4814_v22, %v4804_v1 }
0x1f3a   :  { %v4993_v18 = vmul.f32 %v11371_v31, %v4983_v63  ;;  %v4963_v36 = vadd.f32 %v4955_v43, %v11351_v46  ;;  %vm12586_vm14 = vcmp.lt.s32.totalorder %v6480_v8, 1 }
0x1f3b   :  { %v11392_v0 = vpop.permute.xlu0 %5027  ;;  %v5030_v9 = vpop.permute.xlu1 %5029  ;;  %v4962_v38 = vadd.f32 %v4954_v48, %v11349_v40  ;;  %vm12587_vm12 = vmmov %vm12586_vm14 }
0x1f3c   :  { %v5044_v49 = vsel %vm12576_vm0, %v5030_v9, 0.0  ;;  %v5043_v40 = vsel %vm12578_vm15, %v11392_v0, 0.0  ;;  %vm12588_vm1 = vmmov %vm12587_vm12 }
0x1f3d   :  { %vm12589_vm3 = vmmov %vm12588_vm1 }
0x1f3e   :  { %vm12590_vm2 = vmmov %vm12588_vm1 }
0x1f3f   :  { %v4772_v28 = vpop.permute.xlu0 %4771  ;;  %v4824_v20 = vpop.permute.xlu1 %4823  ;;  %vm12591_vm4 = vmmov %vm12588_vm1 }
0x1f40   :  { %v4787_v11 = vsel %vm674_vm9, %v4772_v28, 0.0  ;;  %v4839_v3 = vsel %vm12569_vm11, %v4824_v20, 0.0  ;;  %v4863_v28 = vadd.f32 %v4855_v19, %v4821_v17  ;;  %v4996_v20 = vmul.f32 %v11371_v31, %v4986_v45  ;;  %vm12585_vm11 = vmmov %vm12576_vm0 }
0x1f41   :  { %v4797_v52 = vmul.f32 %v11280_v34, %v4787_v11  ;;  %v4849_v59 = vmul.f32 %v11289_v26, %v4839_v3  ;;  %v4856_v34 = vmul.f32 %v11289_v26, %v4846_v16  ;;  %v4956_v26 = vmul.f32 %v11353_v29, %v4946_v57  ;;  %vm12594_vm15 = vmmov %vm12588_vm1 }
0x1f42   :  { %v5004_v16 = vadd.f32 %v4996_v20, %v4962_v38  ;;  %v5053_v19 = vmul.f32 %v11445_v15, %v5043_v40  ;;  %v5018_v38 = vmul.f32 %v11366_v33, %v11250_v61 }
0x1f43   :  { %v4815_v2 = vadd.f32 %v4807_v41, %v4797_v52  ;;  %v4976_v55 = vpop.permute.xlu0 %4975  ;;  %v5032_v13 = vpop.permute.xlu1 %5031  ;;  %v4864_v3 = vadd.f32 %v4856_v34, %v4822_v62  ;;  %v4964_v46 = vadd.f32 %v4956_v26, %v11381_v24 }
0x1f44   :  { %v4987_v42 = vsel %vm674_vm9, %v4976_v55, 0.0  ;;  %v5045_v9 = vsel %vm12579_vm6, %v5032_v13, 0.0 }
0x1f45   :  { %v4857_v37 = vadd.f32 %v4849_v59, %v4815_v2  ;;  %v4997_v52 = vmul.f32 %v11371_v31, %v4987_v42  ;;  %v5054_v2 = vmul.f32 %v11445_v15, %v5044_v49  ;;  %v4906_v53 = vadd.f32 %v4898_v10, %v4864_v3 }
0x1f47   :  { %v4899_v41 = vadd.f32 %v4891_v54, %v4857_v37  ;;  %v4938_v25 = vpop.permute.xlu0 %4937  ;;  %v4978_v7 = vpop.permute.xlu1 %4977  ;;  %v5005_v13 = vadd.f32 %v4997_v52, %v4963_v36  ;;  %v5062_v45 = vadd.f32 %v5054_v2, %v11386_v21 }
0x1f48   :  { %v4947_v54 = vsel %vm12577_vm5, %v4938_v25, 0.0  ;;  %v4988_v4 = vsel %vm674_vm9, %v4978_v7, 0.0  ;;  %v5022_v25 = vadd.f32 %v11404_v5, %v5004_v16 }
0x1f49   :  { %v4917_v11 = vadd.f32 %v4909_v39, %v4899_v41  ;;  %v4905_v39 = vadd.f32 %v4897_v6, %v4863_v28  ;;  %v4957_v12 = vmul.f32 %v11353_v29, %v4947_v54  ;;  %v4998_v1 = vmul.f32 %v11371_v31, %v4988_v4 }
0x1f4a   :  { %v5023_v62 = vadd.f32 %v11410_v27, %v5005_v13  ;;  %v5017_v27 = vmul.f32 %v11366_v33, %v11240_v50 }
0x1f4b   :  { %v4959_v22 = vadd.f32 %v4951_v14, %v4917_v11  ;;  %v5034_v32 = vpop.permute.xlu0 %5033  ;;  %v4940_v47 = vpop.permute.xlu1 %4939  ;;  %v5055_v14 = vmul.f32 %v11445_v15, %v5045_v9  ;;  %v4923_v37 = vadd.f32 %v11429_v35, %v4905_v39  ;;  %v5006_v41 = vadd.f32 %v4998_v1, %v4964_v46 }
0x1f4c   :  { %v5046_v55 = vsel %vm12580_vm7, %v5034_v32, 0.0  ;;  %v4948_v0 = vsel %vm12581_vm8, %v4940_v47, 0.0  ;;  %v4924_v35 = vadd.f32 %v11438_v58, %v4906_v53  ;;  %vm12597_vm8 = vmmov %vm12588_vm1 }
0x1f4d   :  { %v5001_v59 = vadd.f32 %v4993_v18, %v4959_v22  ;;  %v5056_v17 = vmul.f32 %v11445_v15, %v5046_v55  ;;  %v4958_v43 = vmul.f32 %v11353_v29, %v4948_v0  ;;  %v4965_v6 = vadd.f32 %v4957_v12, %v4923_v37 }
0x1f4e   :  { %v5063_v7 = vadd.f32 %v5055_v14, %v11390_v60  ;;  %v5024_v3 = vadd.f32 %v11421_v23, %v5006_v41 }
0x1f4f   :  { %v5019_v24 = vadd.f32 %v11398_v44, %v5001_v59  ;;  %v4980_v30 = vpop.permute.xlu0 %4979  ;;  %v5036_v57 = vpop.permute.xlu1 %5035  ;;  %v5064_v26 = vadd.f32 %v5056_v17, %v5022_v25  ;;  %v4966_v11 = vadd.f32 %v4958_v43, %v4924_v35 }
0x1f50   :  { %v4989_v63 = vsel %vm674_vm9, %v4980_v30, 0.0  ;;  %v5047_v34 = vsel %vm12582_vm10, %v5036_v57, 0.0  ;;  %vm12598_vm10 = vcmp.ge.s32.totalorder %v6480_v8, 1 }
0x1f51   :  { %v5061_v48 = vadd.f32 %v5053_v19, %v5019_v24  ;;  %v4999_v44 = vmul.f32 %v11371_v31, %v4989_v63  ;;  %v5057_v28 = vmul.f32 %v11445_v15, %v5047_v34 }
0x1f53   :  { %v5069_v10 = vadd.f32 %v5062_v45, %v5061_v48  ;;  %v4982_v42 = vpop.permute.xlu0 %4981  ;;  %v5038_v21 = vpop.permute.xlu1 %5037  ;;  %v5007_v18 = vadd.f32 %v4999_v44, %v4965_v6  ;;  %v5065_v36 = vadd.f32 %v5057_v28, %v5023_v62 }
0x1f54   :  { %v4990_v29 = vsel %vm674_vm9, %v4982_v42, 0.0  ;;  %v5048_v20 = vsel %vm12583_vm13, %v5038_v21, 0.0  ;;  %vm12584_vm9 = vmmov %vm12576_vm0  ;;  %vm12592_vm0 = vcmp.lt.s32.totalorder %v6480_v8, 7 }
0x1f55   :  { %v5070_v5 = vadd.f32 %v5069_v10, %v5063_v7  ;;  %v5000_v58 = vmul.f32 %v11371_v31, %v4990_v29  ;;  %v5058_v60 = vmul.f32 %v11445_v15, %v5048_v20  ;;  %v5025_v32 = vadd.f32 %v5017_v27, %v5007_v18  ;;  %vm12593_vm5 = vmmov %vm12592_vm0 }
0x1f56   :  { %vm12595_vm6 = vmmov %vm12592_vm0 }
0x1f57   :  { %v5071_v49 = vadd.f32 %v5070_v5, %v5064_v26  ;;  %v5008_v22 = vadd.f32 %v5000_v58, %v4966_v11  ;;  %v5040_v52 = vpop.permute.xlu0 %5039  ;;  %v5042_v54 = vpop.permute.xlu1 %5041  ;;  %v5066_v4 = vadd.f32 %v5058_v60, %v5024_v3  ;;  %v5136_v3 = vstv %s6173_s16  ;;  %vm12596_vm7 = vmmov %vm12592_vm0 }
0x1f58   :  { %v5049_v31 = vsel %vm12584_vm9, %v5040_v52, 0.0  ;;  %v5050_v47 = vsel %vm12585_vm11, %v5042_v54, 0.0  ;;  %vm12599_vm13 = vmmov %vm12592_vm0 }
0x1f59   :  { %v5072_v39 = vadd.f32 %v5071_v49, %v5065_v36  ;;  %v5059_v50 = vmul.f32 %v11445_v15, %v5049_v31  ;;  %v5026_v23 = vadd.f32 %v5018_v38, %v5008_v22  ;;  %v5060_v40 = vmul.f32 %v11445_v15, %v5050_v47  ;;  %vm12600_vm9 = vmmov %vm12592_vm0 }
0x1f5a   :  { %vm12601_vm11 = vmmov %vm12592_vm0 }
0x1f5b   :  { %v5073_v61 = vadd.f32 %v5072_v39, %v5066_v4  ;;  %v5067_v33 = vadd.f32 %v5059_v50, %v5025_v32  ;;  %v5068_v9 = vadd.f32 %v5060_v40, %v5026_v23 }
0x1f5d   :  { %v5074_v46 = vadd.f32 %v5073_v61, %v5067_v33 }
0x1f5f   :  { %v5075_v16 = vadd.f32 %v5074_v46, %v5068_v9 }
0x1f61   :  { %5076 = vadd.xlane.f32.xlu0 %v5075_v16 }
0x1fee   :  { %v5077_v2 = vpop.xlane.xlu0 %5076 }
0x1fef   :  { %v5078_v59 = vrot.slane %v5077_v2, 4 }
0x1ff1   :  { %v5079_v55 = vadd.f32 %v5078_v59, %v5077_v2 }
0x1ff3   :  { %v5080_v53 = vrot.slane %v5079_v55, 2 }
0x1ff5   :  { %v5081_v12 = vadd.f32 %v5080_v53, %v5079_v55 }
0x1ff7   :  { %v5082_v1 = vrot.slane %v5081_v12, 1 }
0x1ff9   :  { %v5083_v0 = vadd.f32 %v5082_v1, %v5081_v12 }
0x1ffb   :  { %6256 = vpush %v5083_v0 }
0x202c   :  { %s6257_s11 = spop %6256 }
0x202d   :  { %s5085_s12 = smul.f32 0.00012207031, %s6257_s11  ;;  %s6188_s11 = sld [smem:[#allocation2 + $0x93]] }
0x202f   :  { %v5086_v19 = vstv %s5085_s12  ;;  %s6189_s12 = sld [smem:[#allocation2 + $0x94]] }
0x2030   :  { %v5087_v13 = vsub.f32 %v5061_v48, %v5086_v19  ;;  %v5088_v24 = vsub.f32 %v5062_v45, %v5086_v19  ;;  %v5089_v15 = vsub.f32 %v5063_v7, %v5086_v19  ;;  %v5090_v14 = vsub.f32 %v5064_v26, %v5086_v19 }
0x2031   :  { %v5091_v37 = vsub.f32 %v5065_v36, %v5086_v19  ;;  %v5092_v34 = vsub.f32 %v5066_v4, %v5086_v19  ;;  %v5093_v6 = vsub.f32 %v5067_v33, %v5086_v19  ;;  %v5094_v35 = vsub.f32 %v5068_v9, %v5086_v19 }
0x2032   :  { %v5095_v30 = vmul.f32 %v5087_v13, %v5087_v13  ;;  %v5096_v57 = vmul.f32 %v5088_v24, %v5088_v24  ;;  %v5097_v17 = vmul.f32 %v5089_v15, %v5089_v15  ;;  %v5098_v43 = vmul.f32 %v5090_v14, %v5090_v14 }
0x2033   :  { %v5099_v41 = vmul.f32 %v5091_v37, %v5091_v37  ;;  %v5100_v10 = vmul.f32 %v5092_v34, %v5092_v34  ;;  %v5101_v28 = vmul.f32 %v5093_v6, %v5093_v6  ;;  %v5102_v48 = vmul.f32 %v5094_v35, %v5094_v35 }
0x2034   :  { %v5103_v63 = vadd.f32 %v5096_v57, %v5095_v30 }
0x2036   :  { %v5104_v44 = vadd.f32 %v5103_v63, %v5097_v17 }
0x2038   :  { %v5105_v25 = vadd.f32 %v5104_v44, %v5098_v43 }
0x203a   :  { %v5106_v62 = vadd.f32 %v5105_v25, %v5099_v41 }
0x203c   :  { %v5107_v42 = vadd.f32 %v5106_v62, %v5100_v10 }
0x203e   :  { %v5108_v45 = vadd.f32 %v5107_v42, %v5101_v28 }
0x2040   :  { %v5109_v7 = vadd.f32 %v5108_v45, %v5102_v48 }
0x2042   :  { %5110 = vadd.xlane.f32.xlu1 %v5109_v7 }
0x20cf   :  { %v5111_v21 = vpop.xlane.xlu1 %5110 }
0x20d0   :  { %v5112_v26 = vrot.slane %v5111_v21, 4 }
0x20d2   :  { %v5113_v18 = vadd.f32 %v5112_v26, %v5111_v21 }
0x20d4   :  { %v5114_v29 = vrot.slane %v5113_v18, 2 }
0x20d6   :  { %v5115_v20 = vadd.f32 %v5114_v29, %v5113_v18 }
0x20d8   :  { %v5116_v5 = vrot.slane %v5115_v20, 1 }
0x20da   :  { %v5117_v11 = vadd.f32 %v5116_v5, %v5115_v20 }
0x20dc   :  { %6258 = vpush %v5117_v11 }
0x210d   :  { %s6259_s13 = spop %6258 }
0x210e   :  { %s5119_s14 = smul.f32 0.00012207031, %s6259_s13  ;;  %s6190_s13 = sld [smem:[#allocation2 + $0x95]] }
0x2110   :  { %s5121_s15 = sadd.f32 1e-05, %s5119_s14  ;;  %s6192_s14 = sld [smem:[#allocation2 + $0x97]] }
0x2112   :  { %v5122_v58 = vstv %s5121_s15  ;;  %s6191_s15 = sld [smem:[#allocation2 + $0x96]] }
0x2113   :  { %6402 = vrsqrt.f32 %v5122_v58 }
0x211d   :  { %v6403_v60 = vpop.eup %6402 }
0x211e   :  { %6260 = vpush %v6403_v60 }
0x214f   :  { %s6261_s17 = spop %6260 }
0x2150   :  { %s5125_s21 = smul.f32 %s6261_s17, %s6172_s1  ;;  %s6193_s1 = sld [smem:[#allocation2 + $0x98]] }
0x2152   :  { %v5126_v27 = vstv %s5125_s21 }
0x2153   :  { %v5128_v38 = vmul.f32 %v5126_v27, %v5088_v24  ;;  %v5127_v49 = vmul.f32 %v5126_v27, %v5087_v13  ;;  %v5130_v36 = vmul.f32 %v5126_v27, %v5090_v14  ;;  %v5129_v22 = vmul.f32 %v5126_v27, %v5089_v15 }
0x2154   :  { %v5131_v23 = vmul.f32 %v5126_v27, %v5091_v37  ;;  %v5132_v61 = vmul.f32 %v5126_v27, %v5092_v34  ;;  %v5133_v46 = vmul.f32 %v5126_v27, %v5093_v6  ;;  %v5134_v59 = vmul.f32 %v5126_v27, %v5094_v35 }
0x2155   :  { %v5138_v52 = vadd.f32 %v5136_v3, %v5128_v38  ;;  %v5137_v54 = vadd.f32 %v5136_v3, %v5127_v49  ;;  %v5140_v31 = vadd.f32 %v5136_v3, %v5130_v36  ;;  %v5139_v47 = vadd.f32 %v5136_v3, %v5129_v22 }
0x2156   :  { %v5141_v40 = vadd.f32 %v5136_v3, %v5131_v23  ;;  %v5142_v9 = vadd.f32 %v5136_v3, %v5132_v61  ;;  %v5143_v2 = vadd.f32 %v5136_v3, %v5133_v46  ;;  %v5144_v53 = vadd.f32 %v5136_v3, %v5134_v59 }
0x2157   :  { %v11539_v4 = vmax.f32 %v5138_v52, 0.0  ;;  %v11541_v32 = vmax.f32 %v5137_v54, 0.0  ;;  %v11547_v39 = vmax.f32 %v5140_v31, 0.0  ;;  %v11549_v50 = vmax.f32 %v5139_v47, 0.0 }
0x2158   :  { %v11559_v33 = vmax.f32 %v5141_v40, 0.0  ;;  %v11565_v16 = vmax.f32 %v5142_v9, 0.0  ;;  %v11571_v55 = vmax.f32 %v5143_v2, 0.0  ;;  %v11577_v12 = vmax.f32 %v5144_v53, 0.0 }
0x2159   :  { %5297 = vrot.lane.b32.xlu0 %v11539_v4, %s6425_s23  ;;  %5295 = vrot.lane.b32.xlu1 %v11541_v32, %s6425_s23  ;;  %v5154_v1 = vrot.slane %v11539_v4, 7  ;;  %v5155_v0 = vrot.slane %v11549_v50, 7  ;;  %v5153_v19 = vrot.slane %v11541_v32, 7  ;;  %v5156_v15 = vrot.slane %v11547_v39, 7 }
0x215a   :  { %v5157_v30 = vrot.slane %v11559_v33, 7  ;;  %v5158_v37 = vrot.slane %v11565_v16, 7  ;;  %v5159_v17 = vrot.slane %v11571_v55, 7  ;;  %v5177_v43 = vrot.slane %v11541_v32, 1 }
0x215b   :  { %v11588_v13 = vsel %vm12586_vm14, %v5154_v1, %v5155_v0  ;;  %v11592_v24 = vsel %vm12587_vm12, %v5153_v19, %v5154_v1  ;;  %v11601_v14 = vsel %vm12588_vm1, %v5155_v0, %v5156_v15  ;;  %v5178_v44 = vrot.slane %v11539_v4, 1  ;;  %vm12602_vm14 = vmmov %vm12592_vm0 }
0x215c   :  { %v11610_v57 = vsel %vm12589_vm3, %v5156_v15, %v5157_v30  ;;  %v11624_v63 = vsel %vm12590_vm2, %v5157_v30, %v5158_v37  ;;  %v11628_v34 = vsel %vm12591_vm4, %v5158_v37, %v5159_v17  ;;  %v5179_v41 = vrot.slane %v11549_v50, 1 }
0x215d   :  { %5301 = vrot.lane.b32.xlu0 %v11547_v39, %s6425_s23  ;;  %5299 = vrot.lane.b32.xlu1 %v11549_v50, %s6425_s23  ;;  %v11638_v6 = vsel %vm12592_vm0, %v5177_v43, %v5178_v44  ;;  %v5160_v25 = vrot.slane %v11577_v12, 7  ;;  %v5180_v62 = vrot.slane %v11547_v39, 1  ;;  %v5181_v42 = vrot.slane %v11559_v33, 1 }
0x215e   :  { %v11648_v35 = vsel %vm12593_vm5, %v5178_v44, %v5179_v41  ;;  %v5182_v21 = vrot.slane %v11565_v16, 1  ;;  %v5183_v18 = vrot.slane %v11571_v55, 1  ;;  %v5184_v20 = vrot.slane %v11577_v12, 1 }
0x215f   :  { %v11652_v10 = vsel %vm12594_vm15, %v5159_v17, %v5160_v25  ;;  %v11661_v28 = vsel %vm12595_vm6, %v5179_v41, %v5180_v62  ;;  %v11670_v48 = vsel %vm12596_vm7, %v5180_v62, %v5181_v42  ;;  %v5168_v45 = vsel %vm12597_vm8, %v5160_v25, %v5153_v19 }
0x2160   :  { %v11684_v7 = vsel %vm12598_vm10, %v5168_v45, 0.0  ;;  %v11693_v26 = vsel %vm12599_vm13, %v5181_v42, %v5182_v21  ;;  %v11702_v29 = vsel %vm12600_vm9, %v5182_v21, %v5183_v18  ;;  %v11715_v5 = vsel %vm12601_vm11, %v5183_v18, %v5184_v20 }
0x2161   :  { %5357 = vrot.lane.b32.xlu0 %v11539_v4, %s6426_s24  ;;  %5355 = vrot.lane.b32.xlu1 %v11541_v32, %s6426_s24  ;;  %v5192_v11 = vsel %vm12602_vm14, %v5184_v20, %v5177_v43  ;;  %vm12603_vm12 = vcmp.lt.s32.totalorder %v12552_v51, 63  ;;  %v11751_v9 = vstv %s6174_s26  ;;  %v11753_v59 = vstv %s6175_s27 }
0x2162   :  { %v11725_v58 = vsel %vm12603_vm12, %v5192_v11, 0.0  ;;  %vm12604_vm1 = vcmp.ge.s32.totalorder %v6691_v56, 1  ;;  %v11760_v19 = vstv %s6176_s28  ;;  %v5238_v15 = vmul.f32 %v11753_v59, %v11592_v24  ;;  %s6194_s28 = sld [smem:[#allocation2 + $0x9a]] }
0x2163   :  { %vm12605_vm3 = vmmov %vm12604_vm1  ;;  %v11764_v17 = vstv %s6177_s30  ;;  %vm12607_vm4 = vcmp.lt.s32.totalorder %v6691_v56, 63  ;;  %v11770_v41 = vstv %s6178_s0  ;;  %v11776_v45 = vstv %s6179_s29  ;;  %s6195_s30 = sld [smem:[#allocation2 + $0x9b]] }
0x2164   :  { %vm12606_vm2 = vmmov %vm12604_vm1  ;;  %v5239_v21 = vmul.f32 %v11753_v59, %v11588_v13  ;;  %v5240_v18 = vmul.f32 %v11753_v59, %v11601_v14  ;;  %v5241_v20 = vmul.f32 %v11753_v59, %v11610_v57 }
0x2165   :  { %5359 = vrot.lane.b32.xlu0 %v11549_v50, %s6426_s24  ;;  %5303 = vrot.lane.b32.xlu1 %v11559_v33, %s6425_s23  ;;  %vm12608_vm0 = vmmov %vm12604_vm1 }
0x2166   :  { %vm12609_vm5 = vmmov %vm12608_vm0 }
0x2167   :  { %vm12610_vm15 = vmmov %vm12607_vm4 }
0x2168   :  { %vm12611_vm6 = vmmov %vm12607_vm4 }
0x2169   :  { %5361 = vrot.lane.b32.xlu0 %v11547_v39, %s6426_s24  ;;  %5305 = vrot.lane.b32.xlu1 %v11565_v16, %s6425_s23  ;;  %vm12612_vm7 = vmmov %vm12608_vm0 }
0x216a   :  { %vm12613_vm8 = vmmov %vm12608_vm0 }
0x216b   :  { %vm12614_vm10 = vmmov %vm12607_vm4 }
0x216c   :  { %vm12615_vm13 = vmmov %vm12608_vm0 }
0x216d   :  { %5363 = vrot.lane.b32.xlu0 %v11559_v33, %s6426_s24  ;;  %5307 = vrot.lane.b32.xlu1 %v11571_v55, %s6425_s23  ;;  %vm12616_vm9 = vmmov %vm12607_vm4 }
0x216e   :  { %vm12617_vm11 = vmmov %vm12607_vm4 }
0x216f   :  { %vm12618_vm14 = vmmov %vm12607_vm4 }
0x2170   :  { %vm12619_vm12 = vmmov %vm12608_vm0 }
0x2171   :  { %5309 = vrot.lane.b32.xlu0 %v11577_v12, %s6425_s23  ;;  %5365 = vrot.lane.b32.xlu1 %v11565_v16, %s6426_s24 }
0x2175   :  { %5205 = vrot.lane.b32.xlu0 %v11588_v13, %s6425_s23  ;;  %5203 = vrot.lane.b32.xlu1 %v11592_v24, %s6425_s23 }
0x2179   :  { %5255 = vrot.lane.b32.xlu0 %v11592_v24, %s6426_s24  ;;  %5207 = vrot.lane.b32.xlu1 %v11601_v14, %s6425_s23 }
0x217d   :  { %5257 = vrot.lane.b32.xlu0 %v11588_v13, %s6426_s24  ;;  %5209 = vrot.lane.b32.xlu1 %v11610_v57, %s6425_s23 }
0x2181   :  { %5259 = vrot.lane.b32.xlu0 %v11601_v14, %s6426_s24  ;;  %5261 = vrot.lane.b32.xlu1 %v11610_v57, %s6426_s24  ;;  %v5340_v57 = vmul.f32 %v11770_v41, %v11539_v4 }
0x2185   :  { %5211 = vrot.lane.b32.xlu0 %v11624_v63, %s6425_s23  ;;  %5213 = vrot.lane.b32.xlu1 %v11628_v34, %s6425_s23 }
0x2189   :  { %5263 = vrot.lane.b32.xlu0 %v11624_v63, %s6426_s24  ;;  %5397 = vrot.lane.b32.xlu1 %v11638_v6, %s6425_s23 }
0x218d   :  { %5399 = vrot.lane.b32.xlu0 %v11648_v35, %s6425_s23  ;;  %5215 = vrot.lane.b32.xlu1 %v11652_v10, %s6425_s23 }
0x2191   :  { %5265 = vrot.lane.b32.xlu0 %v11628_v34, %s6426_s24  ;;  %5401 = vrot.lane.b32.xlu1 %v11661_v28, %s6425_s23 }
0x2195   :  { %5267 = vrot.lane.b32.xlu0 %v11652_v10, %s6426_s24  ;;  %5403 = vrot.lane.b32.xlu1 %v11670_v48, %s6425_s23 }
0x2199   :  { %5457 = vrot.lane.b32.xlu0 %v11638_v6, %s6426_s24  ;;  %5459 = vrot.lane.b32.xlu1 %v11648_v35, %s6426_s24 }
0x219d   :  { %5201 = vrot.lane.b32.xlu0 %v11684_v7, %s6425_s23  ;;  %5253 = vrot.lane.b32.xlu1 %v11684_v7, %s6426_s24 }
0x21a1   :  { %5405 = vrot.lane.b32.xlu0 %v11693_v26, %s6425_s23  ;;  %5461 = vrot.lane.b32.xlu1 %v11661_v28, %s6426_s24 }
0x21a5   :  { %5367 = vrot.lane.b32.xlu0 %v11571_v55, %s6426_s24  ;;  %5407 = vrot.lane.b32.xlu1 %v11702_v29, %s6425_s23 }
0x21a9   :  { %5463 = vrot.lane.b32.xlu0 %v11670_v48, %s6426_s24  ;;  %5369 = vrot.lane.b32.xlu1 %v11577_v12, %s6426_s24 }
0x21ad   :  { %5409 = vrot.lane.b32.xlu0 %v11715_v5, %s6425_s23  ;;  %5465 = vrot.lane.b32.xlu1 %v11693_v26, %s6426_s24 }
0x21b1   :  { %5411 = vrot.lane.b32.xlu0 %v11725_v58, %s6425_s23  ;;  %5467 = vrot.lane.b32.xlu1 %v11702_v29, %s6426_s24 }
0x21b5   :  { %5469 = vrot.lane.b32.xlu0 %v11715_v5, %s6426_s24  ;;  %5471 = vrot.lane.b32.xlu1 %v11725_v58, %s6426_s24 }
0x21cb   :  { %v5298_v60 = vpop.permute.xlu0 %5297  ;;  %v11735_v27 = vpop.permute.xlu1 %5295 }
0x21cc   :  { %v5312_v43 = vsel %vm12606_vm2, %v5298_v60, 0.0  ;;  %vm12622_vm2 = vmmov %vm12608_vm0 }
0x21cd   :  { %v5322_v11 = vmul.f32 %v11764_v17, %v5312_v43 }
0x21cf   :  { %v5302_v3 = vpop.permute.xlu0 %5301  ;;  %v5300_v38 = vpop.permute.xlu1 %5299 }
0x21d0   :  { %v5313_v60 = vsel %vm12609_vm5, %v5300_v38, 0.0 }
0x21d1   :  { %v5323_v43 = vmul.f32 %v11764_v17, %v5313_v60 }
0x21d3   :  { %v5358_v49 = vpop.permute.xlu0 %5357  ;;  %v11737_v36 = vpop.permute.xlu1 %5355 }
0x21d7   :  { %v5360_v22 = vpop.permute.xlu0 %5359  ;;  %v5304_v52 = vpop.permute.xlu1 %5303 }
0x21d8   :  { %v5315_v4 = vsel %vm12615_vm13, %v5304_v52, 0.0 }
0x21db   :  { %v11739_v54 = vpop.permute.xlu0 %5361  ;;  %v11741_v31 = vpop.permute.xlu1 %5305 }
0x21df   :  { %v11743_v47 = vpop.permute.xlu0 %5363  ;;  %v11745_v23 = vpop.permute.xlu1 %5307 }
0x21e3   :  { %v11747_v40 = vpop.permute.xlu0 %5309  ;;  %v11749_v61 = vpop.permute.xlu1 %5365 }
0x21e7   :  { %v5206_v46 = vpop.permute.xlu0 %5205  ;;  %v5204_v2 = vpop.permute.xlu1 %5203 }
0x21e8   :  { %v5218_v53 = vsel %vm12604_vm1, %v5204_v2, 0.0  ;;  %v5219_v0 = vsel %vm12605_vm3, %v5206_v46, 0.0  ;;  %v5372_v46 = vsel %vm12610_vm15, %v5358_v49, 0.0  ;;  %vm12620_vm1 = vmmov %vm12608_vm0 }
0x21e9   :  { %v5228_v1 = vmul.f32 %v11751_v9, %v5218_v53  ;;  %v5229_v25 = vmul.f32 %v11751_v9, %v5219_v0  ;;  %vm12621_vm3 = vmmov %vm12607_vm4 }
0x21ea   :  { %vm12624_vm5 = vmmov %vm12621_vm3 }
0x21eb   :  { %v5256_v30 = vpop.permute.xlu0 %5255  ;;  %v5208_v37 = vpop.permute.xlu1 %5207  ;;  %v5246_v62 = vadd.f32 %v5238_v15, %v5228_v1  ;;  %v5247_v15 = vadd.f32 %v5239_v21, %v5229_v25  ;;  %vm12625_vm15 = vmmov %vm12608_vm0 }
0x21ec   :  { %v5270_v44 = vsel %vm12607_vm4, %v5256_v30, 0.0  ;;  %v5220_v24 = vsel %vm12608_vm0, %v5208_v37, 0.0  ;;  %v5314_v37 = vsel %vm12613_vm8, %v5302_v3, 0.0  ;;  %vm12623_vm4 = vmmov %vm12608_vm0 }
0x21ed   :  { %v5280_v42 = vmul.f32 %v11760_v19, %v5270_v44  ;;  %v5230_v0 = vmul.f32 %v11751_v9, %v5220_v24  ;;  %v5382_v44 = vmul.f32 %v11776_v45, %v5372_v46  ;;  %v5324_v52 = vmul.f32 %v11764_v17, %v5314_v37  ;;  %vm12628_vm8 = vmmov %vm12608_vm0 }
0x21ee   :  { %vm12630_vm13 = vmmov %vm12621_vm3 }
0x21ef   :  { %v5288_v2 = vadd.f32 %v5280_v42, %v5246_v62  ;;  %v5258_v53 = vpop.permute.xlu0 %5257  ;;  %v5210_v1 = vpop.permute.xlu1 %5209  ;;  %v5341_v62 = vmul.f32 %v11770_v41, %v11549_v50  ;;  %v5373_v42 = vsel %vm12614_vm10, %v5360_v22, 0.0  ;;  %vm12629_vm10 = vmmov %vm12621_vm3 }
0x21f0   :  { %v5271_v13 = vsel %vm12611_vm6, %v5258_v53, 0.0  ;;  %v5221_v14 = vsel %vm12612_vm7, %v5210_v1, 0.0  ;;  %vm12626_vm6 = vmmov %vm12621_vm3 }
0x21f1   :  { %v5330_v30 = vadd.f32 %v5322_v11, %v5288_v2  ;;  %v5281_v38 = vmul.f32 %v11760_v19, %v5271_v13  ;;  %v5231_v49 = vmul.f32 %v11751_v9, %v5221_v14  ;;  %v5248_v2 = vadd.f32 %v5240_v18, %v5230_v0  ;;  %vm12627_vm7 = vmmov %vm12608_vm0 }
0x21f2   :  { %v5325_v13 = vmul.f32 %v11764_v17, %v5315_v4 }
0x21f3   :  { %v5289_v25 = vadd.f32 %v5281_v38, %v5247_v15  ;;  %v5260_v24 = vpop.permute.xlu0 %5259  ;;  %v5262_v21 = vpop.permute.xlu1 %5261  ;;  %v5348_v11 = vadd.f32 %v5340_v57, %v5330_v30  ;;  %v5249_v53 = vadd.f32 %v5241_v20, %v5231_v49  ;;  %v5383_v15 = vmul.f32 %v11776_v45, %v5373_v42 }
0x21f4   :  { %v5272_v3 = vsel %vm12616_vm9, %v5260_v24, 0.0  ;;  %v5273_v60 = vsel %vm12617_vm11, %v5262_v21, 0.0  ;;  %v5374_v30 = vsel %vm12618_vm14, %v11739_v54, 0.0  ;;  %v5342_v49 = vmul.f32 %v11770_v41, %v11547_v39  ;;  %vm12631_vm9 = vmmov %vm12608_vm0 }
0x21f5   :  { %v5331_v46 = vadd.f32 %v5323_v43, %v5289_v25  ;;  %v5282_v50 = vmul.f32 %v11760_v19, %v5272_v3  ;;  %v5283_v22 = vmul.f32 %v11760_v19, %v5273_v60  ;;  %v5390_v1 = vadd.f32 %v5382_v44, %v5348_v11  ;;  %vm12632_vm11 = vmmov %vm12621_vm3 }
0x21f6   :  { %v5384_v42 = vmul.f32 %v11776_v45, %v5374_v30  ;;  %v5242_v54 = vmul.f32 %v11753_v59, %v11624_v63  ;;  %v5316_v39 = vsel %vm12620_vm1, %v11741_v31, 0.0  ;;  %vm12633_vm14 = vmmov %vm12621_vm3 }
0x21f7   :  { %v5290_v14 = vadd.f32 %v5282_v50, %v5248_v2  ;;  %v5291_v57 = vadd.f32 %v5283_v22, %v5249_v53  ;;  %v5212_v18 = vpop.permute.xlu0 %5211  ;;  %v5214_v20 = vpop.permute.xlu1 %5213  ;;  %v5349_v0 = vadd.f32 %v5341_v62, %v5331_v46  ;;  %v5343_v62 = vmul.f32 %v11770_v41, %v11559_v33  ;;  %vm12635_vm1 = vmmov %vm12608_vm0 }
0x21f8   :  { %v5222_v38 = vsel %vm12619_vm12, %v5212_v18, 0.0  ;;  %v5326_v63 = vmul.f32 %v11764_v17, %v5316_v39  ;;  %v11845_v22 = vstv %s6181_s22  ;;  %vm12634_vm12 = vmmov %vm12608_vm0 }
0x21f9   :  { %v5332_v37 = vadd.f32 %v5324_v52, %v5290_v14  ;;  %v5333_v43 = vadd.f32 %v5325_v13, %v5291_v57  ;;  %v5232_v44 = vmul.f32 %v11751_v9, %v5222_v38  ;;  %v11827_v4 = vadd.f32 %v5383_v15, %v5349_v0 }
0x21fa   :  { %v11847_v52 = vstv %s6180_s3  ;;  %v5344_v57 = vmul.f32 %v11770_v41, %v11565_v16  ;;  %v5442_v18 = vmul.f32 %v11845_v22, %v11648_v35  ;;  %v11868_v16 = vmul.f32 %v11845_v22, %v11661_v28 }
0x21fb   :  { %v5264_v25 = vpop.permute.xlu0 %5263  ;;  %v11832_v24 = vpop.permute.xlu1 %5397  ;;  %v5350_v21 = vadd.f32 %v5342_v49, %v5332_v37  ;;  %v11834_v11 = vadd.f32 %v5343_v62, %v5333_v43  ;;  %v5250_v2 = vadd.f32 %v5242_v54, %v5232_v44  ;;  %v11872_v35 = vmul.f32 %v11845_v22, %v11670_v48 }
0x21fc   :  { %v5274_v33 = vsel %vm12621_vm3, %v5264_v25, 0.0  ;;  %v11880_v54 = vmul.f32 %v11845_v22, %v11702_v29  ;;  %v5244_v25 = vmul.f32 %v11753_v59, %v11652_v10  ;;  %v5223_v28 = vsel %vm12623_vm4, %v5214_v20, 0.0  ;;  %vm12636_vm3 = vmmov %vm12608_vm0 }
0x21fd   :  { %v5284_v53 = vmul.f32 %v11760_v19, %v5274_v33  ;;  %v11842_v3 = vadd.f32 %v5384_v42, %v5350_v21  ;;  %v11864_v42 = vmul.f32 %v11845_v22, %v11638_v6  ;;  %v5243_v6 = vmul.f32 %v11753_v59, %v11628_v34  ;;  %vm12638_vm4 = vmmov %vm12624_vm5 }
0x21fe   :  { %v5237_v48 = vmul.f32 %v11753_v59, %v11684_v7  ;;  %v11894_v29 = vmul.f32 %v11770_v41, %v11571_v55  ;;  %v11896_v33 = vstv %s6182_s4  ;;  %v11904_v7 = vmul.f32 %v11770_v41, %v11577_v12 }
0x21ff   :  { %v5292_v60 = vadd.f32 %v5284_v53, %v5250_v2  ;;  %v5400_v46 = vpop.permute.xlu0 %5399  ;;  %v5216_v50 = vpop.permute.xlu1 %5215  ;;  %v5311_v2 = vsel %vm12628_vm8, %v11735_v27, 0.0  ;;  %v5371_v12 = vsel %vm12629_vm10, %v11737_v36, 0.0  ;;  %v5233_v53 = vmul.f32 %v11751_v9, %v5223_v28  ;;  %vm12645_vm10 = vmmov %vm12635_vm1 }
0x2200   :  { %v5414_v31 = vsel %vm12622_vm2, %v5400_v46, 0.0  ;;  %v5376_v36 = vsel %vm12633_vm14, %v11749_v61, 0.0  ;;  %v5413_v61 = vsel %vm12635_vm1, %v11832_v24, 0.0  ;;  %vm12637_vm2 = vmmov %vm12608_vm0 }
0x2201   :  { %v5334_v13 = vadd.f32 %v5326_v63, %v5292_v60  ;;  %v5424_v14 = vmul.f32 %v11847_v52, %v5414_v31  ;;  %v5317_v63 = vsel %vm12631_vm9, %v11745_v23, 0.0  ;;  %v5321_v23 = vmul.f32 %v11764_v17, %v5311_v2  ;;  %vm12647_vm9 = vmmov %vm12635_vm1 }
0x2202   :  { %v5327_v28 = vmul.f32 %v11764_v17, %v5317_v63 }
0x2203   :  { %v5432_v0 = vadd.f32 %v5424_v14, %v5390_v1  ;;  %v5266_v15 = vpop.permute.xlu0 %5265  ;;  %v5402_v30 = vpop.permute.xlu1 %5401  ;;  %v11856_v38 = vadd.f32 %v5344_v57, %v5334_v13  ;;  %v11876_v1 = vmul.f32 %v11845_v22, %v11693_v26  ;;  %v5339_v26 = vmul.f32 %v11770_v41, %v11541_v32 }
0x2204   :  { %v5224_v32 = vsel %vm12625_vm15, %v5216_v50, 0.0  ;;  %v5275_v59 = vsel %vm12626_vm6, %v5266_v15, 0.0  ;;  %v5415_v55 = vsel %vm12627_vm7, %v5402_v30, 0.0  ;;  %v5375_v41 = vsel %vm12630_vm13, %v11743_v47, 0.0 }
0x2205   :  { %v11858_v49 = vadd.f32 %v5442_v18, %v5432_v0  ;;  %v5234_v47 = vmul.f32 %v11751_v9, %v5224_v32  ;;  %v5285_v13 = vmul.f32 %v11760_v19, %v5275_v59  ;;  %v5425_v14 = vmul.f32 %v11847_v52, %v5415_v55 }
0x2206   :  { %v5381_v57 = vmul.f32 %v11776_v45, %v5371_v12  ;;  %v5318_v18 = vsel %vm12634_vm12, %v11747_v40, 0.0  ;;  %v5251_v15 = vadd.f32 %v5243_v6, %v5233_v53 }
0x2207   :  { %v5268_v37 = vpop.permute.xlu0 %5267  ;;  %v5404_v43 = vpop.permute.xlu1 %5403 }
0x2208   :  { %v5276_v60 = vsel %vm12632_vm11, %v5268_v37, 0.0  ;;  %v5416_v30 = vsel %vm12636_vm3, %v5404_v43, 0.0  ;;  %v5385_v37 = vmul.f32 %v11776_v45, %v5375_v41  ;;  %v5293_v6 = vadd.f32 %v5285_v13, %v5251_v15 }
0x2209   :  { %v5423_v43 = vmul.f32 %v11847_v52, %v5413_v61  ;;  %v5426_v32 = vmul.f32 %v11847_v52, %v5416_v30 }
0x220a   :  { %v5393_v2 = vadd.f32 %v5385_v37, %v11834_v11 }
0x220b   :  { %v11860_v44 = vpop.permute.xlu0 %5457  ;;  %v5460_v62 = vpop.permute.xlu1 %5459 }
0x220f   :  { %v5202_v21 = vpop.permute.xlu0 %5201  ;;  %v5254_v39 = vpop.permute.xlu1 %5253 }
0x2210   :  { %v5217_v34 = vsel %vm12608_vm0, %v5202_v21, 0.0  ;;  %v5269_v10 = vsel %vm12624_vm5, %v5254_v39, 0.0  ;;  %vm12639_vm0 = vmmov %vm12638_vm4 }
0x2211   :  { %v5227_v20 = vmul.f32 %v11751_v9, %v5217_v34  ;;  %v5279_v27 = vmul.f32 %v11760_v19, %v5269_v10  ;;  %v5286_v9 = vmul.f32 %v11760_v19, %v5276_v60  ;;  %v5252_v34 = vadd.f32 %v5244_v25, %v5234_v47  ;;  %vm12640_vm5 = vmmov %vm12635_vm1 }
0x2212   :  { %v5433_v10 = vadd.f32 %v5425_v14, %v11827_v4  ;;  %v5328_v19 = vmul.f32 %v11764_v17, %v5318_v18  ;;  %vm12641_vm15 = vmmov %vm12639_vm0  ;;  %v5434_v60 = vadd.f32 %v5426_v32, %v11842_v3  ;;  %vm12651_vm1 = vcmp.lt.s32.totalorder %v6480_v8, 1 }
0x2213   :  { %v5245_v46 = vadd.f32 %v5237_v48, %v5227_v20  ;;  %v5406_v50 = vpop.permute.xlu0 %5405  ;;  %v5462_v31 = vpop.permute.xlu1 %5461  ;;  %v5386_v48 = vmul.f32 %v11776_v45, %v5376_v36  ;;  %v5294_v55 = vadd.f32 %v5286_v9, %v5252_v34  ;;  %v5474_v20 = vsel %vm12638_vm4, %v5460_v62, 0.0  ;;  %vm12642_vm6 = vmmov %vm12639_vm0 }
0x2214   :  { %v5417_v24 = vsel %vm12637_vm2, %v5406_v50, 0.0  ;;  %v5473_v62 = vsel %vm12641_vm15, %v11860_v44, 0.0  ;;  %v5451_v11 = vadd.f32 %v11868_v16, %v5433_v10  ;;  %vm12643_vm7 = vmmov %vm12639_vm0  ;;  %vm12657_vm15 = vcmp.lt.s32.totalorder %v6480_v8, 7 }
0x2215   :  { %v5287_v0 = vadd.f32 %v5279_v27, %v5245_v46  ;;  %v5394_v25 = vadd.f32 %v5386_v48, %v11856_v38  ;;  %v5427_v4 = vmul.f32 %v11847_v52, %v5417_v24  ;;  %v5475_v38 = vsel %vm12642_vm6, %v5462_v31, 0.0  ;;  %vm12644_vm8 = vmmov %vm12639_vm0 }
0x2216   :  { %v5484_v46 = vmul.f32 %v11896_v33, %v5474_v20  ;;  %v5336_v36 = vadd.f32 %v5328_v19, %v5294_v55  ;;  %v5483_v16 = vmul.f32 %v11896_v33, %v5473_v62  ;;  %v5485_v3 = vmul.f32 %v11896_v33, %v5475_v38  ;;  %vm12646_vm13 = vmmov %vm12639_vm0 }
0x2217   :  { %v5329_v21 = vadd.f32 %v5321_v23, %v5287_v0  ;;  %v5368_v39 = vpop.permute.xlu0 %5367  ;;  %v5408_v40 = vpop.permute.xlu1 %5407  ;;  %v5435_v14 = vadd.f32 %v5427_v4, %v5393_v2  ;;  %vm12648_vm11 = vmmov %vm12639_vm0  ;;  %v5448_v20 = vmul.f32 %v11845_v22, %v11725_v58 }
0x2218   :  { %v5377_v41 = vsel %vm12639_vm0, %v5368_v39, 0.0  ;;  %v5418_v17 = vsel %vm12640_vm5, %v5408_v40, 0.0  ;;  %v5492_v9 = vadd.f32 %v5484_v46, %v11858_v49  ;;  %v5493_v39 = vadd.f32 %v5485_v3, %v5451_v11  ;;  %vm12649_vm14 = vmmov %vm12639_vm0 }
0x2219   :  { %v5347_v59 = vadd.f32 %v5339_v26, %v5329_v21  ;;  %v5335_v26 = vadd.f32 %v5327_v28, %v5293_v6  ;;  %v5387_v47 = vmul.f32 %v11776_v45, %v5377_v41  ;;  %v5428_v13 = vmul.f32 %v11847_v52, %v5418_v17  ;;  %vm12650_vm12 = vmmov %vm12639_vm0 }
0x221a   :  { %v5452_v21 = vadd.f32 %v11872_v35, %v5434_v60  ;;  %v5453_v34 = vadd.f32 %v11876_v1, %v5435_v14  ;;  %v5447_v1 = vmul.f32 %v11845_v22, %v11715_v5  ;;  %vm12652_vm3 = vmmov %vm12651_vm1 }
0x221b   :  { %v5389_v12 = vadd.f32 %v5381_v57, %v5347_v59  ;;  %v5464_v53 = vpop.permute.xlu0 %5463  ;;  %v5370_v63 = vpop.permute.xlu1 %5369  ;;  %v5353_v18 = vadd.f32 %v11894_v29, %v5335_v26  ;;  %v5436_v48 = vadd.f32 %v5428_v13, %v5394_v25  ;;  %v5354_v29 = vadd.f32 %v11904_v7, %v5336_v36  ;;  %vm12653_vm2 = vmmov %vm12651_vm1 }
0x221c   :  { %v5476_v50 = vsel %vm12643_vm7, %v5464_v53, 0.0  ;;  %v5378_v44 = vsel %vm12644_vm8, %v5370_v63, 0.0  ;;  %vm12654_vm4 = vmmov %vm12651_vm1 }
0x221d   :  { %v5431_v27 = vadd.f32 %v5423_v43, %v5389_v12  ;;  %v5486_v0 = vmul.f32 %v11896_v33, %v5476_v50  ;;  %v5388_v37 = vmul.f32 %v11776_v45, %v5378_v44  ;;  %v5395_v28 = vadd.f32 %v5387_v47, %v5353_v18  ;;  %vm12655_vm0 = vmmov %vm12651_vm1 }
0x221e   :  { %v5454_v55 = vadd.f32 %v11880_v54, %v5436_v48  ;;  %vm12656_vm5 = vmmov %vm12655_vm0 }
0x221f   :  { %v5449_v31 = vadd.f32 %v11864_v42, %v5431_v27  ;;  %v5410_v23 = vpop.permute.xlu0 %5409  ;;  %v5466_v57 = vpop.permute.xlu1 %5465  ;;  %v5494_v49 = vadd.f32 %v5486_v0, %v5452_v21  ;;  %v5396_v35 = vadd.f32 %v5388_v37, %v5354_v29  ;;  %vm12658_vm6 = vmmov %vm12657_vm15 }
0x2220   :  { %v5419_v15 = vsel %vm12645_vm10, %v5410_v23, 0.0  ;;  %v5477_v61 = vsel %vm12646_vm13, %v5466_v57, 0.0  ;;  %vm12659_vm7 = vmmov %vm12655_vm0 }
0x2221   :  { %v5491_v30 = vadd.f32 %v5483_v16, %v5449_v31  ;;  %v5429_v42 = vmul.f32 %v11847_v52, %v5419_v15  ;;  %v5487_v6 = vmul.f32 %v11896_v33, %v5477_v61  ;;  %vm12660_vm8 = vmmov %vm12658_vm6 }
0x2222   :  { %vm12661_vm10 = vmmov %vm12658_vm6 }
0x2223   :  { %v5499_v40 = vadd.f32 %v5492_v9, %v5491_v30  ;;  %v5412_v10 = vpop.permute.xlu0 %5411  ;;  %v5468_v24 = vpop.permute.xlu1 %5467  ;;  %v5437_v19 = vadd.f32 %v5429_v42, %v5395_v28  ;;  %v5495_v25 = vadd.f32 %v5487_v6, %v5453_v34  ;;  %vm12662_vm13 = vmmov %vm12655_vm0 }
0x2224   :  { %v5420_v45 = vsel %vm12647_vm9, %v5412_v10, 0.0  ;;  %v5478_v43 = vsel %vm12648_vm11, %v5468_v24, 0.0  ;;  %vm12663_vm9 = vcmp.ge.s32.totalorder %v6480_v8, 1  ;;  %vm12664_vm11 = vmmov %vm12658_vm6 }
0x2225   :  { %v5500_v32 = vadd.f32 %v5499_v40, %v5493_v39  ;;  %v5430_v7 = vmul.f32 %v11847_v52, %v5420_v45  ;;  %v5488_v59 = vmul.f32 %v11896_v33, %v5478_v43  ;;  %v5455_v53 = vadd.f32 %v5447_v1, %v5437_v19 }
0x2227   :  { %v5501_v2 = vadd.f32 %v5500_v32, %v5494_v49  ;;  %v5438_v12 = vadd.f32 %v5430_v7, %v5396_v35  ;;  %v5470_v4 = vpop.permute.xlu0 %5469  ;;  %v5472_v41 = vpop.permute.xlu1 %5471  ;;  %v5496_v17 = vadd.f32 %v5488_v59, %v5454_v55  ;;  %v5566_v55 = vstv %s6184_s5 }
0x2228   :  { %v5479_v52 = vsel %vm12649_vm14, %v5470_v4, 0.0  ;;  %v5480_v63 = vsel %vm12650_vm12, %v5472_v41, 0.0  ;;  %vm12665_vm14 = vmmov %vm12658_vm6 }
0x2229   :  { %v5502_v26 = vadd.f32 %v5501_v2, %v5495_v25  ;;  %v5489_v5 = vmul.f32 %v11896_v33, %v5479_v52  ;;  %v5456_v54 = vadd.f32 %v5448_v20, %v5438_v12  ;;  %v5490_v62 = vmul.f32 %v11896_v33, %v5480_v63  ;;  %vm12666_vm12 = vmmov %vm12658_vm6 }
0x222b   :  { %v5503_v58 = vadd.f32 %v5502_v26, %v5496_v17  ;;  %v5497_v22 = vadd.f32 %v5489_v5, %v5455_v53  ;;  %v5498_v38 = vadd.f32 %v5490_v62, %v5456_v54 }
0x222d   :  { %v5504_v11 = vadd.f32 %v5503_v58, %v5497_v22 }
0x222f   :  { %v5505_v60 = vadd.f32 %v5504_v11, %v5498_v38 }
0x2231   :  { %5506 = vadd.xlane.f32.xlu0 %v5505_v60 }
0x22be   :  { %v5507_v46 = vpop.xlane.xlu0 %5506 }
0x22bf   :  { %v5508_v27 = vrot.slane %v5507_v46, 4 }
0x22c1   :  { %v5509_v50 = vadd.f32 %v5508_v27, %v5507_v46 }
0x22c3   :  { %v5510_v36 = vrot.slane %v5509_v50, 2 }
0x22c5   :  { %v5511_v47 = vadd.f32 %v5510_v36, %v5509_v50 }
0x22c7   :  { %v5512_v13 = vrot.slane %v5511_v47, 1 }
0x22c9   :  { %v5513_v44 = vadd.f32 %v5512_v13, %v5511_v47 }
0x22cb   :  { %6262 = vpush %v5513_v44 }
0x22fc   :  { %s6263_s18 = spop %6262 }
0x22fd   :  { %s5515_s19 = smul.f32 0.00012207031, %s6263_s18 }
0x22ff   :  { %v5516_v16 = vstv %s5515_s19 }
0x2300   :  { %v5517_v14 = vsub.f32 %v5491_v30, %v5516_v16  ;;  %v5518_v31 = vsub.f32 %v5492_v9, %v5516_v16  ;;  %v5519_v33 = vsub.f32 %v5493_v39, %v5516_v16  ;;  %v5520_v3 = vsub.f32 %v5494_v49, %v5516_v16 }
0x2301   :  { %v5521_v18 = vsub.f32 %v5495_v25, %v5516_v16  ;;  %v5522_v61 = vsub.f32 %v5496_v17, %v5516_v16  ;;  %v5523_v28 = vsub.f32 %v5497_v22, %v5516_v16  ;;  %v5524_v29 = vsub.f32 %v5498_v38, %v5516_v16 }
0x2302   :  { %v5525_v23 = vmul.f32 %v5517_v14, %v5517_v14  ;;  %v5526_v57 = vmul.f32 %v5518_v31, %v5518_v31  ;;  %v5527_v0 = vmul.f32 %v5519_v33, %v5519_v33  ;;  %v5528_v37 = vmul.f32 %v5520_v3, %v5520_v3 }
0x2303   :  { %v5529_v48 = vmul.f32 %v5521_v18, %v5521_v18  ;;  %v5530_v40 = vmul.f32 %v5522_v61, %v5522_v61  ;;  %v5531_v6 = vmul.f32 %v5523_v28, %v5523_v28  ;;  %v5532_v30 = vmul.f32 %v5524_v29, %v5524_v29 }
0x2304   :  { %v5533_v15 = vadd.f32 %v5526_v57, %v5525_v23 }
0x2306   :  { %v5534_v42 = vadd.f32 %v5533_v15, %v5527_v0 }
0x2308   :  { %v5535_v21 = vadd.f32 %v5534_v42, %v5528_v37 }
0x230a   :  { %v5536_v34 = vadd.f32 %v5535_v21, %v5529_v48 }
0x230c   :  { %v5537_v10 = vadd.f32 %v5536_v34, %v5530_v40 }
0x230e   :  { %v5538_v9 = vadd.f32 %v5537_v10, %v5531_v6 }
0x2310   :  { %v5539_v39 = vadd.f32 %v5538_v9, %v5532_v30 }
0x2312   :  { %5540 = vadd.xlane.f32.xlu1 %v5539_v39 }
0x239f   :  { %v5541_v24 = vpop.xlane.xlu1 %5540 }
0x23a0   :  { %v5542_v49 = vrot.slane %v5541_v24, 4 }
0x23a2   :  { %v5543_v19 = vadd.f32 %v5542_v49, %v5541_v24 }
0x23a4   :  { %v5544_v45 = vrot.slane %v5543_v19, 2 }
0x23a6   :  { %v5545_v43 = vadd.f32 %v5544_v45, %v5543_v19 }
0x23a8   :  { %v5546_v32 = vrot.slane %v5545_v43, 1 }
0x23aa   :  { %v5547_v35 = vadd.f32 %v5546_v32, %v5545_v43 }
0x23ac   :  { %6264 = vpush %v5547_v35 }
0x23dd   :  { %s6265_s20 = spop %6264 }
0x23de   :  { %s5549_s6 = smul.f32 0.00012207031, %s6265_s20 }
0x23e0   :  { %s5551_s25 = sadd.f32 1e-05, %s5549_s6 }
0x23e2   :  { %v5552_v7 = vstv %s5551_s25 }
0x23e3   :  { %6404 = vrsqrt.f32 %v5552_v7 }
0x23ed   :  { %v6405_v59 = vpop.eup %6404 }
0x23ee   :  { %6266 = vpush %v6405_v59 }
0x241f   :  { %s6267_s8 = spop %6266 }
0x2420   :  { %s5555_s9 = smul.f32 %s6267_s8, %s6183_s7 }
0x2422   :  { %v5556_v1 = vstv %s5555_s9 }
0x2423   :  { %v5558_v20 = vmul.f32 %v5556_v1, %v5518_v31  ;;  %v5557_v2 = vmul.f32 %v5556_v1, %v5517_v14  ;;  %v5560_v25 = vmul.f32 %v5556_v1, %v5520_v3  ;;  %v5559_v12 = vmul.f32 %v5556_v1, %v5519_v33 }
0x2424   :  { %v5561_v54 = vmul.f32 %v5556_v1, %v5521_v18  ;;  %v5562_v58 = vmul.f32 %v5556_v1, %v5522_v61  ;;  %v5563_v38 = vmul.f32 %v5556_v1, %v5523_v28  ;;  %v5564_v27 = vmul.f32 %v5556_v1, %v5524_v29 }
0x2425   :  { %v5568_v4 = vadd.f32 %v5566_v55, %v5558_v20  ;;  %v5567_v41 = vadd.f32 %v5566_v55, %v5557_v2  ;;  %v5570_v52 = vadd.f32 %v5566_v55, %v5560_v25  ;;  %v5569_v63 = vadd.f32 %v5566_v55, %v5559_v12 }
0x2426   :  { %v5571_v62 = vadd.f32 %v5566_v55, %v5561_v54  ;;  %v5572_v11 = vadd.f32 %v5566_v55, %v5562_v58  ;;  %v5573_v46 = vadd.f32 %v5566_v55, %v5563_v38  ;;  %v5574_v36 = vadd.f32 %v5566_v55, %v5564_v27 }
0x2427   :  { %v12011_v17 = vmax.f32 %v5568_v4, 0.0  ;;  %v12013_v53 = vmax.f32 %v5567_v41, 0.0  ;;  %v12019_v26 = vmax.f32 %v5570_v52, 0.0  ;;  %v12021_v5 = vmax.f32 %v5569_v63, 0.0 }
0x2428   :  { %v12031_v22 = vmax.f32 %v5571_v62, 0.0  ;;  %v12037_v60 = vmax.f32 %v5572_v11, 0.0  ;;  %v12043_v50 = vmax.f32 %v5573_v46, 0.0  ;;  %v12049_v47 = vmax.f32 %v5574_v36, 0.0 }
0x2429   :  { %5727 = vrot.lane.b32.xlu0 %v12011_v17, %s6425_s23  ;;  %5725 = vrot.lane.b32.xlu1 %v12013_v53, %s6425_s23  ;;  %v5584_v13 = vrot.slane %v12011_v17, 7  ;;  %v5585_v44 = vrot.slane %v12021_v5, 7  ;;  %v5583_v16 = vrot.slane %v12013_v53, 7  ;;  %v5586_v33 = vrot.slane %v12019_v26, 7 }
0x242a   :  { %v5587_v23 = vrot.slane %v12031_v22, 7  ;;  %v5588_v18 = vrot.slane %v12037_v60, 7  ;;  %v5589_v0 = vrot.slane %v12043_v50, 7  ;;  %v5607_v37 = vrot.slane %v12013_v53, 1 }
0x242b   :  { %v12060_v14 = vsel %vm12651_vm1, %v5584_v13, %v5585_v44  ;;  %v12064_v31 = vsel %vm12652_vm3, %v5583_v16, %v5584_v13  ;;  %v12073_v3 = vsel %vm12653_vm2, %v5585_v44, %v5586_v33  ;;  %v5608_v42 = vrot.slane %v12011_v17, 1  ;;  %vm12667_vm1 = vmmov %vm12658_vm6 }
0x242c   :  { %v12082_v57 = vsel %vm12654_vm4, %v5586_v33, %v5587_v23  ;;  %v12096_v15 = vsel %vm12655_vm0, %v5587_v23, %v5588_v18  ;;  %v12100_v61 = vsel %vm12656_vm5, %v5588_v18, %v5589_v0  ;;  %v5609_v48 = vrot.slane %v12021_v5, 1 }
0x242d   :  { %5731 = vrot.lane.b32.xlu0 %v12019_v26, %s6425_s23  ;;  %5729 = vrot.lane.b32.xlu1 %v12021_v5, %s6425_s23  ;;  %v12110_v28 = vsel %vm12657_vm15, %v5607_v37, %v5608_v42  ;;  %v5590_v21 = vrot.slane %v12049_v47, 7  ;;  %v5610_v34 = vrot.slane %v12019_v26, 1  ;;  %v5611_v10 = vrot.slane %v12031_v22, 1 }
0x242e   :  { %v12120_v29 = vsel %vm12658_vm6, %v5608_v42, %v5609_v48  ;;  %v5612_v24 = vrot.slane %v12037_v60, 1  ;;  %v5613_v19 = vrot.slane %v12043_v50, 1  ;;  %v5614_v43 = vrot.slane %v12049_v47, 1 }
0x242f   :  { %v12124_v40 = vsel %vm12659_vm7, %v5589_v0, %v5590_v21  ;;  %v12133_v6 = vsel %vm12660_vm8, %v5609_v48, %v5610_v34  ;;  %v12142_v30 = vsel %vm12661_vm10, %v5610_v34, %v5611_v10  ;;  %v5598_v9 = vsel %vm12662_vm13, %v5590_v21, %v5583_v16 }
0x2430   :  { %v12156_v39 = vsel %vm12663_vm9, %v5598_v9, 0.0  ;;  %v12165_v49 = vsel %vm12664_vm11, %v5611_v10, %v5612_v24  ;;  %v12174_v45 = vsel %vm12665_vm14, %v5612_v24, %v5613_v19  ;;  %v12187_v32 = vsel %vm12666_vm12, %v5613_v19, %v5614_v43 }
0x2431   :  { %5787 = vrot.lane.b32.xlu0 %v12011_v17, %s6426_s24  ;;  %5785 = vrot.lane.b32.xlu1 %v12013_v53, %s6426_s24  ;;  %v5622_v35 = vsel %vm12667_vm1, %v5614_v43, %v5607_v37  ;;  %vm12668_vm3 = vcmp.lt.s32.totalorder %v12552_v51, 63  ;;  %vm12669_vm2 = vcmp.ge.s32.totalorder %v6691_v56, 1  ;;  %v12232_v13 = vstv %s6187_s10 }
0x2432   :  { %v12197_v7 = vsel %vm12668_vm3, %v5622_v35, 0.0  ;;  %vm12670_vm4 = vmmov %vm12669_vm2  ;;  %v12236_v23 = vstv %s6188_s11  ;;  %vm12672_vm5 = vcmp.lt.s32.totalorder %v6691_v56, 63  ;;  %v12242_v37 = vstv %s6189_s12 }
0x2433   :  { %vm12671_vm0 = vmmov %vm12669_vm2  ;;  %v12248_v34 = vstv %s6190_s13 }
0x2434   :  { %vm12673_vm15 = vmmov %vm12671_vm0 }
0x2435   :  { %5789 = vrot.lane.b32.xlu0 %v12021_v5, %s6426_s24  ;;  %5733 = vrot.lane.b32.xlu1 %v12031_v22, %s6425_s23  ;;  %vm12674_vm6 = vmmov %vm12671_vm0 }
0x2436   :  { %vm12675_vm7 = vmmov %vm12672_vm5 }
0x2437   :  { %vm12676_vm8 = vmmov %vm12672_vm5 }
0x2438   :  { %vm12677_vm10 = vmmov %vm12671_vm0 }
0x2439   :  { %5791 = vrot.lane.b32.xlu0 %v12019_v26, %s6426_s24  ;;  %5735 = vrot.lane.b32.xlu1 %v12037_v60, %s6425_s23  ;;  %vm12678_vm13 = vmmov %vm12671_vm0 }
0x243a   :  { %vm12679_vm9 = vmmov %vm12672_vm5 }
0x243b   :  { %vm12680_vm11 = vmmov %vm12671_vm0 }
0x243c   :  { %vm12681_vm14 = vmmov %vm12672_vm5 }
0x243d   :  { %5793 = vrot.lane.b32.xlu0 %v12031_v22, %s6426_s24  ;;  %5737 = vrot.lane.b32.xlu1 %v12043_v50, %s6425_s23  ;;  %vm12682_vm12 = vmmov %vm12672_vm5 }
0x243e   :  { %vm12683_vm1 = vmmov %vm12672_vm5 }
0x243f   :  { %vm12684_vm3 = vmmov %vm12671_vm0 }
0x2441   :  { %5739 = vrot.lane.b32.xlu0 %v12049_v47, %s6425_s23  ;;  %5795 = vrot.lane.b32.xlu1 %v12037_v60, %s6426_s24 }
0x2445   :  { %5635 = vrot.lane.b32.xlu0 %v12060_v14, %s6425_s23  ;;  %5633 = vrot.lane.b32.xlu1 %v12064_v31, %s6425_s23 }
0x2449   :  { %5685 = vrot.lane.b32.xlu0 %v12064_v31, %s6426_s24  ;;  %5637 = vrot.lane.b32.xlu1 %v12073_v3, %s6425_s23 }
0x244d   :  { %5687 = vrot.lane.b32.xlu0 %v12060_v14, %s6426_s24  ;;  %5639 = vrot.lane.b32.xlu1 %v12082_v57, %s6425_s23 }
0x2451   :  { %5689 = vrot.lane.b32.xlu0 %v12073_v3, %s6426_s24  ;;  %5691 = vrot.lane.b32.xlu1 %v12082_v57, %s6426_s24 }
0x2455   :  { %5641 = vrot.lane.b32.xlu0 %v12096_v15, %s6425_s23  ;;  %5643 = vrot.lane.b32.xlu1 %v12100_v61, %s6425_s23 }
0x2459   :  { %5693 = vrot.lane.b32.xlu0 %v12096_v15, %s6426_s24  ;;  %5827 = vrot.lane.b32.xlu1 %v12110_v28, %s6425_s23 }
0x245d   :  { %5829 = vrot.lane.b32.xlu0 %v12120_v29, %s6425_s23  ;;  %5645 = vrot.lane.b32.xlu1 %v12124_v40, %s6425_s23 }
0x2461   :  { %5695 = vrot.lane.b32.xlu0 %v12100_v61, %s6426_s24  ;;  %5831 = vrot.lane.b32.xlu1 %v12133_v6, %s6425_s23 }
0x2465   :  { %5697 = vrot.lane.b32.xlu0 %v12124_v40, %s6426_s24  ;;  %5833 = vrot.lane.b32.xlu1 %v12142_v30, %s6425_s23 }
0x2469   :  { %5887 = vrot.lane.b32.xlu0 %v12110_v28, %s6426_s24  ;;  %5889 = vrot.lane.b32.xlu1 %v12120_v29, %s6426_s24 }
0x246d   :  { %5631 = vrot.lane.b32.xlu0 %v12156_v39, %s6425_s23  ;;  %5683 = vrot.lane.b32.xlu1 %v12156_v39, %s6426_s24 }
0x2471   :  { %5835 = vrot.lane.b32.xlu0 %v12165_v49, %s6425_s23  ;;  %5891 = vrot.lane.b32.xlu1 %v12133_v6, %s6426_s24 }
0x2475   :  { %5797 = vrot.lane.b32.xlu0 %v12043_v50, %s6426_s24  ;;  %5837 = vrot.lane.b32.xlu1 %v12174_v45, %s6425_s23 }
0x2479   :  { %5893 = vrot.lane.b32.xlu0 %v12142_v30, %s6426_s24  ;;  %5799 = vrot.lane.b32.xlu1 %v12049_v47, %s6426_s24 }
0x247d   :  { %5839 = vrot.lane.b32.xlu0 %v12187_v32, %s6425_s23  ;;  %5895 = vrot.lane.b32.xlu1 %v12165_v49, %s6426_s24 }
0x2481   :  { %5841 = vrot.lane.b32.xlu0 %v12197_v7, %s6425_s23  ;;  %5897 = vrot.lane.b32.xlu1 %v12174_v45, %s6426_s24  ;;  %s6185_s23 = sld [smem:[#allocation2 + $0x90]] }
0x2485   :  { %5899 = vrot.lane.b32.xlu0 %v12187_v32, %s6426_s24  ;;  %5901 = vrot.lane.b32.xlu1 %v12197_v7, %s6426_s24  ;;  %s6186_s24 = sld [smem:[#allocation2 + $0x91]] }
0x2487   :  { %v12223_v62 = vstv %s6185_s23 }
0x248b   :  { %v12225_v38 = vstv %s6186_s24 }
0x248c   :  { %v5668_v44 = vmul.f32 %v12225_v38, %v12064_v31  ;;  %v5669_v10 = vmul.f32 %v12225_v38, %v12060_v14  ;;  %v5670_v9 = vmul.f32 %v12225_v38, %v12073_v3  ;;  %v5671_v24 = vmul.f32 %v12225_v38, %v12082_v57 }
0x248d   :  { %v5770_v57 = vmul.f32 %v12242_v37, %v12011_v17 }
0x249b   :  { %v5728_v59 = vpop.permute.xlu0 %5727  ;;  %v12207_v1 = vpop.permute.xlu1 %5725 }
0x249c   :  { %v5742_v18 = vsel %vm12671_vm0, %v5728_v59, 0.0 }
0x249d   :  { %v5752_v19 = vmul.f32 %v12236_v23, %v5742_v18  ;;  %v5771_v18 = vmul.f32 %v12242_v37, %v12021_v5 }
0x249f   :  { %v5732_v8 = vpop.permute.xlu0 %5731  ;;  %v5730_v55 = vpop.permute.xlu1 %5729 }
0x24a0   :  { %v5743_v43 = vsel %vm12674_vm6, %v5730_v55, 0.0  ;;  %vm12689_vm6 = vmmov %vm12683_vm1 }
0x24a3   :  { %v5788_v51 = vpop.permute.xlu0 %5787  ;;  %v12209_v20 = vpop.permute.xlu1 %5785 }
0x24a4   :  { %v5802_v35 = vsel %vm12675_vm7, %v5788_v51, 0.0  ;;  %vm12690_vm7 = vmmov %vm12671_vm0 }
0x24a7   :  { %v5790_v2 = vpop.permute.xlu0 %5789  ;;  %v5734_v25 = vpop.permute.xlu1 %5733 }
0x24a8   :  { %v5745_v17 = vsel %vm12680_vm11, %v5734_v25, 0.0  ;;  %vm12695_vm11 = vmmov %vm12683_vm1 }
0x24ab   :  { %v12211_v12 = vpop.permute.xlu0 %5791  ;;  %v12213_v4 = vpop.permute.xlu1 %5735 }
0x24af   :  { %v12215_v41 = vpop.permute.xlu0 %5793  ;;  %v12217_v52 = vpop.permute.xlu1 %5737 }
0x24b3   :  { %v12219_v63 = vpop.permute.xlu0 %5739  ;;  %v12221_v54 = vpop.permute.xlu1 %5795 }
0x24b7   :  { %v5636_v58 = vpop.permute.xlu0 %5635  ;;  %v5634_v11 = vpop.permute.xlu1 %5633 }
0x24b8   :  { %v5648_v46 = vsel %vm12669_vm2, %v5634_v11, 0.0  ;;  %v5649_v36 = vsel %vm12670_vm4, %v5636_v58, 0.0  ;;  %vm12685_vm2 = vmmov %vm12671_vm0 }
0x24b9   :  { %v5658_v27 = vmul.f32 %v12223_v62, %v5648_v46  ;;  %v5659_v42 = vmul.f32 %v12223_v62, %v5649_v36  ;;  %vm12686_vm4 = vmmov %vm12683_vm1 }
0x24bb   :  { %v5686_v16 = vpop.permute.xlu0 %5685  ;;  %v5638_v33 = vpop.permute.xlu1 %5637  ;;  %v5676_v48 = vadd.f32 %v5668_v44, %v5658_v27  ;;  %v5677_v27 = vadd.f32 %v5669_v10, %v5659_v42  ;;  %v5744_v44 = vsel %vm12678_vm13, %v5732_v8, 0.0  ;;  %vm12693_vm13 = vmmov %vm12671_vm0 }
0x24bc   :  { %v5700_v0 = vsel %vm12672_vm5, %v5686_v16, 0.0  ;;  %v5650_v31 = vsel %vm12673_vm15, %v5638_v33, 0.0  ;;  %v5753_v16 = vmul.f32 %v12236_v23, %v5743_v43  ;;  %v5812_v33 = vmul.f32 %v12248_v34, %v5802_v35  ;;  %vm12687_vm5 = vmmov %vm12671_vm0 }
0x24bd   :  { %v5710_v21 = vmul.f32 %v12232_v13, %v5700_v0  ;;  %v5660_v46 = vmul.f32 %v12223_v62, %v5650_v31  ;;  %v5803_v0 = vsel %vm12679_vm9, %v5790_v2, 0.0  ;;  %v5754_v25 = vmul.f32 %v12236_v23, %v5744_v44  ;;  %vm12688_vm15 = vmmov %vm12671_vm0 }
0x24be   :  { %vm12694_vm9 = vmmov %vm12683_vm1 }
0x24bf   :  { %v5718_v59 = vadd.f32 %v5710_v21, %v5676_v48  ;;  %v5688_v58 = vpop.permute.xlu0 %5687  ;;  %v5640_v11 = vpop.permute.xlu1 %5639  ;;  %v5678_v10 = vadd.f32 %v5670_v9, %v5660_v46 }
0x24c0   :  { %v5701_v14 = vsel %vm12676_vm8, %v5688_v58, 0.0  ;;  %v5651_v3 = vsel %vm12677_vm10, %v5640_v11, 0.0  ;;  %v5755_v58 = vmul.f32 %v12236_v23, %v5745_v17  ;;  %vm12691_vm8 = vmmov %vm12683_vm1 }
0x24c1   :  { %v5760_v36 = vadd.f32 %v5752_v19, %v5718_v59  ;;  %v5711_v55 = vmul.f32 %v12232_v13, %v5701_v14  ;;  %v5661_v51 = vmul.f32 %v12223_v62, %v5651_v3  ;;  %v5813_v3 = vmul.f32 %v12248_v34, %v5803_v0  ;;  %vm12692_vm10 = vmmov %vm12671_vm0 }
0x24c3   :  { %v5719_v42 = vadd.f32 %v5711_v55, %v5677_v27  ;;  %v5690_v48 = vpop.permute.xlu0 %5689  ;;  %v5692_v21 = vpop.permute.xlu1 %5691  ;;  %v5778_v31 = vadd.f32 %v5770_v57, %v5760_v36  ;;  %v5679_v19 = vadd.f32 %v5671_v24, %v5661_v51  ;;  %v5804_v57 = vsel %vm12683_vm1, %v12211_v12, 0.0 }
0x24c4   :  { %v5702_v8 = vsel %vm12681_vm14, %v5690_v48, 0.0  ;;  %v5703_v43 = vsel %vm12682_vm12, %v5692_v21, 0.0  ;;  %v5772_v36 = vmul.f32 %v12242_v37, %v12019_v26  ;;  %v5672_v12 = vmul.f32 %v12225_v38, %v12096_v15  ;;  %vm12696_vm14 = vmmov %vm12671_vm0 }
0x24c5   :  { %v5761_v35 = vadd.f32 %v5753_v16, %v5719_v42  ;;  %v5712_v5 = vmul.f32 %v12232_v13, %v5702_v8  ;;  %v5713_v2 = vmul.f32 %v12232_v13, %v5703_v43  ;;  %v5820_v59 = vadd.f32 %v5812_v33, %v5778_v31  ;;  %vm12697_vm12 = vmmov %vm12683_vm1 }
0x24c6   :  { %v5773_v16 = vmul.f32 %v12242_v37, %v12031_v22  ;;  %v5746_v26 = vsel %vm12685_vm2, %v12213_v4, 0.0  ;;  %vm12699_vm2 = vmmov %vm12671_vm0 }
0x24c7   :  { %v5720_v11 = vadd.f32 %v5712_v5, %v5678_v10  ;;  %v5721_v14 = vadd.f32 %v5713_v2, %v5679_v19  ;;  %v5642_v9 = vpop.permute.xlu0 %5641  ;;  %v5644_v24 = vpop.permute.xlu1 %5643  ;;  %v5779_v46 = vadd.f32 %v5771_v18, %v5761_v35  ;;  %v5814_v18 = vmul.f32 %v12248_v34, %v5804_v57 }
0x24c8   :  { %v5652_v27 = vsel %vm12684_vm3, %v5642_v9, 0.0  ;;  %v5756_v15 = vmul.f32 %v12236_v23, %v5746_v26  ;;  %v12317_v35 = vstv %s6192_s14  ;;  %v12319_v5 = vstv %s6191_s15  ;;  %vm12698_vm3 = vmmov %vm12671_vm0 }
0x24c9   :  { %v5762_v55 = vadd.f32 %v5754_v25, %v5720_v11  ;;  %v5763_v51 = vadd.f32 %v5755_v58, %v5721_v14  ;;  %v5662_v44 = vmul.f32 %v12223_v62, %v5652_v27  ;;  %v12299_v33 = vadd.f32 %v5813_v3, %v5779_v46 }
0x24ca   :  { %v5774_v58 = vmul.f32 %v12242_v37, %v12037_v60  ;;  %v5872_v11 = vmul.f32 %v12317_v35, %v12120_v29  ;;  %v12340_v60 = vmul.f32 %v12317_v35, %v12133_v6  ;;  %v12344_v29 = vmul.f32 %v12317_v35, %v12142_v30 }
0x24cb   :  { %v5694_v0 = vpop.permute.xlu0 %5693  ;;  %v12304_v17 = vpop.permute.xlu1 %5827  ;;  %v5780_v42 = vadd.f32 %v5772_v36, %v5762_v55  ;;  %v12306_v48 = vadd.f32 %v5773_v16, %v5763_v51  ;;  %v5680_v21 = vadd.f32 %v5672_v12, %v5662_v44  ;;  %v12336_v44 = vmul.f32 %v12317_v35, %v12110_v28 }
0x24cc   :  { %v5704_v22 = vsel %vm12686_vm4, %v5694_v0, 0.0  ;;  %v12352_v16 = vmul.f32 %v12317_v35, %v12174_v45  ;;  %v5673_v28 = vmul.f32 %v12225_v38, %v12100_v61  ;;  %v5653_v6 = vsel %vm12687_vm5, %v5644_v24, 0.0  ;;  %vm12700_vm4 = vmmov %vm12671_vm0 }
0x24cd   :  { %v5714_v31 = vmul.f32 %v12232_v13, %v5704_v22  ;;  %v12314_v10 = vadd.f32 %v5814_v18, %v5780_v42  ;;  %v5674_v18 = vmul.f32 %v12225_v38, %v12124_v40  ;;  %v5667_v30 = vmul.f32 %v12225_v38, %v12156_v39  ;;  %vm12701_vm5 = vmmov %vm12683_vm1 }
0x24ce   :  { %v12366_v45 = vmul.f32 %v12242_v37, %v12043_v50  ;;  %v12368_v42 = vstv %s6193_s1  ;;  %v12376_v39 = vmul.f32 %v12242_v37, %v12049_v47  ;;  %v5741_v26 = vsel %vm12693_vm13, %v12207_v1, 0.0  ;;  %vm12707_vm13 = vmmov %vm12683_vm1 }
0x24cf   :  { %v5722_v19 = vadd.f32 %v5714_v31, %v5680_v21  ;;  %v5830_v8 = vpop.permute.xlu0 %5829  ;;  %v5646_v43 = vpop.permute.xlu1 %5645  ;;  %v5801_v47 = vsel %vm12694_vm9, %v12209_v20, 0.0  ;;  %v5663_v22 = vmul.f32 %v12223_v62, %v5653_v6  ;;  %v5747_v21 = vsel %vm12696_vm14, %v12217_v52, 0.0  ;;  %vm12708_vm9 = vmmov %vm12671_vm0 }
0x24d0   :  { %v5844_v4 = vsel %vm12671_vm0, %v5830_v8, 0.0  ;;  %v5806_v20 = vsel %vm12683_vm1, %v12221_v54, 0.0  ;;  %v5751_v52 = vmul.f32 %v12236_v23, %v5741_v26  ;;  %v5843_v54 = vsel %vm12699_vm2, %v12304_v17, 0.0  ;;  %vm12710_vm14 = vmmov %vm12671_vm0 }
0x24d1   :  { %v5764_v2 = vadd.f32 %v5756_v15, %v5722_v19  ;;  %v5854_v25 = vmul.f32 %v12319_v5, %v5844_v4 }
0x24d3   :  { %v5862_v14 = vadd.f32 %v5854_v25, %v5820_v59  ;;  %v5696_v9 = vpop.permute.xlu0 %5695  ;;  %v5832_v46 = vpop.permute.xlu1 %5831  ;;  %v12328_v3 = vadd.f32 %v5774_v58, %v5764_v2  ;;  %v12348_v59 = vmul.f32 %v12317_v35, %v12165_v49  ;;  %v5769_v49 = vmul.f32 %v12242_v37, %v12013_v53 }
0x24d4   :  { %v5654_v53 = vsel %vm12690_vm7, %v5646_v43, 0.0  ;;  %v5705_v38 = vsel %vm12691_vm8, %v5696_v9, 0.0  ;;  %v5845_v50 = vsel %vm12692_vm10, %v5832_v46, 0.0  ;;  %v5805_v37 = vsel %vm12695_vm11, %v12215_v41, 0.0  ;;  %vm12704_vm7 = vmmov %vm12683_vm1 }
0x24d5   :  { %v12330_v57 = vadd.f32 %v5872_v11, %v5862_v14  ;;  %v5664_v41 = vmul.f32 %v12223_v62, %v5654_v53  ;;  %v5715_v43 = vmul.f32 %v12232_v13, %v5705_v38  ;;  %v5855_v4 = vmul.f32 %v12319_v5, %v5845_v50  ;;  %vm12705_vm8 = vmmov %vm12683_vm1 }
0x24d6   :  { %v5811_v2 = vmul.f32 %v12248_v34, %v5801_v47  ;;  %v5748_v25 = vsel %vm12698_vm3, %v12219_v63, 0.0  ;;  %v5681_v11 = vadd.f32 %v5673_v28, %v5663_v22  ;;  %v5815_v9 = vmul.f32 %v12248_v34, %v5805_v37  ;;  %vm12706_vm10 = vmmov %vm12683_vm1 }
0x24d7   :  { %v5698_v27 = vpop.permute.xlu0 %5697  ;;  %v5834_v36 = vpop.permute.xlu1 %5833  ;;  %v5757_v46 = vmul.f32 %v12236_v23, %v5747_v21  ;;  %vm12709_vm11 = vmmov %vm12683_vm1 }
0x24d8   :  { %v5706_v31 = vsel %vm12697_vm12, %v5698_v27, 0.0  ;;  %v5846_v14 = vsel %vm12700_vm4, %v5834_v36, 0.0  ;;  %v5816_v27 = vmul.f32 %v12248_v34, %v5806_v20  ;;  %v5723_v28 = vadd.f32 %v5715_v43, %v5681_v11  ;;  %vm12711_vm12 = vmmov %vm12683_vm1 }
0x24d9   :  { %v5853_v36 = vmul.f32 %v12319_v5, %v5843_v54  ;;  %v5823_v50 = vadd.f32 %v5815_v9, %v12306_v48  ;;  %vm12712_vm3 = vmmov %vm12683_vm1 }
0x24db   :  { %v12332_v55 = vpop.permute.xlu0 %5887  ;;  %v5890_v51 = vpop.permute.xlu1 %5889 }
0x24dc   :  { %v5904_v38 = vsel %vm12701_vm5, %v5890_v51, 0.0  ;;  %v5903_v51 = vsel %vm12704_vm7, %v12332_v55, 0.0 }
0x24dd   :  { %v5914_v21 = vmul.f32 %v12368_v42, %v5904_v38 }
0x24df   :  { %v5632_v12 = vpop.permute.xlu0 %5631  ;;  %v5684_v0 = vpop.permute.xlu1 %5683  ;;  %v5922_v11 = vadd.f32 %v5914_v21, %v12330_v57 }
0x24e0   :  { %v5647_v61 = vsel %vm12688_vm15, %v5632_v12, 0.0  ;;  %v5699_v40 = vsel %vm12689_vm6, %v5684_v0, 0.0  ;;  %v5682_v12 = vadd.f32 %v5674_v18, %v5664_v41  ;;  %v5863_v0 = vadd.f32 %v5855_v4, %v12299_v33  ;;  %vm12702_vm15 = vmmov %vm12683_vm1 }
0x24e1   :  { %v5657_v24 = vmul.f32 %v12223_v62, %v5647_v61  ;;  %v5709_v1 = vmul.f32 %v12232_v13, %v5699_v40  ;;  %v5716_v62 = vmul.f32 %v12232_v13, %v5706_v31  ;;  %v5758_v13 = vmul.f32 %v12236_v23, %v5748_v25  ;;  %vm12703_vm6 = vmmov %vm12671_vm0 }
0x24e2   :  { %v5856_v61 = vmul.f32 %v12319_v5, %v5846_v14  ;;  %v5824_v18 = vadd.f32 %v5816_v27, %v12328_v3  ;;  %v5881_v48 = vadd.f32 %v12340_v60, %v5863_v0  ;;  %v5913_v60 = vmul.f32 %v12368_v42, %v5903_v51 }
0x24e3   :  { %v5675_v15 = vadd.f32 %v5667_v30, %v5657_v24  ;;  %v5836_v19 = vpop.permute.xlu0 %5835  ;;  %v5892_v8 = vpop.permute.xlu1 %5891  ;;  %v5724_v53 = vadd.f32 %v5716_v62, %v5682_v12 }
0x24e4   :  { %v5847_v17 = vsel %vm12671_vm0, %v5836_v19, 0.0  ;;  %v5905_v3 = vsel %vm12705_vm8, %v5892_v8, 0.0  ;;  %v5864_v22 = vadd.f32 %v5856_v61, %v12314_v10 }
0x24e5   :  { %v5717_v58 = vadd.f32 %v5709_v1, %v5675_v15  ;;  %v5857_v33 = vmul.f32 %v12319_v5, %v5847_v17  ;;  %v5766_v1 = vadd.f32 %v5758_v13, %v5724_v53  ;;  %v5915_v10 = vmul.f32 %v12368_v42, %v5905_v3 }
0x24e7   :  { %v5759_v6 = vadd.f32 %v5751_v52, %v5717_v58  ;;  %v5798_v30 = vpop.permute.xlu0 %5797  ;;  %v5838_v63 = vpop.permute.xlu1 %5837  ;;  %v5865_v41 = vadd.f32 %v5857_v33, %v5823_v50  ;;  %v5923_v27 = vadd.f32 %v5915_v10, %v5881_v48 }
0x24e8   :  { %v5807_v26 = vsel %vm12702_vm15, %v5798_v30, 0.0  ;;  %v5848_v23 = vsel %vm12703_vm6, %v5838_v63, 0.0 }
0x24e9   :  { %v5777_v40 = vadd.f32 %v5769_v49, %v5759_v6  ;;  %v5765_v49 = vadd.f32 %v5757_v46, %v5723_v28  ;;  %v5817_v19 = vmul.f32 %v12248_v34, %v5807_v26  ;;  %v5858_v20 = vmul.f32 %v12319_v5, %v5848_v23 }
0x24ea   :  { %v5882_v46 = vadd.f32 %v12344_v29, %v5864_v22  ;;  %v5883_v30 = vadd.f32 %v12348_v59, %v5865_v41  ;;  %v5877_v59 = vmul.f32 %v12317_v35, %v12187_v32 }
0x24eb   :  { %v5819_v24 = vadd.f32 %v5811_v2, %v5777_v40  ;;  %v5894_v47 = vpop.permute.xlu0 %5893  ;;  %v5800_v37 = vpop.permute.xlu1 %5799  ;;  %v5783_v52 = vadd.f32 %v12366_v45, %v5765_v49  ;;  %v5866_v9 = vadd.f32 %v5858_v20, %v5824_v18  ;;  %v5784_v45 = vadd.f32 %v12376_v39, %v5766_v1 }
0x24ec   :  { %v5906_v15 = vsel %vm12706_vm10, %v5894_v47, 0.0  ;;  %v5808_v55 = vsel %vm12707_vm13, %v5800_v37, 0.0  ;;  %v5878_v40 = vmul.f32 %v12317_v35, %v12197_v7 }
0x24ed   :  { %v5861_v31 = vadd.f32 %v5853_v36, %v5819_v24  ;;  %v5916_v2 = vmul.f32 %v12368_v42, %v5906_v15  ;;  %v5818_v62 = vmul.f32 %v12248_v34, %v5808_v55  ;;  %v5825_v14 = vadd.f32 %v5817_v19, %v5783_v52 }
0x24ee   :  { %v5884_v61 = vadd.f32 %v12352_v16, %v5866_v9 }
0x24ef   :  { %v5879_v8 = vadd.f32 %v12336_v44, %v5861_v31  ;;  %v5840_v43 = vpop.permute.xlu0 %5839  ;;  %v5896_v4 = vpop.permute.xlu1 %5895  ;;  %v5924_v57 = vadd.f32 %v5916_v2, %v5882_v46  ;;  %v5826_v29 = vadd.f32 %v5818_v62, %v5784_v45 }
0x24f0   :  { %v5849_v25 = vsel %vm12708_vm9, %v5840_v43, 0.0  ;;  %v5907_v58 = vsel %vm12709_vm11, %v5896_v4, 0.0 }
0x24f1   :  { %v5921_v54 = vadd.f32 %v5913_v60, %v5879_v8  ;;  %v5859_v44 = vmul.f32 %v12319_v5, %v5849_v25  ;;  %v5917_v63 = vmul.f32 %v12368_v42, %v5907_v58 }
0x24f3   :  { %v5929_v6 = vadd.f32 %v5922_v11, %v5921_v54  ;;  %v5842_v12 = vpop.permute.xlu0 %5841  ;;  %v5898_v28 = vpop.permute.xlu1 %5897  ;;  %v5867_v0 = vadd.f32 %v5859_v44, %v5825_v14  ;;  %v5925_v38 = vadd.f32 %v5917_v63, %v5883_v30 }
0x24f4   :  { %v5850_v34 = vsel %vm12710_vm14, %v5842_v12, 0.0  ;;  %v5908_v17 = vsel %vm12711_vm12, %v5898_v28, 0.0 }
0x24f5   :  { %v5930_v13 = vadd.f32 %v5929_v6, %v5923_v27  ;;  %v5860_v39 = vmul.f32 %v12319_v5, %v5850_v34  ;;  %v5918_v36 = vmul.f32 %v12368_v42, %v5908_v17  ;;  %v5885_v26 = vadd.f32 %v5877_v59, %v5867_v0 }
0x24f7   :  { %v5931_v53 = vadd.f32 %v5930_v13, %v5924_v57  ;;  %v5868_v50 = vadd.f32 %v5860_v39, %v5826_v29  ;;  %v5900_v18 = vpop.permute.xlu0 %5899  ;;  %v5902_v24 = vpop.permute.xlu1 %5901  ;;  %v5926_v33 = vadd.f32 %v5918_v36, %v5884_v61  ;;  %v5996_v39 = vstv %s6195_s30 }
0x24f8   :  { %v5909_v5 = vsel %vm12683_vm1, %v5900_v18, 0.0  ;;  %v5910_v23 = vsel %vm12712_vm3, %v5902_v24, 0.0 }
0x24f9   :  { %v5932_v47 = vadd.f32 %v5931_v53, %v5925_v38  ;;  %v5919_v32 = vmul.f32 %v12368_v42, %v5909_v5  ;;  %v5886_v16 = vadd.f32 %v5878_v40, %v5868_v50  ;;  %v5920_v37 = vmul.f32 %v12368_v42, %v5910_v23 }
0x24fb   :  { %v5933_v7 = vadd.f32 %v5932_v47, %v5926_v33  ;;  %v5927_v35 = vadd.f32 %v5919_v32, %v5885_v26  ;;  %v5928_v51 = vadd.f32 %v5920_v37, %v5886_v16 }
0x24fd   :  { %v5934_v49 = vadd.f32 %v5933_v7, %v5927_v35 }
0x24ff   :  { %v5935_v48 = vadd.f32 %v5934_v49, %v5928_v51 }
0x2501   :  { %5936 = vadd.xlane.f32.xlu0 %v5935_v48 }
0x258e   :  { %v5937_v3 = vpop.xlane.xlu0 %5936 }
0x258f   :  { %v5938_v22 = vrot.slane %v5937_v3, 4 }
0x2591   :  { %v5939_v21 = vadd.f32 %v5938_v22, %v5937_v3 }
0x2593   :  { %v5940_v31 = vrot.slane %v5939_v21, 2 }
0x2595   :  { %v5941_v15 = vadd.f32 %v5940_v31, %v5939_v21 }
0x2597   :  { %v5942_v1 = vrot.slane %v5941_v15, 1 }
0x2599   :  { %v5943_v56 = vadd.f32 %v5942_v1, %v5941_v15 }
0x259b   :  { %6268 = vpush %v5943_v56 }
0x25cc   :  { %s6269_s16 = spop %6268 }
0x25cd   :  { %s5945_s17 = smul.f32 0.00012207031, %s6269_s16 }
0x25cf   :  { %v5946_v19 = vstv %s5945_s17 }
0x25d0   :  { %v5947_v20 = vsub.f32 %v5921_v54, %v5946_v19  ;;  %v5948_v55 = vsub.f32 %v5922_v11, %v5946_v19  ;;  %v5949_v42 = vsub.f32 %v5923_v27, %v5946_v19  ;;  %v5950_v60 = vsub.f32 %v5924_v57, %v5946_v19 }
0x25d1   :  { %v5951_v10 = vsub.f32 %v5925_v38, %v5946_v19  ;;  %v5952_v52 = vsub.f32 %v5926_v33, %v5946_v19  ;;  %v5953_v58 = vsub.f32 %v5927_v35, %v5946_v19  ;;  %v5954_v14 = vsub.f32 %v5928_v51, %v5946_v19 }
0x25d2   :  { %v5955_v41 = vmul.f32 %v5947_v20, %v5947_v20  ;;  %v5956_v8 = vmul.f32 %v5948_v55, %v5948_v55  ;;  %v5957_v43 = vmul.f32 %v5949_v42, %v5949_v42  ;;  %v5958_v2 = vmul.f32 %v5950_v60, %v5950_v60 }
0x25d3   :  { %v5959_v62 = vmul.f32 %v5951_v10, %v5951_v10  ;;  %v5960_v9 = vmul.f32 %v5952_v52, %v5952_v52  ;;  %v5961_v45 = vmul.f32 %v5953_v58, %v5953_v58  ;;  %v5962_v54 = vmul.f32 %v5954_v14, %v5954_v14 }
0x25d4   :  { %v5963_v4 = vadd.f32 %v5956_v8, %v5955_v41 }
0x25d6   :  { %v5964_v25 = vadd.f32 %v5963_v4, %v5957_v43 }
0x25d8   :  { %v5965_v44 = vadd.f32 %v5964_v25, %v5958_v2 }
0x25da   :  { %v5966_v46 = vadd.f32 %v5965_v44, %v5959_v62 }
0x25dc   :  { %v5967_v6 = vadd.f32 %v5966_v46, %v5960_v9 }
0x25de   :  { %v5968_v11 = vadd.f32 %v5967_v6, %v5961_v45 }
0x25e0   :  { %v5969_v27 = vadd.f32 %v5968_v11, %v5962_v54 }
0x25e2   :  { %5970 = vadd.xlane.f32.xlu1 %v5969_v27 }
0x266f   :  { %v5971_v30 = vpop.xlane.xlu1 %5970 }
0x2670   :  { %v5972_v63 = vrot.slane %v5971_v30, 4 }
0x2672   :  { %v5973_v12 = vadd.f32 %v5972_v63, %v5971_v30 }
0x2674   :  { %v5974_v28 = vrot.slane %v5973_v12, 2 }
0x2676   :  { %v5975_v57 = vadd.f32 %v5974_v28, %v5973_v12 }
0x2678   :  { %v5976_v0 = vrot.slane %v5975_v57, 1 }
0x267a   :  { %v5977_v34 = vadd.f32 %v5976_v0, %v5975_v57 }
0x267c   :  { %6270 = vpush %v5977_v34 }
0x26ad   :  { %s6271_s21 = spop %6270 }
0x26ae   :  { %s5979_s26 = smul.f32 0.00012207031, %s6271_s21 }
0x26b0   :  { %s5981_s27 = sadd.f32 1e-05, %s5979_s26 }
0x26b2   :  { %v5982_v17 = vstv %s5981_s27 }
0x26b3   :  { %6406 = vrsqrt.f32 %v5982_v17 }
0x26bd   :  { %v6407_v13 = vpop.eup %6406 }
0x26be   :  { %6272 = vpush %v6407_v13 }
0x26ef   :  { %s6273_s0 = spop %6272 }
0x26f0   :  { %s5985_s29 = smul.f32 %s6273_s0, %s6194_s28 }
0x26f2   :  { %v5986_v29 = vstv %s5985_s29 }
0x26f3   :  { %v5987_v36 = vmul.f32 %v5986_v29, %v5947_v20  ;;  %v5988_v59 = vmul.f32 %v5986_v29, %v5948_v55  ;;  %v5989_v61 = vmul.f32 %v5986_v29, %v5949_v42  ;;  %v5990_v40 = vmul.f32 %v5986_v29, %v5950_v60 }
0x26f4   :  { %v5991_v53 = vmul.f32 %v5986_v29, %v5951_v10  ;;  %v5992_v38 = vmul.f32 %v5986_v29, %v5952_v52  ;;  %v5993_v50 = vmul.f32 %v5986_v29, %v5953_v58  ;;  %v5994_v18 = vmul.f32 %v5986_v29, %v5954_v14 }
0x26f5   :  { %v5997_v24 = vadd.f32 %v5996_v39, %v5987_v36  ;;  %v5998_v33 = vadd.f32 %v5996_v39, %v5988_v59  ;;  %v5999_v26 = vadd.f32 %v5996_v39, %v5989_v61  ;;  %v6000_v5 = vadd.f32 %v5996_v39, %v5990_v40 }
0x26f6   :  { %v6001_v23 = vadd.f32 %v5996_v39, %v5991_v53  ;;  %v6002_v47 = vadd.f32 %v5996_v39, %v5992_v38  ;;  %v6003_v32 = vadd.f32 %v5996_v39, %v5993_v50  ;;  %v6004_v16 = vadd.f32 %v5996_v39, %v5994_v18 }
0x26f7   :  { %v6005_v37 = vmax.f32 %v5997_v24, 0.0  ;;  %v6006_v7 = vmax.f32 %v5998_v33, 0.0  ;;  %v6007_v35 = vmax.f32 %v5999_v26, 0.0  ;;  %v6008_v49 = vmax.f32 %v6000_v5, 0.0 }
0x26f8   :  { %v6009_v51 = vmax.f32 %v6001_v23, 0.0  ;;  %v6010_v48 = vmax.f32 %v6002_v47, 0.0  ;;  %v6011_v3 = vmax.f32 %v6003_v32, 0.0  ;;  %v6012_v22 = vmax.f32 %v6004_v16, 0.0 }
0x26fa   :  { %v6013_v21 = vmax.f32 %v6005_v37, %v6009_v51  ;;  %v6014_v31 = vmax.f32 %v6006_v7, %v6010_v48  ;;  %v6015_v15 = vmax.f32 %v6007_v35, %v6011_v3  ;;  %v6016_v1 = vmax.f32 %v6008_v49, %v6012_v22 }
0x26fc   :  { %v6017_v56 = vmax.f32 %v6013_v21, %v6014_v31  ;;  %v6018_v19 = vmax.f32 %v6015_v15, %v6016_v1 }
0x26fe   :  { %v6019_v20 = vmax.f32 %v6017_v56, %v6018_v19 }
0x2700   :  { %6020 = vmax.xlane.f32.xlu0 %v6019_v20 }
0x278d   :  { %v6021_v55 = vpop.xlane.xlu0 %6020 }
0x278e   :  { %v6022_v42 = vrot.slane %v6021_v55, 4 }
0x2790   :  { %v6023_v60 = vmax.f32 %v6021_v55, %v6022_v42 }
0x2792   :  { %v6024_v41 = vrot.slane %v6023_v60, 2 }
0x2794   :  { %v6025_v8 = vmax.f32 %v6023_v60, %v6024_v41 }
0x2796   :  { %v6026_v10 = vrot.slane %v6025_v8, 1 }
0x2798   :  { %v6027_v43 = vmax.f32 %v6025_v8, %v6026_v10 }
0x279a   :  { %6274 = vpush %v6027_v43 }
0x27cb   :  { %s6275_s22 = spop %6274 }
0x27cc   :  { %v6029_v4 = vstv %s6275_s22 }
0x27cd   :  { %6408 = vrcp.f32 %v6029_v4 }
0x27d7   :  { %v6409_v52 = vpop.eup %6408 }
0x27d8   :  { %6276 = vpush %v6409_v52 }
0x2809   :  { %s6277_s3 = spop %6276 }
0x280a   :  { %v6032_v2 = vstv %s6277_s3 }
0x280b   :  { %v6033_v25 = vmul.f32 %v6032_v2, %v6005_v37  ;;  %v6034_v58 = vmul.f32 %v6032_v2, %v6006_v7  ;;  %v6035_v62 = vmul.f32 %v6032_v2, %v6007_v35  ;;  %v6036_v44 = vmul.f32 %v6032_v2, %v6008_v49 }
0x280c   :  { %v6037_v14 = vmul.f32 %v6032_v2, %v6009_v51  ;;  %v6038_v9 = vmul.f32 %v6032_v2, %v6010_v48  ;;  %v6039_v46 = vmul.f32 %v6032_v2, %v6011_v3  ;;  %v6040_v45 = vmul.f32 %v6032_v2, %v6012_v22 }
0x280d   :  { %6041 = vst [vmem:[%s12509_s2] sm:$0xff] %v6033_v25  ;;  %6042 = vst [vmem:[%s12509_s2 + $0x8] sm:$0xff] %v6034_v58 }
0x280e   :  { %6043 = vst [vmem:[%s12509_s2 + $0x10] sm:$0xff] %v6035_v62  ;;  %6044 = vst [vmem:[%s12509_s2 + $0x18] sm:$0xff] %v6036_v44 }
0x280f   :  { %6045 = vst [vmem:[%s12509_s2 + $0x20] sm:$0xff] %v6037_v14  ;;  %6046 = vst [vmem:[%s12509_s2 + $0x28] sm:$0xff] %v6038_v9 }
0x2810   :  { %6047 = vst [vmem:[%s12509_s2 + $0x30] sm:$0xff] %v6039_v46  ;;  %6048 = vst [vmem:[%s12509_s2 + $0x38] sm:$0xff] %v6040_v45 }
0x2811   :  { %6053 = vsyncpa [#allocation3], 1 }

</bundles_post_ra>
